<compile_context>
chip_gen: v6e
topology: v6e:2x2x1
jax: 0.10.0
libtpu: 0.0.40
codegen_flags: <defaults>
</compile_context>

<pallas_src>
import functools
import math

import jax
import jax.numpy as jnp
from jax.experimental import pallas as pl
from jax.experimental.pallas import tpu as pltpu


# ------------------------------- fused kernel ------------------------------- #

def _bottleneck_kernel(x_ref, w1_ref, w2_ref, w3_ref,
                       s1_ref, b1_ref, s2_ref, b2_ref, s3_ref, b3_ref,
                       o_ref, p1_ref, *, th):
    # x_ref : (1, H, W, Cin)  f32     (one batch image)
    # w1    : (Cin, P) bf16 ; w2 : (3, 3, P, P) bf16 ; w3 : (P, Cout) bf16
    # s*/b* : (1, C) f32 folded BatchNorm scale / bias
    # o_ref : (1, H, W, Cout) f32
    # p1_ref: (H+2, W+2, P) bf16 VMEM scratch (zero-padded conv1 output)
    H = o_ref.shape[1]
    W = o_ref.shape[2]
    Cin = x_ref.shape[3]
    P = w1_ref.shape[1]
    Cout = o_ref.shape[3]
    n_chunks = H // th

    # Zero the 1-pixel halo of the conv1 activation scratch (the interior is
    # fully overwritten below).  VMEM-only, cheap.
    p1_ref[...] = jnp.zeros(p1_ref.shape, p1_ref.dtype)

    # ---- stage 1: conv1 (1x1) + bn1 + relu, chunked over H rows ----------- #
    # Result stays resident in VMEM as bf16 -> no HBM round-trip for out1.
    for t in range(n_chunks):
        r0 = t * th
        xc = x_ref[0, r0:r0 + th, :, :].astype(jnp.bfloat16).reshape(th * W, Cin)
        y1 = jnp.dot(xc, w1_ref[...], preferred_element_type=jnp.float32)
        y1 = jnp.maximum(y1 * s1_ref[...] + b1_ref[...], 0.0)
        p1_ref[1 + r0:1 + r0 + th, 1:1 + W, :] = (
            y1.astype(jnp.bfloat16).reshape(th, W, P))

    # ---- stages 2+3: conv2 (3x3,pad=1) + bn2 + relu -> conv3 (1x1) + bn3
    #      + identity residual + relu, chunked over H rows ------------------ #
    for t in range(n_chunks):
        r0 = t * th
        acc = jnp.zeros((th * W, P), jnp.float32)
        # 3x3 conv as 9 shifted matmuls against the padded VMEM activation.
        for dh in range(3):
            for dw in range(3):
                win = p1_ref[r0 + dh:r0 + dh + th, dw:dw + W, :]
                acc = acc + jnp.dot(win.reshape(th * W, P), w2_ref[dh, dw],
                                    preferred_element_type=jnp.float32)
        y2 = jnp.maximum(acc * s2_ref[...] + b2_ref[...], 0.0).astype(jnp.bfloat16)
        y3 = jnp.dot(y2, w3_ref[...], preferred_element_type=jnp.float32)
        res = x_ref[0, r0:r0 + th, :, :].reshape(th * W, Cout)   # f32 residual
        y3 = y3 * s3_ref[...] + b3_ref[...] + res
        o_ref[0, r0:r0 + th, :, :] = (
            jnp.maximum(y3, 0.0).reshape(th, W, Cout).astype(o_ref.dtype))


# ------------------------------- wrapper ------------------------------------ #

def bottleneck_forward(x_nchw, params):
    """Pallas implementation of Bottleneck.forward (stride=1, downsample=None)."""
    N, C, H, W = x_nchw.shape
    P = params["w1"].shape[1]
    Cout = params["w3"].shape[1]
    assert Cout == C, "identity residual requires inplanes == planes * expansion"

    th = math.gcd(H, 8)                 # static H-chunk height inside the kernel

    x = jnp.transpose(x_nchw, (0, 2, 3, 1)).astype(jnp.float32)   # NHWC
    w1 = params["w1"].astype(jnp.bfloat16)
    w2 = params["w2"].astype(jnp.bfloat16)
    w3 = params["w3"].astype(jnp.bfloat16)

    kernel = functools.partial(_bottleneck_kernel, th=th)

    out = pl.pallas_call(
        kernel,
        out_shape=jax.ShapeDtypeStruct((N, H, W, Cout), jnp.float32),
        grid=(N,),
        in_specs=[
            pl.BlockSpec((1, H, W, C), lambda n: (n, 0, 0, 0)),     # x (per batch)
            pl.BlockSpec((C, P), lambda n: (0, 0)),                 # w1
            pl.BlockSpec((3, 3, P, P), lambda n: (0, 0, 0, 0)),     # w2
            pl.BlockSpec((P, Cout), lambda n: (0, 0)),              # w3
            pl.BlockSpec((1, P), lambda n: (0, 0)),                 # s1
            pl.BlockSpec((1, P), lambda n: (0, 0)),                 # b1
            pl.BlockSpec((1, P), lambda n: (0, 0)),                 # s2
            pl.BlockSpec((1, P), lambda n: (0, 0)),                 # b2
            pl.BlockSpec((1, Cout), lambda n: (0, 0)),              # s3
            pl.BlockSpec((1, Cout), lambda n: (0, 0)),              # b3
        ],
        out_specs=pl.BlockSpec((1, H, W, Cout), lambda n: (n, 0, 0, 0)),
        scratch_shapes=[pltpu.VMEM((H + 2, W + 2, P), jnp.bfloat16)],
        compiler_params=pltpu.CompilerParams(
            dimension_semantics=("parallel",)),
    )(x, w1, w2, w3, params["s1"], params["b1"], params["s2"], params["b2"],
      params["s3"], params["b3"])

    return jnp.transpose(out, (0, 3, 1, 2))                         # back to NCHW


# ------------------------------- parameters --------------------------------- #

def _fold_bn(gamma, beta, mean, var, eps=1e-5):
    scale = gamma / jnp.sqrt(var + eps)
    bias = beta - mean * scale
    return (scale.reshape(1, -1).astype(jnp.float32),
            bias.reshape(1, -1).astype(jnp.float32))


def make_bottleneck_params(key, inplanes, planes):
    ks = jax.random.split(key, 6)
    exp = 4
    # conv weights (1x1 as (Cin, Cout) matmul; 3x3 in HWIO)
    w1 = 0.1 * jax.random.normal(ks[0], (inplanes, planes), jnp.float32)
    w2 = 0.1 * jax.random.normal(ks[1], (3, 3, planes, planes), jnp.float32)
    w3 = 0.1 * jax.random.normal(ks[2], (planes, planes * exp), jnp.float32)

    def bn_params(k, c):
        k1, k2, k3, k4 = jax.random.split(k, 4)
        gamma = 1.0 + 0.1 * jax.random.normal(k1, (c,), jnp.float32)
        beta = 0.1 * jax.random.normal(k2, (c,), jnp.float32)
        mean = 0.1 * jax.random.normal(k3, (c,), jnp.float32)
        var = jnp.abs(jax.random.normal(k4, (c,), jnp.float32)) + 0.5
        return gamma, beta, mean, var

    bn1 = bn_params(ks[3], planes)
    bn2 = bn_params(ks[4], planes)
    bn3 = bn_params(ks[5], planes * exp)
    s1, b1 = _fold_bn(*bn1)
    s2, b2 = _fold_bn(*bn2)
    s3, b3 = _fold_bn(*bn3)
    return dict(w1=w1, w2=w2, w3=w3, s1=s1, b1=b1, s2=s2, b2=b2, s3=s3, b3=b3,
                bn1=bn1, bn2=bn2, bn3=bn3)


# ------------------------------- reference ----------------------------------- #

def bottleneck_reference(x_nchw, params, eps=1e-5):
    """Pure-JAX reference that mirrors the kernel's bf16 matmul inputs."""
    x = jnp.transpose(x_nchw, (0, 2, 3, 1)).astype(jnp.float32)
    bf = jnp.bfloat16

    def bn(y, p):
        g, b, m, v = p
        return (y - m) / jnp.sqrt(v + eps) * g + b

    w1 = params["w1"].astype(bf)
    w2 = params["w2"].astype(bf)
    w3 = params["w3"].astype(bf)

    y = jnp.einsum("nhwc,cd->nhwd", x.astype(bf), w1,
                   preferred_element_type=jnp.float32)
    y = jax.nn.relu(bn(y, params["bn1"]))

    N, H, W, P = y.shape
    yp = jnp.pad(y.astype(bf), ((0, 0), (1, 1), (1, 1), (0, 0)))
    acc = jnp.zeros((N, H, W, P), jnp.float32)
    for dh in range(3):
        for dw in range(3):
            acc = acc + jnp.einsum("nhwc,cd->nhwd",
                                   yp[:, dh:dh + H, dw:dw + W, :], w2[dh, dw],
                                   preferred_element_type=jnp.float32)
    y = jax.nn.relu(bn(acc, params["bn2"]))

    y = jnp.einsum("nhwc,cd->nhwd", y.astype(bf), w3,
                   preferred_element_type=jnp.float32)
    y = jax.nn.relu(bn(y, params["bn3"]) + x)
    return jnp.transpose(y, (0, 3, 1, 2))


# --------------------------------- main -------------------------------------- #

if __name__ == "__main__":
    key = jax.random.PRNGKey(0)
    k_x, k_p = jax.random.split(key)

    # ResNet-like (stage-1) bottleneck: inplanes = planes*4 -> identity residual.
    N, planes, H, W = 2, 64, 16, 16
    inplanes = planes * 4
    x = jax.random.normal(k_x, (N, inplanes, H, W), jnp.float32)   # NCHW like PyTorch
    params = make_bottleneck_params(k_p, inplanes, planes)

    out = jax.block_until_ready(bottleneck_forward(x, params))
    ref = jax.block_until_ready(bottleneck_reference(x, params))

    assert out.shape == (N, planes * 4, H, W), out.shape
    max_err = float(jnp.max(jnp.abs(out - ref)))
    assert jnp.allclose(out, ref, rtol=1e-2, atol=1e-2), max_err

    print("KERNEL_OK")
</pallas_src>

<mosaic_0001>
module attributes {stable_mosaic.version = 11 : i64} {
  func.func @_bottleneck_kernel(%arg0: i32, %arg1: memref<1x16x16x256xf32, #tpu.memory_space<vmem>>, %arg2: memref<256x64xbf16, #tpu.memory_space<vmem>>, %arg3: memref<3x3x64x64xbf16, #tpu.memory_space<vmem>>, %arg4: memref<64x256xbf16, #tpu.memory_space<vmem>>, %arg5: memref<1x64xf32, #tpu.memory_space<vmem>>, %arg6: memref<1x64xf32, #tpu.memory_space<vmem>>, %arg7: memref<1x64xf32, #tpu.memory_space<vmem>>, %arg8: memref<1x64xf32, #tpu.memory_space<vmem>>, %arg9: memref<1x256xf32, #tpu.memory_space<vmem>>, %arg10: memref<1x256xf32, #tpu.memory_space<vmem>>, %arg11: memref<1x16x16x256xf32, #tpu.memory_space<vmem>>, %arg12: memref<18x18x64xbf16, #tpu.memory_space<vmem>>) attributes {dimension_semantics = [#tpu.dimension_semantics<parallel>], iteration_bounds = array<i64: 2>, scalar_prefetch = 0 : i64, scratch_operands = 1 : i64, tpu.core_type = #tpu.core_type<tc>, window_params = [{transform_indices = @transform_0, window_bounds = array<i64: 1, 16, 16, 256>}, {pipeline_mode = #tpu.pipeline_mode<synchronous>, transform_indices = @transform_1, window_bounds = array<i64: 256, 64>}, {pipeline_mode = #tpu.pipeline_mode<synchronous>, transform_indices = @transform_2, window_bounds = array<i64: 3, 3, 64, 64>}, {pipeline_mode = #tpu.pipeline_mode<synchronous>, transform_indices = @transform_3, window_bounds = array<i64: 64, 256>}, {pipeline_mode = #tpu.pipeline_mode<synchronous>, transform_indices = @transform_4, window_bounds = array<i64: 1, 64>}, {pipeline_mode = #tpu.pipeline_mode<synchronous>, transform_indices = @transform_5, window_bounds = array<i64: 1, 64>}, {pipeline_mode = #tpu.pipeline_mode<synchronous>, transform_indices = @transform_6, window_bounds = array<i64: 1, 64>}, {pipeline_mode = #tpu.pipeline_mode<synchronous>, transform_indices = @transform_7, window_bounds = array<i64: 1, 64>}, {pipeline_mode = #tpu.pipeline_mode<synchronous>, transform_indices = @transform_8, window_bounds = array<i64: 1, 256>}, {pipeline_mode = #tpu.pipeline_mode<synchronous>, transform_indices = @transform_9, window_bounds = array<i64: 1, 256>}, {transform_indices = @transform_10, window_bounds = array<i64: 1, 16, 16, 256>}]} {
    %cst = arith.constant 0.000000e+00 : bf16
    %0 = vector.broadcast %cst : bf16 to vector<18x18x64xbf16>
    %c0 = arith.constant 0 : index
    %c0_0 = arith.constant 0 : index
    %c0_1 = arith.constant 0 : index
    %1 = vector.load %arg12[%c0, %c0_0, %c0_1] : memref<18x18x64xbf16, #tpu.memory_space<vmem>>, vector<18x18x64xbf16>
    tpu.vector_store %arg12[%c0, %c0_0, %c0_1], %0 {strides = array<i32>} : memref<18x18x64xbf16, #tpu.memory_space<vmem>>, vector<18x18x64xbf16>,
    %c0_2 = arith.constant 0 : index
    %c0_3 = arith.constant 0 : index
    %c0_4 = arith.constant 0 : index
    %c0_5 = arith.constant 0 : index
    %2 = vector.load %arg1[%c0_2, %c0_3, %c0_4, %c0_5] : memref<1x16x16x256xf32, #tpu.memory_space<vmem>>, vector<1x8x16x256xf32>
    %3 = vector.shape_cast %2 : vector<1x8x16x256xf32> to vector<8x16x256xf32>
    %4 = arith.truncf %3 : vector<8x16x256xf32> to vector<8x16x256xbf16>
    %5 = vector.shape_cast %4 : vector<8x16x256xbf16> to vector<128x256xbf16>
    %c0_6 = arith.constant 0 : index
    %c0_7 = arith.constant 0 : index
    %6 = vector.load %arg2[%c0_6, %c0_7] : memref<256x64xbf16, #tpu.memory_space<vmem>>, vector<256x64xbf16>
    %cst_8 = arith.constant dense<0.000000e+00> : vector<128x64xf32>
    %7 = tpu.matmul %5, %6, %cst_8 {dimension_numbers = #tpu.dot_dimension_numbers<[1], [0], [0], [1], [0, 0, 1, 1], [], []>} : vector<128x256xbf16>, vector<256x64xbf16>, vector<128x64xf32> -> vector<128x64xf32>
    %c0_9 = arith.constant 0 : index
    %c0_10 = arith.constant 0 : index
    %8 = vector.load %arg5[%c0_9, %c0_10] : memref<1x64xf32, #tpu.memory_space<vmem>>, vector<1x64xf32>
    %9 = vector.broadcast %8 : vector<1x64xf32> to vector<128x64xf32>
    %10 = arith.mulf %7, %9 : vector<128x64xf32>
    %c0_11 = arith.constant 0 : index
    %c0_12 = arith.constant 0 : index
    %11 = vector.load %arg6[%c0_11, %c0_12] : memref<1x64xf32, #tpu.memory_space<vmem>>, vector<1x64xf32>
    %12 = vector.broadcast %11 : vector<1x64xf32> to vector<128x64xf32>
    %13 = arith.addf %10, %12 : vector<128x64xf32>
    %cst_13 = arith.constant 0.000000e+00 : f32
    %14 = vector.broadcast %cst_13 : f32 to vector<128x64xf32>
    %15 = arith.maximumf %13, %14 : vector<128x64xf32>
    %16 = arith.truncf %15 : vector<128x64xf32> to vector<128x64xbf16>
    %17 = vector.shape_cast %16 : vector<128x64xbf16> to vector<8x16x64xbf16>
    %c1 = arith.constant 1 : index
    %c1_14 = arith.constant 1 : index
    %c0_15 = arith.constant 0 : index
    %18 = vector.load %arg12[%c1, %c1_14, %c0_15] : memref<18x18x64xbf16, #tpu.memory_space<vmem>>, vector<8x16x64xbf16>
    tpu.vector_store %arg12[%c1, %c1_14, %c0_15], %17 {strides = array<i32>} : memref<18x18x64xbf16, #tpu.memory_space<vmem>>, vector<8x16x64xbf16>,
    %c0_16 = arith.constant 0 : index
    %c8 = arith.constant 8 : index
    %c0_17 = arith.constant 0 : index
    %c0_18 = arith.constant 0 : index
    %19 = vector.load %arg1[%c0_16, %c8, %c0_17, %c0_18] : memref<1x16x16x256xf32, #tpu.memory_space<vmem>>, vector<1x8x16x256xf32>
    %20 = vector.shape_cast %19 : vector<1x8x16x256xf32> to vector<8x16x256xf32>
    %21 = arith.truncf %20 : vector<8x16x256xf32> to vector<8x16x256xbf16>
    %22 = vector.shape_cast %21 : vector<8x16x256xbf16> to vector<128x256xbf16>
    %c0_19 = arith.constant 0 : index
    %c0_20 = arith.constant 0 : index
    %23 = vector.load %arg2[%c0_19, %c0_20] : memref<256x64xbf16, #tpu.memory_space<vmem>>, vector<256x64xbf16>
    %cst_21 = arith.constant dense<0.000000e+00> : vector<128x64xf32>
    %24 = tpu.matmul %22, %23, %cst_21 {dimension_numbers = #tpu.dot_dimension_numbers<[1], [0], [0], [1], [0, 0, 1, 1], [], []>} : vector<128x256xbf16>, vector<256x64xbf16>, vector<128x64xf32> -> vector<128x64xf32>
    %c0_22 = arith.constant 0 : index
    %c0_23 = arith.constant 0 : index
    %25 = vector.load %arg5[%c0_22, %c0_23] : memref<1x64xf32, #tpu.memory_space<vmem>>, vector<1x64xf32>
    %26 = vector.broadcast %25 : vector<1x64xf32> to vector<128x64xf32>
    %27 = arith.mulf %24, %26 : vector<128x64xf32>
    %c0_24 = arith.constant 0 : index
    %c0_25 = arith.constant 0 : index
    %28 = vector.load %arg6[%c0_24, %c0_25] : memref<1x64xf32, #tpu.memory_space<vmem>>, vector<1x64xf32>
    %29 = vector.broadcast %28 : vector<1x64xf32> to vector<128x64xf32>
    %30 = arith.addf %27, %29 : vector<128x64xf32>
    %cst_26 = arith.constant 0.000000e+00 : f32
    %31 = vector.broadcast %cst_26 : f32 to vector<128x64xf32>
    %32 = arith.maximumf %30, %31 : vector<128x64xf32>
    %33 = arith.truncf %32 : vector<128x64xf32> to vector<128x64xbf16>
    %34 = vector.shape_cast %33 : vector<128x64xbf16> to vector<8x16x64xbf16>
    %c9 = arith.constant 9 : index
    %c1_27 = arith.constant 1 : index
    %c0_28 = arith.constant 0 : index
    %35 = vector.load %arg12[%c9, %c1_27, %c0_28] : memref<18x18x64xbf16, #tpu.memory_space<vmem>>, vector<8x16x64xbf16>
    tpu.vector_store %arg12[%c9, %c1_27, %c0_28], %34 {strides = array<i32>} : memref<18x18x64xbf16, #tpu.memory_space<vmem>>, vector<8x16x64xbf16>,
    %cst_29 = arith.constant 0.000000e+00 : f32
    %36 = vector.broadcast %cst_29 : f32 to vector<128x64xf32>
    %c0_30 = arith.constant 0 : index
    %c0_31 = arith.constant 0 : index
    %c0_32 = arith.constant 0 : index
    %37 = vector.load %arg12[%c0_30, %c0_31, %c0_32] : memref<18x18x64xbf16, #tpu.memory_space<vmem>>, vector<8x16x64xbf16>
    %38 = vector.shape_cast %37 : vector<8x16x64xbf16> to vector<128x64xbf16>
    %c0_33 = arith.constant 0 : index
    %c0_34 = arith.constant 0 : index
    %c0_35 = arith.constant 0 : index
    %c0_36 = arith.constant 0 : index
    %39 = vector.load %arg3[%c0_33, %c0_34, %c0_35, %c0_36] : memref<3x3x64x64xbf16, #tpu.memory_space<vmem>>, vector<1x1x64x64xbf16>
    %40 = vector.shape_cast %39 : vector<1x1x64x64xbf16> to vector<64x64xbf16>
    %cst_37 = arith.constant dense<0.000000e+00> : vector<128x64xf32>
    %41 = tpu.matmul %38, %40, %cst_37 {dimension_numbers = #tpu.dot_dimension_numbers<[1], [0], [0], [1], [0, 0, 1, 1], [], []>} : vector<128x64xbf16>, vector<64x64xbf16>, vector<128x64xf32> -> vector<128x64xf32>
    %42 = arith.addf %36, %41 : vector<128x64xf32>
    %c0_38 = arith.constant 0 : index
    %c1_39 = arith.constant 1 : index
    %c0_40 = arith.constant 0 : index
    %43 = vector.load %arg12[%c0_38, %c1_39, %c0_40] : memref<18x18x64xbf16, #tpu.memory_space<vmem>>, vector<8x16x64xbf16>
    %44 = vector.shape_cast %43 : vector<8x16x64xbf16> to vector<128x64xbf16>
    %c0_41 = arith.constant 0 : index
    %c1_42 = arith.constant 1 : index
    %c0_43 = arith.constant 0 : index
    %c0_44 = arith.constant 0 : index
    %45 = vector.load %arg3[%c0_41, %c1_42, %c0_43, %c0_44] : memref<3x3x64x64xbf16, #tpu.memory_space<vmem>>, vector<1x1x64x64xbf16>
    %46 = vector.shape_cast %45 : vector<1x1x64x64xbf16> to vector<64x64xbf16>
    %cst_45 = arith.constant dense<0.000000e+00> : vector<128x64xf32>
    %47 = tpu.matmul %44, %46, %cst_45 {dimension_numbers = #tpu.dot_dimension_numbers<[1], [0], [0], [1], [0, 0, 1, 1], [], []>} : vector<128x64xbf16>, vector<64x64xbf16>, vector<128x64xf32> -> vector<128x64xf32>
    %48 = arith.addf %42, %47 : vector<128x64xf32>
    %c0_46 = arith.constant 0 : index
    %c2 = arith.constant 2 : index
    %c0_47 = arith.constant 0 : index
    %49 = vector.load %arg12[%c0_46, %c2, %c0_47] : memref<18x18x64xbf16, #tpu.memory_space<vmem>>, vector<8x16x64xbf16>
    %50 = vector.shape_cast %49 : vector<8x16x64xbf16> to vector<128x64xbf16>
    %c0_48 = arith.constant 0 : index
    %c2_49 = arith.constant 2 : index
    %c0_50 = arith.constant 0 : index
    %c0_51 = arith.constant 0 : index
    %51 = vector.load %arg3[%c0_48, %c2_49, %c0_50, %c0_51] : memref<3x3x64x64xbf16, #tpu.memory_space<vmem>>, vector<1x1x64x64xbf16>
    %52 = vector.shape_cast %51 : vector<1x1x64x64xbf16> to vector<64x64xbf16>
    %cst_52 = arith.constant dense<0.000000e+00> : vector<128x64xf32>
    %53 = tpu.matmul %50, %52, %cst_52 {dimension_numbers = #tpu.dot_dimension_numbers<[1], [0], [0], [1], [0, 0, 1, 1], [], []>} : vector<128x64xbf16>, vector<64x64xbf16>, vector<128x64xf32> -> vector<128x64xf32>
    %54 = arith.addf %48, %53 : vector<128x64xf32>
    %c1_53 = arith.constant 1 : index
    %c0_54 = arith.constant 0 : index
    %c0_55 = arith.constant 0 : index
    %55 = vector.load %arg12[%c1_53, %c0_54, %c0_55] : memref<18x18x64xbf16, #tpu.memory_space<vmem>>, vector<8x16x64xbf16>
    %56 = vector.shape_cast %55 : vector<8x16x64xbf16> to vector<128x64xbf16>
    %c1_56 = arith.constant 1 : index
    %c0_57 = arith.constant 0 : index
    %c0_58 = arith.constant 0 : index
    %c0_59 = arith.constant 0 : index
    %57 = vector.load %arg3[%c1_56, %c0_57, %c0_58, %c0_59] : memref<3x3x64x64xbf16, #tpu.memory_space<vmem>>, vector<1x1x64x64xbf16>
    %58 = vector.shape_cast %57 : vector<1x1x64x64xbf16> to vector<64x64xbf16>
    %cst_60 = arith.constant dense<0.000000e+00> : vector<128x64xf32>
    %59 = tpu.matmul %56, %58, %cst_60 {dimension_numbers = #tpu.dot_dimension_numbers<[1], [0], [0], [1], [0, 0, 1, 1], [], []>} : vector<128x64xbf16>, vector<64x64xbf16>, vector<128x64xf32> -> vector<128x64xf32>
    %60 = arith.addf %54, %59 : vector<128x64xf32>
    %c1_61 = arith.constant 1 : index
    %c1_62 = arith.constant 1 : index
    %c0_63 = arith.constant 0 : index
    %61 = vector.load %arg12[%c1_61, %c1_62, %c0_63] : memref<18x18x64xbf16, #tpu.memory_space<vmem>>, vector<8x16x64xbf16>
    %62 = vector.shape_cast %61 : vector<8x16x64xbf16> to vector<128x64xbf16>
    %c1_64 = arith.constant 1 : index
    %c1_65 = arith.constant 1 : index
    %c0_66 = arith.constant 0 : index
    %c0_67 = arith.constant 0 : index
    %63 = vector.load %arg3[%c1_64, %c1_65, %c0_66, %c0_67] : memref<3x3x64x64xbf16, #tpu.memory_space<vmem>>, vector<1x1x64x64xbf16>
    %64 = vector.shape_cast %63 : vector<1x1x64x64xbf16> to vector<64x64xbf16>
    %cst_68 = arith.constant dense<0.000000e+00> : vector<128x64xf32>
    %65 = tpu.matmul %62, %64, %cst_68 {dimension_numbers = #tpu.dot_dimension_numbers<[1], [0], [0], [1], [0, 0, 1, 1], [], []>} : vector<128x64xbf16>, vector<64x64xbf16>, vector<128x64xf32> -> vector<128x64xf32>
    %66 = arith.addf %60, %65 : vector<128x64xf32>
    %c1_69 = arith.constant 1 : index
    %c2_70 = arith.constant 2 : index
    %c0_71 = arith.constant 0 : index
    %67 = vector.load %arg12[%c1_69, %c2_70, %c0_71] : memref<18x18x64xbf16, #tpu.memory_space<vmem>>, vector<8x16x64xbf16>
    %68 = vector.shape_cast %67 : vector<8x16x64xbf16> to vector<128x64xbf16>
    %c1_72 = arith.constant 1 : index
    %c2_73 = arith.constant 2 : index
    %c0_74 = arith.constant 0 : index
    %c0_75 = arith.constant 0 : index
    %69 = vector.load %arg3[%c1_72, %c2_73, %c0_74, %c0_75] : memref<3x3x64x64xbf16, #tpu.memory_space<vmem>>, vector<1x1x64x64xbf16>
    %70 = vector.shape_cast %69 : vector<1x1x64x64xbf16> to vector<64x64xbf16>
    %cst_76 = arith.constant dense<0.000000e+00> : vector<128x64xf32>
    %71 = tpu.matmul %68, %70, %cst_76 {dimension_numbers = #tpu.dot_dimension_numbers<[1], [0], [0], [1], [0, 0, 1, 1], [], []>} : vector<128x64xbf16>, vector<64x64xbf16>, vector<128x64xf32> -> vector<128x64xf32>
    %72 = arith.addf %66, %71 : vector<128x64xf32>
    %c2_77 = arith.constant 2 : index
    %c0_78 = arith.constant 0 : index
    %c0_79 = arith.constant 0 : index
    %73 = vector.load %arg12[%c2_77, %c0_78, %c0_79] : memref<18x18x64xbf16, #tpu.memory_space<vmem>>, vector<8x16x64xbf16>
    %74 = vector.shape_cast %73 : vector<8x16x64xbf16> to vector<128x64xbf16>
    %c2_80 = arith.constant 2 : index
    %c0_81 = arith.constant 0 : index
    %c0_82 = arith.constant 0 : index
    %c0_83 = arith.constant 0 : index
    %75 = vector.load %arg3[%c2_80, %c0_81, %c0_82, %c0_83] : memref<3x3x64x64xbf16, #tpu.memory_space<vmem>>, vector<1x1x64x64xbf16>
    %76 = vector.shape_cast %75 : vector<1x1x64x64xbf16> to vector<64x64xbf16>
    %cst_84 = arith.constant dense<0.000000e+00> : vector<128x64xf32>
    %77 = tpu.matmul %74, %76, %cst_84 {dimension_numbers = #tpu.dot_dimension_numbers<[1], [0], [0], [1], [0, 0, 1, 1], [], []>} : vector<128x64xbf16>, vector<64x64xbf16>, vector<128x64xf32> -> vector<128x64xf32>
    %78 = arith.addf %72, %77 : vector<128x64xf32>
    %c2_85 = arith.constant 2 : index
    %c1_86 = arith.constant 1 : index
    %c0_87 = arith.constant 0 : index
    %79 = vector.load %arg12[%c2_85, %c1_86, %c0_87] : memref<18x18x64xbf16, #tpu.memory_space<vmem>>, vector<8x16x64xbf16>
    %80 = vector.shape_cast %79 : vector<8x16x64xbf16> to vector<128x64xbf16>
    %c2_88 = arith.constant 2 : index
    %c1_89 = arith.constant 1 : index
    %c0_90 = arith.constant 0 : index
    %c0_91 = arith.constant 0 : index
    %81 = vector.load %arg3[%c2_88, %c1_89, %c0_90, %c0_91] : memref<3x3x64x64xbf16, #tpu.memory_space<vmem>>, vector<1x1x64x64xbf16>
    %82 = vector.shape_cast %81 : vector<1x1x64x64xbf16> to vector<64x64xbf16>
    %cst_92 = arith.constant dense<0.000000e+00> : vector<128x64xf32>
    %83 = tpu.matmul %80, %82, %cst_92 {dimension_numbers = #tpu.dot_dimension_numbers<[1], [0], [0], [1], [0, 0, 1, 1], [], []>} : vector<128x64xbf16>, vector<64x64xbf16>, vector<128x64xf32> -> vector<128x64xf32>
    %84 = arith.addf %78, %83 : vector<128x64xf32>
    %c2_93 = arith.constant 2 : index
    %c2_94 = arith.constant 2 : index
    %c0_95 = arith.constant 0 : index
    %85 = vector.load %arg12[%c2_93, %c2_94, %c0_95] : memref<18x18x64xbf16, #tpu.memory_space<vmem>>, vector<8x16x64xbf16>
    %86 = vector.shape_cast %85 : vector<8x16x64xbf16> to vector<128x64xbf16>
    %c2_96 = arith.constant 2 : index
    %c2_97 = arith.constant 2 : index
    %c0_98 = arith.constant 0 : index
    %c0_99 = arith.constant 0 : index
    %87 = vector.load %arg3[%c2_96, %c2_97, %c0_98, %c0_99] : memref<3x3x64x64xbf16, #tpu.memory_space<vmem>>, vector<1x1x64x64xbf16>
    %88 = vector.shape_cast %87 : vector<1x1x64x64xbf16> to vector<64x64xbf16>
    %cst_100 = arith.constant dense<0.000000e+00> : vector<128x64xf32>
    %89 = tpu.matmul %86, %88, %cst_100 {dimension_numbers = #tpu.dot_dimension_numbers<[1], [0], [0], [1], [0, 0, 1, 1], [], []>} : vector<128x64xbf16>, vector<64x64xbf16>, vector<128x64xf32> -> vector<128x64xf32>
    %90 = arith.addf %84, %89 : vector<128x64xf32>
    %c0_101 = arith.constant 0 : index
    %c0_102 = arith.constant 0 : index
    %91 = vector.load %arg7[%c0_101, %c0_102] : memref<1x64xf32, #tpu.memory_space<vmem>>, vector<1x64xf32>
    %92 = vector.broadcast %91 : vector<1x64xf32> to vector<128x64xf32>
    %93 = arith.mulf %90, %92 : vector<128x64xf32>
    %c0_103 = arith.constant 0 : index
    %c0_104 = arith.constant 0 : index
    %94 = vector.load %arg8[%c0_103, %c0_104] : memref<1x64xf32, #tpu.memory_space<vmem>>, vector<1x64xf32>
    %95 = vector.broadcast %94 : vector<1x64xf32> to vector<128x64xf32>
    %96 = arith.addf %93, %95 : vector<128x64xf32>
    %cst_105 = arith.constant 0.000000e+00 : f32
    %97 = vector.broadcast %cst_105 : f32 to vector<128x64xf32>
    %98 = arith.maximumf %96, %97 : vector<128x64xf32>
    %99 = arith.truncf %98 : vector<128x64xf32> to vector<128x64xbf16>
    %c0_106 = arith.constant 0 : index
    %c0_107 = arith.constant 0 : index
    %100 = vector.load %arg4[%c0_106, %c0_107] : memref<64x256xbf16, #tpu.memory_space<vmem>>, vector<64x256xbf16>
    %cst_108 = arith.constant dense<0.000000e+00> : vector<128x256xf32>
    %101 = tpu.matmul %99, %100, %cst_108 {dimension_numbers = #tpu.dot_dimension_numbers<[1], [0], [0], [1], [0, 0, 1, 1], [], []>} : vector<128x64xbf16>, vector<64x256xbf16>, vector<128x256xf32> -> vector<128x256xf32>
    %c0_109 = arith.constant 0 : index
    %c0_110 = arith.constant 0 : index
    %c0_111 = arith.constant 0 : index
    %c0_112 = arith.constant 0 : index
    %102 = vector.load %arg1[%c0_109, %c0_110, %c0_111, %c0_112] : memref<1x16x16x256xf32, #tpu.memory_space<vmem>>, vector<1x8x16x256xf32>
    %103 = vector.shape_cast %102 : vector<1x8x16x256xf32> to vector<8x16x256xf32>
    %104 = vector.shape_cast %103 : vector<8x16x256xf32> to vector<128x256xf32>
    %c0_113 = arith.constant 0 : index
    %c0_114 = arith.constant 0 : index
    %105 = vector.load %arg9[%c0_113, %c0_114] : memref<1x256xf32, #tpu.memory_space<vmem>>, vector<1x256xf32>
    %106 = vector.broadcast %105 : vector<1x256xf32> to vector<128x256xf32>
    %107 = arith.mulf %101, %106 : vector<128x256xf32>
    %c0_115 = arith.constant 0 : index
    %c0_116 = arith.constant 0 : index
    %108 = vector.load %arg10[%c0_115, %c0_116] : memref<1x256xf32, #tpu.memory_space<vmem>>, vector<1x256xf32>
    %109 = vector.broadcast %108 : vector<1x256xf32> to vector<128x256xf32>
    %110 = arith.addf %107, %109 : vector<128x256xf32>
    %111 = arith.addf %110, %104 : vector<128x256xf32>
    %cst_117 = arith.constant 0.000000e+00 : f32
    %112 = vector.broadcast %cst_117 : f32 to vector<128x256xf32>
    %113 = arith.maximumf %111, %112 : vector<128x256xf32>
    %114 = vector.shape_cast %113 : vector<128x256xf32> to vector<8x16x256xf32>
    %c0_118 = arith.constant 0 : index
    %c0_119 = arith.constant 0 : index
    %c0_120 = arith.constant 0 : index
    %c0_121 = arith.constant 0 : index
    %115 = vector.load %arg11[%c0_118, %c0_119, %c0_120, %c0_121] : memref<1x16x16x256xf32, #tpu.memory_space<vmem>>, vector<1x8x16x256xf32>
    %116 = vector.shape_cast %115 : vector<1x8x16x256xf32> to vector<8x16x256xf32>
    %117 = vector.shape_cast %114 : vector<8x16x256xf32> to vector<1x8x16x256xf32>
    tpu.vector_store %arg11[%c0_118, %c0_119, %c0_120, %c0_121], %117 {strides = array<i32>} : memref<1x16x16x256xf32, #tpu.memory_space<vmem>>, vector<1x8x16x256xf32>,
    %cst_122 = arith.constant 0.000000e+00 : f32
    %118 = vector.broadcast %cst_122 : f32 to vector<128x64xf32>
    %c8_123 = arith.constant 8 : index
    %c0_124 = arith.constant 0 : index
    %c0_125 = arith.constant 0 : index
    %119 = vector.load %arg12[%c8_123, %c0_124, %c0_125] : memref<18x18x64xbf16, #tpu.memory_space<vmem>>, vector<8x16x64xbf16>
    %120 = vector.shape_cast %119 : vector<8x16x64xbf16> to vector<128x64xbf16>
    %c0_126 = arith.constant 0 : index
    %c0_127 = arith.constant 0 : index
    %c0_128 = arith.constant 0 : index
    %c0_129 = arith.constant 0 : index
    %121 = vector.load %arg3[%c0_126, %c0_127, %c0_128, %c0_129] : memref<3x3x64x64xbf16, #tpu.memory_space<vmem>>, vector<1x1x64x64xbf16>
    %122 = vector.shape_cast %121 : vector<1x1x64x64xbf16> to vector<64x64xbf16>
    %cst_130 = arith.constant dense<0.000000e+00> : vector<128x64xf32>
    %123 = tpu.matmul %120, %122, %cst_130 {dimension_numbers = #tpu.dot_dimension_numbers<[1], [0], [0], [1], [0, 0, 1, 1], [], []>} : vector<128x64xbf16>, vector<64x64xbf16>, vector<128x64xf32> -> vector<128x64xf32>
    %124 = arith.addf %118, %123 : vector<128x64xf32>
    %c8_131 = arith.constant 8 : index
    %c1_132 = arith.constant 1 : index
    %c0_133 = arith.constant 0 : index
    %125 = vector.load %arg12[%c8_131, %c1_132, %c0_133] : memref<18x18x64xbf16, #tpu.memory_space<vmem>>, vector<8x16x64xbf16>
    %126 = vector.shape_cast %125 : vector<8x16x64xbf16> to vector<128x64xbf16>
    %c0_134 = arith.constant 0 : index
    %c1_135 = arith.constant 1 : index
    %c0_136 = arith.constant 0 : index
    %c0_137 = arith.constant 0 : index
    %127 = vector.load %arg3[%c0_134, %c1_135, %c0_136, %c0_137] : memref<3x3x64x64xbf16, #tpu.memory_space<vmem>>, vector<1x1x64x64xbf16>
    %128 = vector.shape_cast %127 : vector<1x1x64x64xbf16> to vector<64x64xbf16>
    %cst_138 = arith.constant dense<0.000000e+00> : vector<128x64xf32>
    %129 = tpu.matmul %126, %128, %cst_138 {dimension_numbers = #tpu.dot_dimension_numbers<[1], [0], [0], [1], [0, 0, 1, 1], [], []>} : vector<128x64xbf16>, vector<64x64xbf16>, vector<128x64xf32> -> vector<128x64xf32>
    %130 = arith.addf %124, %129 : vector<128x64xf32>
    %c8_139 = arith.constant 8 : index
    %c2_140 = arith.constant 2 : index
    %c0_141 = arith.constant 0 : index
    %131 = vector.load %arg12[%c8_139, %c2_140, %c0_141] : memref<18x18x64xbf16, #tpu.memory_space<vmem>>, vector<8x16x64xbf16>
    %132 = vector.shape_cast %131 : vector<8x16x64xbf16> to vector<128x64xbf16>
    %c0_142 = arith.constant 0 : index
    %c2_143 = arith.constant 2 : index
    %c0_144 = arith.constant 0 : index
    %c0_145 = arith.constant 0 : index
    %133 = vector.load %arg3[%c0_142, %c2_143, %c0_144, %c0_145] : memref<3x3x64x64xbf16, #tpu.memory_space<vmem>>, vector<1x1x64x64xbf16>
    %134 = vector.shape_cast %133 : vector<1x1x64x64xbf16> to vector<64x64xbf16>
    %cst_146 = arith.constant dense<0.000000e+00> : vector<128x64xf32>
    %135 = tpu.matmul %132, %134, %cst_146 {dimension_numbers = #tpu.dot_dimension_numbers<[1], [0], [0], [1], [0, 0, 1, 1], [], []>} : vector<128x64xbf16>, vector<64x64xbf16>, vector<128x64xf32> -> vector<128x64xf32>
    %136 = arith.addf %130, %135 : vector<128x64xf32>
    %c9_147 = arith.constant 9 : index
    %c0_148 = arith.constant 0 : index
    %c0_149 = arith.constant 0 : index
    %137 = vector.load %arg12[%c9_147, %c0_148, %c0_149] : memref<18x18x64xbf16, #tpu.memory_space<vmem>>, vector<8x16x64xbf16>
    %138 = vector.shape_cast %137 : vector<8x16x64xbf16> to vector<128x64xbf16>
    %c1_150 = arith.constant 1 : index
    %c0_151 = arith.constant 0 : index
    %c0_152 = arith.constant 0 : index
    %c0_153 = arith.constant 0 : index
    %139 = vector.load %arg3[%c1_150, %c0_151, %c0_152, %c0_153] : memref<3x3x64x64xbf16, #tpu.memory_space<vmem>>, vector<1x1x64x64xbf16>
    %140 = vector.shape_cast %139 : vector<1x1x64x64xbf16> to vector<64x64xbf16>
    %cst_154 = arith.constant dense<0.000000e+00> : vector<128x64xf32>
    %141 = tpu.matmul %138, %140, %cst_154 {dimension_numbers = #tpu.dot_dimension_numbers<[1], [0], [0], [1], [0, 0, 1, 1], [], []>} : vector<128x64xbf16>, vector<64x64xbf16>, vector<128x64xf32> -> vector<128x64xf32>
    %142 = arith.addf %136, %141 : vector<128x64xf32>
    %c9_155 = arith.constant 9 : index
    %c1_156 = arith.constant 1 : index
    %c0_157 = arith.constant 0 : index
    %143 = vector.load %arg12[%c9_155, %c1_156, %c0_157] : memref<18x18x64xbf16, #tpu.memory_space<vmem>>, vector<8x16x64xbf16>
    %144 = vector.shape_cast %143 : vector<8x16x64xbf16> to vector<128x64xbf16>
    %c1_158 = arith.constant 1 : index
    %c1_159 = arith.constant 1 : index
    %c0_160 = arith.constant 0 : index
    %c0_161 = arith.constant 0 : index
    %145 = vector.load %arg3[%c1_158, %c1_159, %c0_160, %c0_161] : memref<3x3x64x64xbf16, #tpu.memory_space<vmem>>, vector<1x1x64x64xbf16>
    %146 = vector.shape_cast %145 : vector<1x1x64x64xbf16> to vector<64x64xbf16>
    %cst_162 = arith.constant dense<0.000000e+00> : vector<128x64xf32>
    %147 = tpu.matmul %144, %146, %cst_162 {dimension_numbers = #tpu.dot_dimension_numbers<[1], [0], [0], [1], [0, 0, 1, 1], [], []>} : vector<128x64xbf16>, vector<64x64xbf16>, vector<128x64xf32> -> vector<128x64xf32>
    %148 = arith.addf %142, %147 : vector<128x64xf32>
    %c9_163 = arith.constant 9 : index
    %c2_164 = arith.constant 2 : index
    %c0_165 = arith.constant 0 : index
    %149 = vector.load %arg12[%c9_163, %c2_164, %c0_165] : memref<18x18x64xbf16, #tpu.memory_space<vmem>>, vector<8x16x64xbf16>
    %150 = vector.shape_cast %149 : vector<8x16x64xbf16> to vector<128x64xbf16>
    %c1_166 = arith.constant 1 : index
    %c2_167 = arith.constant 2 : index
    %c0_168 = arith.constant 0 : index
    %c0_169 = arith.constant 0 : index
    %151 = vector.load %arg3[%c1_166, %c2_167, %c0_168, %c0_169] : memref<3x3x64x64xbf16, #tpu.memory_space<vmem>>, vector<1x1x64x64xbf16>
    %152 = vector.shape_cast %151 : vector<1x1x64x64xbf16> to vector<64x64xbf16>
    %cst_170 = arith.constant dense<0.000000e+00> : vector<128x64xf32>
    %153 = tpu.matmul %150, %152, %cst_170 {dimension_numbers = #tpu.dot_dimension_numbers<[1], [0], [0], [1], [0, 0, 1, 1], [], []>} : vector<128x64xbf16>, vector<64x64xbf16>, vector<128x64xf32> -> vector<128x64xf32>
    %154 = arith.addf %148, %153 : vector<128x64xf32>
    %c10 = arith.constant 10 : index
    %c0_171 = arith.constant 0 : index
    %c0_172 = arith.constant 0 : index
    %155 = vector.load %arg12[%c10, %c0_171, %c0_172] : memref<18x18x64xbf16, #tpu.memory_space<vmem>>, vector<8x16x64xbf16>
    %156 = vector.shape_cast %155 : vector<8x16x64xbf16> to vector<128x64xbf16>
    %c2_173 = arith.constant 2 : index
    %c0_174 = arith.constant 0 : index
    %c0_175 = arith.constant 0 : index
    %c0_176 = arith.constant 0 : index
    %157 = vector.load %arg3[%c2_173, %c0_174, %c0_175, %c0_176] : memref<3x3x64x64xbf16, #tpu.memory_space<vmem>>, vector<1x1x64x64xbf16>
    %158 = vector.shape_cast %157 : vector<1x1x64x64xbf16> to vector<64x64xbf16>
    %cst_177 = arith.constant dense<0.000000e+00> : vector<128x64xf32>
    %159 = tpu.matmul %156, %158, %cst_177 {dimension_numbers = #tpu.dot_dimension_numbers<[1], [0], [0], [1], [0, 0, 1, 1], [], []>} : vector<128x64xbf16>, vector<64x64xbf16>, vector<128x64xf32> -> vector<128x64xf32>
    %160 = arith.addf %154, %159 : vector<128x64xf32>
    %c10_178 = arith.constant 10 : index
    %c1_179 = arith.constant 1 : index
    %c0_180 = arith.constant 0 : index
    %161 = vector.load %arg12[%c10_178, %c1_179, %c0_180] : memref<18x18x64xbf16, #tpu.memory_space<vmem>>, vector<8x16x64xbf16>
    %162 = vector.shape_cast %161 : vector<8x16x64xbf16> to vector<128x64xbf16>
    %c2_181 = arith.constant 2 : index
    %c1_182 = arith.constant 1 : index
    %c0_183 = arith.constant 0 : index
    %c0_184 = arith.constant 0 : index
    %163 = vector.load %arg3[%c2_181, %c1_182, %c0_183, %c0_184] : memref<3x3x64x64xbf16, #tpu.memory_space<vmem>>, vector<1x1x64x64xbf16>
    %164 = vector.shape_cast %163 : vector<1x1x64x64xbf16> to vector<64x64xbf16>
    %cst_185 = arith.constant dense<0.000000e+00> : vector<128x64xf32>
    %165 = tpu.matmul %162, %164, %cst_185 {dimension_numbers = #tpu.dot_dimension_numbers<[1], [0], [0], [1], [0, 0, 1, 1], [], []>} : vector<128x64xbf16>, vector<64x64xbf16>, vector<128x64xf32> -> vector<128x64xf32>
    %166 = arith.addf %160, %165 : vector<128x64xf32>
    %c10_186 = arith.constant 10 : index
    %c2_187 = arith.constant 2 : index
    %c0_188 = arith.constant 0 : index
    %167 = vector.load %arg12[%c10_186, %c2_187, %c0_188] : memref<18x18x64xbf16, #tpu.memory_space<vmem>>, vector<8x16x64xbf16>
    %168 = vector.shape_cast %167 : vector<8x16x64xbf16> to vector<128x64xbf16>
    %c2_189 = arith.constant 2 : index
    %c2_190 = arith.constant 2 : index
    %c0_191 = arith.constant 0 : index
    %c0_192 = arith.constant 0 : index
    %169 = vector.load %arg3[%c2_189, %c2_190, %c0_191, %c0_192] : memref<3x3x64x64xbf16, #tpu.memory_space<vmem>>, vector<1x1x64x64xbf16>
    %170 = vector.shape_cast %169 : vector<1x1x64x64xbf16> to vector<64x64xbf16>
    %cst_193 = arith.constant dense<0.000000e+00> : vector<128x64xf32>
    %171 = tpu.matmul %168, %170, %cst_193 {dimension_numbers = #tpu.dot_dimension_numbers<[1], [0], [0], [1], [0, 0, 1, 1], [], []>} : vector<128x64xbf16>, vector<64x64xbf16>, vector<128x64xf32> -> vector<128x64xf32>
    %172 = arith.addf %166, %171 : vector<128x64xf32>
    %c0_194 = arith.constant 0 : index
    %c0_195 = arith.constant 0 : index
    %173 = vector.load %arg7[%c0_194, %c0_195] : memref<1x64xf32, #tpu.memory_space<vmem>>, vector<1x64xf32>
    %174 = vector.broadcast %173 : vector<1x64xf32> to vector<128x64xf32>
    %175 = arith.mulf %172, %174 : vector<128x64xf32>
    %c0_196 = arith.constant 0 : index
    %c0_197 = arith.constant 0 : index
    %176 = vector.load %arg8[%c0_196, %c0_197] : memref<1x64xf32, #tpu.memory_space<vmem>>, vector<1x64xf32>
    %177 = vector.broadcast %176 : vector<1x64xf32> to vector<128x64xf32>
    %178 = arith.addf %175, %177 : vector<128x64xf32>
    %cst_198 = arith.constant 0.000000e+00 : f32
    %179 = vector.broadcast %cst_198 : f32 to vector<128x64xf32>
    %180 = arith.maximumf %178, %179 : vector<128x64xf32>
    %181 = arith.truncf %180 : vector<128x64xf32> to vector<128x64xbf16>
    %c0_199 = arith.constant 0 : index
    %c0_200 = arith.constant 0 : index
    %182 = vector.load %arg4[%c0_199, %c0_200] : memref<64x256xbf16, #tpu.memory_space<vmem>>, vector<64x256xbf16>
    %cst_201 = arith.constant dense<0.000000e+00> : vector<128x256xf32>
    %183 = tpu.matmul %181, %182, %cst_201 {dimension_numbers = #tpu.dot_dimension_numbers<[1], [0], [0], [1], [0, 0, 1, 1], [], []>} : vector<128x64xbf16>, vector<64x256xbf16>, vector<128x256xf32> -> vector<128x256xf32>
    %c0_202 = arith.constant 0 : index
    %c8_203 = arith.constant 8 : index
    %c0_204 = arith.constant 0 : index
    %c0_205 = arith.constant 0 : index
    %184 = vector.load %arg1[%c0_202, %c8_203, %c0_204, %c0_205] : memref<1x16x16x256xf32, #tpu.memory_space<vmem>>, vector<1x8x16x256xf32>
    %185 = vector.shape_cast %184 : vector<1x8x16x256xf32> to vector<8x16x256xf32>
    %186 = vector.shape_cast %185 : vector<8x16x256xf32> to vector<128x256xf32>
    %c0_206 = arith.constant 0 : index
    %c0_207 = arith.constant 0 : index
    %187 = vector.load %arg9[%c0_206, %c0_207] : memref<1x256xf32, #tpu.memory_space<vmem>>, vector<1x256xf32>
    %188 = vector.broadcast %187 : vector<1x256xf32> to vector<128x256xf32>
    %189 = arith.mulf %183, %188 : vector<128x256xf32>
    %c0_208 = arith.constant 0 : index
    %c0_209 = arith.constant 0 : index
    %190 = vector.load %arg10[%c0_208, %c0_209] : memref<1x256xf32, #tpu.memory_space<vmem>>, vector<1x256xf32>
    %191 = vector.broadcast %190 : vector<1x256xf32> to vector<128x256xf32>
    %192 = arith.addf %189, %191 : vector<128x256xf32>
    %193 = arith.addf %192, %186 : vector<128x256xf32>
    %cst_210 = arith.constant 0.000000e+00 : f32
    %194 = vector.broadcast %cst_210 : f32 to vector<128x256xf32>
    %195 = arith.maximumf %193, %194 : vector<128x256xf32>
    %196 = vector.shape_cast %195 : vector<128x256xf32> to vector<8x16x256xf32>
    %c0_211 = arith.constant 0 : index
    %c8_212 = arith.constant 8 : index
    %c0_213 = arith.constant 0 : index
    %c0_214 = arith.constant 0 : index
    %197 = vector.load %arg11[%c0_211, %c8_212, %c0_213, %c0_214] : memref<1x16x16x256xf32, #tpu.memory_space<vmem>>, vector<1x8x16x256xf32>
    %198 = vector.shape_cast %197 : vector<1x8x16x256xf32> to vector<8x16x256xf32>
    %199 = vector.shape_cast %196 : vector<8x16x256xf32> to vector<1x8x16x256xf32>
    tpu.vector_store %arg11[%c0_211, %c8_212, %c0_213, %c0_214], %199 {strides = array<i32>} : memref<1x16x16x256xf32, #tpu.memory_space<vmem>>, vector<1x8x16x256xf32>,
    return
  }
  func.func @transform_0(%arg0: i32) -> (i32, i32, i32, i32) {
    %c0_i32 = arith.constant 0 : i32
    %c0_i32_0 = arith.constant 0 : i32
    %c0_i32_1 = arith.constant 0 : i32
    %c0_i32_2 = arith.constant 0 : i32
    return %arg0, %c0_i32, %c0_i32_0, %c0_i32_1 : i32, i32, i32, i32
  }
  func.func @transform_1(%arg0: i32) -> (i32, i32) {
    %c0_i32 = arith.constant 0 : i32
    %c0_i32_0 = arith.constant 0 : i32
    %c0_i32_1 = arith.constant 0 : i32
    return %c0_i32, %c0_i32_0 : i32, i32
  }
  func.func @transform_2(%arg0: i32) -> (i32, i32, i32, i32) {
    %c0_i32 = arith.constant 0 : i32
    %c0_i32_0 = arith.constant 0 : i32
    %c0_i32_1 = arith.constant 0 : i32
    %c0_i32_2 = arith.constant 0 : i32
    %c0_i32_3 = arith.constant 0 : i32
    return %c0_i32, %c0_i32_0, %c0_i32_1, %c0_i32_2 : i32, i32, i32, i32
  }
  func.func @transform_3(%arg0: i32) -> (i32, i32) {
    %c0_i32 = arith.constant 0 : i32
    %c0_i32_0 = arith.constant 0 : i32
    %c0_i32_1 = arith.constant 0 : i32
    return %c0_i32, %c0_i32_0 : i32, i32
  }
  func.func @transform_4(%arg0: i32) -> (i32, i32) {
    %c0_i32 = arith.constant 0 : i32
    %c0_i32_0 = arith.constant 0 : i32
    %c0_i32_1 = arith.constant 0 : i32
    return %c0_i32, %c0_i32_0 : i32, i32
  }
  func.func @transform_5(%arg0: i32) -> (i32, i32) {
    %c0_i32 = arith.constant 0 : i32
    %c0_i32_0 = arith.constant 0 : i32
    %c0_i32_1 = arith.constant 0 : i32
    return %c0_i32, %c0_i32_0 : i32, i32
  }
  func.func @transform_6(%arg0: i32) -> (i32, i32) {
    %c0_i32 = arith.constant 0 : i32
    %c0_i32_0 = arith.constant 0 : i32
    %c0_i32_1 = arith.constant 0 : i32
    return %c0_i32, %c0_i32_0 : i32, i32
  }
  func.func @transform_7(%arg0: i32) -> (i32, i32) {
    %c0_i32 = arith.constant 0 : i32
    %c0_i32_0 = arith.constant 0 : i32
    %c0_i32_1 = arith.constant 0 : i32
    return %c0_i32, %c0_i32_0 : i32, i32
  }
  func.func @transform_8(%arg0: i32) -> (i32, i32) {
    %c0_i32 = arith.constant 0 : i32
    %c0_i32_0 = arith.constant 0 : i32
    %c0_i32_1 = arith.constant 0 : i32
    return %c0_i32, %c0_i32_0 : i32, i32
  }
  func.func @transform_9(%arg0: i32) -> (i32, i32) {
    %c0_i32 = arith.constant 0 : i32
    %c0_i32_0 = arith.constant 0 : i32
    %c0_i32_1 = arith.constant 0 : i32
    return %c0_i32, %c0_i32_0 : i32, i32
  }
  func.func @transform_10(%arg0: i32) -> (i32, i32, i32, i32) {
    %c0_i32 = arith.constant 0 : i32
    %c0_i32_0 = arith.constant 0 : i32
    %c0_i32_1 = arith.constant 0 : i32
    %c0_i32_2 = arith.constant 0 : i32
    return %arg0, %c0_i32, %c0_i32_0, %c0_i32_1 : i32, i32, i32, i32
  }
}

</mosaic_0001>

<bundles_post_ra>
// kernel: tpu_custom_call.1
= control target key start
LH: loop header
LB: loop body
LE: loop exit
PB: predicated region body
PF: predicated region fallthrough
CT: control target
= control target key end

     0   :  { %s12968_s0 = inlined_call_operand.hbm [shape: f32[2,16,16,256], index: 0, kind: input, shape index: {}]   ;;  %s12969_s1 = inlined_call_operand.vmem [shape: bf16[256,64], index: 1, kind: input, shape index: {}]   ;;  %s12970_s2 = inlined_call_operand.hbm [shape: bf16[3,3,64,64], index: 2, kind: input, shape index: {}]   ;;  %s12971_s3 = inlined_call_operand.vmem [shape: bf16[64,256], index: 3, kind: input, shape index: {}]   ;;  %s12972_s4 = inlined_call_operand.vmem [shape: f32[1,64], index: 4, kind: input, shape index: {}]   ;;  %s12973_s5 = inlined_call_operand.vmem [shape: f32[1,64], index: 5, kind: input, shape index: {}]   ;;  %s12974_s6 = inlined_call_operand.vmem [shape: f32[1,64], index: 6, kind: input, shape index: {}]   ;;  %s12975_s7 = inlined_call_operand.vmem [shape: f32[1,64], index: 7, kind: input, shape index: {}]   ;;  %s12976_s8 = inlined_call_operand.vmem [shape: f32[1,256], index: 8, kind: input, shape index: {}]   ;;  %s12977_s9 = inlined_call_operand.vmem [shape: f32[1,256], index: 9, kind: input, shape index: {}]   ;;  %s12978_s10 = inlined_call_operand.hbm [shape: f32[2,16,16,256], index: 10, kind: output, shape index: {}]  }
   0x1   :  { %12996 = sst [smem:[#allocation39_spill]] %s12970_s2 }
   0x2   :  { %15 = vsyncpa [#allocation4], 0 }
   0x3   :  { %17 = vsyncpa [#allocation4 + $0x1], 0 }
   0x4   :  { %18 = vsyncpa [#allocation7], 0 }
   0x5   :  { %19 = vsyncpa [#allocation5], 0 }
   0x6   :  { %21 = vsyncpa [#allocation5 + $0x1], 0  ;;  %s10018_s13 = smov 0   ;;  %s10020_s14 = smov 0  }
   0x7   :  { %s10022_s15 = smov 0   ;;  %s10024_s16 = smov 0  }
   0x8 LB: > { %12997 = sst [smem:[#allocation12_spill]] %s9939_s13  ;;  %s10039_s17 = sadd.s32 4294967295, %s9951_s16   ;;  %s9951_s16 = sphi %s10024_s16, %s13082_s16   ;;  %s9947_s15 = sphi %s10022_s15, %s13085_s15   ;;  %s9943_s14 = sphi %s10020_s14, %s13084_s14   ;;  %s9939_s13 = sphi %s10018_s13, %s13083_s13  }
   0x9   : > { %s8095_s18 = sadd.s32 4294967294, %s9951_s16   ;;  %p47_p0 = scmp.ne.s32.totalorder %s9943_s14, %s9939_s13 }
   0xa   : > { %p12983_p1 = scmp.eq.s32.totalorder %s10039_s17, 0  ;;  %p266_p3 = scmp.eq.s32.totalorder %s8095_s18, 1 }
   0xb   : > { %p8096_p5 = scmp.ge.s32.totalorder %s9951_s16, 1  ;;  %p273_p7 = scmp.lt.s32.totalorder %s9951_s16, 3 }
   0xc   : > { %p10048_p4 = por %p12983_p1, %p47_p0  ;;  %p10053_p6 = por %p266_p3, %p47_p0 }
   0xd   : > { %p10058_p8 = pnand %p8096_p5, %p273_p7  ;;  %s9953_s22 = smov [#allocation6]  }
   0xe   : > { %s12998_s19 = scalar_select %p10048_p4, 1, 0 }
   0xf   : > { %s12999_s20 = scalar_select %p10053_p6, 1, 0 }
  0x10   : > { %s13001_s21 = scalar_select %p10058_p8, 1, 0 }
  0x11   : > { %13000 = sst [smem:[#allocation13_spill]] %s12999_s20  ;;  %s288_s23 = sshll.u32 %s9953_s22, 4  ;;  %s289_s23 = int_to_ptr.vmem [resolvable:$true] %s288_s23 }
  0x12   : > { %p9553_p9 = pneg %p10058_p8  ;;  %s10072_s25 = sadd.s32 1, %s9951_s16  }
  0x13   : > { %13003 = sst [smem:[#allocation14_spill]] %s10072_s25  ;;  %s34_s26 = sadd.s32 1, %s9947_s15 }
  0x14   : > { %p10067_p11 = pnand %p9553_p9, %p12983_p1  ;;  %s31_s27 = ssub.s32 %s9951_s16, %s10072_s25 }
  0x15   : > { %s9840_s28 = scalar_lea.vmem %s289_s23, 4608  ;;  %p9848_p5 = scmp.lt.s32.totalorder %s289_s23, %s289_s23 }
  0x16   : > { %p9831_p12 = pneg %p10067_p11  ;;  %p9841_p13 = scmp.ne.s32.totalorder %s289_s23, %s9840_s28 }
  0x17   : > { %p9849_p7 = scmp.lt.s32.totalorder %s9840_s28, %s9840_s28 }
  0x18   : > { %p9843_p0 = pnand %p9841_p13, %p9831_p12 }
  0x19   : > { %p9850_p10 = por %p9849_p7, %p9848_p5 }
  0x1a   : > { %p9844_p3 = pneg %p9843_p0 }
  0x1c   : > { %p9851_p2 = pnand %p9850_p10, %p9844_p3 }
  0x1e   : > { %9854 = shalt.err (!%p9851_p2)
}
  0x1f   : > { %s9954_s29 = smov 64   ;;  %s9955_s30 = smov 4  }
  0x20   : > { %s13004_s2 = sld [smem:[#allocation39_spill]]  ;;  %p32_p9 = scmp.eq.s32.totalorder %s31_s27, 0 }
  0x21   : > { %p41_p12 = scmp.ne.s32.totalorder %s9947_s15, %s9943_s14  ;;  %p42_p10 = scmp.eq.s32.totalorder %s9951_s16, 0 }
  0x22   : > { %p9566_p2 = scmp.lt.s32.totalorder %s9951_s16, 2  ;;  %p13005_p0 = scmp.eq.s32.totalorder %s10039_s17, 1 }
  0x23   : > { %s10089_s18 = scalar_select %p32_p9, %s9947_s15, %s34_s26  }
  0x24   : > { %p43_p13 = por %p42_p10, %p41_p12  ;;  %p10093_p3 = por %p13005_p0, %p41_p12 }
  0x25   : > { %s323_s28 = sand.u32 1, %s9947_s15   ;;  %s8719_s25 = sshll.u32 %s9951_s16, 13 }
  0x26   : > { %9556 = dma.hbm_to_vmem [thread:$0]  (!%p10067_p11), %s13004_s2, 4608, %s289_s23, [#allocation7], %s9954_s29, %s9954_s29, %s9955_s30  }
  0x27   : > { %s13006_s22 = scalar_select %p10093_p3, 1, 0 }
  0x28   : > { %s8099_s20 = sshll.u32 %s323_s28, 9  ;;  %s10102_s11 = scalar_lea.hbm %s12968_s0, %s8719_s25 }
  0x29   : > { %s327_s23 = scalar_lea.vmem [#allocation3], %s8099_s20  ;;  %p10104_p11 = pnand %p9566_p2, %p43_p13 }
  0x2a   : > { %s334_s26 = sshll.u32 %s327_s23, 4  ;;  %s10110_s29 = scalar_lea.sflag [#allocation4], %s323_s28  ;;  %s10108_s26 = int_to_ptr.vmem [resolvable:$true] %s334_s26 }
  0x2b   : > { %s9855_s30 = scalar_lea.hbm %s10102_s11, 8192  ;;  %p9857_p7 = pneg %p10104_p11 }
  0x2c   : > { %p9856_p5 = scmp.ne.s32.totalorder %s10102_s11, %s9855_s30  ;;  %s9860_s20 = scalar_lea.hbm %s12968_s0, 16384 }
  0x2d   : > { %p9861_p10 = scmp.lt.s32.totalorder %s10102_s11, %s12968_s0  ;;  %p9862_p2 = scmp.lt.s32.totalorder %s9860_s20, %s9855_s30 }
  0x2e   : > { %p9858_p9 = pnand %p9857_p7, %p9856_p5 }
  0x2f   : > { %p9863_p13 = por %p9862_p2, %p9861_p10 }
  0x30   : > { %p9859_p12 = pneg %p9858_p9 }
  0x32   : > { %p9864_p0 = pnand %p9863_p13, %p9859_p12 }
  0x34   : > { %9867 = shalt.err (!%p9864_p0)
}
  0x35   : > { %s9868_s28 = scalar_lea.vmem %s10108_s26, 8192  ;;  %s9956_s23 = smov [#allocation3]  }
  0x36   : > { %p9869_p1 = scmp.ne.s32.totalorder %s10108_s26, %s9868_s28  ;;  %s9873_s2 = sshll.u32 %s9956_s23, 4  ;;  %s9874_s2 = int_to_ptr.vmem [resolvable:$false] %s9873_s2 }
  0x37   : > { %s9875_s13 = scalar_lea.vmem %s9874_s2, 16384  ;;  %p9876_p9 = scmp.lt.s32.totalorder %s10108_s26, %s9874_s2 }
  0x38   : > { %p9871_p6 = pnand %p9869_p1, %p9857_p7  ;;  %p9877_p3 = scmp.lt.s32.totalorder %s9875_s13, %s9868_s28 }
  0x3a   : > { %p9872_p5 = pneg %p9871_p6  ;;  %p9878_p4 = por %p9877_p3, %p9876_p9 }
  0x3c   : > { %p9879_p8 = pnand %p9878_p4, %p9872_p5 }
  0x3e   : > { %9882 = shalt.err (!%p9879_p8)
}
  0x3f   : > { %s9957_s30 = smov 256   ;;  %s9958_s25 = smov 16  }
  0x40   : > { %9560 = dma.hbm_to_vmem [thread:$0]  (!%p10104_p11), %s10102_s11, 8192, %s10108_s26, %s10110_s29, %s9957_s30, %s9957_s30, %s9958_s25  }
  0x41   : > { %p13008_p1 = scmp.ne.s32.totalorder %s13001_s21, 0 }
  0x43   : > { %346 = sbr.rel (%p13008_p1) target bundleno = 1367 (0x557), region = 60 }
  0x48   : > { %s10134_s20 = sand.u32 1, %s9943_s14   ;;  %p13009_p4 = scmp.ne.s32.totalorder %s12998_s19, 0 }
  0x49   : > { %s8103_s2 = sshll.u32 %s10134_s20, 9  ;;  %s349_s12 = scalar_lea.sflag [#allocation4], %s10134_s20 }
  0x4a   : > { %s10140_s24 = scalar_lea.vmem [#allocation3], %s8103_s2 }
  0x4b   : > { %9926 = dma.done.wait (%p13009_p4), %s349_s12, 8192  }
  0x4c   : > { %9928 = vsyncadd (%p13009_p4), %s349_s12, 4294959104  ;;  %p13010_p6 = scmp.eq.s32.totalorder %s10039_s17, 0 }
  0x4e   : > { %9930 = dma.done.wait (%p13010_p6), [#allocation7], 4608   ;;  %p13011_p8 = pmov %p13010_p6 }
  0x4f   : > { %v9609_v0 = vld [vmem:[%s12969_s1 + $0x78] sm:$0xff]   ;;  %v9611_v2 = vld [vmem:[%s12969_s1 + $0x70] sm:$0xff]   ;;  %v9613_v4 = vld [vmem:[%s12969_s1 + $0x68] sm:$0xff]   ;;  %vm394_vm0 = vcmask 519168   ;;  %vm397_vm1 = vcmask 516096   ;;  %vm1943_vm2 = vcmask 523264  }
  0x50   : > { %9932 = vsyncadd (%p13011_p8), [#allocation7], 4294962688  ;;  %v9610_v1 = vld [vmem:[%s12969_s1 + $0x38] sm:$0xff]   ;;  %8753 = vmatprep.subr.bf16.mxu0 %v9609_v0  ;;  %9529 = vmatprep.subr.bf16.mxu1 %v9609_v0  ;;  %v9612_v3 = vld [vmem:[%s12969_s1 + $0x30] sm:$0xff]   ;;  %vm1691_vm3 = vsmask.f32 3328 }
  0x51   : > { %8754 = vmatpush3.bf16.msra.mxu0 %v9610_v1  ;;  %9537 = vmatpush3.bf16.msra.mxu1 %v9610_v1  ;;  %v9614_v5 = vld [vmem:[%s12969_s1 + $0x28] sm:$0xff]   ;;  %v9615_v6 = vld [vmem:[%s12969_s1 + $0x60] sm:$0xff]   ;;  %v9617_v8 = vld [vmem:[%s12969_s1 + $0x58] sm:$0xff]   ;;  %vm1692_vm4 = vsmask.f32 7440  ;;  %vm2274_vm6 = vcmask 1042432  }
  0x52   : > { %8755 = vmatprep.subr.bf16.mxu0 %v9611_v2  ;;  %9530 = vmatprep.subr.bf16.mxu1 %v9611_v2  ;;  %v9616_v7 = vld [vmem:[%s12969_s1 + $0x20] sm:$0xff]   ;;  %v9618_v9 = vld [vmem:[%s12969_s1 + $0x18] sm:$0xff]   ;;  %v9619_v10 = vld [vmem:[%s12969_s1 + $0x50] sm:$0xff]   ;;  %vm2275_vm7 = vcmask 1046532   ;;  %vm998_vm9 = vsmask.f32 7938 }
  0x53   : > { %v451_v11 = vld [vmem:[%s10140_s24 + $0x8] sm:$0xff]  ;;  %v453_v12 = vld [vmem:[%s10140_s24 + $0x18] sm:$0xff]  ;;  %v9621_v18 = vld [vmem:[%s12969_s1 + $0x48] sm:$0xff]   ;;  %vm833_vm10 = vsmask.f32 256  ;;  %s12394_s29 = scalar_lea.vmem [#allocation8], %s8103_s2 }
  0x54   : > { %v483_v13 = vpack.c.bf16 %v453_v12, %v451_v11  ;;  %v467_v14 = vld [vmem:[%s10140_s24 + $0x88] sm:$0xff]  ;;  %v469_v15 = vld [vmem:[%s10140_s24 + $0x98] sm:$0xff]  ;;  %v9622_v19 = vld [vmem:[%s12969_s1 + $0x8] sm:$0xff]   ;;  %vm834_vm11 = vsmask.f32 4368  ;;  %s8752_s2 = sshll.u32 %s10039_s17, 13 }
  0x55   : > { %8756 = vmatpush3.bf16.msra.mxu0 %v9612_v3  ;;  %9538 = vmatpush3.bf16.msra.mxu1 %v9612_v3  ;;  %v491_v16 = vpack.c.bf16 %v469_v15, %v467_v14  ;;  %v9620_v17 = vld [vmem:[%s12969_s1 + $0x10] sm:$0xff]   ;;  %v9623_v20 = vld [vmem:[%s12969_s1 + $0x40] sm:$0xff]   ;;  %v450_v22 = vld [vmem:[%s10140_s24] sm:$0xff]  ;;  %s8012_s28 = sshll.u32 %s12394_s29, 4  ;;  %s12921_s13 = scalar_lea.hbm %s12978_s10, %s8752_s2  ;;  %s12923_s28 = int_to_ptr.vmem [resolvable:$true] %s8012_s28 }
  0x56   : > { %8757 = vmatprep.subr.bf16.mxu0 %v9613_v4  ;;  %9531 = vmatprep.subr.bf16.mxu1 %v9613_v4  ;;  %v9624_v21 = vld [vmem:[%s12969_s1] sm:$0xff]   ;;  %v452_v23 = vld [vmem:[%s10140_s24 + $0x10] sm:$0xff]  ;;  %v466_v24 = vld [vmem:[%s10140_s24 + $0x80] sm:$0xff]  ;;  %s9883_s30 = scalar_lea.vmem %s12923_s28, 8192  ;;  %p13077_p11 = scmp.ne.s32.totalorder %s13006_s22, 0 }
  0x57   : > { %658 = vmatprep.mubr.bf16.mxu0 %v483_v13  ;;  %690 = vmatprep.mubr.bf16.mxu1 %v491_v16  ;;  %v468_v25 = vld [vmem:[%s10140_s24 + $0x90] sm:$0xff]  ;;  %v455_v26 = vld [vmem:[%s10140_s24 + $0x28] sm:$0xff]  ;;  %v457_v27 = vld [vmem:[%s10140_s24 + $0x38] sm:$0xff]  ;;  %v482_v31 = vpack.c.bf16 %v452_v23, %v450_v22  ;;  %p9884_p3 = scmp.ne.s32.totalorder %s12923_s28, %s9883_s30  ;;  %s9960_s17 = smov [#allocation8]  }
  0x58   : > { %v471_v28 = vld [vmem:[%s10140_s24 + $0xa8] sm:$0xff]  ;;  %v473_v29 = vld [vmem:[%s10140_s24 + $0xb8] sm:$0xff]  ;;  %v9625_v30 = vld [vmem:[%s12969_s1 + $0x78] sm:$0xff]   ;;  %v490_v32 = vpack.c.bf16 %v468_v25, %v466_v24  ;;  %v485_v33 = vpack.c.bf16 %v457_v27, %v455_v26  ;;  %s9887_s25 = sshll.u32 %s9960_s17, 4  ;;  %s9888_s25 = int_to_ptr.vmem [resolvable:$false] %s9887_s25 }
  0x59   : > { %8758 = vmatpush3.bf16.msra.mxu0 %v9614_v5  ;;  %9539 = vmatpush3.bf16.msra.mxu1 %v9614_v5  ;;  %v493_v34 = vpack.c.bf16 %v473_v29, %v471_v28  ;;  %v9626_v35 = vld [vmem:[%s12969_s1 + $0x38] sm:$0xff]   ;;  %v456_v37 = vld [vmem:[%s10140_s24 + $0x30] sm:$0xff]  ;;  %v9627_v40 = vld [vmem:[%s12969_s1 + $0x70] sm:$0xff]   ;;  %p9885_p7 = pnand %p9884_p3, %p13077_p11  ;;  %s9889_s12 = scalar_lea.vmem %s9888_s25, 16384 }
  0x5a   : > { %8759 = vmatprep.subr.bf16.mxu0 %v9615_v6  ;;  %9532 = vmatprep.subr.bf16.mxu1 %v9615_v6  ;;  %v454_v36 = vld [vmem:[%s10140_s24 + $0x20] sm:$0xff]  ;;  %v472_v39 = vld [vmem:[%s10140_s24 + $0xb0] sm:$0xff]  ;;  %v459_v41 = vld [vmem:[%s10140_s24 + $0x48] sm:$0xff]  ;;  %p9890_p10 = scmp.lt.s32.totalorder %s12923_s28, %s9888_s25  ;;  %p9891_p2 = scmp.lt.s32.totalorder %s9889_s12, %s9883_s30 }
  0x5b   : > { %v470_v38 = vld [vmem:[%s10140_s24 + $0xa0] sm:$0xff]  ;;  %v461_v42 = vld [vmem:[%s10140_s24 + $0x58] sm:$0xff]  ;;  %v475_v43 = vld [vmem:[%s10140_s24 + $0xc8] sm:$0xff]  ;;  %v484_v47 = vpack.c.bf16 %v456_v37, %v454_v36  ;;  %p9886_p12 = pneg %p9885_p7 }
  0x5c   : > { %v477_v44 = vld [vmem:[%s10140_s24 + $0xd8] sm:$0xff]  ;;  %v9629_v46 = vld [vmem:[%s12969_s1 + $0x68] sm:$0xff]   ;;  %v492_v48 = vpack.c.bf16 %v472_v39, %v470_v38  ;;  %v487_v49 = vpack.c.bf16 %v461_v42, %v459_v41  ;;  %v458_v52 = vld [vmem:[%s10140_s24 + $0x40] sm:$0xff]  ;;  %p9892_p13 = por %p9891_p2, %p9890_p10 }
  0x5d   : > { %8760 = vmatpush3.bf16.msra.mxu0 %v9616_v7  ;;  %9540 = vmatpush3.bf16.msra.mxu1 %v9616_v7  ;;  %v9628_v45 = vld [vmem:[%s12969_s1 + $0x30] sm:$0xff]   ;;  %v495_v50 = vpack.c.bf16 %v477_v44, %v475_v43  ;;  %v9630_v51 = vld [vmem:[%s12969_s1 + $0x28] sm:$0xff]   ;;  %v9631_v53 = vld [vmem:[%s12969_s1 + $0x60] sm:$0xff]  }
  0x5e   : > { %8761 = vmatprep.subr.bf16.mxu0 %v9617_v8  ;;  %9533 = vmatprep.subr.bf16.mxu1 %v9617_v8  ;;  %v460_v54 = vld [vmem:[%s10140_s24 + $0x50] sm:$0xff]  ;;  %v474_v55 = vld [vmem:[%s10140_s24 + $0xc0] sm:$0xff]  ;;  %v463_v57 = vld [vmem:[%s10140_s24 + $0x68] sm:$0xff]  ;;  %p9893_p0 = pnand %p9892_p13, %p9886_p12 }
  0x5f   : > { %v476_v56 = vld [vmem:[%s10140_s24 + $0xd0] sm:$0xff]  ;;  %v465_v58 = vld [vmem:[%s10140_s24 + $0x78] sm:$0xff]  ;;  %v479_v59 = vld [vmem:[%s10140_s24 + $0xe8] sm:$0xff]  ;;  %v486_v63 = vpack.c.bf16 %v460_v54, %v458_v52  ;;  %v12987_v52 = vmov 0  }
  0x60   : > { %v481_v60 = vld [vmem:[%s10140_s24 + $0xf8] sm:$0xff]  ;;  %v9632_v61 = vld [vmem:[%s12969_s1 + $0x20] sm:$0xff]   ;;  %v9633_v62 = vld [vmem:[%s12969_s1 + $0x58] sm:$0xff]   ;;  %v494_v0 = vpack.c.bf16 %v476_v56, %v474_v55  ;;  %v489_v1 = vpack.c.bf16 %v465_v58, %v463_v57  ;;  %399 = vst.msk [vmem:[#allocation2 + $0xc] sm:$0xf] %vm394_vm0, %v12987_v52 }
  0x61   : > { %8762 = vmatpush3.bf16.msra.mxu0 %v9618_v9  ;;  %9541 = vmatpush3.bf16.msra.mxu1 %v9618_v9  ;;  %v497_v2 = vpack.c.bf16 %v481_v60, %v479_v59  ;;  %v9634_v3 = vld [vmem:[%s12969_s1 + $0x18] sm:$0xff]   ;;  %v464_v5 = vld [vmem:[%s10140_s24 + $0x70] sm:$0xff]  ;;  %v9635_v8 = vld [vmem:[%s12969_s1 + $0x50] sm:$0xff]   ;;  %395 = vst.msk [vmem:[#allocation2] sm:$0xf] %vm394_vm0, %v12987_v52 }
  0x62   : > { %8763 = vmatprep.subr.bf16.mxu0 %v9619_v10  ;;  %9534 = vmatprep.subr.bf16.mxu1 %v9619_v10  ;;  %v462_v4 = vld [vmem:[%s10140_s24 + $0x60] sm:$0xff]  ;;  %v480_v7 = vld [vmem:[%s10140_s24 + $0xf0] sm:$0xff]  ;;  %v9636_v9 = vld [vmem:[%s12969_s1 + $0x10] sm:$0xff]   ;;  %396 = vst.msk [vmem:[#allocation2 + $0x4] sm:$0xf] %vm394_vm0, %v12987_v52 }
  0x63   : > { %v478_v6 = vld [vmem:[%s10140_s24 + $0xe0] sm:$0xff]  ;;  %v8141_v10 = vld [vmem:[%s10140_s24 + $0x108] sm:$0xff]  ;;  %v8143_v11 = vld [vmem:[%s10140_s24 + $0x118] sm:$0xff]  ;;  %v488_v13 = vpack.c.bf16 %v464_v5, %v462_v4  ;;  %400 = vst.msk [vmem:[#allocation2 + $0x10] sm:$0xf] %vm394_vm0, %v12987_v52 }
  0x64   : > { %v9637_v12 = vld [vmem:[%s12969_s1 + $0x48] sm:$0xff]   ;;  %v496_v14 = vpack.c.bf16 %v480_v7, %v478_v6  ;;  %v9639_v16 = vld [vmem:[%s12969_s1 + $0x40] sm:$0xff]   ;;  %v8147_v22 = vld [vmem:[%s10140_s24 + $0x138] sm:$0xff]  ;;  %402 = vst.msk [vmem:[#allocation2 + $0x18] sm:$0xf] %vm394_vm0, %v12987_v52 }
  0x65   : > { %8764 = vmatpush3.bf16.msra.mxu0 %v9620_v17  ;;  %9542 = vmatpush3.bf16.msra.mxu1 %v9620_v17  ;;  %v9638_v15 = vld [vmem:[%s12969_s1 + $0x8] sm:$0xff]   ;;  %v1092_v17 = vpack.c.bf16 %v8143_v11, %v8141_v10  ;;  %v8144_v25 = vld [vmem:[%s10140_s24 + $0x120] sm:$0xff]  ;;  %v8149_v27 = vld [vmem:[%s10140_s24 + $0x148] sm:$0xff]  ;;  %403 = vst.msk [vmem:[#allocation2 + $0x1c] sm:$0xf] %vm394_vm0, %v12987_v52 }
  0x66   : > { %8765 = vmatprep.subr.bf16.mxu0 %v9621_v18  ;;  %9535 = vmatprep.subr.bf16.mxu1 %v9621_v18  ;;  %v9640_v18 = vld [vmem:[%s12969_s1] sm:$0xff]   ;;  %v8146_v26 = vld [vmem:[%s10140_s24 + $0x130] sm:$0xff]  ;;  %v8151_v28 = vld [vmem:[%s10140_s24 + $0x158] sm:$0xff]  ;;  %405 = vst.msk [vmem:[#allocation2 + $0x24] sm:$0xf] %vm394_vm0, %v12987_v52 }
  0x67   : > { %v1093_v29 = vpack.c.bf16 %v8146_v26, %v8144_v25  ;;  %v8152_v37 = vld [vmem:[%s10140_s24 + $0x160] sm:$0xff]  ;;  %v8154_v38 = vld [vmem:[%s10140_s24 + $0x170] sm:$0xff]  ;;  %v8157_v39 = vld [vmem:[%s10140_s24 + $0x188] sm:$0xff]  ;;  %406 = vst.msk [vmem:[#allocation2 + $0x28] sm:$0xf] %vm394_vm0, %v12987_v52 }
  0x68   : > { %v1097_v41 = vpack.c.bf16 %v8154_v38, %v8152_v37  ;;  %v8156_v43 = vld [vmem:[%s10140_s24 + $0x180] sm:$0xff]  ;;  %v8158_v44 = vld [vmem:[%s10140_s24 + $0x190] sm:$0xff]  ;;  %408 = vst.msk [vmem:[#allocation2 + $0x30] sm:$0xf] %vm394_vm0, %v12987_v52  ;;  %409 = vst.msk [vmem:[#allocation2 + $0x34] sm:$0xf] %vm394_vm0, %v12987_v52 }
  0x69   : > { %8766 = vmatpush3.bf16.msra.mxu0 %v9622_v19  ;;  %9543 = vmatpush3.bf16.msra.mxu1 %v9622_v19  ;;  %v8140_v19 = vld [vmem:[%s10140_s24 + $0x100] sm:$0xff]  ;;  %411 = vst.msk [vmem:[#allocation2 + $0x3c] sm:$0xf] %vm394_vm0, %v12987_v52  ;;  %412 = vst.msk [vmem:[#allocation2 + $0x40] sm:$0xf] %vm394_vm0, %v12987_v52  ;;  %v8166_v57 = vld [vmem:[%s10140_s24 + $0x1d0] sm:$0xff] }
  0x6a   : > { %8767 = vmatprep.subr.bf16.mxu0 %v9623_v20  ;;  %9536 = vmatprep.subr.bf16.mxu1 %v9623_v20  ;;  %v8142_v20 = vld [vmem:[%s10140_s24 + $0x110] sm:$0xff]  ;;  %414 = vst.msk [vmem:[#allocation2 + $0x48] sm:$0xf] %vm394_vm0, %v12987_v52  ;;  %415 = vst.msk [vmem:[#allocation2 + $0x4c] sm:$0xf] %vm394_vm0, %v12987_v52  ;;  %v8164_v56 = vld [vmem:[%s10140_s24 + $0x1c0] sm:$0xff] }
  0x6b   : > { %v1091_v23 = vpack.c.bf16 %v8142_v20, %v8140_v19  ;;  %417 = vst.msk [vmem:[#allocation2 + $0x54] sm:$0xf] %vm394_vm0, %v12987_v52  ;;  %418 = vst.msk [vmem:[#allocation2 + $0x58] sm:$0xf] %vm394_vm0, %v12987_v52  ;;  %v1103_v58 = vpack.c.bf16 %v8166_v57, %v8164_v56  ;;  %v9641_v59 = vld [vmem:[#allocation6 + $0x18] sm:$0xff]   ;;  %v9643_v60 = vld [vmem:[#allocation6 + $0x10] sm:$0xff]  }
  0x6c   : > { %420 = vst.msk [vmem:[#allocation2 + $0x60] sm:$0xf] %vm394_vm0, %v12987_v52  ;;  %421 = vst.msk [vmem:[#allocation2 + $0x64] sm:$0xf] %vm394_vm0, %v12987_v52  ;;  %v9644_v4 = vld [vmem:[#allocation6 + $0x8] sm:$0xff]   ;;  %v9646_v5 = vld [vmem:[#allocation6] sm:$0xff]  }
  0x6d   : > { %8768 = vmatpush3.bf16.msra.mxu0 %v9624_v21  ;;  %9544 = vmatpush3.bf16.msra.mxu1 %v9624_v21  ;;  %v8145_v21 = vld [vmem:[%s10140_s24 + $0x128] sm:$0xff]  ;;  %423 = vst.msk [vmem:[#allocation2 + $0x6c] sm:$0xf] %vm394_vm0, %v12987_v52  ;;  %424 = vst.msk [vmem:[#allocation2 + $0x70] sm:$0xf] %vm394_vm0, %v12987_v52  ;;  %v9645_v6 = vld [vmem:[#allocation6 + $0x30] sm:$0xff]  }
  0x6e   : > { %8817 = vmatprep.subr.bf16.mxu1 %v9625_v30  ;;  %v1094_v24 = vpack.c.bf16 %v8147_v22, %v8145_v21  ;;  %v1096_v30 = vpack.c.bf16 %v8151_v28, %v8149_v27  ;;  %426 = vst.msk [vmem:[#allocation2 + $0x78] sm:$0xf] %vm394_vm0, %v12987_v52  ;;  %427 = vst.msk [vmem:[#allocation2 + $0x7c] sm:$0xf] %vm394_vm0, %v12987_v52  ;;  %v1659_v7 = vld [vmem:[#allocation2] sm:$0xf] }
  0x6f   : > { %429 = vst.msk [vmem:[#allocation2 + $0x84] sm:$0xf] %vm394_vm0, %v12987_v52  ;;  %430 = vst.msk [vmem:[#allocation2 + $0x88] sm:$0xf] %vm394_vm0, %v12987_v52  ;;  %v1695_v10 = vshrl.u32 %v1659_v7, 16  ;;  %v1698_v11 = vshll.u32 %v1659_v7, 16 }
  0x70   : > { %659 = vmatmul.mubr.bf16.vlgmr.msra.gmra.mxu0 %v482_v31  ;;  %691 = vmatmul.mubr.bf16.vlgmr.msra.gmra.mxu1 %v490_v32  ;;  %v8148_v31 = vld [vmem:[%s10140_s24 + $0x140] sm:$0xff]  ;;  %v8150_v32 = vld [vmem:[%s10140_s24 + $0x150] sm:$0xff]  ;;  %432 = vst.msk [vmem:[#allocation2 + $0x90] sm:$0xf] %vm394_vm0, %v12987_v52  ;;  %433 = vst.msk [vmem:[#allocation2 + $0x94] sm:$0xf] %vm394_vm0, %v12987_v52 }
  0x71   : > { %666 = vmatprep.mubr.bf16.mxu0 %v485_v33  ;;  %698 = vmatprep.mubr.bf16.mxu1 %v493_v34  ;;  %v8153_v33 = vld [vmem:[%s10140_s24 + $0x168] sm:$0xff]  ;;  %v8155_v34 = vld [vmem:[%s10140_s24 + $0x178] sm:$0xff]  ;;  %435 = vst.msk [vmem:[#allocation2 + $0x9c] sm:$0xf] %vm394_vm0, %v12987_v52  ;;  %436 = vst.msk [vmem:[#allocation2 + $0xa0] sm:$0xf] %vm394_vm0, %v12987_v52 }
  0x72   : > { %8818 = vmatpush3.bf16.msra.mxu1 %v9626_v35  ;;  %v1095_v35 = vpack.c.bf16 %v8150_v32, %v8148_v31  ;;  %v1098_v36 = vpack.c.bf16 %v8155_v34, %v8153_v33  ;;  %438 = vst.msk [vmem:[#allocation2 + $0xa8] sm:$0xf] %vm394_vm0, %v12987_v52  ;;  %439 = vst.msk [vmem:[#allocation2 + $0xac] sm:$0xf] %vm394_vm0, %v12987_v52  ;;  %v10428_v31 = vld [vmem:[#allocation6 + $0x58] sm:$0xff]   ;;  %v13014_v38 = vmov 0 }
  0x73   : > { %8819 = vmatprep.subr.bf16.mxu1 %v9627_v40  ;;  %v8159_v40 = vld [vmem:[%s10140_s24 + $0x198] sm:$0xff]  ;;  %441 = vst.msk [vmem:[#allocation2 + $0xb4] sm:$0xf] %vm394_vm0, %v12987_v52  ;;  %442 = vst.msk [vmem:[#allocation2 + $0xb8] sm:$0xf] %vm394_vm0, %v12987_v52  ;;  %v9767_v27 = vld [vmem:[#allocation6 + $0x100] sm:$0xff]  }
  0x74   : > { %v1100_v42 = vpack.c.bf16 %v8159_v40, %v8157_v39  ;;  %444 = vst.msk [vmem:[#allocation2 + $0xc0] sm:$0xf] %vm394_vm0, %v12987_v52  ;;  %445 = vst.msk [vmem:[#allocation2 + $0xc4] sm:$0xf] %vm394_vm0, %v12987_v52  ;;  %v10431_v32 = vld [vmem:[#allocation6 + $0x78] sm:$0xff]  }
  0x75   : > { %447 = vst.msk [vmem:[#allocation2 + $0xcc] sm:$0xf] %vm394_vm0, %v12987_v52  ;;  %448 = vst.msk [vmem:[#allocation2 + $0xd0] sm:$0xf] %vm394_vm0, %v12987_v52 }
  0x76   : > { %8820 = vmatpush3.bf16.msra.mxu1 %v9628_v45  ;;  %v8161_v45 = vld [vmem:[%s10140_s24 + $0x1a8] sm:$0xff]  ;;  %401 = vst.msk [vmem:[#allocation2 + $0x14] sm:$0x1] %vm397_vm1, %v12987_v52  ;;  %398 = vst.msk [vmem:[#allocation2 + $0x8] sm:$0x1] %vm397_vm1, %v12987_v52 }
  0x77   : > { %8821 = vmatprep.subr.bf16.mxu1 %v9629_v46  ;;  %v8163_v46 = vld [vmem:[%s10140_s24 + $0x1b8] sm:$0xff]  ;;  %404 = vst.msk [vmem:[#allocation2 + $0x20] sm:$0x1] %vm397_vm1, %v12987_v52  ;;  %407 = vst.msk [vmem:[#allocation2 + $0x2c] sm:$0x1] %vm397_vm1, %v12987_v52 }
  0x78   : > { %667 = vmatmul.mubr.bf16.gmra.mxu0 %v484_v47  ;;  %699 = vmatmul.mubr.bf16.gmra.mxu1 %v492_v48  ;;  %v1099_v47 = vpack.c.bf16 %v8158_v44, %v8156_v43  ;;  %v1102_v48 = vpack.c.bf16 %v8163_v46, %v8161_v45  ;;  %410 = vst.msk [vmem:[#allocation2 + $0x38] sm:$0x1] %vm397_vm1, %v12987_v52  ;;  %413 = vst.msk [vmem:[#allocation2 + $0x44] sm:$0x1] %vm397_vm1, %v12987_v52  ;;  %v10451_v45 = vld [vmem:[%s12972_s4] ss:$0 sm:$0xff] }
  0x79   : > { %674 = vmatprep.mubr.bf16.mxu0 %v487_v49  ;;  %706 = vmatprep.mubr.bf16.mxu1 %v495_v50  ;;  %v8160_v49 = vld [vmem:[%s10140_s24 + $0x1a0] sm:$0xff]  ;;  %v8162_v50 = vld [vmem:[%s10140_s24 + $0x1b0] sm:$0xff]  ;;  %416 = vst.msk [vmem:[#allocation2 + $0x50] sm:$0x1] %vm397_vm1, %v12987_v52  ;;  %419 = vst.msk [vmem:[#allocation2 + $0x5c] sm:$0x1] %vm397_vm1, %v12987_v52 }
  0x7a   : > { %8822 = vmatpush3.bf16.msra.mxu1 %v9630_v51  ;;  %v8165_v51 = vld [vmem:[%s10140_s24 + $0x1c8] sm:$0xff]  ;;  %v1101_v54 = vpack.c.bf16 %v8162_v50, %v8160_v49  ;;  %422 = vst.msk [vmem:[#allocation2 + $0x68] sm:$0x1] %vm397_vm1, %v12987_v52  ;;  %425 = vst.msk [vmem:[#allocation2 + $0x74] sm:$0x1] %vm397_vm1, %v12987_v52 }
  0x7b   : > { %8823 = vmatprep.subr.bf16.mxu1 %v9631_v53  ;;  %v8167_v53 = vld [vmem:[%s10140_s24 + $0x1d8] sm:$0xff]  ;;  %428 = vst.msk [vmem:[#allocation2 + $0x80] sm:$0x1] %vm397_vm1, %v12987_v52  ;;  %431 = vst.msk [vmem:[#allocation2 + $0x8c] sm:$0x1] %vm397_vm1, %v12987_v52 }
  0x7c   : > { %v1104_v55 = vpack.c.bf16 %v8167_v53, %v8165_v51  ;;  %434 = vst.msk [vmem:[#allocation2 + $0x98] sm:$0x1] %vm397_vm1, %v12987_v52  ;;  %437 = vst.msk [vmem:[#allocation2 + $0xa4] sm:$0x1] %vm397_vm1, %v12987_v52  ;;  %v10456_v49 = vld [vmem:[%s12973_s5] ss:$0 sm:$0xff] }
  0x7d   : > { %440 = vst.msk [vmem:[#allocation2 + $0xb0] sm:$0x1] %vm397_vm1, %v12987_v52  ;;  %443 = vst.msk [vmem:[#allocation2 + $0xbc] sm:$0x1] %vm397_vm1, %v12987_v52  ;;  %v1683_v19 = vld [vmem:[#allocation2 + $0x8] sm:$0x1] }
  0x7e   : > { %8824 = vmatpush3.bf16.msra.mxu1 %v9632_v61  ;;  %446 = vst.msk [vmem:[#allocation2 + $0xc8] sm:$0x1] %vm397_vm1, %v12987_v52  ;;  %449 = vst.msk [vmem:[#allocation2 + $0xd4] sm:$0x1] %vm397_vm1, %v12987_v52  ;;  %v8169_v61 = vld [vmem:[%s10140_s24 + $0x1e8] sm:$0xff]  ;;  %v1714_v22 = vshll.u32 %v1683_v19, 16 }
  0x7f   : > { %8825 = vmatprep.subr.bf16.mxu1 %v9633_v62  ;;  %v8171_v62 = vld [vmem:[%s10140_s24 + $0x1f8] sm:$0xff]  ;;  %vm10419_vm5 = vmor %vm1691_vm3, %vm1692_vm4  ;;  %v2282_v34 = vrot.slane %v1683_v19, 5 }
  0x80   : > { %675 = vmatmul.mubr.bf16.gmra.mxu0 %v486_v63  ;;  %707 = vmatmul.mubr.bf16.gmra.mxu1 %v494_v0  ;;  %v1106_v63 = vpack.c.bf16 %v8171_v62, %v8169_v61  ;;  %v9642_v0 = vld [vmem:[#allocation6 + $0x38] sm:$0xff]   ;;  %v1716_v26 = vrot.slane %v1714_v22, 5  ;;  %vm10434_vm8 = vmor %vm2274_vm6, %vm2275_vm7 }
  0x81   : > { %682 = vmatprep.mubr.bf16.mxu0 %v489_v1  ;;  %714 = vmatprep.mubr.bf16.mxu1 %v497_v2  ;;  %v8168_v1 = vld [vmem:[%s10140_s24 + $0x1e0] sm:$0xff]  ;;  %v8170_v2 = vld [vmem:[%s10140_s24 + $0x1f0] sm:$0xff]  ;;  %v13015_v38 = vsel %vm10434_vm8, 4294967295, %v13014_v38  ;;  %vm10470_vm12 = vmand %vm394_vm0, %vm998_vm9 }
  0x82   : > { %8826 = vmatpush3.bf16.msra.mxu1 %v9634_v3  ;;  %9097 = vmatprep.subr.bf16.mxu0 %v9642_v0  ;;  %v1105_v3 = vpack.c.bf16 %v8170_v2, %v8168_v1  ;;  %13016 = vst [vmem:[#allocation15_spill] sm:$0xff] %v13015_v38  ;;  %vm10480_vm13 = vmor %vm833_vm10, %vm834_vm11 }
  0x83   : > { %8827 = vmatprep.subr.bf16.mxu1 %v9635_v8  ;;  %9098 = vmatpush3.bf16.msra.mxu0 %v9642_v0  ;;  %v1660_v8 = vld [vmem:[#allocation2 + $0x4] sm:$0xf]  ;;  %vm10487_vm14 = vmand %vm397_vm1, %vm833_vm10 }
  0x84   : > { %9099 = vmatprep.subr.bf16.mxu0 %v9645_v6  ;;  %v2279_v33 = vrot.slane %v1660_v8, 5 }
  0x86   : > { %8828 = vmatpush3.bf16.msra.mxu1 %v9636_v9  ;;  %v8226_v9 = vcombine.low %v1659_v7, %v1660_v8  ;;  %v2281_v37 = vrot.slane %v2279_v33, 4 }
  0x87   : > { %8829 = vmatprep.subr.bf16.mxu1 %v9637_v12  ;;  %9100 = vmatpush3.bf16.msra.mxu0 %v9645_v6  ;;  %v1708_v12 = vshrl.u32 %v1660_v8, 16 }
  0x88   : > { %683 = vmatmul.mubr.bf16.gmra.mxu0 %v488_v13  ;;  %715 = vmatmul.mubr.bf16.gmra.mxu1 %v496_v14  ;;  %v1697_v13 = vrot.slane %v1695_v10, 4  ;;  %v1700_v14 = vrot.slane %v1698_v11, 5  ;;  %v10444_v40 = vsel %vm10434_vm8, %v2281_v37, %v2282_v34 }
  0x89   : > { %1267 = vmatprep.mubr.bf16.mxu1 %v1092_v17 }
  0x8a   : > { %8830 = vmatpush3.bf16.msra.mxu1 %v9638_v15  ;;  %v1704_v15 = vshll.u32 %v1660_v8, 16  ;;  %v1701_v20 = vor.u32 %v1700_v14, %v1697_v13 }
  0x8b   : > { %8831 = vmatprep.subr.bf16.mxu1 %v9639_v16  ;;  %v9649_v16 = vld [vmem:[#allocation6 + $0x28] sm:$0xff]  }
  0x8c   : > { %v1706_v17 = vrot.slane %v1704_v15, 5  ;;  %9101 = vmatprep.subr.bf16.mxu0 %v9649_v16 }
  0x8d   : > { %9102 = vmatpush3.bf16.msra.mxu0 %v9649_v16 }
  0x8e   : > { %8832 = vmatpush3.bf16.msra.mxu1 %v9640_v18  ;;  %v1710_v18 = vrot.slane %v1708_v12, 4 }
  0x8f   : > { %9121 = vmatprep.subr.bf16.mxu1 %v9641_v59 }
  0x90   : > { %v1711_v21 = vor.u32 %v1710_v18, %v1706_v17 }
  0x91   : > { %1268 = vmatmul.mubr.bf16.vlgmr.msra.gmra.mxu1 %v1091_v23  ;;  %v9650_v23 = vld [vmem:[#allocation6 + $0x20] sm:$0xff]  }
  0x92   : > { %1275 = vmatprep.mubr.bf16.mxu1 %v1094_v24  ;;  %9122 = vmatpush3.bf16.msra.mxu1 %v9641_v59  ;;  %v1702_v24 = vrot.slane %v1701_v20, 4  ;;  %v1712_v25 = vrot.slane %v1711_v21, 4 }
  0x93   : > { %9123 = vmatprep.subr.bf16.mxu1 %v9643_v60  ;;  %9103 = vmatprep.subr.bf16.mxu0 %v9650_v23 }
  0x94   : > { %v1707_v28 = vsel %vm10419_vm5, %v1702_v24, %v1706_v17  ;;  %9104 = vmatpush3.bf16.msra.mxu0 %v9650_v23 }
  0x95   : > { %9145 = vmatprep.subr.bf16.mxu0 %v10428_v31 }
  0x96   : > { %9124 = vmatpush3.bf16.msra.mxu1 %v9643_v60 }
  0x97   : > { %9125 = vmatprep.subr.bf16.mxu1 %v9644_v4 }
  0x99   : > { %1276 = vmatmul.mubr.bf16.gmra.mxu1 %v1093_v29  ;;  %v1717_v29 = vsel %vm10419_vm5, %v1712_v25, %v1716_v26 }
  0x9a   : > { %1283 = vmatprep.mubr.bf16.mxu1 %v1096_v30  ;;  %9126 = vmatpush3.bf16.msra.mxu1 %v9644_v4  ;;  %v8206_v30 = vcombine.low %v1707_v28, %v1717_v29  ;;  %v1000_v29 = vld [vmem:[#allocation2 + $0xc] sm:$0xf] }
  0x9b   : > { %9127 = vmatprep.subr.bf16.mxu1 %v9646_v5 }
  0x9c   : > { %9105 = vmatprep.mubr.msk.bf16.mxu0 %vm1943_vm2, %v8206_v30 }
  0x9e   : > { %9128 = vmatpush3.bf16.msra.mxu1 %v9646_v5 }
  0x9f   : > { %9169 = vmatprep.subr.bf16.mxu1 %v10431_v32 }
  0xa1   : > { %1284 = vmatmul.mubr.bf16.gmra.mxu1 %v1095_v35  ;;  %v2250_v35 = vld [vmem:[#allocation2] sm:$0xe] }
  0xa2   : > { %1291 = vmatprep.mubr.bf16.mxu1 %v1098_v36  ;;  %v8246_v36 = vrot.slane %v2250_v35, 9 }
  0xa4   : > { %v10440_v39 = vsel %vm10434_vm8, %v8246_v36, %v2279_v33 }
  0xa9   : > { %1292 = vmatmul.mubr.bf16.gmra.mxu1 %v1097_v41  ;;  %v8254_v41 = vcombine.low %v10440_v39, %v10444_v40 }
  0xaa   : > { %1299 = vmatprep.mubr.bf16.mxu1 %v1100_v42 }
  0xb1   : > { %1300 = vmatmul.mubr.bf16.gmra.mxu1 %v1099_v47 }
  0xb2   : > { %1307 = vmatprep.mubr.bf16.mxu1 %v1102_v48 }
  0xb9   : > { %1308 = vmatmul.mubr.bf16.gmra.mxu1 %v1101_v54 }
  0xba   : > { %1315 = vmatprep.mubr.bf16.mxu1 %v1104_v55 }
  0xc1   : > { %1316 = vmatmul.mubr.bf16.gmra.mxu1 %v1103_v58 }
  0xc2   : > { %1323 = vmatprep.mubr.bf16.mxu1 %v1106_v63 }
  0xc9   : > { %1324 = vmatmul.mubr.bf16.gmra.mxu1 %v1105_v3 }
  0xca   : > { %9129 = vmatprep.mubr.msk.bf16.mxu1 %vm1943_vm2, %v8226_v9 }
 0x130   : > { %v8769_v42 = vpop.f32.mrf.mxu0  ;;  %v8793_v43 = vpop.f32.mrf.mxu1 }
 0x132   : > { %v8770_v44 = vpop.f32.mrf.mxu0  ;;  %v8794_v46 = vpop.f32.mrf.mxu1 }
 0x133   : > { %v8771_v47 = vadd.f32 %v8770_v44, %v8769_v42  ;;  %v8795_v48 = vadd.f32 %v8794_v46, %v8793_v43  ;;  %v1030_v46 = vld [vmem:[#allocation2 + $0x3c] sm:$0xf] }
 0x134   : > { %v8772_v50 = vpop.f32.mrf.mxu0  ;;  %v8796_v51 = vpop.f32.mrf.mxu1 }
 0x135   : > { %v730_v53 = vmul.f32 %v8771_v47, %v10451_v45  ;;  %v738_v54 = vmul.f32 %v8795_v48, %v10451_v45 }
 0x136   : > { %v8773_v55 = vpop.f32.mrf.mxu0  ;;  %v8797_v56 = vpop.f32.mrf.mxu1 }
 0x137   : > { %v753_v57 = vadd.f32 %v10456_v49, %v730_v53  ;;  %v8774_v58 = vadd.f32 %v8773_v55, %v8772_v50  ;;  %v761_v59 = vadd.f32 %v10456_v49, %v738_v54  ;;  %v8798_v60 = vadd.f32 %v8797_v56, %v8796_v51  ;;  %v9733_v55 = vld [vmem:[%s12971_s3 + $0x30] ss:$8 sps:$4 sm:$0xff]  }
 0x138   : > { %v8775_v61 = vpop.f32.mrf.mxu0  ;;  %v8799_v62 = vpop.f32.mrf.mxu1 }
 0x139   : > { %v769_v63 = vmax.f32 %v753_v57, 0.0  ;;  %v731_v0 = vmul.f32 %v8774_v58, %v10451_v45  ;;  %v777_v1 = vmax.f32 %v761_v59, 0.0  ;;  %v739_v2 = vmul.f32 %v8798_v60, %v10451_v45  ;;  %v1006_v60 = vld [vmem:[#allocation2 + $0x14] sm:$0x1] }
 0x13a   : > { %v8776_v3 = vpop.f32.mrf.mxu0  ;;  %v8800_v4 = vpop.f32.mrf.mxu1 }
 0x13b   : > { %v8720_v5 = vpack.c.bf16 %v769_v63, %v769_v63  ;;  %v754_v6 = vadd.f32 %v10456_v49, %v731_v0  ;;  %v8728_v7 = vpack.c.bf16 %v777_v1, %v777_v1  ;;  %v8777_v8 = vadd.f32 %v8776_v3, %v8775_v61 }
 0x13c   : > { %v762_v9 = vadd.f32 %v10456_v49, %v739_v2  ;;  %v8778_v10 = vpop.f32.mrf.mxu0  ;;  %v8801_v11 = vadd.f32 %v8800_v4, %v8799_v62  ;;  %v8802_v12 = vpop.f32.mrf.mxu1 }
 0x13d   : > { %v837_v13 = vshrl.u32 %v8720_v5, 16  ;;  %v840_v14 = vshll.u32 %v8720_v5, 16  ;;  %v770_v15 = vmax.f32 %v754_v6, 0.0  ;;  %v905_v16 = vshrl.u32 %v8728_v7, 16  ;;  %v1034_v5 = vld [vmem:[#allocation2 + $0x44] sm:$0x1] }
 0x13e   : > { %v908_v17 = vshll.u32 %v8728_v7, 16  ;;  %v732_v18 = vmul.f32 %v8777_v8, %v10451_v45  ;;  %v778_v19 = vmax.f32 %v762_v9, 0.0  ;;  %v8779_v20 = vpop.f32.mrf.mxu0  ;;  %v740_v21 = vmul.f32 %v8801_v11, %v10451_v45  ;;  %v8803_v22 = vpop.f32.mrf.mxu1 }
 0x13f   : > { %v839_v23 = vrot.slane %v837_v13, 7  ;;  %v8721_v24 = vpack.c.bf16 %v770_v15, %v770_v15  ;;  %v907_v25 = vrot.slane %v905_v16, 7  ;;  %v8780_v26 = vadd.f32 %v8779_v20, %v8778_v10 }
 0x140   : > { %v755_v30 = vadd.f32 %v10456_v49, %v732_v18  ;;  %v8729_v33 = vpack.c.bf16 %v778_v19, %v778_v19  ;;  %v763_v34 = vadd.f32 %v10456_v49, %v740_v21  ;;  %v8781_v35 = vpop.f32.mrf.mxu0  ;;  %v8804_v36 = vadd.f32 %v8803_v22, %v8802_v12  ;;  %v8805_v2 = vpop.f32.mrf.mxu1 }
 0x141   : > { %v842_v37 = vor.u32 %v840_v14, %v839_v23  ;;  %v843_v42 = vrot.slane %v839_v23, 4  ;;  %v845_v43 = vshrl.u32 %v8721_v24, 16  ;;  %v848_v44 = vshll.u32 %v8721_v24, 16  ;;  %v1009_v23 = vld [vmem:[#allocation2 + $0x18] sm:$0xf] }
 0x142   : > { %v910_v47 = vor.u32 %v908_v17, %v907_v25  ;;  %v911_v48 = vrot.slane %v907_v25, 4  ;;  %v771_v50 = vmax.f32 %v755_v30, 0.0  ;;  %v913_v51 = vshrl.u32 %v8729_v33, 16  ;;  %v8782_v53 = vpop.f32.mrf.mxu0  ;;  %v8806_v21 = vpop.f32.mrf.mxu1 }
 0x143   : > { %v1001_v54 = vsel %vm10470_vm12, %v842_v37, %v1000_v29  ;;  %v847_v56 = vrot.slane %v845_v43, 7  ;;  %v916_v57 = vshll.u32 %v8729_v33, 16  ;;  %v733_v58 = vmul.f32 %v8780_v26, %v10451_v45 }
 0x144   : > { %1002 = vst [vmem:[#allocation2 + $0xc] sm:$0xf] %v1001_v54  ;;  %v1031_v61 = vsel %vm10470_vm12, %v910_v47, %v1030_v46  ;;  %v8722_v62 = vpack.c.bf16 %v771_v50, %v771_v50  ;;  %v915_v63 = vrot.slane %v913_v51, 7  ;;  %v779_v0 = vmax.f32 %v763_v34, 0.0  ;;  %v8784_v1 = vpop.f32.mrf.mxu0 }
 0x145   : > { %v850_v3 = vor.u32 %v848_v44, %v847_v56  ;;  %v852_v4 = vrot.slane %v847_v56, 4  ;;  %1032 = vst [vmem:[#allocation2 + $0x3c] sm:$0xf] %v1031_v61  ;;  %v756_v6 = vadd.f32 %v10456_v49, %v733_v58  ;;  %v8783_v7 = vadd.f32 %v8782_v53, %v8781_v35  ;;  %v1013_v61 = vld [vmem:[#allocation2 + $0x20] sm:$0x1] }
 0x146   : > { %v854_v8 = vshrl.u32 %v8722_v62, 16  ;;  %v857_v9 = vshll.u32 %v8722_v62, 16  ;;  %v918_v10 = vor.u32 %v916_v57, %v915_v63  ;;  %v920_v11 = vrot.slane %v915_v63, 4  ;;  %v8785_v12 = vpop.f32.mrf.mxu0 }
 0x147   : > { %v851_v13 = vsel %vm10480_vm13, %v843_v42, %v850_v3  ;;  %v1007_v14 = vsel %vm10487_vm14, %v852_v4, %v1006_v60  ;;  %v772_v15 = vmax.f32 %v756_v6, 0.0  ;;  %v8730_v16 = vpack.c.bf16 %v779_v0, %v779_v0 }
 0x148   : > { %1003 = vst.msk [vmem:[#allocation2 + $0x10] sm:$0xf] %vm394_vm0, %v851_v13  ;;  %1008 = vst [vmem:[#allocation2 + $0x14] sm:$0x1] %v1007_v14  ;;  %v856_v17 = vrot.slane %v854_v8, 7  ;;  %v919_v18 = vsel %vm10480_vm13, %v911_v48, %v918_v10  ;;  %v1035_v19 = vsel %vm10487_vm14, %v920_v11, %v1034_v5  ;;  %v734_v20 = vmul.f32 %v8783_v7, %v10451_v45  ;;  %v8787_v22 = vpop.f32.mrf.mxu0 }
 0x149   : > { %1033 = vst.msk [vmem:[#allocation2 + $0x40] sm:$0xf] %vm394_vm0, %v919_v18  ;;  %1036 = vst [vmem:[#allocation2 + $0x44] sm:$0x1] %v1035_v19  ;;  %v8723_v24 = vpack.c.bf16 %v772_v15, %v772_v15  ;;  %v922_v25 = vshrl.u32 %v8730_v16, 16  ;;  %v925_v26 = vshll.u32 %v8730_v16, 16  ;;  %v741_v29 = vmul.f32 %v8804_v36, %v10451_v45  ;;  %v8808_v36 = vpop.f32.mrf.mxu1 }
 0x14a   : > { %v859_v30 = vor.u32 %v857_v9, %v856_v17  ;;  %v860_v33 = vrot.slane %v856_v17, 4  ;;  %v757_v34 = vadd.f32 %v10456_v49, %v734_v20  ;;  %v8786_v35 = vadd.f32 %v8785_v12, %v8784_v1  ;;  %v8788_v37 = vpop.f32.mrf.mxu0  ;;  %v1037_v48 = vld [vmem:[#allocation2 + $0x48] sm:$0xf] }
 0x14b   : > { %v862_v42 = vshrl.u32 %v8723_v24, 16  ;;  %v865_v43 = vshll.u32 %v8723_v24, 16  ;;  %v924_v44 = vrot.slane %v922_v25, 7  ;;  %v764_v46 = vadd.f32 %v10456_v49, %v741_v29  ;;  %v8809_v10 = vpop.f32.mrf.mxu1  ;;  %v10516_v12 = vld [vmem:[#allocation2 + $0xc] sm:$0xf] }
 0x14c   : > { %v1010_v47 = vsel %vm10470_vm12, %v859_v30, %v1009_v23  ;;  %v773_v50 = vmax.f32 %v757_v34, 0.0  ;;  %v735_v51 = vmul.f32 %v8786_v35, %v10451_v45  ;;  %v8807_v53 = vadd.f32 %v8806_v21, %v8805_v2  ;;  %v8790_v54 = vpop.f32.mrf.mxu0  ;;  %v1016_v21 = vld [vmem:[#allocation2 + $0x24] sm:$0xf]  ;;  %v1041_v30 = vld [vmem:[#allocation2 + $0x50] sm:$0x1] }
 0x14d   : > { %1011 = vst [vmem:[#allocation2 + $0x18] sm:$0xf] %v1010_v47  ;;  %v864_v56 = vrot.slane %v862_v42, 7  ;;  %v927_v57 = vor.u32 %v925_v26, %v924_v44  ;;  %v928_v58 = vrot.slane %v924_v44, 4  ;;  %v780_v60 = vmax.f32 %v764_v46, 0.0 }
 0x14e   : > { %v8724_v62 = vpack.c.bf16 %v773_v50, %v773_v50  ;;  %v758_v63 = vadd.f32 %v10456_v49, %v735_v51  ;;  %v742_v0 = vmul.f32 %v8807_v53, %v10451_v45  ;;  %v8789_v1 = vadd.f32 %v8788_v37, %v8787_v22  ;;  %v8791_v11 = vpop.f32.mrf.mxu0  ;;  %v1020_v53 = vld [vmem:[#allocation2 + $0x2c] sm:$0x1] }
 0x14f   : > { %v867_v3 = vor.u32 %v865_v43, %v864_v56  ;;  %v869_v4 = vrot.slane %v864_v56, 4  ;;  %v1038_v5 = vsel %vm10470_vm12, %v927_v57, %v1037_v48  ;;  %v8731_v2 = vpack.c.bf16 %v780_v60, %v780_v60  ;;  %v1044_v60 = vld [vmem:[#allocation2 + $0x54] sm:$0xf] }
 0x150   : > { %1039 = vst [vmem:[#allocation2 + $0x48] sm:$0xf] %v1038_v5  ;;  %v871_v6 = vshrl.u32 %v8724_v62, 16  ;;  %v874_v7 = vshll.u32 %v8724_v62, 16  ;;  %v774_v8 = vmax.f32 %v758_v63, 0.0  ;;  %v765_v9 = vadd.f32 %v10456_v49, %v742_v0 }
 0x151   : > { %v868_v13 = vsel %vm10480_vm13, %v860_v33, %v867_v3  ;;  %v1014_v14 = vsel %vm10487_vm14, %v869_v4, %v1013_v61  ;;  %v930_v15 = vshrl.u32 %v8731_v2, 16  ;;  %v933_v16 = vshll.u32 %v8731_v2, 16 }
 0x152   : > { %1012 = vst.msk [vmem:[#allocation2 + $0x1c] sm:$0xf] %vm394_vm0, %v868_v13  ;;  %1015 = vst [vmem:[#allocation2 + $0x20] sm:$0x1] %v1014_v14  ;;  %v873_v17 = vrot.slane %v871_v6, 7  ;;  %v8725_v18 = vpack.c.bf16 %v774_v8, %v774_v8  ;;  %v781_v19 = vmax.f32 %v765_v9, 0.0  ;;  %v736_v20 = vmul.f32 %v8789_v1, %v10451_v45 }
 0x153   : > { %v932_v22 = vrot.slane %v930_v15, 7  ;;  %v8810_v23 = vadd.f32 %v8809_v10, %v8808_v36  ;;  %v8792_v24 = vadd.f32 %v8791_v11, %v8790_v54  ;;  %v1719_v25 = vshrl.u32 %v10516_v12, 16 }
 0x154   : > { %v876_v26 = vor.u32 %v874_v7, %v873_v17  ;;  %v877_v29 = vrot.slane %v873_v17, 4  ;;  %v879_v33 = vshrl.u32 %v8725_v18, 16  ;;  %v882_v34 = vshll.u32 %v8725_v18, 16  ;;  %v1663_v7 = vld [vmem:[#allocation2 + $0x18] sm:$0xf] }
 0x155   : > { %v935_v35 = vor.u32 %v933_v16, %v932_v22  ;;  %v937_v37 = vrot.slane %v932_v22, 4  ;;  %v8732_v42 = vpack.c.bf16 %v781_v19, %v781_v19  ;;  %v759_v43 = vadd.f32 %v10456_v49, %v736_v20  ;;  %v9659_v22 = vld [vmem:[#allocation6 + $0x70] sm:$0xff]  }
 0x156   : > { %v1017_v44 = vsel %vm10470_vm12, %v876_v26, %v1016_v21  ;;  %v881_v46 = vrot.slane %v879_v33, 7  ;;  %v743_v47 = vmul.f32 %v8810_v23, %v10451_v45  ;;  %v737_v48 = vmul.f32 %v8792_v24, %v10451_v45  ;;  %v1023_v24 = vld [vmem:[#allocation2 + $0x30] sm:$0xf] }
 0x157   : > { %1018 = vst [vmem:[#allocation2 + $0x24] sm:$0xf] %v1017_v44  ;;  %v936_v50 = vsel %vm10480_vm13, %v928_v58, %v935_v35  ;;  %v1042_v51 = vsel %vm10487_vm14, %v937_v37, %v1041_v30  ;;  %v939_v36 = vshrl.u32 %v8732_v42, 16  ;;  %v942_v54 = vshll.u32 %v8732_v42, 16  ;;  %v10539_v58 = vld [vmem:[#allocation2 + $0x10] sm:$0xf] }
 0x158   : > { %1040 = vst.msk [vmem:[#allocation2 + $0x4c] sm:$0xf] %vm394_vm0, %v936_v50  ;;  %1043 = vst [vmem:[#allocation2 + $0x50] sm:$0x1] %v1042_v51  ;;  %v884_v56 = vor.u32 %v882_v34, %v881_v46  ;;  %v886_v57 = vrot.slane %v881_v46, 4  ;;  %v775_v61 = vmax.f32 %v759_v43, 0.0  ;;  %v766_v62 = vadd.f32 %v10456_v49, %v743_v47 }
 0x159   : > { %v10536_v63 = vrot.slane %v939_v36, 7  ;;  %v760_v0 = vadd.f32 %v10456_v49, %v737_v48  ;;  %v1721_v1 = vrot.slane %v1719_v25, 4  ;;  %v1722_v3 = vshll.u32 %v10516_v12, 16  ;;  %v10550_v17 = vld [vmem:[#allocation2 + $0x1c] sm:$0xf]  ;;  %v9662_v48 = vld [vmem:[#allocation6 + $0x68] sm:$0xff]  }
 0x15a   : > { %v885_v4 = vsel %vm10480_vm13, %v877_v29, %v884_v56  ;;  %v1021_v5 = vsel %vm10487_vm14, %v886_v57, %v1020_v53  ;;  %v8726_v2 = vpack.c.bf16 %v775_v61, %v775_v61  ;;  %v782_v6 = vmax.f32 %v766_v62, 0.0  ;;  %v1048_v30 = vld [vmem:[#allocation2 + $0x5c] sm:$0x1]  ;;  %v10558_v42 = vld [vmem:[#allocation2 + $0x14] sm:$0x1] }
 0x15b   : > { %1019 = vst.msk [vmem:[#allocation2 + $0x28] sm:$0xf] %vm394_vm0, %v885_v4  ;;  %1022 = vst [vmem:[#allocation2 + $0x2c] sm:$0x1] %v1021_v5  ;;  %v944_v8 = vor.u32 %v942_v54, %v10536_v63  ;;  %v945_v9 = vrot.slane %v10536_v63, 4  ;;  %v776_v10 = vmax.f32 %v760_v0, 0.0  ;;  %v8227_v20 = vcombine.low %v10516_v12, %v10539_v58 }
 0x15c   : > { %v1724_v11 = vrot.slane %v1722_v3, 5  ;;  %v888_v13 = vshrl.u32 %v8726_v2, 16  ;;  %v891_v14 = vshll.u32 %v8726_v2, 16  ;;  %v8733_v15 = vpack.c.bf16 %v782_v6, %v782_v6 }
 0x15d   : > { %v1732_v16 = vshrl.u32 %v10539_v58, 16  ;;  %v1045_v18 = vsel %vm10470_vm12, %v944_v8, %v1044_v60  ;;  %v8727_v19 = vpack.c.bf16 %v776_v10, %v776_v10  ;;  %v1743_v21 = vshrl.u32 %v1663_v7, 16  ;;  %9130 = vmatmul.mubr.msk.bf16.vlgmr.msra.gmra.mxu1 %vm1943_vm2, %v8227_v20  ;;  %v1027_v60 = vld [vmem:[#allocation2 + $0x38] sm:$0x1]  ;;  %v10580_v10 = vld [vmem:[#allocation2 + $0x20] sm:$0x1] }
 0x15e   : > { %1046 = vst [vmem:[#allocation2 + $0x54] sm:$0xf] %v1045_v18  ;;  %v890_v23 = vrot.slane %v888_v13, 7  ;;  %v947_v25 = vshrl.u32 %v8733_v15, 16  ;;  %v950_v26 = vshll.u32 %v8733_v15, 16  ;;  %v1746_v29 = vshll.u32 %v1663_v7, 16  ;;  %9170 = vmatpush3.bf16.msra.mxu1 %v10431_v32 }
 0x15f   : > { %v896_v33 = vshrl.u32 %v8727_v19, 16  ;;  %v899_v34 = vshll.u32 %v8727_v19, 16  ;;  %v1745_v35 = vrot.slane %v1743_v21, 4  ;;  %v1756_v37 = vshrl.u32 %v10550_v17, 16  ;;  %v1665_v47 = vld [vmem:[#allocation2 + $0x24] sm:$0xf]  ;;  %9171 = vmatprep.subr.bf16.mxu1 %v9659_v22 }
 0x160   : > { %v893_v43 = vor.u32 %v891_v14, %v890_v23  ;;  %v894_v12 = vrot.slane %v890_v23, 4  ;;  %v949_v44 = vrot.slane %v947_v25, 7  ;;  %v1748_v46 = vrot.slane %v1746_v29, 5  ;;  %v9656_v29 = vld [vmem:[#allocation6 + $0x50] sm:$0xff]  }
 0x161   : > { %v898_v50 = vrot.slane %v896_v33, 7  ;;  %v8228_v51 = vcombine.low %v1663_v7, %v10550_v17  ;;  %v1725_v53 = vor.u32 %v1724_v11, %v1721_v1  ;;  %v1728_v36 = vshll.u32 %v10539_v58, 16  ;;  %v9664_v11 = vld [vmem:[#allocation6 + $0x60] sm:$0xff]  }
 0x162   : > { %v1024_v54 = vsel %vm10470_vm12, %v893_v43, %v1023_v24  ;;  %v952_v56 = vor.u32 %v950_v26, %v949_v44  ;;  %v954_v57 = vrot.slane %v949_v44, 4  ;;  %v1734_v61 = vrot.slane %v1732_v16, 4  ;;  %v10565_v62 = vld [vmem:[#allocation2 + $0x28] sm:$0xf]  ;;  %9172 = vmatpush3.bf16.msra.mxu1 %v9659_v22  ;;  %v10588_v26 = vld [vmem:[#allocation2 + $0x3c] sm:$0xf] }
 0x163   : > { %1025 = vst [vmem:[#allocation2 + $0x30] sm:$0xf] %v1024_v54  ;;  %v901_v63 = vor.u32 %v899_v34, %v898_v50  ;;  %v903_v32 = vrot.slane %v898_v50, 4  ;;  %9133 = vmatprep.mubr.msk.bf16.mxu1 %vm1943_vm2, %v8228_v51  ;;  %v1726_v0 = vrot.slane %v1725_v53, 4  ;;  %v1730_v3 = vrot.slane %v1728_v36, 5  ;;  %9173 = vmatprep.subr.bf16.mxu1 %v9662_v48 }
 0x164   : > { %v953_v1 = vsel %vm10480_vm13, %v945_v9, %v952_v56  ;;  %v1049_v4 = vsel %vm10487_vm14, %v954_v57, %v1048_v30  ;;  %v1738_v5 = vshll.u32 %v10558_v42, 16  ;;  %v1767_v2 = vshrl.u32 %v1665_v47, 16  ;;  %v10599_v54 = vld [vmem:[#allocation2 + $0x40] sm:$0xf] }
 0x165   : > { %1047 = vst.msk [vmem:[#allocation2 + $0x58] sm:$0xf] %vm394_vm0, %v953_v1  ;;  %1050 = vst [vmem:[#allocation2 + $0x5c] sm:$0x1] %v1049_v4  ;;  %v902_v6 = vsel %vm10480_vm13, %v894_v12, %v901_v63  ;;  %v1028_v7 = vsel %vm10487_vm14, %v903_v32, %v1027_v60  ;;  %v1731_v8 = vsel %vm10419_vm5, %v1726_v0, %v1730_v3  ;;  %v1770_v15 = vshll.u32 %v1665_v47, 16 }
 0x166   : > { %v1735_v9 = vor.u32 %v1734_v61, %v1730_v3  ;;  %1026 = vst.msk [vmem:[#allocation2 + $0x34] sm:$0xf] %vm394_vm0, %v902_v6  ;;  %1029 = vst [vmem:[#allocation2 + $0x38] sm:$0x1] %v1028_v7  ;;  %v1740_v13 = vrot.slane %v1738_v5, 5  ;;  %v1769_v14 = vrot.slane %v1767_v2, 4  ;;  %v8229_v19 = vcombine.low %v1665_v47, %v10565_v62  ;;  %9174 = vmatpush3.bf16.msra.mxu1 %v9662_v48  ;;  %v8811_v5 = vpop.f32.mrf.mxu1 }
 0x167   : > { %v1780_v16 = vshrl.u32 %v10565_v62, 16  ;;  %v1749_v20 = vor.u32 %v1748_v46, %v1745_v35  ;;  %v1752_v21 = vshll.u32 %v10550_v17, 16  ;;  %v1772_v22 = vrot.slane %v1770_v15, 5  ;;  %v10593_v35 = vld [vmem:[#allocation2 + $0x2c] sm:$0x1]  ;;  %9175 = vmatprep.subr.bf16.mxu1 %v9664_v11  ;;  %v9661_v15 = vld [vmem:[#allocation6 + $0x48] sm:$0xff]  }
 0x168   : > { %v1736_v18 = vrot.slane %v1735_v9, 4  ;;  %v1758_v23 = vrot.slane %v1756_v37, 4  ;;  %v1762_v24 = vshll.u32 %v10580_v10, 16  ;;  %v1776_v25 = vshll.u32 %v10565_v62, 16  ;;  %9134 = vmatmul.mubr.msk.bf16.gmra.mxu1 %vm1943_vm2, %v8229_v19  ;;  %v10595_v37 = vld [vmem:[#allocation6 + $0xb8] sm:$0xff]  }
 0x169   : > { %v1750_v33 = vrot.slane %v1749_v20, 4  ;;  %v1754_v34 = vrot.slane %v1752_v21, 5  ;;  %v1782_v43 = vrot.slane %v1780_v16, 4  ;;  %v1773_v47 = vor.u32 %v1772_v22, %v1769_v14  ;;  %v1671_v63 = vld [vmem:[#allocation2 + $0x48] sm:$0xf] }
 0x16a   : > { %v1741_v30 = vsel %vm10419_vm5, %v1736_v18, %v1740_v13  ;;  %v1764_v44 = vrot.slane %v1762_v24, 5  ;;  %v1667_v46 = vld [vmem:[#allocation2 + $0x30] sm:$0xf]  ;;  %v1778_v50 = vrot.slane %v1776_v25, 5  ;;  %v1786_v60 = vshll.u32 %v10593_v35, 16  ;;  %9176 = vmatpush3.bf16.msra.mxu1 %v9664_v11 }
 0x16b   : > { %v8207_v12 = vcombine.low %v1731_v8, %v1741_v30  ;;  %v1755_v48 = vsel %vm10419_vm5, %v1750_v33, %v1754_v34  ;;  %v1759_v51 = vor.u32 %v1758_v23, %v1754_v34  ;;  %v1791_v53 = vshrl.u32 %v1667_v46, 16  ;;  %9217 = vmatprep.subr.bf16.mxu1 %v10595_v37  ;;  %v10613_v9 = vld [vmem:[#allocation2 + $0x4c] sm:$0xf]  ;;  %v8812_v30 = vpop.f32.mrf.mxu1  ;;  %v1673_v33 = vld [vmem:[#allocation2 + $0x54] sm:$0xf] }
 0x16c   : > { %v1794_v36 = vshll.u32 %v1667_v46, 16  ;;  %v1774_v56 = vrot.slane %v1773_v47, 4  ;;  %v1783_v57 = vor.u32 %v1782_v43, %v1778_v50  ;;  %v1815_v61 = vshrl.u32 %v10588_v26, 16 }
 0x16d   : > { %9106 = vmatmul.mubr.msk.bf16.vlgmr.msra.gmra.mxu0 %vm1943_vm2, %v8207_v12  ;;  %v1760_v32 = vrot.slane %v1759_v51, 4  ;;  %v10605_v0 = vld [vmem:[#allocation2 + $0x34] sm:$0xf]  ;;  %v1793_v3 = vrot.slane %v1791_v53, 4  ;;  %v1818_v4 = vshll.u32 %v10588_v26, 16  ;;  %v1788_v11 = vrot.slane %v1786_v60, 5 }
 0x16e   : > { %9146 = vmatpush3.bf16.msra.mxu0 %v10428_v31  ;;  %v1796_v1 = vrot.slane %v1794_v36, 5  ;;  %v1804_v2 = vshrl.u32 %v10605_v0, 16  ;;  %v8230_v6 = vcombine.low %v1667_v46, %v10605_v0  ;;  %v1779_v7 = vsel %vm10419_vm5, %v1774_v56, %v1778_v50  ;;  %v10621_v21 = vld [vmem:[#allocation2 + $0x38] sm:$0x1] }
 0x16f   : > { %v1784_v8 = vrot.slane %v1783_v57, 4  ;;  %9147 = vmatprep.subr.bf16.mxu0 %v9656_v29  ;;  %v1765_v31 = vsel %vm10419_vm5, %v1760_v32, %v1764_v44  ;;  %v1817_v13 = vrot.slane %v1815_v61, 4  ;;  %v1820_v14 = vrot.slane %v1818_v4, 5  ;;  %v10629_v44 = vld [vmem:[#allocation2 + $0x58] sm:$0xf] }
 0x170   : > { %v8208_v16 = vcombine.low %v1755_v48, %v1765_v31  ;;  %9137 = vmatprep.mubr.msk.bf16.mxu1 %vm1943_vm2, %v8230_v6  ;;  %v1828_v18 = vshrl.u32 %v10599_v54, 16  ;;  %v8231_v19 = vcombine.low %v10588_v26, %v10599_v54  ;;  %v1839_v20 = vshrl.u32 %v1671_v63, 16  ;;  %v9665_v46 = vld [vmem:[#allocation6 + $0x40] sm:$0xff]   ;;  %v10638_v32 = vld [vmem:[#allocation2 + $0x44] sm:$0x1]  ;;  %v10641_v6 = vld [vmem:[#allocation6 + $0x98] sm:$0xff]  }
 0x171   : > { %v1789_v22 = vsel %vm10419_vm5, %v1784_v8, %v1788_v11  ;;  %v1842_v23 = vshll.u32 %v1671_v63, 16  ;;  %v1852_v24 = vshrl.u32 %v10613_v9, 16  ;;  %v8232_v25 = vcombine.low %v1671_v63, %v10613_v9 }
 0x172   : > { %9148 = vmatpush3.bf16.msra.mxu0 %v9656_v29  ;;  %9109 = vmatprep.mubr.msk.bf16.mxu0 %vm1943_vm2, %v8208_v16  ;;  %v8209_v34 = vcombine.low %v1779_v7, %v1789_v22  ;;  %v1841_v26 = vrot.slane %v1839_v20, 4  ;;  %v8813_v43 = vadd.f32 %v8812_v30, %v8811_v5  ;;  %v1797_v12 = vor.u32 %v1796_v1, %v1793_v3  ;;  %v10646_v16 = vld [vmem:[#allocation2 + $0x50] sm:$0x1] }
 0x173   : > { %9138 = vmatmul.mubr.msk.bf16.gmra.mxu1 %vm1943_vm2, %v8231_v19  ;;  %v1844_v47 = vrot.slane %v1842_v23, 5  ;;  %v1800_v50 = vshll.u32 %v10605_v0, 16  ;;  %v1806_v48 = vrot.slane %v1804_v2, 4  ;;  %v1810_v29 = vshll.u32 %v10621_v21, 16  ;;  %9149 = vmatprep.subr.bf16.mxu0 %v9661_v15  ;;  %v8814_v2 = vpop.f32.mrf.mxu1 }
 0x174   : > { %9141 = vmatprep.mubr.msk.bf16.mxu1 %vm1943_vm2, %v8232_v25  ;;  %v744_v51 = vmul.f32 %v8813_v43, %v10451_v45  ;;  %v1798_v53 = vrot.slane %v1797_v12, 4  ;;  %v1863_v36 = vshrl.u32 %v1673_v33, 16  ;;  %v1866_v56 = vshll.u32 %v1673_v33, 16 }
 0x175   : > { %9110 = vmatmul.mubr.msk.bf16.gmra.mxu0 %vm1943_vm2, %v8209_v34  ;;  %v1802_v57 = vrot.slane %v1800_v50, 5  ;;  %v1812_v60 = vrot.slane %v1810_v29, 5  ;;  %v1876_v61 = vshrl.u32 %v10629_v44, 16  ;;  %v8233_v63 = vcombine.low %v1673_v33, %v10629_v44  ;;  %v8815_v12 = vpop.f32.mrf.mxu1 }
 0x176   : > { %9150 = vmatpush3.bf16.msra.mxu0 %v9661_v15  ;;  %v767_v3 = vadd.f32 %v10456_v49, %v744_v51  ;;  %v1865_v1 = vrot.slane %v1863_v36, 4  ;;  %v1868_v4 = vrot.slane %v1866_v56, 5  ;;  %v1821_v5 = vor.u32 %v1820_v14, %v1817_v13  ;;  %v9663_v14 = vld [vmem:[#allocation2 + $0xc] sm:$0xff]   ;;  %v1051_v36 = vld [vmem:[#allocation2 + $0x60] sm:$0xf] }
 0x177   : > { %9151 = vmatprep.subr.bf16.mxu0 %v9665_v46  ;;  %v1803_v7 = vsel %vm10419_vm5, %v1798_v53, %v1802_v57  ;;  %v1807_v8 = vor.u32 %v1806_v48, %v1802_v57  ;;  %v1824_v31 = vshll.u32 %v10599_v54, 16  ;;  %v1830_v11 = vrot.slane %v1828_v18, 4  ;;  %v10658_v53 = vld [vmem:[#allocation2 + $0x5c] sm:$0x1] }
 0x178   : > { %v783_v19 = vmax.f32 %v767_v3, 0.0  ;;  %v1822_v15 = vrot.slane %v1821_v5, 4  ;;  %v1834_v20 = vshll.u32 %v10638_v32, 16  ;;  %v1845_v22 = vor.u32 %v1844_v47, %v1841_v26 }
 0x179   : > { %v1808_v23 = vrot.slane %v1807_v8, 4  ;;  %v1826_v13 = vrot.slane %v1824_v31, 5  ;;  %v1848_v25 = vshll.u32 %v10613_v9, 16  ;;  %v1854_v30 = vrot.slane %v1852_v24, 4 }
 0x17a   : > { %9152 = vmatpush3.bf16.msra.mxu0 %v9665_v46  ;;  %v8734_v33 = vpack.c.bf16 %v783_v19, %v783_v19  ;;  %v1836_v34 = vrot.slane %v1834_v20, 5  ;;  %v1846_v43 = vrot.slane %v1845_v22, 4  ;;  %v1858_v18 = vshll.u32 %v10646_v16, 16  ;;  %v2251_v20 = vld [vmem:[#allocation2 + $0xc] sm:$0xe] }
 0x17b   : > { %9142 = vmatmul.mubr.msk.bf16.gmra.mxu1 %vm1943_vm2, %v8233_v63  ;;  %9193 = vmatprep.subr.bf16.mxu0 %v10641_v6  ;;  %v1813_v26 = vsel %vm10419_vm5, %v1808_v23, %v1812_v60  ;;  %v1827_v47 = vsel %vm10419_vm5, %v1822_v15, %v1826_v13  ;;  %v1831_v50 = vor.u32 %v1830_v11, %v1826_v13  ;;  %v1850_v24 = vrot.slane %v1848_v25, 5  ;;  %v2252_v22 = vld [vmem:[#allocation2 + $0x18] sm:$0xe] }
 0x17c   : > { %9177 = vmatprep.mubr.msk.bf16.mxu1 %vm1943_vm2, %v9663_v14  ;;  %v956_v46 = vshrl.u32 %v8734_v33, 16  ;;  %v959_v48 = vshll.u32 %v8734_v33, 16  ;;  %v8210_v29 = vcombine.low %v1803_v7, %v1813_v26  ;;  %v1860_v51 = vrot.slane %v1858_v18, 5  ;;  %v9666_v14 = vld [vmem:[#allocation2 + $0x18] sm:$0xff]   ;;  %v2253_v26 = vld [vmem:[#allocation2 + $0x24] sm:$0xe] }
 0x17d   : > { %v1832_v56 = vrot.slane %v1831_v50, 4  ;;  %v1851_v57 = vsel %vm10419_vm5, %v1846_v43, %v1850_v24  ;;  %v1855_v63 = vor.u32 %v1854_v30, %v1850_v24  ;;  %v8816_v60 = vadd.f32 %v8815_v12, %v8814_v2 }
 0x17e   : > { %v10662_v3 = vrot.slane %v956_v46, 7  ;;  %9113 = vmatprep.mubr.msk.bf16.mxu0 %vm1943_vm2, %v8210_v29  ;;  %v1869_v5 = vor.u32 %v1868_v4, %v1865_v1  ;;  %v1872_v8 = vshll.u32 %v10629_v44, 16  ;;  %v1878_v31 = vrot.slane %v1876_v61, 4  ;;  %v9675_v4 = vld [vmem:[#allocation6 + $0xb0] sm:$0xff]  }
 0x17f   : > { %v1837_v7 = vsel %vm10419_vm5, %v1832_v56, %v1836_v34  ;;  %v1856_v11 = vrot.slane %v1855_v63, 4  ;;  %v745_v19 = vmul.f32 %v8816_v60, %v10451_v45  ;;  %v1882_v15 = vshll.u32 %v10658_v53, 16  ;;  %v9667_v45 = vld [vmem:[#allocation2 + $0x24] sm:$0xff]  }
 0x180   : > { %v961_v2 = vor.u32 %v959_v48, %v10662_v3  ;;  %v962_v23 = vrot.slane %v10662_v3, 4  ;;  %v8211_v13 = vcombine.low %v1827_v47, %v1837_v7  ;;  %v1870_v1 = vrot.slane %v1869_v5, 4 }
 0x181   : > { %v1861_v61 = vsel %vm10419_vm5, %v1856_v11, %v1860_v51  ;;  %v768_v25 = vadd.f32 %v10456_v49, %v745_v19  ;;  %v1874_v30 = vrot.slane %v1872_v8, 5  ;;  %v1884_v33 = vrot.slane %v1882_v15, 5  ;;  %v9678_v51 = vld [vmem:[#allocation6 + $0xa8] sm:$0xff]   ;;  %v2254_v8 = vld [vmem:[#allocation2 + $0x30] sm:$0xe]  ;;  %v9679_v19 = vld [vmem:[#allocation6 + $0xa0] sm:$0xff]  }
 0x182   : > { %v1052_v34 = vsel %vm10470_vm12, %v961_v2, %v1051_v36  ;;  %9114 = vmatmul.mubr.msk.bf16.gmra.mxu0 %vm1943_vm2, %v8211_v13  ;;  %v8212_v43 = vcombine.low %v1851_v57, %v1861_v61  ;;  %v8247_v18 = vrot.slane %v2251_v20, 9  ;;  %v2286_v12 = vrot.slane %v10539_v58, 5  ;;  %v1055_v15 = vld [vmem:[#allocation2 + $0x68] sm:$0x1]  ;;  %v9670_v61 = vld [vmem:[#allocation2 + $0x3c] sm:$0xff]  }
 0x183   : > { %9178 = vmatmul.mubr.msk.bf16.vlgmr.msra.gmra.mxu1 %vm1943_vm2, %v9666_v14  ;;  %1053 = vst [vmem:[#allocation2 + $0x60] sm:$0xf] %v1052_v34  ;;  %v784_v47 = vmax.f32 %v768_v25, 0.0  ;;  %v1875_v49 = vsel %vm10419_vm5, %v1870_v1, %v1874_v30  ;;  %v1879_v50 = vor.u32 %v1878_v31, %v1874_v30  ;;  %v2289_v24 = vrot.slane %v10558_v42, 5  ;;  %v3163_v14 = vld [vmem:[#allocation2 + $0xc] sm:$0xe] }
 0x184   : > { %9181 = vmatprep.mubr.msk.bf16.mxu1 %vm1943_vm2, %v9667_v45  ;;  %9218 = vmatpush3.bf16.msra.mxu1 %v10595_v37  ;;  %v10688_v46 = vsel %vm10434_vm8, %v8247_v18, %v2286_v12  ;;  %v2288_v58 = vrot.slane %v2286_v12, 4  ;;  %v8248_v48 = vrot.slane %v2252_v22, 9  ;;  %v2293_v29 = vrot.slane %v10550_v17, 5  ;;  %v2255_v17 = vld [vmem:[#allocation2 + $0x3c] sm:$0xe]  ;;  %v9668_v22 = vld [vmem:[#allocation2 + $0x30] sm:$0xff]  }
 0x185   : > { %9117 = vmatprep.mubr.msk.bf16.mxu0 %vm1943_vm2, %v8212_v43  ;;  %9219 = vmatprep.subr.bf16.mxu1 %v9675_v4  ;;  %v8735_v36 = vpack.c.bf16 %v784_v47, %v784_v47  ;;  %v1880_v56 = vrot.slane %v1879_v50, 4  ;;  %v2296_v57 = vrot.slane %v10580_v10, 5  ;;  %v8249_v63 = vrot.slane %v2253_v26, 9  ;;  %v10718_v45 = vld [vmem:[#allocation2 + $0x14] sm:$0x1] }
 0x186   : > { %v10694_v42 = vsel %vm10434_vm8, %v2288_v58, %v2289_v24  ;;  %v10698_v37 = vsel %vm10434_vm8, %v8248_v48, %v2293_v29  ;;  %v2295_v60 = vrot.slane %v2293_v29, 4  ;;  %v2300_v5 = vrot.slane %v10565_v62, 5  ;;  %v10747_v24 = vld [vmem:[#allocation2 + $0x20] sm:$0x1] }
 0x187   : > { %v964_v31 = vshrl.u32 %v8735_v36, 16  ;;  %v967_v7 = vshll.u32 %v8735_v36, 16  ;;  %v1885_v11 = vsel %vm10419_vm5, %v1880_v56, %v1884_v33  ;;  %v8255_v10 = vcombine.low %v10688_v46, %v10694_v42  ;;  %v10716_v33 = vld [vmem:[#allocation2 + $0x10] sm:$0xf]  ;;  %v9677_v46 = vld [vmem:[#allocation6 + $0x88] sm:$0xff]  }
 0x188   : > { %9220 = vmatpush3.bf16.msra.mxu1 %v9675_v4  ;;  %v8213_v20 = vcombine.low %v1875_v49, %v1885_v11  ;;  %v10707_v2 = vsel %vm10434_vm8, %v2295_v60, %v2296_v57  ;;  %v10711_v62 = vsel %vm10434_vm8, %v8249_v63, %v2300_v5  ;;  %v2302_v13 = vrot.slane %v2300_v5, 4  ;;  %v2256_v49 = vld [vmem:[#allocation2 + $0x48] sm:$0xe] }
 0x189   : > { %9221 = vmatprep.subr.bf16.mxu1 %v9678_v51  ;;  %v966_v1 = vrot.slane %v964_v31, 7  ;;  %v8256_v4 = vcombine.low %v10698_v37, %v10707_v2  ;;  %v2303_v25 = vrot.slane %v10593_v35, 5  ;;  %v8250_v30 = vrot.slane %v2254_v8, 9  ;;  %v2257_v8 = vld [vmem:[#allocation2 + $0x54] sm:$0xe]  ;;  %v9672_v31 = vld [vmem:[#allocation6 + $0x90] sm:$0xff]  }
 0x18a   : > { %9118 = vmatmul.mubr.msk.bf16.gmra.mxu0 %vm1943_vm2, %v8213_v20  ;;  %v2307_v34 = vrot.slane %v10605_v0, 5  ;;  %v2310_v43 = vrot.slane %v10621_v21, 5  ;;  %v8251_v18 = vrot.slane %v2255_v17, 9  ;;  %v2314_v12 = vrot.slane %v10599_v54, 5  ;;  %v3164_v21 = vld [vmem:[#allocation2 + $0x18] sm:$0xe] }
 0x18b   : > { %9182 = vmatmul.mubr.msk.bf16.gmra.mxu1 %vm1943_vm2, %v9668_v22  ;;  %v969_v26 = vor.u32 %v967_v7, %v966_v1  ;;  %v971_v47 = vrot.slane %v966_v1, 4  ;;  %9153 = vmatprep.mubr.msk.bf16.mxu0 %vm1943_vm2, %v8254_v41  ;;  %v10732_v35 = vsel %vm10434_vm8, %v2302_v13, %v2303_v25  ;;  %v2317_v0 = vrot.slane %v10638_v32, 5  ;;  %v10745_v41 = vld [vmem:[#allocation2 + $0x1c] sm:$0xf]  ;;  %v10749_v32 = vld [vmem:[#allocation6 + $0xf8] sm:$0xff]   ;;  %v9671_v17 = vld [vmem:[#allocation2 + $0x48] sm:$0xff]  }
 0x18c   : > { %9185 = vmatprep.mubr.msk.bf16.mxu1 %vm1943_vm2, %v9670_v61  ;;  %v8257_v54 = vcombine.low %v10711_v62, %v10732_v35  ;;  %v10739_v50 = vsel %vm10434_vm8, %v8250_v30, %v2307_v34  ;;  %v2309_v39 = vrot.slane %v2307_v34, 4  ;;  %v10743_v40 = vsel %vm10434_vm8, %v8251_v18, %v2314_v12  ;;  %9222 = vmatpush3.bf16.msra.mxu1 %v9678_v51  ;;  %v10778_v22 = vld [vmem:[#allocation2 + $0x28] sm:$0xf]  ;;  %v2753_v13 = vld [vmem:[#allocation2 + $0xc] sm:$0xf] }
 0x18d   : > { %v970_v58 = vsel %vm10480_vm13, %v962_v23, %v969_v26  ;;  %v1056_v48 = vsel %vm10487_vm14, %v971_v47, %v1055_v15  ;;  %v2316_v29 = vrot.slane %v2314_v12, 4  ;;  %v8314_v36 = vrot.slane %v3163_v14, 9  ;;  %9223 = vmatprep.subr.bf16.mxu1 %v9679_v19  ;;  %v3165_v61 = vld [vmem:[#allocation2 + $0x24] sm:$0xe]  ;;  %v10796_v18 = vld [vmem:[#allocation2 + $0x2c] sm:$0x1] }
 0x18e   : > { %1054 = vst.msk [vmem:[#allocation2 + $0x64] sm:$0xf] %vm394_vm0, %v970_v58  ;;  %1057 = vst [vmem:[#allocation2 + $0x68] sm:$0x1] %v1056_v48  ;;  %v10760_v51 = vsel %vm10434_vm8, %v2309_v39, %v2310_v43  ;;  %v3197_v56 = vrot.slane %v10716_v33, 5  ;;  %v3200_v3 = vrot.slane %v10718_v45, 5 }
 0x18f   : > { %v8252_v57 = vrot.slane %v2256_v49, 9  ;;  %v8258_v23 = vcombine.low %v10739_v50, %v10760_v51  ;;  %v10768_v63 = vsel %vm10434_vm8, %v2316_v29, %v2317_v0  ;;  %v2321_v60 = vrot.slane %v10613_v9, 5  ;;  %v10819_v12 = vld [vmem:[#allocation2 + $0x34] sm:$0xf]  ;;  %v3166_v26 = vld [vmem:[#allocation2 + $0x30] sm:$0xe] }
 0x190   : > { %v2324_v5 = vrot.slane %v10646_v16, 5  ;;  %v8259_v7 = vcombine.low %v10743_v40, %v10768_v63  ;;  %v10776_v11 = vsel %vm10434_vm8, %v8314_v36, %v3197_v56  ;;  %v3199_v15 = vrot.slane %v3197_v56, 4  ;;  %9224 = vmatpush3.bf16.msra.mxu1 %v9679_v19  ;;  %v9674_v19 = vld [vmem:[#allocation2 + $0x54] sm:$0xff]  }
 0x191   : > { %v8315_v20 = vrot.slane %v3164_v21, 9  ;;  %v10782_v9 = vsel %vm10434_vm8, %v8252_v57, %v2321_v60  ;;  %v2323_v16 = vrot.slane %v2321_v60, 4  ;;  %v3204_v14 = vrot.slane %v10745_v41, 5  ;;  %9265 = vmatprep.subr.bf16.mxu1 %v10749_v32  ;;  %v10834_v56 = vld [vmem:[#allocation2 + $0x38] sm:$0x1] }
 0x192   : > { %v3207_v1 = vrot.slane %v10747_v24, 5  ;;  %9154 = vmatmul.mubr.msk.bf16.vlgmr.msra.gmra.mxu0 %vm1943_vm2, %v8255_v10  ;;  %v3201_v25 = vsel %vm10434_vm8, %v3199_v15, %v3200_v3  ;;  %v8253_v30 = vrot.slane %v2257_v8, 9  ;;  %v2328_v34 = vrot.slane %v10629_v44, 5  ;;  %v9680_v3 = vld [vmem:[#allocation6 + $0x80] sm:$0xff]  }
 0x193   : > { %9186 = vmatmul.mubr.msk.bf16.gmra.mxu1 %vm1943_vm2, %v9671_v17  ;;  %v2331_v43 = vrot.slane %v10658_v53, 5  ;;  %9194 = vmatpush3.bf16.msra.mxu0 %v10641_v6  ;;  %v8322_v42 = vcombine.low %v10776_v11, %v3201_v25  ;;  %v10806_v10 = vsel %vm10434_vm8, %v2323_v16, %v2324_v5  ;;  %v10810_v44 = vsel %vm10434_vm8, %v8315_v20, %v3204_v14  ;;  %v2756_v17 = vld [vmem:[#allocation2 + $0x18] sm:$0xf] }
 0x194   : > { %9157 = vmatprep.mubr.msk.bf16.mxu0 %vm1943_vm2, %v8256_v4  ;;  %v3206_v53 = vrot.slane %v3204_v14, 4  ;;  %9195 = vmatprep.subr.bf16.mxu0 %v9672_v31  ;;  %v8260_v6 = vcombine.low %v10782_v9, %v10806_v10  ;;  %v10817_v37 = vsel %vm10434_vm8, %v8253_v30, %v2328_v34  ;;  %v2330_v2 = vrot.slane %v2328_v34, 4  ;;  %v10862_v30 = vld [vmem:[#allocation2 + $0x44] sm:$0x1]  ;;  %v10912_v10 = vld [vmem:[#allocation2 + $0x50] sm:$0x1] }
 0x195   : > { %9189 = vmatprep.mubr.msk.bf16.mxu1 %vm1943_vm2, %v9674_v19  ;;  %v8316_v4 = vrot.slane %v3165_v61, 9  ;;  %v3211_v0 = vrot.slane %v10778_v22, 5  ;;  %v3214_v49 = vrot.slane %v10796_v18, 5  ;;  %v2778_v21 = vshrl.u32 %v2753_v13, 16  ;;  %v9676_v39 = vld [vmem:[#allocation2 + $0x60] sm:$0xff]  }
 0x196   : > { %v10823_v47 = vsel %vm10434_vm8, %v3206_v53, %v3207_v1  ;;  %v10831_v48 = vsel %vm10434_vm8, %v2330_v2, %v2331_v43  ;;  %v2781_v29 = vshll.u32 %v2753_v13, 16  ;;  %v2787_v36 = vshll.u32 %v10716_v33, 16  ;;  %v10865_v53 = vld [vmem:[#allocation6 + $0xd8] sm:$0xff]  }
 0x197   : > { %v8323_v58 = vcombine.low %v10810_v44, %v10823_v47  ;;  %9196 = vmatpush3.bf16.msra.mxu0 %v9672_v31  ;;  %v8261_v57 = vcombine.low %v10817_v37, %v10831_v48  ;;  %v10840_v60 = vsel %vm10434_vm8, %v8316_v4, %v3211_v0  ;;  %v3213_v5 = vrot.slane %v3211_v0, 4  ;;  %v2759_v0 = vld [vmem:[#allocation2 + $0x24] sm:$0xf] }
 0x198   : > { %v2780_v8 = vrot.slane %v2778_v21, 4  ;;  %9197 = vmatprep.subr.bf16.mxu0 %v9677_v46  ;;  %v2783_v11 = vrot.slane %v2781_v29, 5  ;;  %v2789_v15 = vrot.slane %v2787_v36, 5  ;;  %v2791_v20 = vshrl.u32 %v10716_v33, 16 }
 0x199   : > { %v2797_v13 = vshll.u32 %v10718_v45, 16  ;;  %v3215_v31 = vsel %vm10434_vm8, %v3213_v5, %v3214_v49  ;;  %v8317_v16 = vrot.slane %v3166_v26, 9  ;;  %v3218_v14 = vrot.slane %v10819_v12, 5 }
 0x19a   : > { %v3221_v1 = vrot.slane %v10834_v56, 5  ;;  %9158 = vmatmul.mubr.msk.bf16.gmra.mxu0 %vm1943_vm2, %v8257_v54  ;;  %v8324_v61 = vcombine.low %v10840_v60, %v3215_v31  ;;  %v2784_v33 = vor.u32 %v2783_v11, %v2780_v8  ;;  %v2793_v19 = vrot.slane %v2791_v20, 4  ;;  %v10878_v60 = vld [vmem:[#allocation2 + $0x40] sm:$0xf]  ;;  %v8833_v8 = vpop.f32.mrf.mxu1 }
 0x19b   : > { %9190 = vmatmul.mubr.msk.bf16.gmra.mxu1 %vm1943_vm2, %v9676_v39  ;;  %v2799_v45 = vrot.slane %v2797_v13, 5  ;;  %9161 = vmatprep.mubr.msk.bf16.mxu0 %vm1943_vm2, %v8258_v23  ;;  %v10860_v25 = vsel %vm10434_vm8, %v8317_v16, %v3218_v14  ;;  %v3220_v62 = vrot.slane %v3218_v14, 4  ;;  %v2802_v35 = vshrl.u32 %v2756_v17, 16  ;;  %v3167_v23 = vld [vmem:[#allocation2 + $0x3c] sm:$0xe]  ;;  %v9684_v16 = vld [vmem:[#allocation6 + $0xf0] sm:$0xff]  }
 0x19c   : > { %9198 = vmatpush3.bf16.msra.mxu0 %v9677_v46  ;;  %v2805_v54 = vshll.u32 %v2756_v17, 16  ;;  %9225 = vmatprep.mubr.msk.bf16.mxu1 %vm1943_vm2, %v8322_v42  ;;  %v2785_v34 = vrot.slane %v2784_v33, 4  ;;  %v2794_v43 = vor.u32 %v2793_v19, %v2789_v15  ;;  %v2811_v50 = vshll.u32 %v10745_v41, 16  ;;  %v8834_v47 = vpop.f32.mrf.mxu1 }
 0x19d   : > { %9199 = vmatprep.subr.bf16.mxu0 %v9680_v3  ;;  %v2815_v51 = vshrl.u32 %v10745_v41, 16  ;;  %v10871_v46 = vsel %vm10434_vm8, %v3220_v62, %v3221_v1  ;;  %v2804_v2 = vrot.slane %v2802_v35, 4  ;;  %v2821_v26 = vshll.u32 %v10747_v24, 16 }
 0x19e   : > { %v2807_v4 = vrot.slane %v2805_v54, 5  ;;  %v2790_v42 = vsel %vm10419_vm5, %v2785_v34, %v2789_v15  ;;  %v2795_v49 = vrot.slane %v2794_v43, 4  ;;  %v8325_v21 = vcombine.low %v10860_v25, %v10871_v46  ;;  %v10949_v48 = vpop.f32.mrf.mxu1  ;;  %v10953_v46 = vld [vmem:[#allocation2 + $0x5c] sm:$0x1] }
 0x19f   : > { %v2813_v39 = vrot.slane %v2811_v50, 5  ;;  %v2817_v29 = vrot.slane %v2815_v51, 4  ;;  %v2823_v36 = vrot.slane %v2821_v26, 5  ;;  %v8318_v5 = vrot.slane %v3167_v23, 9  ;;  %v2762_v50 = vld [vmem:[#allocation2 + $0x30] sm:$0xf] }
 0x1a0   : > { %9200 = vmatpush3.bf16.msra.mxu0 %v9680_v3  ;;  %v2808_v41 = vor.u32 %v2807_v4, %v2804_v2  ;;  %v2800_v24 = vsel %vm10419_vm5, %v2795_v49, %v2799_v45  ;;  %v3225_v17 = vrot.slane %v10878_v60, 5  ;;  %v3228_v11 = vrot.slane %v10862_v30, 5  ;;  %v10899_v45 = vld [vmem:[%s12972_s4] ss:$0 sm:$0xff] }
 0x1a1   : > { %9241 = vmatprep.subr.bf16.mxu0 %v10865_v53  ;;  %v2826_v15 = vshrl.u32 %v2759_v0, 16  ;;  %v8294_v20 = vcombine.low %v2790_v42, %v2800_v24  ;;  %v2818_v3 = vor.u32 %v2817_v29, %v2813_v39  ;;  %v2829_v31 = vshll.u32 %v2759_v0, 16  ;;  %v9686_v51 = vld [vmem:[#allocation6 + $0xe8] sm:$0xff]  }
 0x1a2   : > { %v2809_v13 = vrot.slane %v2808_v41, 4  ;;  %9162 = vmatmul.mubr.msk.bf16.gmra.mxu0 %vm1943_vm2, %v8259_v7  ;;  %v3226_v14 = vsel %vm10434_vm8, %v8318_v5, %v3225_v17  ;;  %v3227_v1 = vrot.slane %v3225_v17, 4  ;;  %v2835_v19 = vshll.u32 %v10778_v22, 16 }
 0x1a3   : > { %9226 = vmatmul.mubr.msk.bf16.vlgmr.msra.gmra.mxu1 %vm1943_vm2, %v8323_v58  ;;  %v2828_v33 = vrot.slane %v2826_v15, 4  ;;  %9165 = vmatprep.mubr.msk.bf16.mxu0 %vm1943_vm2, %v8260_v6  ;;  %v2819_v63 = vrot.slane %v2818_v3, 4  ;;  %v2831_v7 = vrot.slane %v2829_v31, 5  ;;  %v2839_v44 = vshrl.u32 %v10778_v22, 16  ;;  %v3168_v58 = vld [vmem:[#allocation2 + $0x48] sm:$0xe] }
 0x1a4   : > { %9229 = vmatprep.mubr.msk.bf16.mxu1 %vm1943_vm2, %v8324_v61  ;;  %v2814_v40 = vsel %vm10419_vm5, %v2809_v13, %v2813_v39  ;;  %v3229_v62 = vsel %vm10434_vm8, %v3227_v1, %v3228_v11  ;;  %v2837_v35 = vrot.slane %v2835_v19, 5  ;;  %v2845_v54 = vshll.u32 %v10796_v18, 16  ;;  %9266 = vmatpush3.bf16.msra.mxu1 %v10749_v32  ;;  %v10920_v22 = vld [vmem:[%s12973_s5] ss:$0 sm:$0xff]  ;;  %v10925_v32 = vld [vmem:[#allocation2 + $0x4c] sm:$0xf] }
 0x1a5   : > { %v8835_v9 = vadd.f32 %v8834_v47, %v8833_v8  ;;  %v2824_v6 = vsel %vm10419_vm5, %v2819_v63, %v2823_v36  ;;  %v8326_v61 = vcombine.low %v3226_v14, %v3229_v62  ;;  %v2832_v34 = vor.u32 %v2831_v7, %v2828_v33  ;;  %9267 = vmatprep.subr.bf16.mxu1 %v9684_v16  ;;  %v9687_v11 = vld [vmem:[#allocation6 + $0xe0] sm:$0xff]  }
 0x1a6   : > { %v2841_v43 = vrot.slane %v2839_v44, 4  ;;  %v10922_v18 = vcombine.low %v2814_v40, %v2824_v6  ;;  %v2847_v23 = vrot.slane %v2845_v54, 5  ;;  %v8319_v4 = vrot.slane %v3168_v58, 9  ;;  %v10955_v19 = vld [vmem:[#allocation2 + $0x58] sm:$0xf] }
 0x1a7   : > { %v1339_v2 = vmul.f32 %v8835_v9, %v10899_v45  ;;  %v2833_v26 = vrot.slane %v2832_v34, 4  ;;  %v3232_v42 = vrot.slane %v10925_v32, 5  ;;  %v3235_v49 = vrot.slane %v10912_v10, 5  ;;  %v2765_v40 = vld [vmem:[#allocation2 + $0x3c] sm:$0xf] }
 0x1a8   : > { %v2842_v0 = vor.u32 %v2841_v43, %v2837_v35  ;;  %v2850_v41 = vshrl.u32 %v2762_v50, 16  ;;  %v2853_v29 = vshll.u32 %v2762_v50, 16  ;;  %v2859_v36 = vshll.u32 %v10819_v12, 16  ;;  %9268 = vmatpush3.bf16.msra.mxu1 %v9684_v16  ;;  %v3169_v16 = vld [vmem:[#allocation2 + $0x54] sm:$0xe]  ;;  %v9682_v50 = vld [vmem:[#allocation6 + $0xd0] sm:$0xff]  }
 0x1a9   : > { %v1362_v39 = vadd.f32 %v10920_v22, %v1339_v2  ;;  %v2838_v5 = vsel %vm10419_vm5, %v2833_v26, %v2837_v35  ;;  %v3233_v24 = vsel %vm10434_vm8, %v8319_v4, %v3232_v42  ;;  %v3234_v17 = vrot.slane %v3232_v42, 4  ;;  %9269 = vmatprep.subr.bf16.mxu1 %v9686_v51  ;;  %v1603_v43 = vld [vmem:[#allocation2 + $0x6c] sm:$0xf] }
 0x1aa   : > { %v2843_v8 = vrot.slane %v2842_v0, 4  ;;  %9166 = vmatmul.mubr.msk.bf16.gmra.mxu0 %vm1943_vm2, %v8261_v57  ;;  %v2852_v13 = vrot.slane %v2850_v41, 4  ;;  %v2855_v3 = vrot.slane %v2853_v29, 5  ;;  %v2861_v31 = vrot.slane %v2859_v36, 5 }
 0x1ab   : > { %9230 = vmatmul.mubr.msk.bf16.gmra.mxu1 %vm1943_vm2, %v8325_v21  ;;  %v1378_v15 = vmax.f32 %v1362_v39, 0.0  ;;  %9201 = vmatprep.mubr.msk.bf16.mxu0 %vm1943_vm2, %v8294_v20  ;;  %v3236_v37 = vsel %vm10434_vm8, %v3234_v17, %v3235_v49  ;;  %v2863_v57 = vshrl.u32 %v10819_v12, 16  ;;  %v2869_v25 = vshll.u32 %v10834_v56, 16  ;;  %v3170_v49 = vld [vmem:[#allocation2 + $0x60] sm:$0xe] }
 0x1ac   : > { %9233 = vmatprep.mubr.msk.bf16.mxu1 %vm1943_vm2, %v8326_v61  ;;  %v2848_v14 = vsel %vm10419_vm5, %v2843_v8, %v2847_v23  ;;  %v8327_v33 = vcombine.low %v3233_v24, %v3236_v37  ;;  %v2856_v20 = vor.u32 %v2855_v3, %v2852_v13  ;;  %9270 = vmatpush3.bf16.msra.mxu1 %v9686_v51  ;;  %v8320_v44 = vrot.slane %v3169_v16, 9  ;;  %v8837_v61 = vpop.f32.mrf.mxu1  ;;  %v2768_v8 = vld [vmem:[#allocation2 + $0x48] sm:$0xf]  ;;  %v9685_v16 = vld [vmem:[#allocation6 + $0xc8] sm:$0xff]  }
 0x1ad   : > { %v8296_v21 = vcombine.low %v2838_v5, %v2848_v14  ;;  %v8736_v1 = vpack.c.bf16 %v1378_v15, %v1378_v15  ;;  %v2865_v63 = vrot.slane %v2863_v57, 4  ;;  %v2871_v7 = vrot.slane %v2869_v25, 5  ;;  %9271 = vmatprep.subr.bf16.mxu1 %v9687_v11 }
 0x1ae   : > { %v3239_v47 = vrot.slane %v10955_v19, 5  ;;  %v2857_v62 = vrot.slane %v2856_v20, 4  ;;  %v3242_v56 = vrot.slane %v10953_v46, 5  ;;  %v2874_v6 = vshrl.u32 %v2765_v40, 16  ;;  %v10969_v39 = vpop.f32.mrf.mxu1 }
 0x1af   : > { %v1443_v58 = vshrl.u32 %v8736_v1, 16  ;;  %v1446_v12 = vshll.u32 %v8736_v1, 16  ;;  %v2866_v35 = vor.u32 %v2865_v63, %v2861_v31  ;;  %v2877_v23 = vshll.u32 %v2765_v40, 16 }
 0x1b0   : > { %v3240_v54 = vsel %vm10434_vm8, %v8320_v44, %v3239_v47  ;;  %v3241_v9 = vrot.slane %v3239_v47, 4  ;;  %v2862_v51 = vsel %vm10419_vm5, %v2857_v62, %v2861_v31  ;;  %v2883_v2 = vshll.u32 %v10878_v60, 16  ;;  %9272 = vmatpush3.bf16.msra.mxu1 %v9687_v11  ;;  %v10981_v11 = vld [vmem:[#allocation2 + $0x68] sm:$0x1]  ;;  %v10990_v25 = vpop.f32.mrf.mxu1  ;;  %v3672_v62 = vld [vmem:[#allocation2 + $0x18] sm:$0xf] }
 0x1b1   : > { %v10961_v34 = vrot.slane %v1443_v58, 7  ;;  %v2867_v4 = vrot.slane %v2866_v35, 4  ;;  %v2876_v0 = vrot.slane %v2874_v6, 4  ;;  %v2887_v42 = vshrl.u32 %v10878_v60, 16  ;;  %v11005_v6 = vld [vmem:[#allocation2 + $0x1c] sm:$0xf] }
 0x1b2   : > { %v3243_v26 = vsel %vm10434_vm8, %v3241_v9, %v3242_v56  ;;  %9202 = vmatmul.mubr.msk.bf16.vlgmr.msra.gmra.mxu0 %vm1943_vm2, %v10922_v18  ;;  %v2879_v5 = vrot.slane %v2877_v23, 5  ;;  %v2885_v24 = vrot.slane %v2883_v2, 5  ;;  %v2893_v18 = vshll.u32 %v10862_v30, 16 }
 0x1b3   : > { %v1448_v41 = vor.u32 %v1446_v12, %v10961_v34  ;;  %v1449_v29 = vrot.slane %v10961_v34, 4  ;;  %9234 = vmatmul.mubr.msk.bf16.gmra.mxu1 %vm1943_vm2, %v8327_v33  ;;  %v8328_v36 = vcombine.low %v3240_v54, %v3243_v26  ;;  %9242 = vmatpush3.bf16.msra.mxu0 %v10865_v53  ;;  %v2872_v60 = vsel %vm10419_vm5, %v2867_v4, %v2871_v7  ;;  %v10986_v53 = vld [vmem:[#allocation2 + $0x64] sm:$0xf] }
 0x1b4   : > { %9205 = vmatprep.mubr.msk.bf16.mxu0 %vm1943_vm2, %v8296_v21  ;;  %v2889_v17 = vrot.slane %v2887_v42, 4  ;;  %9243 = vmatprep.subr.bf16.mxu0 %v9682_v50  ;;  %v8297_v13 = vcombine.low %v2862_v51, %v2872_v60  ;;  %v2880_v3 = vor.u32 %v2879_v5, %v2876_v0  ;;  %v8321_v31 = vrot.slane %v3170_v49, 9  ;;  %v11011_v49 = vld [vmem:[#allocation6 + $0x118] sm:$0xff]  }
 0x1b5   : > { %v1604_v15 = vsel %vm10470_vm12, %v1448_v41, %v1603_v43  ;;  %9237 = vmatprep.mubr.msk.bf16.mxu1 %vm1943_vm2, %v8328_v36  ;;  %v2895_v37 = vrot.slane %v2893_v18, 5  ;;  %v8838_v57 = vadd.f32 %v8837_v61, %v10949_v48  ;;  %v3246_v30 = vrot.slane %v10986_v53, 5  ;;  %v9688_v61 = vld [vmem:[#allocation6 + $0xc0] sm:$0xff]   ;;  %v11007_v43 = vpop.f32.mrf.mxu1  ;;  %v11015_v41 = vld [vmem:[#allocation2 + $0x20] sm:$0x1] }
 0x1b6   : > { %1605 = vst [vmem:[#allocation2 + $0x6c] sm:$0xf] %v1604_v15  ;;  %v2890_v14 = vor.u32 %v2889_v17, %v2885_v24  ;;  %v2881_v21 = vrot.slane %v2880_v3, 4  ;;  %v3249_v1 = vrot.slane %v10981_v11, 5  ;;  %v2898_v33 = vshrl.u32 %v2768_v8, 16 }
 0x1b7   : > { %v2901_v20 = vshll.u32 %v2768_v8, 16  ;;  %9244 = vmatpush3.bf16.msra.mxu0 %v9682_v50  ;;  %v1340_v63 = vmul.f32 %v8838_v57, %v10899_v45  ;;  %v3247_v7 = vsel %vm10434_vm8, %v8321_v31, %v3246_v30  ;;  %v3248_v44 = vrot.slane %v3246_v30, 4  ;;  %v2771_v18 = vld [vmem:[#allocation2 + $0x54] sm:$0xf]  ;;  %v11019_v15 = vpop.f32.mrf.mxu1 }
 0x1b8   : > { %v2891_v40 = vrot.slane %v2890_v14, 4  ;;  %v2886_v48 = vsel %vm10419_vm5, %v2881_v21, %v2885_v24  ;;  %9245 = vmatprep.subr.bf16.mxu0 %v9685_v16  ;;  %v2900_v47 = vrot.slane %v2898_v33, 4  ;;  %v2907_v12 = vshll.u32 %v10925_v32, 16 }
 0x1b9   : > { %v2903_v58 = vrot.slane %v2901_v20, 5  ;;  %v1363_v35 = vadd.f32 %v10920_v22, %v1340_v63  ;;  %v3250_v54 = vsel %vm10434_vm8, %v3248_v44, %v3249_v1  ;;  %v2911_v9 = vshrl.u32 %v10925_v32, 16 }
 0x1ba   : > { %v2896_v56 = vsel %vm10419_vm5, %v2891_v40, %v2895_v37  ;;  %9206 = vmatmul.mubr.msk.bf16.gmra.mxu0 %vm1943_vm2, %v8297_v13  ;;  %v8329_v51 = vcombine.low %v3247_v7, %v3250_v54  ;;  %v2909_v2 = vrot.slane %v2907_v12, 5  ;;  %v2917_v0 = vshll.u32 %v10912_v10, 16 }
 0x1bb   : > { %v8298_v50 = vcombine.low %v2886_v48, %v2896_v56  ;;  %v2904_v23 = vor.u32 %v2903_v58, %v2900_v47  ;;  %v1379_v4 = vmax.f32 %v1363_v35, 0.0  ;;  %v2913_v26 = vrot.slane %v2911_v9, 4  ;;  %9246 = vmatpush3.bf16.msra.mxu0 %v9685_v16  ;;  %v11028_v48 = vpop.f32.mrf.mxu1  ;;  %v1607_v47 = vld [vmem:[#allocation2 + $0x74] sm:$0x1] }
 0x1bc   : > { %v3697_v42 = vshrl.u32 %v3672_v62, 16  ;;  %9238 = vmatmul.mubr.msk.bf16.gmra.mxu1 %vm1943_vm2, %v8329_v51  ;;  %v3700_v36 = vshll.u32 %v3672_v62, 16  ;;  %v3706_v5 = vshll.u32 %v11005_v6, 16  ;;  %v3710_v8 = vshrl.u32 %v11005_v6, 16  ;;  %9247 = vmatprep.subr.bf16.mxu0 %v9688_v61 }
 0x1bd   : > { %9209 = vmatprep.mubr.msk.bf16.mxu0 %vm1943_vm2, %v8298_v50  ;;  %v2905_v32 = vrot.slane %v2904_v23, 4  ;;  %v8737_v60 = vpack.c.bf16 %v1379_v4, %v1379_v4  ;;  %v2914_v24 = vor.u32 %v2913_v26, %v2909_v2  ;;  %v2919_v17 = vrot.slane %v2917_v0, 5  ;;  %v3675_v50 = vld [vmem:[#allocation2 + $0x24] sm:$0xf]  ;;  %v11037_v26 = vld [vmem:[#allocation2 + $0x28] sm:$0xf] }
 0x1be   : > { %v3699_v10 = vrot.slane %v3697_v42, 4  ;;  %v3702_v3 = vrot.slane %v3700_v36, 5  ;;  %v3708_v31 = vrot.slane %v3706_v5, 5  ;;  %v3712_v16 = vrot.slane %v3710_v8, 4  ;;  %v11039_v0 = vld [vmem:[#allocation2 + $0x2c] sm:$0x1] }
 0x1bf   : > { %v2910_v13 = vsel %vm10419_vm5, %v2905_v32, %v2909_v2  ;;  %v1451_v14 = vshrl.u32 %v8737_v60, 16  ;;  %v1454_v37 = vshll.u32 %v8737_v60, 16  ;;  %v2915_v57 = vrot.slane %v2914_v24, 4  ;;  %9248 = vmatpush3.bf16.msra.mxu0 %v9688_v61  ;;  %v2774_v8 = vld [vmem:[#allocation2 + $0x60] sm:$0xf]  ;;  %v11047_v60 = vpop.f32.mrf.mxu1 }
 0x1c0   : > { %v3716_v30 = vshll.u32 %v11015_v41, 16  ;;  %v3703_v21 = vor.u32 %v3702_v3, %v3699_v10  ;;  %v3713_v1 = vor.u32 %v3712_v16, %v3708_v31  ;;  %v2922_v33 = vshrl.u32 %v2771_v18, 16  ;;  %9289 = vmatprep.subr.bf16.mxu0 %v11011_v49 }
 0x1c1   : > { %v2925_v20 = vshll.u32 %v2771_v18, 16  ;;  %v1453_v40 = vrot.slane %v1451_v14, 7  ;;  %v2920_v63 = vsel %vm10419_vm5, %v2915_v57, %v2919_v17  ;;  %v2931_v44 = vshll.u32 %v10955_v19, 16 }
 0x1c2   : > { %v3718_v7 = vrot.slane %v3716_v30, 5  ;;  %v8299_v58 = vcombine.low %v2910_v13, %v2920_v63  ;;  %v3704_v12 = vrot.slane %v3703_v21, 4  ;;  %v3714_v62 = vrot.slane %v3713_v1, 4  ;;  %v3678_v21 = vld [vmem:[#allocation2 + $0x30] sm:$0xf]  ;;  %v11056_v1 = vpop.f32.mrf.mxu1 }
 0x1c3   : > { %v2924_v56 = vrot.slane %v2922_v33, 4  ;;  %v1456_v35 = vor.u32 %v1454_v37, %v1453_v40  ;;  %v1458_v54 = vrot.slane %v1453_v40, 4  ;;  %v2927_v9 = vrot.slane %v2925_v20, 5 }
 0x1c4   : > { %v2933_v61 = vrot.slane %v2931_v44, 5  ;;  %9210 = vmatmul.mubr.msk.bf16.gmra.mxu0 %vm1943_vm2, %v8299_v58  ;;  %v3709_v51 = vsel %vm10419_vm5, %v3704_v12, %v3708_v31  ;;  %v3719_v23 = vsel %vm10419_vm5, %v3714_v62, %v3718_v7  ;;  %v2935_v2 = vshrl.u32 %v10955_v19, 16 }
 0x1c5   : > { %v2941_v4 = vshll.u32 %v10953_v46, 16  ;;  %v1457_v42 = vsel %vm10480_vm13, %v1449_v29, %v1456_v35  ;;  %v1608_v32 = vsel %vm10487_vm14, %v1458_v54, %v1607_v47  ;;  %v8362_v36 = vcombine.low %v3709_v51, %v3719_v23  ;;  %v11063_v35 = vld [vmem:[#allocation2 + $0x34] sm:$0xf]  ;;  %v11065_v23 = vld [vmem:[#allocation2 + $0x38] sm:$0x1] }
 0x1c6   : > { %v2928_v5 = vor.u32 %v2927_v9, %v2924_v56  ;;  %1606 = vst.msk [vmem:[#allocation2 + $0x70] sm:$0xf] %vm394_vm0, %v1457_v42  ;;  %1609 = vst [vmem:[#allocation2 + $0x74] sm:$0x1] %v1608_v32  ;;  %v2937_v46 = vrot.slane %v2935_v2, 4  ;;  %v3721_v24 = vshrl.u32 %v3675_v50, 16  ;;  %v11067_v2 = vpop.f32.mrf.mxu1 }
 0x1c7   : > { %v2943_v19 = vrot.slane %v2941_v4, 5  ;;  %v3724_v17 = vshll.u32 %v3675_v50, 16  ;;  %9273 = vmatprep.mubr.msk.bf16.mxu1 %vm1943_vm2, %v8362_v36  ;;  %v3730_v29 = vshll.u32 %v11037_v26, 16  ;;  %v3734_v10 = vshrl.u32 %v11037_v26, 16  ;;  %v3681_v32 = vld [vmem:[#allocation2 + $0x3c] sm:$0xf] }
 0x1c8   : > { %v2929_v34 = vrot.slane %v2928_v5, 4  ;;  %v3740_v18 = vshll.u32 %v11039_v0, 16  ;;  %v2938_v13 = vor.u32 %v2937_v46, %v2933_v61  ;;  %v3723_v3 = vrot.slane %v3721_v24, 4 }
 0x1c9   : > { %v3726_v31 = vrot.slane %v3724_v17, 5  ;;  %v2946_v16 = vshrl.u32 %v2774_v8, 16  ;;  %v3732_v37 = vrot.slane %v3730_v29, 5  ;;  %v3736_v57 = vrot.slane %v3734_v10, 4 }
 0x1ca   : > { %v2934_v14 = vsel %vm10419_vm5, %v2929_v34, %v2933_v61  ;;  %v3742_v30 = vrot.slane %v3740_v18, 5  ;;  %v2939_v33 = vrot.slane %v2938_v13, 4  ;;  %v2949_v63 = vshll.u32 %v2774_v8, 16 }
 0x1cb   : > { %v3727_v20 = vor.u32 %v3726_v31, %v3723_v3  ;;  %v2948_v40 = vrot.slane %v2946_v16, 4  ;;  %v3737_v7 = vor.u32 %v3736_v57, %v3732_v37  ;;  %v2955_v44 = vshll.u32 %v10986_v53, 16  ;;  %v11079_v3 = vld [vmem:[#allocation2 + $0x44] sm:$0x1]  ;;  %v11081_v16 = vpop.f32.mrf.mxu1 }
 0x1cc   : > { %v2959_v47 = vshrl.u32 %v10986_v53, 16  ;;  %v2965_v58 = vshll.u32 %v10981_v11, 16  ;;  %v2944_v12 = vsel %vm10419_vm5, %v2939_v33, %v2943_v19  ;;  %v2951_v56 = vrot.slane %v2949_v63, 5  ;;  %v11075_v19 = vld [vmem:[#allocation2 + $0x40] sm:$0xf] }
 0x1cd   : > { %v3728_v62 = vrot.slane %v3727_v20, 4  ;;  %v3745_v54 = vshrl.u32 %v3678_v21, 16  ;;  %v8300_v9 = vcombine.low %v2934_v14, %v2944_v12  ;;  %v3738_v61 = vrot.slane %v3737_v7, 4  ;;  %v11090_v12 = vld [vmem:[#allocation2 + $0x4c] sm:$0xf] }
 0x1ce   : > { %v2957_v50 = vrot.slane %v2955_v44, 5  ;;  %v2961_v51 = vrot.slane %v2959_v47, 4  ;;  %v2952_v11 = vor.u32 %v2951_v56, %v2948_v40  ;;  %v2967_v4 = vrot.slane %v2965_v58, 5  ;;  %v9689_v56 = vld [vmem:[#allocation2 + $0x18] sm:$0xff]  }
 0x1cf   : > { %v3733_v53 = vsel %vm10419_vm5, %v3728_v62, %v3732_v37  ;;  %v3747_v42 = vrot.slane %v3745_v54, 4  ;;  %9213 = vmatprep.mubr.msk.bf16.mxu0 %vm1943_vm2, %v8300_v9  ;;  %v3743_v36 = vsel %vm10419_vm5, %v3738_v61, %v3742_v30  ;;  %v3748_v8 = vshll.u32 %v3678_v21, 16  ;;  %v3684_v21 = vld [vmem:[#allocation2 + $0x48] sm:$0xf] }
 0x1d0   : > { %v2962_v5 = vor.u32 %v2961_v51, %v2957_v50  ;;  %v3754_v46 = vshll.u32 %v11063_v35, 16  ;;  %v8363_v24 = vcombine.low %v3733_v53, %v3743_v36  ;;  %v2953_v17 = vrot.slane %v2952_v11, 4 }
 0x1d1   : > { %v3758_v34 = vshrl.u32 %v11063_v35, 16  ;;  %v3764_v29 = vshll.u32 %v11065_v23, 16  ;;  %v3750_v18 = vrot.slane %v3748_v8, 5  ;;  %v3769_v31 = vshrl.u32 %v3681_v32, 16 }
 0x1d2   : > { %v2963_v10 = vrot.slane %v2962_v5, 4  ;;  %v3756_v13 = vrot.slane %v3754_v46, 5  ;;  %9274 = vmatmul.mubr.msk.bf16.vlgmr.msra.gmra.mxu1 %vm1943_vm2, %v8363_v24  ;;  %v2958_v14 = vsel %vm10419_vm5, %v2953_v17, %v2957_v50  ;;  %v3772_v30 = vshll.u32 %v3681_v32, 16  ;;  %v11093_v50 = vpop.f32.mrf.mxu1 }
 0x1d3   : > { %v3760_v37 = vrot.slane %v3758_v34, 4  ;;  %v3766_v57 = vrot.slane %v3764_v29, 5  ;;  %v3751_v20 = vor.u32 %v3750_v18, %v3747_v42  ;;  %v3771_v40 = vrot.slane %v3769_v31, 4  ;;  %v3687_v29 = vld [vmem:[#allocation2 + $0x54] sm:$0xf] }
 0x1d4   : > { %v2968_v33 = vsel %vm10419_vm5, %v2963_v10, %v2967_v4  ;;  %v3778_v63 = vshll.u32 %v11075_v19, 16  ;;  %v3774_v47 = vrot.slane %v3772_v30, 5  ;;  %v3782_v58 = vshrl.u32 %v11075_v19, 16  ;;  %v11096_v4 = vld [vmem:[#allocation2 + $0x50] sm:$0x1] }
 0x1d5   : > { %v8301_v7 = vcombine.low %v2958_v14, %v2968_v33  ;;  %v3761_v44 = vor.u32 %v3760_v37, %v3756_v13  ;;  %v3752_v62 = vrot.slane %v3751_v20, 4  ;;  %v3788_v9 = vshll.u32 %v11079_v3, 16  ;;  %v11108_v37 = vpop.f32.mrf.mxu1  ;;  %v9691_v20 = vld [vmem:[#allocation2 + $0x24] sm:$0xff]  }
 0x1d6   : > { %v3780_v54 = vrot.slane %v3778_v63, 5  ;;  %v3793_v61 = vshrl.u32 %v3684_v21, 16  ;;  %v3775_v53 = vor.u32 %v3774_v47, %v3771_v40  ;;  %v3784_v11 = vrot.slane %v3782_v58, 4  ;;  %v9693_v47 = vld [vmem:[#allocation6 + $0x110] sm:$0xff]  }
 0x1d7   : > { %9214 = vmatmul.mubr.msk.bf16.gmra.mxu0 %vm1943_vm2, %v8301_v7  ;;  %v3762_v51 = vrot.slane %v3761_v44, 4  ;;  %v3796_v42 = vshll.u32 %v3684_v21, 16  ;;  %v3757_v32 = vsel %vm10419_vm5, %v3752_v62, %v3756_v13  ;;  %v3790_v36 = vrot.slane %v3788_v9, 5  ;;  %v11106_v13 = vld [vmem:[#allocation2 + $0x58] sm:$0xf] }
 0x1d8   : > { %9249 = vmatprep.mubr.msk.bf16.mxu0 %vm1943_vm2, %v9689_v56  ;;  %v3795_v5 = vrot.slane %v3793_v61, 4  ;;  %v3802_v8 = vshll.u32 %v11090_v12, 16  ;;  %v3776_v24 = vrot.slane %v3775_v53, 4  ;;  %v3785_v17 = vor.u32 %v3784_v11, %v3780_v54  ;;  %v3690_v61 = vld [vmem:[#allocation2 + $0x60] sm:$0xf] }
 0x1d9   : > { %v3767_v46 = vsel %vm10419_vm5, %v3762_v51, %v3766_v57  ;;  %v3798_v34 = vrot.slane %v3796_v42, 5  ;;  %v3806_v31 = vshrl.u32 %v11090_v12, 16  ;;  %v3812_v14 = vshll.u32 %v11096_v4, 16  ;;  %v11121_v11 = vld [vmem:[#allocation2 + $0x64] sm:$0xf]  ;;  %v11123_v42 = vpop.f32.mrf.mxu1 }
 0x1da   : > { %v8364_v10 = vcombine.low %v3757_v32, %v3767_v46  ;;  %v3804_v18 = vrot.slane %v3802_v8, 5  ;;  %v3781_v30 = vsel %vm10419_vm5, %v3776_v24, %v3780_v54  ;;  %v3786_v21 = vrot.slane %v3785_v17, 4  ;;  %v11118_v54 = vld [vmem:[#allocation2 + $0x5c] sm:$0x1] }
 0x1db   : > { %v3799_v33 = vor.u32 %v3798_v34, %v3795_v5  ;;  %v8841_v57 = vadd.f32 %v10990_v25, %v10969_v39  ;;  %v3808_v40 = vrot.slane %v3806_v31, 4  ;;  %v3814_v63 = vrot.slane %v3812_v14, 5  ;;  %v11134_v14 = vld [vmem:[#allocation2 + $0x68] sm:$0x1] }
 0x1dc   : > { %9277 = vmatprep.mubr.msk.bf16.mxu1 %vm1943_vm2, %v8364_v10  ;;  %v3817_v7 = vshrl.u32 %v3687_v29, 16  ;;  %v3820_v44 = vshll.u32 %v3687_v29, 16  ;;  %v3791_v58 = vsel %vm10419_vm5, %v3786_v21, %v3790_v36  ;;  %v3826_v9 = vshll.u32 %v11106_v13, 16  ;;  %v9692_v36 = vld [vmem:[#allocation2 + $0x30] sm:$0xff]   ;;  %v9696_v10 = vld [vmem:[#allocation6 + $0x108] sm:$0xff]  }
 0x1dd   : > { %v3800_v62 = vrot.slane %v3799_v33, 4  ;;  %v1341_v56 = vmul.f32 %v8841_v57, %v10899_v45  ;;  %v8365_v39 = vcombine.low %v3781_v30, %v3791_v58  ;;  %v3809_v25 = vor.u32 %v3808_v40, %v3804_v18  ;;  %v11139_v40 = vpop.f32.mrf.mxu1 }
 0x1de   : > { %v3819_v51 = vrot.slane %v3817_v7, 4  ;;  %v3822_v53 = vrot.slane %v3820_v44, 5  ;;  %v3828_v8 = vrot.slane %v3826_v9, 5  ;;  %v3830_v46 = vshrl.u32 %v11106_v13, 16 }
 0x1df   : > { %9250 = vmatmul.mubr.msk.bf16.vlgmr.msra.gmra.mxu0 %vm1943_vm2, %v9691_v20  ;;  %v3805_v32 = vsel %vm10419_vm5, %v3800_v62, %v3804_v18  ;;  %v1364_v5 = vadd.f32 %v10920_v22, %v1341_v56  ;;  %9278 = vmatmul.mubr.msk.bf16.gmra.mxu1 %vm1943_vm2, %v8365_v39  ;;  %v3810_v24 = vrot.slane %v3809_v25, 4  ;;  %v3836_v34 = vshll.u32 %v11118_v54, 16  ;;  %v3693_v25 = vld [vmem:[#allocation2 + $0x6c] sm:$0xf] }
 0x1e0   : > { %9290 = vmatpush3.bf16.msra.mxu0 %v11011_v49  ;;  %v3823_v17 = vor.u32 %v3822_v53, %v3819_v51  ;;  %v3841_v29 = vshrl.u32 %v3690_v61, 16  ;;  %9253 = vmatprep.mubr.msk.bf16.mxu0 %vm1943_vm2, %v9692_v36  ;;  %v3832_v18 = vrot.slane %v3830_v46, 4  ;;  %v3844_v30 = vshll.u32 %v3690_v61, 16  ;;  %v9694_v36 = vld [vmem:[#allocation2 + $0x3c] sm:$0xff]  }
 0x1e1   : > { %v1380_v31 = vmax.f32 %v1364_v5, 0.0  ;;  %9291 = vmatprep.subr.bf16.mxu0 %v9693_v47  ;;  %v3850_v21 = vshll.u32 %v11121_v11, 16  ;;  %v3815_v33 = vsel %vm10419_vm5, %v3810_v24, %v3814_v63  ;;  %v3838_v49 = vrot.slane %v3836_v34, 5  ;;  %v9695_v24 = vld [vmem:[#allocation2 + $0x48] sm:$0xff]   ;;  %v9699_v34 = vld [vmem:[#allocation6 + $0x100] sm:$0xff]  }
 0x1e2   : > { %v3824_v57 = vrot.slane %v3823_v17, 4  ;;  %v3843_v20 = vrot.slane %v3841_v29, 4  ;;  %v8366_v7 = vcombine.low %v3805_v32, %v3815_v33  ;;  %v3833_v58 = vor.u32 %v3832_v18, %v3828_v8 }
 0x1e3   : > { %v8738_v44 = vpack.c.bf16 %v1380_v31, %v1380_v31  ;;  %v3846_v62 = vrot.slane %v3844_v30, 5  ;;  %v3852_v9 = vrot.slane %v3850_v21, 5  ;;  %v3854_v61 = vshrl.u32 %v11121_v11, 16  ;;  %v1610_v21 = vld [vmem:[#allocation2 + $0x78] sm:$0xf] }
 0x1e4   : > { %v3829_v56 = vsel %vm10419_vm5, %v3824_v57, %v3828_v8  ;;  %v3860_v39 = vshll.u32 %v11134_v14, 16  ;;  %9292 = vmatpush3.bf16.msra.mxu0 %v9693_v47  ;;  %9281 = vmatprep.mubr.msk.bf16.mxu1 %vm1943_vm2, %v8366_v7  ;;  %v3834_v53 = vrot.slane %v3833_v58, 4  ;;  %v8844_v8 = vadd.f32 %v11019_v15, %v11007_v43  ;;  %v11150_v47 = vpop.f32.mrf.mxu1 }
 0x1e5   : > { %v1460_v63 = vshrl.u32 %v8738_v44, 16  ;;  %v1463_v51 = vshll.u32 %v8738_v44, 16  ;;  %v3847_v32 = vor.u32 %v3846_v62, %v3843_v20  ;;  %9293 = vmatprep.subr.bf16.mxu0 %v9696_v10  ;;  %v3856_v5 = vrot.slane %v3854_v61, 4 }
 0x1e6   : > { %v3862_v46 = vrot.slane %v3860_v39, 5  ;;  %v8847_v17 = vadd.f32 %v11047_v60, %v11028_v48  ;;  %v3839_v31 = vsel %vm10419_vm5, %v3834_v53, %v3838_v49  ;;  %v3865_v30 = vshrl.u32 %v3693_v25, 16  ;;  %v11160_v48 = vld [vmem:[#allocation2 + $0x70] sm:$0xf]  ;;  %v11162_v60 = vld [vmem:[#allocation2 + $0x74] sm:$0x1]  ;;  %v11171_v39 = vpop.f32.mrf.mxu1 }
 0x1e7   : > { %v11152_v29 = vrot.slane %v1460_v63, 7  ;;  %9254 = vmatmul.mubr.msk.bf16.gmra.mxu0 %vm1943_vm2, %v9694_v36  ;;  %v3848_v18 = vrot.slane %v3847_v32, 4  ;;  %v8367_v33 = vcombine.low %v3829_v56, %v3839_v31  ;;  %v3857_v57 = vor.u32 %v3856_v5, %v3852_v9  ;;  %v11173_v63 = vld [vmem:[#allocation6 + $0x38] sm:$0xff]  }
 0x1e8   : > { %9257 = vmatprep.mubr.msk.bf16.mxu0 %vm1943_vm2, %v9695_v24  ;;  %v1342_v43 = vmul.f32 %v8844_v8, %v10899_v45  ;;  %v1343_v15 = vmul.f32 %v8847_v17, %v10899_v45  ;;  %v3867_v44 = vrot.slane %v3865_v30, 4  ;;  %9294 = vmatpush3.bf16.msra.mxu0 %v9696_v10  ;;  %v3868_v61 = vshll.u32 %v3693_v25, 16  ;;  %v4082_v24 = vld [vmem:[#allocation2 + $0x18] sm:$0xe] }
 0x1e9   : > { %v1465_v20 = vor.u32 %v1463_v51, %v11152_v29  ;;  %v1466_v49 = vrot.slane %v11152_v29, 4  ;;  %v3853_v7 = vsel %vm10419_vm5, %v3848_v18, %v3852_v9  ;;  %9282 = vmatmul.mubr.msk.bf16.gmra.mxu1 %vm1943_vm2, %v8367_v33  ;;  %v3858_v58 = vrot.slane %v3857_v57, 4  ;;  %9295 = vmatprep.subr.bf16.mxu0 %v9699_v34  ;;  %v9697_v30 = vld [vmem:[#allocation2 + $0x54] sm:$0xff]  }
 0x1ea   : > { %v1365_v62 = vadd.f32 %v10920_v22, %v1342_v43  ;;  %v1366_v56 = vadd.f32 %v10920_v22, %v1343_v15  ;;  %v3874_v9 = vshll.u32 %v11160_v48, 16  ;;  %v3878_v10 = vshrl.u32 %v11160_v48, 16  ;;  %v9698_v43 = vld [vmem:[#allocation2 + $0x60] sm:$0xff]  }
 0x1eb   : > { %v1611_v51 = vsel %vm10470_vm12, %v1465_v20, %v1610_v21  ;;  %v3884_v53 = vshll.u32 %v11162_v60, 16  ;;  %v3863_v36 = vsel %vm10419_vm5, %v3858_v58, %v3862_v46  ;;  %v3870_v5 = vrot.slane %v3868_v61, 5  ;;  %v11184_v20 = vpop.f32.mrf.mxu1 }
 0x1ec   : > { %1612 = vst [vmem:[#allocation2 + $0x78] sm:$0xf] %v1611_v51  ;;  %v1381_v32 = vmax.f32 %v1365_v62, 0.0  ;;  %v1382_v25 = vmax.f32 %v1366_v56, 0.0  ;;  %v8368_v8 = vcombine.low %v3853_v7, %v3863_v36  ;;  %v3876_v17 = vrot.slane %v3874_v9, 5  ;;  %9296 = vmatpush3.bf16.msra.mxu0 %v9699_v34 }
 0x1ed   : > { %v3880_v31 = vrot.slane %v3878_v10, 4  ;;  %v3886_v18 = vrot.slane %v3884_v53, 5  ;;  %v3871_v57 = vor.u32 %v3870_v5, %v3867_v44  ;;  %v8850_v15 = vadd.f32 %v11067_v2, %v11056_v1  ;;  %9313 = vmatprep.subr.bf16.mxu0 %v11173_v63  ;;  %v1614_v53 = vld [vmem:[#allocation2 + $0x80] sm:$0x1] }
 0x1ee   : > { %v8739_v21 = vpack.c.bf16 %v1381_v32, %v1381_v32  ;;  %v8740_v33 = vpack.c.bf16 %v1382_v25, %v1382_v25  ;;  %9285 = vmatprep.mubr.msk.bf16.mxu1 %vm1943_vm2, %v8368_v8  ;;  %v8853_v7 = vadd.f32 %v11093_v50, %v11081_v16  ;;  %v8382_v34 = vrot.slane %v4082_v24, 9  ;;  %v11199_v50 = vpop.f32.mrf.mxu1  ;;  %v1617_v32 = vld [vmem:[#allocation2 + $0x84] sm:$0xf] }
 0x1ef   : > { %v3881_v46 = vor.u32 %v3880_v31, %v3876_v17  ;;  %9258 = vmatmul.mubr.msk.bf16.gmra.mxu0 %vm1943_vm2, %v9697_v30  ;;  %v4116_v58 = vrot.slane %v11005_v6, 5  ;;  %v3872_v1 = vrot.slane %v3871_v57, 4  ;;  %v1344_v51 = vmul.f32 %v8850_v15, %v10899_v45  ;;  %v4083_v57 = vld [vmem:[#allocation2 + $0x24] sm:$0xe] }
 0x1f0   : > { %v1468_v44 = vshrl.u32 %v8739_v21, 16  ;;  %v1471_v62 = vshll.u32 %v8739_v21, 16  ;;  %v1477_v56 = vshrl.u32 %v8740_v33, 16  ;;  %v1480_v61 = vshll.u32 %v8740_v33, 16  ;;  %9261 = vmatprep.mubr.msk.bf16.mxu0 %vm1943_vm2, %v9698_v43 }
 0x1f1   : > { %v3882_v2 = vrot.slane %v3881_v46, 4  ;;  %v1345_v9 = vmul.f32 %v8853_v7, %v10899_v45  ;;  %v4117_v16 = vsel %vm10434_vm8, %v8382_v34, %v4116_v58  ;;  %v4118_v6 = vrot.slane %v4116_v58, 4  ;;  %v9700_v7 = vld [vmem:[#allocation2 + $0x6c] sm:$0xff]  }
 0x1f2   : > { %v1470_v10 = vrot.slane %v1468_v44, 7  ;;  %v11195_v36 = vrot.slane %v1477_v56, 7  ;;  %v3877_v25 = vsel %vm10419_vm5, %v3872_v1, %v3876_v17  ;;  %v1367_v24 = vadd.f32 %v10920_v22, %v1344_v51 }
 0x1f3   : > { %v3887_v5 = vsel %vm10419_vm5, %v3882_v2, %v3886_v18  ;;  %v1368_v8 = vadd.f32 %v10920_v22, %v1345_v9  ;;  %v4119_v17 = vrot.slane %v11015_v41, 5  ;;  %v8856_v44 = vadd.f32 %v11123_v42, %v11108_v37  ;;  %v4084_v2 = vld [vmem:[#allocation2 + $0x30] sm:$0xe] }
 0x1f4   : > { %v1473_v31 = vor.u32 %v1471_v62, %v1470_v10  ;;  %v1475_v30 = vrot.slane %v1470_v10, 4  ;;  %v1482_v21 = vor.u32 %v1480_v61, %v11195_v36  ;;  %v1483_v33 = vrot.slane %v11195_v36, 4  ;;  %v8864_v62 = vpop.f32.mrf.mxu1 }
 0x1f5   : > { %v8369_v43 = vcombine.low %v3877_v25, %v3887_v5  ;;  %v1383_v15 = vmax.f32 %v1367_v24, 0.0  ;;  %v1384_v46 = vmax.f32 %v1368_v8, 0.0  ;;  %v8383_v56 = vrot.slane %v4083_v57, 9  ;;  %v1624_v8 = vld [vmem:[#allocation2 + $0x90] sm:$0xf] }
 0x1f6   : > { %v1474_v18 = vsel %vm10480_vm13, %v1466_v49, %v1473_v31  ;;  %v1615_v34 = vsel %vm10487_vm14, %v1475_v30, %v1614_v53  ;;  %v1618_v58 = vsel %vm10470_vm12, %v1482_v21, %v1617_v32  ;;  %v4120_v49 = vsel %vm10434_vm8, %v4118_v6, %v4119_v17 }
 0x1f7   : > { %1613 = vst.msk [vmem:[#allocation2 + $0x7c] sm:$0xf] %vm394_vm0, %v1474_v18  ;;  %1616 = vst [vmem:[#allocation2 + $0x80] sm:$0x1] %v1615_v34  ;;  %9286 = vmatmul.mubr.msk.bf16.gmra.mxu1 %vm1943_vm2, %v8369_v43  ;;  %v8741_v41 = vpack.c.bf16 %v1383_v15, %v1383_v15  ;;  %v8742_v29 = vpack.c.bf16 %v1384_v46, %v1384_v46  ;;  %9262 = vmatmul.mubr.msk.bf16.gmra.mxu0 %vm1943_vm2, %v9700_v7  ;;  %v4123_v42 = vrot.slane %v11037_v26, 5 }
 0x1f8   : > { %1619 = vst [vmem:[#allocation2 + $0x84] sm:$0xf] %v1618_v58  ;;  %v8390_v61 = vcombine.low %v4117_v16, %v4120_v49  ;;  %v1346_v1 = vmul.f32 %v8856_v44, %v10899_v45  ;;  %v8859_v37 = vadd.f32 %v11150_v47, %v11139_v40  ;;  %4538 = vmatprep.mubr.bf16.mxu1 %v12987_v52  ;;  %v11235_v40 = vpop.f32.mrf.mxu1  ;;  %v1621_v47 = vld [vmem:[#allocation2 + $0x8c] sm:$0x1]  ;;  %v4126_v5 = vrot.slane %v11039_v0, 5 }
 0x1f9   : > { %v1485_v51 = vshrl.u32 %v8741_v41, 16  ;;  %v1488_v9 = vshll.u32 %v8741_v41, 16  ;;  %v1494_v10 = vshrl.u32 %v8742_v29, 16  ;;  %v1497_v53 = vshll.u32 %v8742_v29, 16  ;;  %v4085_v34 = vld [vmem:[#allocation2 + $0x3c] sm:$0xe] }
 0x1fa   : > { %9297 = vmatprep.mubr.msk.bf16.mxu0 %vm1943_vm2, %v8390_v61  ;;  %v1369_v36 = vadd.f32 %v10920_v22, %v1346_v1  ;;  %v1347_v16 = vmul.f32 %v8859_v37, %v10899_v45  ;;  %v4124_v6 = vsel %vm10434_vm8, %v8383_v56, %v4123_v42  ;;  %v4125_v32 = vrot.slane %v4123_v42, 4  ;;  %v9702_v41 = vld [vmem:[#allocation6 + $0x30] sm:$0xff]  }
 0x1fb   : > { %v1487_v26 = vrot.slane %v1485_v51, 7  ;;  %v11237_v25 = vrot.slane %v1494_v10, 7  ;;  %v8384_v24 = vrot.slane %v4084_v2, 9  ;;  %v4130_v21 = vrot.slane %v11063_v35, 5  ;;  %v4086_v2 = vld [vmem:[#allocation2 + $0x48] sm:$0xe] }
 0x1fc   : > { %v1385_v31 = vmax.f32 %v1369_v36, 0.0  ;;  %v1370_v30 = vadd.f32 %v10920_v22, %v1347_v16  ;;  %v4133_v45 = vrot.slane %v11065_v23, 5  ;;  %v4127_v0 = vsel %vm10434_vm8, %v4125_v32, %v4126_v5  ;;  %v8867_v22 = vpop.f32.mrf.mxu1  ;;  %v1628_v16 = vld [vmem:[#allocation2 + $0x98] sm:$0x1]  ;;  %v11279_v5 = vld [vmem:[%s12973_s5] ss:$0 sm:$0xff] }
 0x1fd   : > { %v1490_v57 = vor.u32 %v1488_v9, %v1487_v26  ;;  %v1492_v43 = vrot.slane %v1487_v26, 4  ;;  %v1499_v15 = vor.u32 %v1497_v53, %v11237_v25  ;;  %v1500_v46 = vrot.slane %v11237_v25, 4  ;;  %v1631_v25 = vld [vmem:[#allocation2 + $0x9c] sm:$0xf] }
 0x1fe   : > { %v8743_v7 = vpack.c.bf16 %v1385_v31, %v1385_v31  ;;  %v1386_v17 = vmax.f32 %v1370_v30, 0.0  ;;  %v4131_v18 = vsel %vm10434_vm8, %v8384_v24, %v4130_v21  ;;  %v8391_v44 = vcombine.low %v4124_v6, %v4127_v0  ;;  %v8869_v36 = vpop.f32.mrf.mxu1 }
 0x1ff   : > { %v1491_v35 = vsel %vm10480_vm13, %v1483_v33, %v1490_v57  ;;  %v1622_v23 = vsel %vm10487_vm14, %v1492_v43, %v1621_v47  ;;  %v1625_v58 = vsel %vm10470_vm12, %v1499_v15, %v1624_v8  ;;  %v4132_v61 = vrot.slane %v4130_v21, 4 }
 0x200   : > { %1620 = vst.msk [vmem:[#allocation2 + $0x88] sm:$0xf] %vm394_vm0, %v1491_v35  ;;  %1623 = vst [vmem:[#allocation2 + $0x8c] sm:$0x1] %v1622_v23  ;;  %v1502_v29 = vshrl.u32 %v8743_v7, 16  ;;  %v1505_v49 = vshll.u32 %v8743_v7, 16  ;;  %v8744_v56 = vpack.c.bf16 %v1386_v17, %v1386_v17  ;;  %9298 = vmatmul.mubr.msk.bf16.vlgmr.msra.gmra.mxu0 %vm1943_vm2, %v8391_v44  ;;  %v8862_v33 = vadd.f32 %v11184_v20, %v11171_v39  ;;  %v8870_v15 = vpop.f32.mrf.mxu1 }
 0x201   : > { %1626 = vst [vmem:[#allocation2 + $0x90] sm:$0xf] %v1625_v58  ;;  %v8865_v1 = vadd.f32 %v8864_v62, %v11199_v50  ;;  %v8385_v37 = vrot.slane %v4085_v34, 9  ;;  %v4137_v42 = vrot.slane %v11075_v19, 5  ;;  %v4134_v53 = vsel %vm10434_vm8, %v4132_v61, %v4133_v45  ;;  %9314 = vmatpush3.bf16.msra.mxu0 %v11173_v63  ;;  %v11267_v39 = vld [vmem:[%s12972_s4] ss:$0 sm:$0xff] }
 0x202   : > { %v1504_v51 = vrot.slane %v1502_v29, 7  ;;  %v1511_v9 = vshrl.u32 %v8744_v56, 16  ;;  %v1514_v10 = vshll.u32 %v8744_v56, 16  ;;  %v8392_v6 = vcombine.low %v4131_v18, %v4134_v53  ;;  %9315 = vmatprep.subr.bf16.mxu0 %v9702_v41  ;;  %v9703_v62 = vld [vmem:[#allocation6 + $0x28] sm:$0xff]   ;;  %v9704_v58 = vld [vmem:[#allocation6 + $0x20] sm:$0xff]  }
 0x203   : > { %v1348_v20 = vmul.f32 %v11267_v39, %v8862_v33  ;;  %v1349_v19 = vmul.f32 %v11267_v39, %v8865_v1  ;;  %v4138_v50 = vsel %vm10434_vm8, %v8385_v37, %v4137_v42  ;;  %v4139_v63 = vrot.slane %v4137_v42, 4  ;;  %v8872_v1 = vpop.f32.mrf.mxu1  ;;  %v4088_v42 = vld [vmem:[#allocation2 + $0x60] sm:$0xe] }
 0x204   : > { %v1507_v32 = vor.u32 %v1505_v49, %v1504_v51  ;;  %v1509_v26 = vrot.slane %v1504_v51, 4  ;;  %v11273_v47 = vrot.slane %v1511_v9, 7  ;;  %9301 = vmatprep.mubr.msk.bf16.mxu0 %vm1943_vm2, %v8392_v6  ;;  %v4140_v31 = vrot.slane %v11079_v3, 5 }
 0x205   : > { %v1371_v24 = vadd.f32 %v11279_v5, %v1348_v20  ;;  %v1372_v8 = vadd.f32 %v11279_v5, %v1349_v19  ;;  %v8386_v30 = vrot.slane %v4086_v2, 9  ;;  %9316 = vmatpush3.bf16.msra.mxu0 %v9702_v41  ;;  %v4144_v0 = vrot.slane %v11090_v12, 5  ;;  %v1635_v2 = vld [vmem:[#allocation2 + $0xa4] sm:$0x1]  ;;  %v1638_v19 = vld [vmem:[#allocation2 + $0xa8] sm:$0xf] }
 0x206   : > { %v1508_v21 = vsel %vm10480_vm13, %v1500_v46, %v1507_v32  ;;  %v1629_v45 = vsel %vm10487_vm14, %v1509_v26, %v1628_v16  ;;  %v1516_v57 = vor.u32 %v1514_v10, %v11273_v47  ;;  %v1517_v43 = vrot.slane %v11273_v47, 4  ;;  %v4087_v46 = vld [vmem:[#allocation2 + $0x54] sm:$0xe]  ;;  %9317 = vmatprep.subr.bf16.mxu0 %v9703_v62 }
 0x207   : > { %1627 = vst.msk [vmem:[#allocation2 + $0x94] sm:$0xf] %vm394_vm0, %v1508_v21  ;;  %1630 = vst [vmem:[#allocation2 + $0x98] sm:$0x1] %v1629_v45  ;;  %v1387_v7 = vmax.f32 %v1371_v24, 0.0  ;;  %v1388_v17 = vmax.f32 %v1372_v8, 0.0  ;;  %v4141_v3 = vsel %vm10434_vm8, %v4139_v63, %v4140_v31  ;;  %v8868_v23 = vadd.f32 %v8867_v22, %v11235_v40  ;;  %v8873_v63 = vpop.f32.mrf.mxu1 }
 0x208   : > { %v1632_v18 = vsel %vm10470_vm12, %v1516_v57, %v1631_v25  ;;  %v8393_v34 = vcombine.low %v4138_v50, %v4141_v3  ;;  %v4147_v35 = vrot.slane %v11096_v4, 5  ;;  %v4145_v29 = vsel %vm10434_vm8, %v8386_v30, %v4144_v0 }
 0x209   : > { %1633 = vst [vmem:[#allocation2 + $0x9c] sm:$0xf] %v1632_v18  ;;  %v8745_v44 = vpack.c.bf16 %v1387_v7, %v1387_v7  ;;  %v8746_v41 = vpack.c.bf16 %v1388_v17, %v1388_v17  ;;  %v4146_v49 = vrot.slane %v4144_v0, 4  ;;  %v1350_v12 = vmul.f32 %v11267_v39, %v8868_v23  ;;  %9318 = vmatpush3.bf16.msra.mxu0 %v9703_v62  ;;  %v11317_v7 = vpop.f32.mrf.mxu1 }
 0x20a   : > { %9302 = vmatmul.mubr.msk.bf16.gmra.mxu0 %vm1943_vm2, %v8393_v34  ;;  %v8871_v56 = vadd.f32 %v8870_v15, %v8869_v36  ;;  %v8387_v61 = vrot.slane %v4087_v46, 9  ;;  %v4151_v33 = vrot.slane %v11106_v13, 5  ;;  %9319 = vmatprep.subr.bf16.mxu0 %v9704_v58  ;;  %v11309_v13 = vld [vmem:[#allocation6 + $0x18] sm:$0xff]   ;;  %v4154_v32 = vrot.slane %v11118_v54, 5  ;;  %v4089_v15 = vld [vmem:[#allocation2 + $0x6c] sm:$0xe] }
 0x20b   : > { %v1519_v4 = vshrl.u32 %v8745_v44, 16  ;;  %v1522_v37 = vshll.u32 %v8745_v44, 16  ;;  %v1528_v40 = vshrl.u32 %v8746_v41, 16  ;;  %v1531_v22 = vshll.u32 %v8746_v41, 16  ;;  %v11331_v34 = vld [vmem:[#allocation2 + $0x60] sm:$0xf] }
 0x20c   : > { %v4148_v51 = vsel %vm10434_vm8, %v4146_v49, %v4147_v35  ;;  %v1373_v9 = vadd.f32 %v11279_v5, %v1350_v12  ;;  %v1351_v10 = vmul.f32 %v11267_v39, %v8871_v56  ;;  %v4152_v53 = vsel %vm10434_vm8, %v8387_v61, %v4151_v33  ;;  %v11336_v12 = vpop.f32.mrf.mxu1  ;;  %v1642_v56 = vld [vmem:[#allocation2 + $0xb0] sm:$0x1] }
 0x20d   : > { %v1521_v36 = vrot.slane %v1519_v4, 7  ;;  %v1530_v16 = vrot.slane %v1528_v40, 7  ;;  %v8394_v6 = vcombine.low %v4145_v29, %v4148_v51  ;;  %v4153_v20 = vrot.slane %v4151_v33, 4  ;;  %9320 = vmatpush3.bf16.msra.mxu0 %v9704_v58 }
 0x20e   : > { %v1389_v50 = vmax.f32 %v1373_v9, 0.0  ;;  %v1374_v62 = vadd.f32 %v11279_v5, %v1351_v10  ;;  %v8388_v26 = vrot.slane %v4088_v42, 9  ;;  %v4158_v57 = vrot.slane %v11121_v11, 5  ;;  %9337 = vmatprep.subr.bf16.mxu0 %v11309_v13  ;;  %v11345_v42 = vld [vmem:[#allocation2 + $0x64] sm:$0xf] }
 0x20f   : > { %v1524_v25 = vor.u32 %v1522_v37, %v1521_v36  ;;  %v1526_v24 = vrot.slane %v1521_v36, 4  ;;  %v1533_v8 = vor.u32 %v1531_v22, %v1530_v16  ;;  %v1534_v31 = vrot.slane %v1530_v16, 4  ;;  %9305 = vmatprep.mubr.msk.bf16.mxu0 %vm1943_vm2, %v8394_v6  ;;  %v4860_v10 = vld [vmem:[#allocation2 + $0x68] sm:$0x1]  ;;  %v11356_v6 = vld [vmem:[#allocation2 + $0x6c] sm:$0xf] }
 0x210   : > { %v8747_v30 = vpack.c.bf16 %v1389_v50, %v1389_v50  ;;  %v1390_v21 = vmax.f32 %v1374_v62, 0.0  ;;  %v4155_v45 = vsel %vm10434_vm8, %v4153_v20, %v4154_v32  ;;  %v4159_v47 = vsel %vm10434_vm8, %v8388_v26, %v4158_v57  ;;  %v11358_v20 = vpop.f32.mrf.mxu1  ;;  %v11365_v26 = vld [vmem:[#allocation2 + $0x70] sm:$0xf] }
 0x211   : > { %v1525_v54 = vsel %vm10480_vm13, %v1517_v43, %v1524_v25  ;;  %v1636_v17 = vsel %vm10487_vm14, %v1526_v24, %v1635_v2  ;;  %v1639_v3 = vsel %vm10470_vm12, %v1533_v8, %v1638_v19  ;;  %v8395_v0 = vcombine.low %v4152_v53, %v4155_v45 }
 0x212   : > { %1634 = vst.msk [vmem:[#allocation2 + $0xa0] sm:$0xf] %vm394_vm0, %v1525_v54  ;;  %1637 = vst [vmem:[#allocation2 + $0xa4] sm:$0x1] %v1636_v17  ;;  %v1536_v11 = vshrl.u32 %v8747_v30, 16  ;;  %v1539_v46 = vshll.u32 %v8747_v30, 16  ;;  %v8748_v18 = vpack.c.bf16 %v1390_v21, %v1390_v21  ;;  %v8874_v23 = vadd.f32 %v8873_v63, %v8872_v1 }
 0x213   : > { %1640 = vst [vmem:[#allocation2 + $0xa8] sm:$0xf] %v1639_v3  ;;  %9306 = vmatmul.mubr.msk.bf16.gmra.mxu0 %vm1943_vm2, %v8395_v0  ;;  %v4160_v43 = vrot.slane %v4158_v57, 4  ;;  %v4161_v35 = vrot.slane %v11134_v14, 5  ;;  %v8389_v58 = vrot.slane %v4089_v15, 9  ;;  %v4165_v49 = vrot.slane %v11160_v48, 5  ;;  %v11374_v0 = vpop.f32.mrf.mxu1 }
 0x214   : > { %v1538_v44 = vrot.slane %v1536_v11, 7  ;;  %v1545_v41 = vshrl.u32 %v8748_v18, 16  ;;  %v1548_v29 = vshll.u32 %v8748_v18, 16  ;;  %v1352_v33 = vmul.f32 %v11267_v39, %v8874_v23  ;;  %v1645_v48 = vld [vmem:[#allocation2 + $0xb4] sm:$0xf] }
 0x215   : > { %v4162_v61 = vsel %vm10434_vm8, %v4160_v43, %v4161_v35  ;;  %v4168_v4 = vrot.slane %v11162_v60, 5  ;;  %v4869_v37 = vshrl.u32 %v11331_v34, 16  ;;  %v4166_v51 = vsel %vm10434_vm8, %v8389_v58, %v4165_v49  ;;  %v11376_v43 = vld [vmem:[#allocation2 + $0x78] sm:$0xf] }
 0x216   : > { %v1541_v14 = vor.u32 %v1539_v46, %v1538_v44  ;;  %v1543_v1 = vrot.slane %v1538_v44, 4  ;;  %v11343_v40 = vrot.slane %v1545_v41, 7  ;;  %v8396_v22 = vcombine.low %v4159_v47, %v4162_v61 }
 0x217   : > { %v1375_v2 = vadd.f32 %v11279_v5, %v1352_v33  ;;  %v4167_v9 = vrot.slane %v4165_v49, 4  ;;  %v4871_v16 = vrot.slane %v4869_v37, 4  ;;  %v4872_v62 = vshll.u32 %v11331_v34, 16  ;;  %v1649_v49 = vld [vmem:[#allocation2 + $0xbc] sm:$0x1] }
 0x218   : > { %v1542_v60 = vsel %vm10480_vm13, %v1534_v31, %v1541_v14  ;;  %v1643_v53 = vsel %vm10487_vm14, %v1543_v1, %v1642_v56  ;;  %v1550_v36 = vor.u32 %v1548_v29, %v11343_v40  ;;  %9309 = vmatprep.mubr.msk.bf16.mxu0 %vm1943_vm2, %v8396_v22  ;;  %v4878_v32 = vshll.u32 %v11345_v42, 16  ;;  %v4861_v31 = vld [vmem:[#allocation2 + $0x74] sm:$0x1]  ;;  %v11380_v14 = vld [vmem:[#allocation2 + $0x7c] sm:$0xf] }
 0x219   : > { %1641 = vst.msk [vmem:[#allocation2 + $0xac] sm:$0xf] %vm394_vm0, %v1542_v60  ;;  %1644 = vst [vmem:[#allocation2 + $0xb0] sm:$0x1] %v1643_v53  ;;  %v1391_v19 = vmax.f32 %v1375_v2, 0.0  ;;  %v4169_v50 = vsel %vm10434_vm8, %v4167_v9, %v4168_v4  ;;  %v4882_v24 = vshrl.u32 %v11345_v42, 16 }
 0x21a   : > { %v1646_v63 = vsel %vm10470_vm12, %v1550_v36, %v1645_v48  ;;  %v8397_v25 = vcombine.low %v4166_v51, %v4169_v50  ;;  %v4888_v8 = vshll.u32 %v4860_v10, 16  ;;  %v4874_v21 = vrot.slane %v4872_v62, 5 }
 0x21b   : > { %1647 = vst [vmem:[#allocation2 + $0xb4] sm:$0xf] %v1646_v63  ;;  %v8749_v30 = vpack.c.bf16 %v1391_v19, %v1391_v19  ;;  %v4880_v45 = vrot.slane %v4878_v32, 5  ;;  %v4893_v57 = vshrl.u32 %v11356_v6, 16  ;;  %v4884_v15 = vrot.slane %v4882_v24, 4 }
 0x21c   : > { %9310 = vmatmul.mubr.msk.bf16.gmra.mxu0 %vm1943_vm2, %v8397_v25  ;;  %v4890_v54 = vrot.slane %v4888_v8, 5  ;;  %v4896_v17 = vshll.u32 %v11356_v6, 16  ;;  %v4902_v3 = vshll.u32 %v11365_v26, 16  ;;  %v4875_v18 = vor.u32 %v4874_v21, %v4871_v16  ;;  %v11389_v16 = vld [vmem:[#allocation2 + $0x84] sm:$0xf] }
 0x21d   : > { %v1553_v11 = vshrl.u32 %v8749_v30, 16  ;;  %v1556_v46 = vshll.u32 %v8749_v30, 16  ;;  %v4895_v47 = vrot.slane %v4893_v57, 4  ;;  %v4885_v35 = vor.u32 %v4884_v15, %v4880_v45  ;;  %v11383_v22 = vpop.f32.mrf.mxu1  ;;  %v11408_v15 = vld [vmem:[#allocation2 + $0x88] sm:$0xf] }
 0x21e   : > { %v4898_v23 = vrot.slane %v4896_v17, 5  ;;  %v4904_v58 = vrot.slane %v4902_v3, 5  ;;  %v4906_v44 = vshrl.u32 %v11365_v26, 16  ;;  %v1551_v41 = vrot.slane %v11343_v40, 4  ;;  %v4862_v40 = vld [vmem:[#allocation2 + $0x80] sm:$0x1] }
 0x21f   : > { %v1555_v29 = vrot.slane %v1553_v11, 7  ;;  %v4876_v56 = vrot.slane %v4875_v18, 4  ;;  %v4912_v61 = vshll.u32 %v4861_v31, 16  ;;  %v4886_v33 = vrot.slane %v4885_v35, 4  ;;  %v11391_v19 = vpop.f32.mrf.mxu1 }
 0x220   : > { %v4899_v4 = vor.u32 %v4898_v23, %v4895_v47  ;;  %v4908_v37 = vrot.slane %v4906_v44, 4  ;;  %v4917_v1 = vshrl.u32 %v11376_v43, 16  ;;  %v4920_v63 = vshll.u32 %v11376_v43, 16  ;;  %v11415_v44 = vld [vmem:[#allocation2 + $0x90] sm:$0xf] }
 0x221   : > { %v1558_v48 = vor.u32 %v1556_v46, %v1555_v29  ;;  %v1560_v2 = vrot.slane %v1555_v29, 4  ;;  %v4881_v51 = vsel %vm10419_vm5, %v4876_v56, %v4880_v45  ;;  %v4914_v9 = vrot.slane %v4912_v61, 5  ;;  %v11403_v30 = vpop.f32.mrf.mxu1  ;;  %v4863_v46 = vld [vmem:[#allocation2 + $0x8c] sm:$0x1]  ;;  %v5937_v52 = vld [vmem:[#allocation2 + $0xb0] sm:$0x1] }
 0x222   : > { %v4891_v10 = vsel %vm10419_vm5, %v4886_v33, %v4890_v54  ;;  %v4900_v60 = vrot.slane %v4899_v4, 4  ;;  %v4909_v53 = vor.u32 %v4908_v37, %v4904_v58  ;;  %v4919_v36 = vrot.slane %v4917_v1, 4 }
 0x223   : > { %v1559_v50 = vsel %vm10480_vm13, %v1551_v41, %v1558_v48  ;;  %v1650_v62 = vsel %vm10487_vm14, %v1560_v2, %v1649_v49  ;;  %v8428_v32 = vcombine.low %v4881_v51, %v4891_v10  ;;  %v4926_v8 = vshll.u32 %v11380_v14, 16  ;;  %v11418_v56 = vpop.f32.mrf.mxu1 }
 0x224   : > { %1648 = vst.msk [vmem:[#allocation2 + $0xb8] sm:$0xf] %vm394_vm0, %v1559_v50  ;;  %1651 = vst [vmem:[#allocation2 + $0xbc] sm:$0x1] %v1650_v62  ;;  %v4905_v25 = vsel %vm10419_vm5, %v4900_v60, %v4904_v58  ;;  %v4910_v24 = vrot.slane %v4909_v53, 4  ;;  %v4930_v31 = vshrl.u32 %v11380_v14, 16  ;;  %v8877_v57 = vadd.f32 %v11336_v12, %v11317_v7 }
 0x225   : > { %9321 = vmatprep.mubr.msk.bf16.mxu0 %vm1943_vm2, %v8428_v32  ;;  %v4922_v21 = vrot.slane %v4920_v63, 5  ;;  %v4936_v45 = vshll.u32 %v4862_v40, 16  ;;  %v4941_v54 = vshrl.u32 %v11389_v16, 16  ;;  %v4928_v3 = vrot.slane %v4926_v8, 5  ;;  %v9706_v7 = vld [vmem:[#allocation6 + $0x10] sm:$0xff]  }
 0x226   : > { %v4915_v17 = vsel %vm10419_vm5, %v4910_v24, %v4914_v9  ;;  %v4932_v11 = vrot.slane %v4930_v31, 4  ;;  %v4944_v18 = vshll.u32 %v11389_v16, 16  ;;  %v1353_v58 = vmul.f32 %v11267_v39, %v8877_v57  ;;  %v11428_v53 = vld [vmem:[#allocation2 + $0x94] sm:$0xf]  ;;  %v4864_v31 = vld [vmem:[#allocation2 + $0x98] sm:$0x1] }
 0x227   : > { %v8429_v47 = vcombine.low %v4905_v25, %v4915_v17  ;;  %v4923_v35 = vor.u32 %v4922_v21, %v4919_v36  ;;  %v4938_v23 = vrot.slane %v4936_v45, 5  ;;  %v4943_v41 = vrot.slane %v4941_v54, 4  ;;  %v9707_v36 = vld [vmem:[#allocation6 + $0x8] sm:$0xff]  }
 0x228   : > { %v4933_v12 = vor.u32 %v4932_v11, %v4928_v3  ;;  %v4946_v29 = vrot.slane %v4944_v18, 5  ;;  %v4950_v49 = vshll.u32 %v11408_v15, 16  ;;  %v1376_v33 = vadd.f32 %v11279_v5, %v1353_v58  ;;  %v11424_v51 = vpop.f32.mrf.mxu1 }
 0x229   : > { %9322 = vmatmul.mubr.msk.bf16.vlgmr.msra.gmra.mxu0 %vm1943_vm2, %v8429_v47  ;;  %v4924_v61 = vrot.slane %v4923_v35, 4  ;;  %v4954_v4 = vshrl.u32 %v11408_v15, 16  ;;  %v4960_v37 = vshll.u32 %v4863_v46, 16  ;;  %v8880_v32 = vadd.f32 %v11374_v0, %v11358_v20  ;;  %v11444_v0 = vld [vmem:[#allocation2 + $0x9c] sm:$0xf] }
 0x22a   : > { %v4934_v1 = vrot.slane %v4933_v12, 4  ;;  %v4947_v48 = vor.u32 %v4946_v29, %v4943_v41  ;;  %v4952_v2 = vrot.slane %v4950_v49, 5  ;;  %9338 = vmatpush3.bf16.msra.mxu0 %v11309_v13  ;;  %v1392_v40 = vmax.f32 %v1376_v33, 0.0  ;;  %v11435_v63 = vpop.f32.mrf.mxu1  ;;  %v11459_v33 = vld [vmem:[#allocation2 + $0xa0] sm:$0xf] }
 0x22b   : > { %v4929_v9 = vsel %vm10419_vm5, %v4924_v61, %v4928_v3  ;;  %v4956_v10 = vrot.slane %v4954_v4, 4  ;;  %v4962_v60 = vrot.slane %v4960_v37, 5  ;;  %9339 = vmatprep.subr.bf16.mxu0 %v9706_v7  ;;  %v4965_v13 = vshrl.u32 %v11415_v44, 16 }
 0x22c   : > { %v4939_v50 = vsel %vm10419_vm5, %v4934_v1, %v4938_v23  ;;  %v4948_v62 = vrot.slane %v4947_v48, 4  ;;  %v8750_v24 = vpack.c.bf16 %v1392_v40, %v1392_v40  ;;  %v4968_v21 = vshll.u32 %v11415_v44, 16  ;;  %v11446_v3 = vpop.f32.mrf.mxu1  ;;  %v9708_v23 = vld [vmem:[#allocation6] sm:$0xff]   ;;  %v1652_v1 = vld [vmem:[#allocation2 + $0xc0] sm:$0xf] }
 0x22d   : > { %v8430_v25 = vcombine.low %v4929_v9, %v4939_v50  ;;  %v4957_v8 = vor.u32 %v4956_v10, %v4952_v2  ;;  %v11438_v45 = vpop.f32.mrf.mxu0  ;;  %v1354_v54 = vmul.f32 %v11267_v39, %v8880_v32  ;;  %v4967_v17 = vrot.slane %v4965_v13, 4  ;;  %v4865_v9 = vld [vmem:[#allocation2 + $0xa4] sm:$0x1]  ;;  %v11469_v13 = vld [vmem:[#allocation6 + $0x78] sm:$0xff]  }
 0x22e   : > { %v4953_v57 = vsel %vm10419_vm5, %v4948_v62, %v4952_v2  ;;  %v4974_v20 = vshll.u32 %v11428_v53, 16  ;;  %9340 = vmatpush3.bf16.msra.mxu0 %v9706_v7  ;;  %v1562_v11 = vshrl.u32 %v8750_v24, 16  ;;  %v1565_v46 = vshll.u32 %v8750_v24, 16  ;;  %v11453_v29 = vpop.f32.mrf.mxu1 }
 0x22f   : > { %9325 = vmatprep.mubr.msk.bf16.mxu0 %vm1943_vm2, %v8430_v25  ;;  %v4958_v18 = vrot.slane %v4957_v8, 4  ;;  %v4970_v47 = vrot.slane %v4968_v21, 5  ;;  %9341 = vmatprep.subr.bf16.mxu0 %v9707_v36  ;;  %v11449_v35 = vpop.f32.mrf.mxu0  ;;  %v1377_v39 = vadd.f32 %v11279_v5, %v1354_v54  ;;  %v4978_v12 = vshrl.u32 %v11428_v53, 16 }
 0x230   : > { %v4976_v58 = vrot.slane %v4974_v20, 5  ;;  %v4984_v41 = vshll.u32 %v4864_v31, 16  ;;  %v11455_v7 = vrot.slane %v1562_v11, 7  ;;  %v4989_v4 = vshrl.u32 %v11444_v0, 16 }
 0x231   : > { %v4963_v49 = vsel %vm10419_vm5, %v4958_v18, %v4962_v60  ;;  %v4971_v61 = vor.u32 %v4970_v47, %v4967_v17  ;;  %v11462_v37 = vpop.f32.mrf.mxu0  ;;  %v1393_v48 = vmax.f32 %v1377_v39, 0.0  ;;  %v4980_v2 = vrot.slane %v4978_v12, 4  ;;  %v11479_v17 = vld [vmem:[#allocation2 + $0xa8] sm:$0xf] }
 0x232   : > { %v8431_v5 = vcombine.low %v4953_v57, %v4963_v49  ;;  %9342 = vmatpush3.bf16.msra.mxu0 %v9707_v36  ;;  %v1567_v40 = vor.u32 %v1565_v46, %v11455_v7  ;;  %v4986_v50 = vrot.slane %v4984_v41, 5  ;;  %v4991_v62 = vrot.slane %v4989_v4, 4  ;;  %v11486_v49 = vld [vmem:[#allocation2 + $0xac] sm:$0xf] }
 0x233   : > { %v4972_v10 = vrot.slane %v4971_v61, 4  ;;  %9343 = vmatprep.subr.bf16.mxu0 %v9708_v23  ;;  %v11465_v60 = vpop.f32.mrf.mxu0  ;;  %v11467_v32 = vpop.f32.mrf.mxu1  ;;  %v8751_v25 = vpack.c.bf16 %v1393_v48, %v1393_v48  ;;  %v4981_v24 = vor.u32 %v4980_v2, %v4976_v58  ;;  %v4992_v8 = vshll.u32 %v11444_v0, 16 }
 0x234   : > { %9326 = vmatmul.mubr.msk.bf16.gmra.mxu0 %vm1943_vm2, %v8431_v5  ;;  %v4998_v36 = vshll.u32 %v11459_v33, 16  ;;  %v1653_v31 = vsel %vm10470_vm12, %v1567_v40, %v1652_v1  ;;  %v5002_v57 = vshrl.u32 %v11459_v33, 16  ;;  %v5008_v54 = vshll.u32 %v4865_v9, 16  ;;  %v4866_v40 = vld [vmem:[#allocation2 + $0xb0] sm:$0x1] }
 0x235   : > { %v4977_v21 = vsel %vm10419_vm5, %v4972_v10, %v4976_v58  ;;  %v11481_v20 = vpop.f32.mrf.mxu0  ;;  %v11483_v11 = vpop.f32.mrf.mxu1  ;;  %1654 = vst [vmem:[#allocation2 + $0xc0] sm:$0xf] %v1653_v31  ;;  %v1570_v46 = vshrl.u32 %v8751_v25, 16  ;;  %v1573_v18 = vshll.u32 %v8751_v25, 16  ;;  %v4982_v47 = vrot.slane %v4981_v24, 4 }
 0x236   : > { %v4994_v39 = vrot.slane %v4992_v8, 5  ;;  %9344 = vmatpush3.bf16.msra.mxu0 %v9708_v23  ;;  %v1568_v28 = vrot.slane %v11455_v7, 4  ;;  %v5000_v12 = vrot.slane %v4998_v36, 5  ;;  %v5004_v41 = vrot.slane %v5002_v57, 4  ;;  %v1656_v7 = vld [vmem:[#allocation2 + $0xc8] sm:$0x1] }
 0x237   : > { %v5010_v58 = vrot.slane %v5008_v54, 5  ;;  %v11488_v61 = vpop.f32.mrf.mxu0  ;;  %v11490_v4 = vpop.f32.mrf.mxu1  ;;  %9385 = vmatprep.subr.bf16.mxu0 %v11469_v13  ;;  %v1572_v1 = vrot.slane %v1570_v46, 7  ;;  %v4987_v5 = vsel %vm10419_vm5, %v4982_v47, %v4986_v50  ;;  %v11497_v23 = vadd.f32 %v11383_v22, %v11438_v45  ;;  %v11508_v54 = vld [vmem:[#allocation2 + $0xb8] sm:$0xf] }
 0x238   : > { %v4995_v48 = vor.u32 %v4994_v39, %v4991_v62  ;;  %v8432_v2 = vcombine.low %v4977_v21, %v4987_v5  ;;  %v5005_v9 = vor.u32 %v5004_v41, %v5000_v12  ;;  %v5013_v10 = vshrl.u32 %v11479_v17, 16  ;;  %v11504_v62 = vld [vmem:[#allocation2 + $0xb4] sm:$0xf]  ;;  %v4867_v5 = vld [vmem:[#allocation2 + $0xbc] sm:$0x1] }
 0x239   : > { %v5016_v25 = vshll.u32 %v11479_v17, 16  ;;  %v11501_v24 = vpop.f32.mrf.mxu1  ;;  %v1575_v8 = vor.u32 %v1573_v18, %v1572_v1  ;;  %v1577_v36 = vrot.slane %v1572_v1, 4  ;;  %v5022_v50 = vshll.u32 %v11486_v49, 16  ;;  %v9112_v46 = vpop.f32.mrf.mxu0 }
 0x23a   : > { %v4996_v31 = vrot.slane %v4995_v48, 4  ;;  %9329 = vmatprep.mubr.msk.bf16.mxu0 %vm1943_vm2, %v8432_v2  ;;  %v5006_v22 = vrot.slane %v5005_v9, 4  ;;  %v5015_v45 = vrot.slane %v5013_v10, 4  ;;  %v5026_v57 = vshrl.u32 %v11486_v49, 16 }
 0x23b   : > { %v5018_v21 = vrot.slane %v5016_v25, 5  ;;  %v11510_v47 = vpop.f32.mrf.mxu1  ;;  %v1576_v18 = vsel %vm10480_vm13, %v1568_v28, %v1575_v8  ;;  %v1657_v39 = vsel %vm10487_vm14, %v1577_v36, %v1656_v7  ;;  %v5024_v1 = vrot.slane %v5022_v50, 5  ;;  %v11533_v50 = vpop.f32.mrf.mxu0 }
 0x23c   : > { %v5001_v41 = vsel %vm10419_vm5, %v4996_v31, %v5000_v12  ;;  %1655 = vst.msk [vmem:[#allocation2 + $0xc4] sm:$0xf] %vm394_vm0, %v1576_v18  ;;  %1658 = vst [vmem:[#allocation2 + $0xc8] sm:$0x1] %v1657_v39  ;;  %v5011_v48 = vsel %vm10419_vm5, %v5006_v22, %v5010_v58  ;;  %v5028_v9 = vrot.slane %v5026_v57, 4  ;;  %v5032_v10 = vshll.u32 %v4866_v40, 16 }
 0x23d   : > { %v5019_v2 = vor.u32 %v5018_v21, %v5015_v45  ;;  %v11521_v25 = vpop.f32.mrf.mxu1  ;;  %v8433_v59 = vcombine.low %v5001_v41, %v5011_v48  ;;  %v5037_v28 = vshrl.u32 %v11504_v62, 16  ;;  %v5040_v12 = vshll.u32 %v11504_v62, 16  ;;  %v9735_v58 = vld [vmem:[%s12971_s3 + $0x34] ss:$8 sps:$4 sm:$0xff]  }
 0x23e   : > { %v5046_v7 = vshll.u32 %v11508_v54, 16  ;;  %v5029_v36 = vor.u32 %v5028_v9, %v5024_v1  ;;  %v5034_v40 = vrot.slane %v5032_v10, 5  ;;  %v5050_v31 = vshrl.u32 %v11508_v54, 16  ;;  %4514 = vmatprep.subr.bf16.mxu1 %v9735_v58 }
 0x23f   : > { %v5020_v8 = vrot.slane %v5019_v2, 4  ;;  %v9144_v22 = vpop.f32.mrf.mxu1  ;;  %9330 = vmatmul.mubr.msk.bf16.gmra.mxu0 %vm1943_vm2, %v8433_v59  ;;  %v5039_v45 = vrot.slane %v5037_v28, 4  ;;  %v5042_v21 = vrot.slane %v5040_v12, 5  ;;  %v5056_v18 = vshll.u32 %v4867_v5, 16  ;;  %4515 = vmatpush1.bf16.msra.mxu1 %v9733_v55  ;;  %v9736_v55 = vld [vmem:[%s12971_s3 + $0x20] ss:$8 sps:$4 sm:$0xff]  }
 0x240   : > { %v5048_v57 = vrot.slane %v5046_v7, 5  ;;  %v5030_v41 = vrot.slane %v5029_v36, 4  ;;  %v5052_v48 = vrot.slane %v5050_v31, 4  ;;  %v11542_v10 = vadd.f32 %v11391_v19, %v11449_v35  ;;  %v9738_v19 = vld [vmem:[%s12971_s3 + $0x24] ss:$8 sps:$4 sm:$0xff]  }
 0x241   : > { %v5025_v39 = vsel %vm10419_vm5, %v5020_v8, %v5024_v1  ;;  %v11538_v2 = vpop.f32.mrf.mxu1  ;;  %v5043_v9 = vor.u32 %v5042_v21, %v5039_v45  ;;  %v5058_v12 = vrot.slane %v5056_v18, 5  ;;  %v11548_v5 = vadd.f32 %v11403_v30, %v11462_v37  ;;  %4516 = vmatprep.subr.bf16.mxu1 %v9738_v19 }
 0x242   : > { %v5035_v59 = vsel %vm10419_vm5, %v5030_v41, %v5034_v40  ;;  %v5053_v28 = vor.u32 %v5052_v48, %v5048_v57  ;;  %v9115_v1 = vpop.f32.mrf.mxu0  ;;  %v11558_v36 = vadd.f32 %v11424_v51, %v11481_v20  ;;  %v11562_v30 = vadd.f32 %v11435_v63, %v11488_v61 }
 0x243   : > { %v9179_v7 = vpop.f32.mrf.mxu1  ;;  %v8434_v35 = vcombine.low %v5025_v39, %v5035_v59  ;;  %v5044_v58 = vrot.slane %v5043_v9, 4  ;;  %v11570_v45 = vadd.f32 %v11446_v3, %v9112_v46  ;;  %v11575_v20 = vadd.f32 %v11467_v32, %v9115_v1  ;;  %4517 = vmatpush1.bf16.msra.mxu1 %v9736_v55  ;;  %v9739_v3 = vld [vmem:[%s12971_s3 + $0x10] ss:$8 sps:$4 sm:$0xff]   ;;  %v9741_v46 = vld [vmem:[%s12971_s3 + $0x14] ss:$8 sps:$4 sm:$0xff]   ;;  %v9712_v55 = vld [vmem:[#allocation6 + $0x70] sm:$0xff]  }
 0x244   : > { %v5054_v8 = vrot.slane %v5053_v28, 4  ;;  %v2034_v37 = vpop.f32.mrf.mxu0  ;;  %v8448_v32 = vcombine.low %v11331_v34, %v11345_v42  ;;  %4518 = vmatprep.subr.bf16.mxu1 %v9741_v46  ;;  %v8450_v34 = vcombine.low %v11376_v43, %v11380_v14  ;;  %v8449_v1 = vcombine.low %v11356_v6, %v11365_v26  ;;  %v9744_v43 = vld [vmem:[%s12971_s3 + $0x4] ss:$8 sps:$4 sm:$0xff]  }
 0x245   : > { %v11564_v40 = vpop.f32.mrf.mxu1  ;;  %9333 = vmatprep.mubr.msk.bf16.mxu0 %vm1943_vm2, %v8434_v35  ;;  %v5049_v31 = vsel %vm10419_vm5, %v5044_v58, %v5048_v57  ;;  %v11578_v63 = vadd.f32 %v11483_v11, %v2034_v37  ;;  %v9715_v14 = vld [vmem:[#allocation6 + $0x68] sm:$0xff]   ;;  %v8451_v37 = vcombine.low %v11389_v16, %v11408_v15 }
 0x246   : > { %v5059_v51 = vsel %vm10419_vm5, %v5054_v8, %v5058_v12  ;;  %v9116_v61 = vpop.f32.mrf.mxu0 }
 0x247   : > { %v9180_v21 = vpop.f32.mrf.mxu1  ;;  %v8435_v18 = vcombine.low %v5049_v31, %v5059_v51  ;;  %v11581_v39 = vadd.f32 %v11490_v4, %v9116_v61  ;;  %4519 = vmatpush1.bf16.msra.mxu1 %v9739_v3  ;;  %v9717_v3 = vld [vmem:[#allocation6 + $0x60] sm:$0xff]  }
 0x248   : > { %v11591_v11 = vpop.f32.mrf.mxu0  ;;  %4520 = vmatprep.subr.bf16.mxu1 %v9744_v43 }
 0x249   : > { %v11593_v57 = vpop.f32.mrf.mxu1  ;;  %9334 = vmatmul.mubr.msk.bf16.gmra.mxu0 %vm1943_vm2, %v8435_v18 }
 0x24a   : > { %9345 = vmatprep.mubr.msk.bf16.mxu0 %vm1943_vm2, %v8448_v32  ;;  %v9119_v4 = vpop.f32.mrf.mxu0 }
 0x24b   : > { %v9183_v41 = vpop.f32.mrf.mxu1  ;;  %v11598_v48 = vadd.f32 %v11510_v47, %v9119_v4 }
 0x24c   : > { %v2050_v9 = vpop.f32.mrf.mxu0 }
 0x24d   : > { %v2690_v59 = vpop.f32.mrf.mxu1  ;;  %v11601_v28 = vadd.f32 %v11521_v25, %v2050_v9  ;;  %v9742_v25 = vld [vmem:[%s12971_s3] ss:$8 sps:$4 sm:$0xff]   ;;  %v8453_v9 = vcombine.low %v11444_v0, %v11459_v33 }
 0x24e   : > { %v9120_v42 = vpop.f32.mrf.mxu0  ;;  %4521 = vmatpush1.bf16.msra.mxu1 %v9742_v25 }
 0x24f   : > { %v9184_v12 = vpop.f32.mrf.mxu1  ;;  %v11607_v19 = vadd.f32 %v9144_v22, %v9120_v42  ;;  %v8454_v42 = vcombine.low %v11479_v17, %v11486_v49 }
 0x250   : > { %v11609_v35 = vpop.f32.mrf.mxu0 }
 0x251   : > { %v11611_v47 = vpop.f32.mrf.mxu1  ;;  %9346 = vmatmul.mubr.msk.bf16.vlgmr.msra.gmra.mxu0 %vm1943_vm2, %v8449_v1 }
 0x252   : > { %9349 = vmatprep.mubr.msk.bf16.mxu0 %vm1943_vm2, %v8450_v34  ;;  %9386 = vmatpush3.bf16.msra.mxu0 %v11469_v13  ;;  %v9155_v6 = vpop.f32.mrf.mxu0  ;;  %v8452_v13 = vcombine.low %v11415_v44, %v11428_v53  ;;  %v11642_v44 = vld [vmem:[#allocation6 + $0x58] sm:$0xff]  }
 0x253   : > { %v9187_v26 = vpop.f32.mrf.mxu1  ;;  %9387 = vmatprep.subr.bf16.mxu0 %v9712_v55  ;;  %v2513_v22 = vadd.f32 %v9155_v6, %v11497_v23  ;;  %v2191_v23 = vadd.f32 %v11418_v56, %v11465_v60  ;;  %13023 = vst [vmem:[#allocation16_spill] sm:$0xff] %v11642_v44  ;;  %9361 = vmatprep.subr.bf16.mxu1 %v11642_v44 }
 0x254   : > { %v2448_v58 = vpop.f32.mrf.mxu0 }
 0x255   : > { %v2706_v8 = vpop.f32.mrf.mxu1  ;;  %v11626_v31 = vadd.f32 %v2448_v58, %v11542_v10  ;;  %v11628_v51 = vadd.f32 %v9179_v7, %v2513_v22 }
 0x256   : > { %9388 = vmatpush3.bf16.msra.mxu0 %v9712_v55  ;;  %v9156_v61 = vpop.f32.mrf.mxu0 }
 0x257   : > { %v9188_v18 = vpop.f32.mrf.mxu1  ;;  %9389 = vmatprep.subr.bf16.mxu0 %v9715_v14  ;;  %v2514_v46 = vadd.f32 %v9156_v61, %v11548_v5  ;;  %v9723_v5 = vld [vmem:[#allocation6 + $0xb8] sm:$0xff]  }
 0x258   : > { %v2451_v32 = vpop.f32.mrf.mxu0 }
 0x259   : > { %v11635_v16 = vpop.f32.mrf.mxu1  ;;  %9350 = vmatmul.mubr.msk.bf16.gmra.mxu0 %vm1943_vm2, %v8451_v37  ;;  %v11638_v15 = vadd.f32 %v2451_v32, %v2191_v23  ;;  %v11640_v10 = vadd.f32 %v9180_v21, %v2514_v46  ;;  %v2239_v23 = vadd.f32 %v11538_v2, %v11609_v35  ;;  %v9725_v46 = vld [vmem:[#allocation6 + $0xb0] sm:$0xff]   ;;  %v9727_v35 = vld [vmem:[#allocation6 + $0xa8] sm:$0xff]  }
 0x25a   : > { %9353 = vmatprep.mubr.msk.bf16.mxu0 %vm1943_vm2, %v8452_v13  ;;  %9390 = vmatpush3.bf16.msra.mxu0 %v9715_v14  ;;  %v9159_v53 = vpop.f32.mrf.mxu0 }
 0x25b   : > { %v9191_v56 = vpop.f32.mrf.mxu1  ;;  %9391 = vmatprep.subr.bf16.mxu0 %v9717_v3  ;;  %v2517_v60 = vadd.f32 %v9159_v53, %v11558_v36  ;;  %v2207_v36 = vadd.f32 %v11453_v29, %v11533_v50 }
 0x25c   : > { %v2464_v7 = vpop.f32.mrf.mxu0 }
 0x25d   : > { %v2722_v4 = vpop.f32.mrf.mxu1  ;;  %v2515_v21 = vadd.f32 %v2464_v7, %v11562_v30  ;;  %v11650_v34 = vadd.f32 %v9183_v41, %v2517_v60 }
 0x25e   : > { %9392 = vmatpush3.bf16.msra.mxu0 %v9717_v3  ;;  %v9160_v1 = vpop.f32.mrf.mxu0  ;;  %v9718_v3 = vld [vmem:[#allocation2 + $0x78] sm:$0xff]  }
 0x25f   : > { %v9192_v55 = vpop.f32.mrf.mxu1  ;;  %v2518_v25 = vadd.f32 %v9160_v1, %v11570_v45  ;;  %9433 = vmatprep.subr.bf16.mxu0 %v9723_v5  ;;  %v11657_v43 = vadd.f32 %v2690_v59, %v2515_v21  ;;  %v8455_v45 = vcombine.low %v11504_v62, %v11508_v54  ;;  %v9720_v21 = vld [vmem:[#allocation2 + $0x90] sm:$0xff]  }
 0x260   : > { %v2467_v6 = vpop.f32.mrf.mxu0 }
 0x261   : > { %v11659_v0 = vpop.f32.mrf.mxu1  ;;  %9354 = vmatmul.mubr.msk.bf16.gmra.mxu0 %vm1943_vm2, %v8453_v9  ;;  %v11662_v33 = vadd.f32 %v2467_v6, %v2207_v36  ;;  %v11664_v30 = vadd.f32 %v9184_v12, %v2518_v25  ;;  %v2223_v12 = vadd.f32 %v11501_v24, %v11591_v11 }
 0x262   : > { %13024 = vst [vmem:[#allocation17_spill] sm:$0xff] %v11659_v0  ;;  %9357 = vmatprep.mubr.msk.bf16.mxu0 %vm1943_vm2, %v8454_v42  ;;  %v9163_v17 = vpop.f32.mrf.mxu0  ;;  %v9728_v42 = vld [vmem:[#allocation6 + $0xa0] sm:$0xff]   ;;  %v5943_v0 = vld [vmem:[#allocation2 + $0xc8] sm:$0x1] }
 0x263   : > { %v2521_v49 = vadd.f32 %v9163_v17, %v11575_v20  ;;  %v11668_v29 = vpop.f32.mrf.mxu1  ;;  %v9716_v20 = vld [vmem:[#allocation2 + $0x6c] sm:$0xff]  }
 0x264   : > { %v2480_v50 = vpop.f32.mrf.mxu0  ;;  %v11728_v17 = vld [vmem:[#allocation6 + $0xf8] sm:$0xff]  }
 0x265   : > { %v2519_v41 = vadd.f32 %v2480_v50, %v11578_v63  ;;  %v11673_v59 = vadd.f32 %v9187_v26, %v2521_v49  ;;  %v11678_v58 = vpop.f32.mrf.mxu1  ;;  %v5921_v49 = vld [vmem:[#allocation2 + $0x70] sm:$0xf] }
 0x266   : > { %v9164_v14 = vpop.f32.mrf.mxu0  ;;  %v6363_v50 = vrot.slane %v5921_v49, 5 }
 0x267   : > { %v2522_v22 = vadd.f32 %v9164_v14, %v11581_v39  ;;  %v11680_v37 = vadd.f32 %v2706_v8, %v2519_v41  ;;  %v11689_v24 = vpop.f32.mrf.mxu1  ;;  %v5922_v41 = vld [vmem:[#allocation2 + $0x74] sm:$0x1]  ;;  %v6329_v14 = vld [vmem:[#allocation2 + $0x6c] sm:$0xe] }
 0x268   : > { %v2483_v13 = vpop.f32.mrf.mxu0 }
 0x269   : > { %9358 = vmatmul.mubr.msk.bf16.gmra.mxu0 %vm1943_vm2, %v8455_v45  ;;  %v11683_v61 = vadd.f32 %v2483_v13, %v2223_v12  ;;  %v11685_v62 = vadd.f32 %v9188_v18, %v2522_v22  ;;  %v11697_v32 = vpop.f32.mrf.mxu1  ;;  %v9722_v22 = vld [vmem:[#allocation2 + $0xa8] sm:$0xff]  }
 0x26a   : > { %9393 = vmatprep.mubr.msk.bf16.mxu0 %vm1943_vm2, %v9716_v20  ;;  %v9167_v54 = vpop.f32.mrf.mxu0 }
 0x26b   : > { %v2525_v63 = vadd.f32 %v9167_v54, %v11598_v48  ;;  %v9719_v48 = vld [vmem:[#allocation2 + $0x84] sm:$0xff]   ;;  %v9724_v54 = vld [vmem:[#allocation2 + $0xb4] sm:$0xff]  }
 0x26c   : > { %v2496_v39 = vpop.f32.mrf.mxu0 }
 0x26d   : > { %v2523_v11 = vadd.f32 %v2496_v39, %v11601_v28  ;;  %v11692_v26 = vadd.f32 %v9191_v56, %v2525_v63  ;;  %v11707_v56 = vpop.f32.mrf.mxu1  ;;  %v6365_v39 = vrot.slane %v6363_v50, 4 }
 0x26e   : > { %v9168_v8 = vpop.f32.mrf.mxu0 }
 0x26f   : > { %v2526_v18 = vadd.f32 %v9168_v8, %v11607_v19  ;;  %v11699_v53 = vadd.f32 %v2722_v4, %v2523_v11  ;;  %v11714_v1 = vpop.f32.mrf.mxu1  ;;  %v6366_v11 = vrot.slane %v5922_v41, 5 }
 0x270   : > { %v2499_v60 = vpop.f32.mrf.mxu0 }
 0x271   : > { %9394 = vmatmul.mubr.msk.bf16.vlgmr.msra.gmra.mxu0 %vm1943_vm2, %v9718_v3  ;;  %v11702_v7 = vadd.f32 %v2499_v60, %v2239_v23  ;;  %v11704_v28 = vadd.f32 %v9192_v55, %v2526_v18  ;;  %v11723_v25 = vpop.f32.mrf.mxu1  ;;  %v5924_v23 = vld [vmem:[#allocation2 + $0x7c] sm:$0xf]  ;;  %v5925_v3 = vld [vmem:[#allocation2 + $0x80] sm:$0x1]  ;;  %v6367_v60 = vsel %vm10434_vm8, %v6365_v39, %v6366_v11 }
 0x272   : > { %9397 = vmatprep.mubr.msk.bf16.mxu0 %vm1943_vm2, %v9719_v48  ;;  %9434 = vmatpush3.bf16.msra.mxu0 %v9723_v5  ;;  %v9203_v2 = vpop.f32.mrf.mxu0  ;;  %v9721_v5 = vld [vmem:[#allocation2 + $0x9c] sm:$0xff]   ;;  %13026 = vst [vmem:[#allocation19_spill] sm:$0xff] %v11723_v25  ;;  %v6370_v18 = vrot.slane %v5924_v23, 5  ;;  %v6373_v49 = vrot.slane %v5925_v3, 5  ;;  %v2746_v3 = vadd.f32 %v11635_v16, %v11683_v61 }
 0x273   : > { %13025 = vst [vmem:[#allocation18_spill] sm:$0xff] %v11702_v7  ;;  %9435 = vmatprep.subr.bf16.mxu0 %v9725_v46  ;;  %v11710_v19 = vadd.f32 %v9203_v2, %v11628_v51  ;;  %v11733_v20 = vpop.f32.mrf.mxu1  ;;  %v5928_v2 = vld [vmem:[#allocation2 + $0x8c] sm:$0x1]  ;;  %v5933_v11 = vld [vmem:[#allocation2 + $0xa0] sm:$0xf] }
 0x274   : > { %v11712_v4 = vpop.f32.mrf.mxu0  ;;  %13027 = vst [vmem:[#allocation20_spill] sm:$0xff] %v11733_v20 }
 0x276   : > { %9436 = vmatpush3.bf16.msra.mxu0 %v9725_v46  ;;  %v9204_v9 = vpop.f32.mrf.mxu0  ;;  %v6330_v46 = vld [vmem:[#allocation2 + $0x78] sm:$0xe] }
 0x277   : > { %9437 = vmatprep.subr.bf16.mxu0 %v9727_v35  ;;  %v11717_v55 = vadd.f32 %v9204_v9, %v11640_v10 }
 0x278   : > { %v11719_v36 = vpop.f32.mrf.mxu0 }
 0x279   : > { %9398 = vmatmul.mubr.msk.bf16.gmra.mxu0 %vm1943_vm2, %v9720_v21 }
 0x27a   : > { %9401 = vmatprep.mubr.msk.bf16.mxu0 %vm1943_vm2, %v9721_v5  ;;  %9438 = vmatpush3.bf16.msra.mxu0 %v9727_v35  ;;  %v9207_v51 = vpop.f32.mrf.mxu0  ;;  %v6331_v35 = vld [vmem:[#allocation2 + $0x84] sm:$0xe] }
 0x27b   : > { %9439 = vmatprep.subr.bf16.mxu0 %v9728_v42  ;;  %v11726_v6 = vadd.f32 %v9207_v51, %v11650_v34  ;;  %v2742_v34 = vadd.f32 %v11611_v47, %v11662_v33  ;;  %v5927_v47 = vld [vmem:[#allocation2 + $0x88] sm:$0xf]  ;;  %v9726_v5 = vld [vmem:[#allocation2 + $0xc0] sm:$0xff]   ;;  %v8537_v51 = vrot.slane %v6330_v46, 9  ;;  %v6391_v46 = vrot.slane %v5933_v11, 5 }
 0x27c   : > { %v3100_v10 = vpop.f32.mrf.mxu0  ;;  %v6377_v9 = vrot.slane %v5927_v47, 5  ;;  %v6334_v11 = vld [vmem:[#allocation2 + $0xa8] sm:$0xe] }
 0x27d   : > { %v11731_v45 = vadd.f32 %v3100_v10, %v11657_v43  ;;  %v8536_v43 = vrot.slane %v6329_v14, 9  ;;  %v5930_v10 = vld [vmem:[#allocation2 + $0x94] sm:$0xf] }
 0x27e   : > { %9440 = vmatpush3.bf16.msra.mxu0 %v9728_v42  ;;  %v9208_v12 = vpop.f32.mrf.mxu0  ;;  %v6384_v39 = vrot.slane %v5930_v10, 5 }
 0x27f   : > { %v11736_v13 = vadd.f32 %v9208_v12, %v11664_v30  ;;  %9481 = vmatprep.subr.bf16.mxu0 %v11728_v17  ;;  %v11745_v30 = vpop.f32.mrf.mxu1  ;;  %v6364_v48 = vsel %vm10434_vm8, %v8536_v43, %v6363_v50  ;;  %v6372_v12 = vrot.slane %v6370_v18, 4  ;;  %v6332_v43 = vld [vmem:[#allocation2 + $0x90] sm:$0xe] }
 0x280   : > { %v3103_v63 = vpop.f32.mrf.mxu0  ;;  %13030 = vst [vmem:[#allocation23_spill] sm:$0xff] %v11745_v30  ;;  %v8544_v50 = vcombine.low %v6364_v48, %v6367_v60  ;;  %v5934_v48 = vld [vmem:[#allocation2 + $0xa4] sm:$0x1]  ;;  %v8539_v16 = vrot.slane %v6332_v43, 9  ;;  %v6386_v10 = vrot.slane %v6384_v39, 4 }
 0x281   : > { %13028 = vst [vmem:[#allocation21_spill] sm:$0xff] %v11736_v13  ;;  %9402 = vmatmul.mubr.msk.bf16.gmra.mxu0 %vm1943_vm2, %v9722_v22  ;;  %v11742_v8 = vadd.f32 %v3103_v63, %v2742_v34  ;;  %v11754_v41 = vpop.f32.mrf.mxu1  ;;  %v8538_v22 = vrot.slane %v6331_v35, 9  ;;  %v6380_v34 = vrot.slane %v5928_v2, 5 }
 0x282   : > { %9405 = vmatprep.mubr.msk.bf16.mxu0 %vm1943_vm2, %v9724_v54  ;;  %13032 = vst [vmem:[#allocation25_spill] sm:$0xff] %v11754_v41  ;;  %v5931_v54 = vld [vmem:[#allocation2 + $0x98] sm:$0x1] }
 0x283   : > { %13029 = vst [vmem:[#allocation22_spill] sm:$0xff] %v11742_v8  ;;  %v11768_v60 = vpop.f32.mrf.mxu1  ;;  %v6378_v35 = vsel %vm10434_vm8, %v8538_v22, %v6377_v9  ;;  %v6387_v61 = vrot.slane %v5931_v54, 5  ;;  %v11782_v22 = vld [vmem:[#allocation2 + $0xb8] sm:$0xf]  ;;  %v11784_v54 = vld [vmem:[#allocation2 + $0xb4] sm:$0xe] }
 0x284   : > { %v9211_v33 = vpop.f32.mrf.mxu0  ;;  %13035 = vst [vmem:[#allocation28_spill] sm:$0xff] %v11768_v60 }
 0x285   : > { %v11752_v21 = vadd.f32 %v9211_v33, %v11673_v59  ;;  %v6379_v59 = vrot.slane %v6377_v9, 4  ;;  %v6371_v33 = vsel %vm10434_vm8, %v8537_v51, %v6370_v18  ;;  %v6393_v51 = vrot.slane %v6391_v46, 4 }
 0x286   : > { %v3116_v42 = vpop.f32.mrf.mxu0  ;;  %v6385_v9 = vsel %vm10434_vm8, %v8539_v16, %v6384_v39  ;;  %v5940_v16 = vld [vmem:[#allocation2 + $0xbc] sm:$0x1] }
 0x287   : > { %13031 = vst [vmem:[#allocation24_spill] sm:$0xff] %v11752_v21  ;;  %v11757_v14 = vadd.f32 %v3116_v42, %v11680_v37  ;;  %v6333_v37 = vld [vmem:[#allocation2 + $0x9c] sm:$0xe]  ;;  %v5936_v42 = vld [vmem:[#allocation2 + $0xac] sm:$0xf] }
 0x288   : > { %v9212_v63 = vpop.f32.mrf.mxu0  ;;  %v6398_v18 = vrot.slane %v5936_v42, 5  ;;  %v6405_v42 = vrot.slane %v11782_v22, 5  ;;  %v6840_v22 = vld [vmem:[#allocation2 + $0x88] sm:$0xf] }
 0x289   : > { %13033 = vst [vmem:[#allocation26_spill] sm:$0xff] %v11757_v14  ;;  %9406 = vmatmul.mubr.msk.bf16.gmra.mxu0 %vm1943_vm2, %v9726_v5  ;;  %v11761_v23 = vadd.f32 %v9212_v63, %v11685_v62  ;;  %v6374_v62 = vsel %vm10434_vm8, %v6372_v12, %v6373_v49  ;;  %v6381_v5 = vsel %vm10434_vm8, %v6379_v59, %v6380_v34  ;;  %v6394_v63 = vrot.slane %v5934_v48, 5  ;;  %v9730_v49 = vld [vmem:[#allocation6 + $0xf0] sm:$0xff]   ;;  %v6836_v34 = vld [vmem:[#allocation2 + $0x78] sm:$0xf] }
 0x28a   : > { %9441 = vmatprep.mubr.msk.bf16.mxu0 %vm1943_vm2, %v8544_v50  ;;  %v3119_v47 = vpop.f32.mrf.mxu0  ;;  %v8540_v50 = vrot.slane %v6333_v37, 9  ;;  %v8546_v12 = vcombine.low %v6378_v35, %v6381_v5  ;;  %v6388_v59 = vsel %vm10434_vm8, %v6386_v10, %v6387_v61  ;;  %v8541_v37 = vrot.slane %v6334_v11, 9  ;;  %v11791_v48 = vld [vmem:[#allocation2 + $0xc4] sm:$0xf] }
 0x28b   : > { %13034 = vst [vmem:[#allocation27_spill] sm:$0xff] %v11761_v23  ;;  %v11770_v2 = vadd.f32 %v3119_v47, %v2746_v3  ;;  %v8545_v3 = vcombine.low %v6371_v33, %v6374_v62  ;;  %v11778_v47 = vpop.f32.mrf.mxu1  ;;  %v6400_v33 = vrot.slane %v6398_v18, 4  ;;  %v6837_v62 = vld [vmem:[#allocation2 + $0x7c] sm:$0xf]  ;;  %v6395_v39 = vsel %vm10434_vm8, %v6393_v51, %v6394_v63  ;;  %v9731_v10 = vld [vmem:[#allocation6 + $0xe8] sm:$0xff]  }
 0x28c   : > { %13037 = vst [vmem:[#allocation30_spill] sm:$0xff] %v11778_v47  ;;  %v6392_v43 = vsel %vm10434_vm8, %v8540_v50, %v6391_v46  ;;  %v6401_v35 = vrot.slane %v5937_v52, 5  ;;  %v6412_v61 = vrot.slane %v11791_v48, 5  ;;  %v6336_v46 = vld [vmem:[#allocation2 + $0xc0] sm:$0xe]  ;;  %v6861_v50 = vshrl.u32 %v6836_v34, 16 }
 0x28d   : > { %13036 = vst [vmem:[#allocation29_spill] sm:$0xff] %v11770_v2  ;;  %v9239_v5 = vpop.f32.mrf.mxu1  ;;  %v6864_v11 = vshll.u32 %v6836_v34, 16  ;;  %v6874_v7 = vshrl.u32 %v6837_v62, 16  ;;  %v8548_v44 = vcombine.low %v6392_v43, %v6395_v39  ;;  %v11801_v52 = vsel %vm10434_vm8, %v8541_v37, %v6398_v18  ;;  %v6839_v63 = vld [vmem:[#allocation2 + $0x84] sm:$0xf] }
 0x28e   : > { %v8542_v51 = vrot.slane %v11784_v54, 9  ;;  %v11806_v48 = vsel %vm10434_vm8, %v6400_v33, %v6401_v35  ;;  %v6407_v47 = vrot.slane %v6405_v42, 4  ;;  %v8543_v34 = vrot.slane %v6336_v46, 9  ;;  %v6843_v2 = vld [vmem:[#allocation2 + $0x94] sm:$0xf] }
 0x28f   : > { %v11808_v43 = vpop.f32.mrf.mxu1  ;;  %v6415_v37 = vrot.slane %v5943_v0, 5  ;;  %v6863_v54 = vrot.slane %v6861_v50, 4  ;;  %v6866_v39 = vrot.slane %v6864_v11, 5  ;;  %v6876_v33 = vrot.slane %v6874_v7, 4  ;;  %v6838_v46 = vld [vmem:[#allocation2 + $0x80] sm:$0x1] }
 0x290   : > { %13038 = vst [vmem:[#allocation31_spill] sm:$0xff] %v11808_v43  ;;  %v6885_v23 = vshrl.u32 %v6839_v63, 16  ;;  %v6894_v43 = vshll.u32 %v6840_v22, 16  ;;  %v6918_v7 = vshll.u32 %v6843_v2, 16 }
 0x291   : > { %9442 = vmatmul.mubr.msk.bf16.vlgmr.msra.gmra.mxu0 %vm1943_vm2, %v8545_v3  ;;  %v8547_v3 = vcombine.low %v6385_v9, %v6388_v59  ;;  %v6414_v59 = vrot.slane %v6412_v61, 4 }
 0x292   : > { %9445 = vmatprep.mubr.msk.bf16.mxu0 %vm1943_vm2, %v8546_v12  ;;  %9482 = vmatpush3.bf16.msra.mxu0 %v11728_v17  ;;  %v6870_v12 = vshll.u32 %v6837_v62, 16  ;;  %v6408_v17 = vrot.slane %v5940_v16, 5  ;;  %v6842_v62 = vld [vmem:[#allocation2 + $0x90] sm:$0xf]  ;;  %v9732_v16 = vld [vmem:[#allocation6 + $0xe0] sm:$0xff]  }
 0x293   : > { %9483 = vmatprep.subr.bf16.mxu0 %v9730_v49  ;;  %v6909_v11 = vshrl.u32 %v6842_v62, 16 }
 0x294   : > { %v11811_v60 = vrot.slane %v6870_v12, 5  ;;  %v6912_v12 = vshll.u32 %v6842_v62, 16 }
 0x296   : > { %9484 = vmatpush3.bf16.msra.mxu0 %v9730_v49  ;;  %v6888_v49 = vshll.u32 %v6839_v63, 16  ;;  %v6406_v63 = vsel %vm10434_vm8, %v8542_v51, %v6405_v42  ;;  %v6877_v42 = vor.u32 %v6876_v33, %v11811_v60  ;;  %v6880_v51 = vshll.u32 %v6838_v46, 16 }
 0x297   : > { %v9215_v9 = vpop.f32.mrf.mxu0  ;;  %9485 = vmatprep.subr.bf16.mxu0 %v9731_v10 }
 0x298   : > { %v3161_v18 = vadd.f32 %v9215_v9, %v11692_v26  ;;  %v6898_v26 = vshrl.u32 %v6840_v22, 16  ;;  %v6922_v9 = vshrl.u32 %v6843_v2, 16  ;;  %v6867_v2 = vor.u32 %v6866_v39, %v6863_v54 }
 0x299   : > { %v3132_v35 = vpop.f32.mrf.mxu0  ;;  %9446 = vmatmul.mubr.msk.bf16.gmra.mxu0 %vm1943_vm2, %v8547_v3  ;;  %v6409_v3 = vsel %vm10434_vm8, %v6407_v47, %v6408_v17  ;;  %v6841_v47 = vld [vmem:[#allocation2 + $0x8c] sm:$0x1]  ;;  %v6887_v17 = vrot.slane %v6885_v23, 4  ;;  %v6890_v62 = vrot.slane %v6888_v49, 5  ;;  %v8549_v54 = vcombine.low %v11801_v52, %v11806_v48  ;;  %v6845_v23 = vld [vmem:[#allocation2 + $0x9c] sm:$0xf] }
 0x29a   : > { %v11815_v41 = vadd.f32 %v3132_v35, %v11699_v53  ;;  %v11817_v0 = vadd.f32 %v9239_v5, %v3161_v18  ;;  %9449 = vmatprep.mubr.msk.bf16.mxu0 %vm1943_vm2, %v8548_v44  ;;  %9486 = vmatpush3.bf16.msra.mxu0 %v9731_v10  ;;  %v11824_v53 = vpop.f32.mrf.mxu1  ;;  %v11828_v5 = vsel %vm10434_vm8, %v8543_v34, %v6412_v61  ;;  %v11840_v18 = vrot.slane %v6894_v43, 5  ;;  %v6844_v34 = vld [vmem:[#allocation2 + $0x98] sm:$0x1]  ;;  %v6846_v49 = vld [vmem:[#allocation2 + $0xa0] sm:$0xf] }
 0x29b   : > { %v9216_v50 = vpop.f32.mrf.mxu0  ;;  %13040 = vst [vmem:[#allocation33_spill] sm:$0xff] %v11824_v53  ;;  %9487 = vmatprep.subr.bf16.mxu0 %v9732_v16  ;;  %v11835_v10 = vsel %vm10434_vm8, %v6414_v59, %v6415_v37  ;;  %v6900_v61 = vrot.slane %v6898_v26, 4  ;;  %v6911_v35 = vrot.slane %v6909_v11, 4  ;;  %v11844_v59 = vrot.slane %v6918_v7, 5  ;;  %v6848_v11 = vld [vmem:[#allocation2 + $0xa8] sm:$0xf] }
 0x29c   : > { %13039 = vst [vmem:[#allocation32_spill] sm:$0xff] %v11815_v41  ;;  %v11831_v44 = vadd.f32 %v9216_v50, %v11704_v28  ;;  %v6914_v50 = vrot.slane %v6912_v12, 5  ;;  %v6924_v37 = vrot.slane %v6922_v9, 4  ;;  %v8550_v39 = vcombine.low %v6406_v63, %v6409_v3  ;;  %v11848_v33 = vpop.f32.mrf.mxu1  ;;  %v6849_v9 = vld [vmem:[#allocation2 + $0xac] sm:$0xf] }
 0x29d   : > { %v11838_v22 = vpop.f32.mrf.mxu0  ;;  %13043 = vst [vmem:[#allocation36_spill] sm:$0xff] %v11848_v33  ;;  %v8551_v43 = vcombine.low %v11828_v5, %v11835_v10  ;;  %v6878_v46 = vrot.slane %v6877_v42, 4  ;;  %v6882_v26 = vrot.slane %v6880_v51, 5  ;;  %v6891_v12 = vor.u32 %v6890_v62, %v6887_v17 }
 0x29e   : > { %13041 = vst [vmem:[#allocation34_spill] sm:$0xff] %v11831_v44  ;;  %13042 = vst [vmem:[#allocation35_spill] sm:$0xff] %v11838_v22  ;;  %9488 = vmatpush3.bf16.msra.mxu0 %v9732_v16  ;;  %v6868_v16 = vrot.slane %v6867_v2, 4  ;;  %v6901_v7 = vor.u32 %v6900_v61, %v11840_v18  ;;  %v6904_v52 = vshll.u32 %v6841_v47, 16  ;;  %v6928_v48 = vshll.u32 %v6844_v34, 16  ;;  %v11860_v42 = vpop.f32.mrf.mxu1 }
 0x29f   : > { %v11842_v28 = vpop.f32.mrf.mxu0  ;;  %v6915_v63 = vor.u32 %v6914_v50, %v6911_v35  ;;  %v6925_v3 = vor.u32 %v6924_v37, %v11844_v59  ;;  %v6933_v10 = vshrl.u32 %v6845_v23, 16  ;;  %v6936_v2 = vshll.u32 %v6845_v23, 16 }
 0x2a0   : > { %v6942_v51 = vshll.u32 %v6846_v49, 16  ;;  %v6946_v33 = vshrl.u32 %v6846_v49, 16  ;;  %v6960_v17 = vshll.u32 %v6848_v11, 16  ;;  %v6873_v47 = vsel %vm10419_vm5, %v6868_v16, %v11811_v60  ;;  %v11871_v41 = vpop.f32.mrf.mxu1  ;;  %v6847_v60 = vld [vmem:[#allocation2 + $0xa4] sm:$0x1] }
 0x2a1   : > { %v11852_v38 = vpop.f32.mrf.mxu0  ;;  %9450 = vmatmul.mubr.msk.bf16.gmra.mxu0 %vm1943_vm2, %v8549_v54  ;;  %v6957_v54 = vshrl.u32 %v6848_v11, 16  ;;  %v6883_v62 = vsel %vm10419_vm5, %v6878_v46, %v6882_v26  ;;  %v6966_v34 = vshll.u32 %v6849_v9, 16  ;;  %v6970_v35 = vshrl.u32 %v6849_v9, 16  ;;  %v6850_v9 = vld [vmem:[#allocation2 + $0xb0] sm:$0x1] }
 0x2a2   : > { %9453 = vmatprep.mubr.msk.bf16.mxu0 %vm1943_vm2, %v8550_v39  ;;  %v6892_v50 = vrot.slane %v6891_v12, 4  ;;  %v6902_v37 = vrot.slane %v6901_v7, 4  ;;  %v6906_v39 = vrot.slane %v6904_v52, 5  ;;  %v6930_v23 = vrot.slane %v6928_v48, 5  ;;  %v6851_v48 = vld [vmem:[#allocation2 + $0xb4] sm:$0xf] }
 0x2a3   : > { %v11858_v5 = vpop.f32.mrf.mxu0  ;;  %v6916_v53 = vrot.slane %v6915_v63, 4  ;;  %v6926_v44 = vrot.slane %v6925_v3, 4  ;;  %v6935_v11 = vrot.slane %v6933_v10, 4  ;;  %v6938_v22 = vrot.slane %v6936_v2, 5 }
 0x2a4   : > { %v11873_v16 = vrot.slane %v6942_v51, 5  ;;  %v6948_v46 = vrot.slane %v6946_v33, 4  ;;  %v6959_v26 = vrot.slane %v6957_v54, 4  ;;  %v6962_v14 = vrot.slane %v6960_v17, 5  ;;  %v6852_v33 = vld [vmem:[#allocation2 + $0xb8] sm:$0xf] }
 0x2a5   : > { %v11867_v61 = vpop.f32.mrf.mxu0  ;;  %v8584_v30 = vcombine.low %v6873_v47, %v6883_v62  ;;  %v11875_v12 = vrot.slane %v6966_v34, 5  ;;  %v6972_v7 = vrot.slane %v6970_v35, 4  ;;  %v6897_v63 = vsel %vm10419_vm5, %v6892_v50, %v11840_v18  ;;  %v6854_v17 = vld [vmem:[#allocation2 + $0xc0] sm:$0xf]  ;;  %v6855_v47 = vld [vmem:[#allocation2 + $0xc4] sm:$0xf]  ;;  %v11893_v18 = vpop.f32.mrf.mxu1 }
 0x2a6   : > { %v6907_v3 = vsel %vm10419_vm5, %v6902_v37, %v6906_v39  ;;  %v6921_v10 = vsel %vm10419_vm5, %v6916_v53, %v11844_v59  ;;  %v6931_v2 = vsel %vm10419_vm5, %v6926_v44, %v6930_v23  ;;  %v6939_v51 = vor.u32 %v6938_v22, %v6935_v11 }
 0x2a7   : > { %v11869_v49 = vpop.f32.mrf.mxu0  ;;  %v6952_v54 = vshll.u32 %v6847_v60, 16  ;;  %v6949_v62 = vor.u32 %v6948_v46, %v11873_v16  ;;  %v6963_v34 = vor.u32 %v6962_v14, %v6959_v26  ;;  %v6976_v35 = vshll.u32 %v6850_v9, 16  ;;  %v11901_v14 = vpop.f32.mrf.mxu1 }
 0x2a8   : > { %v6973_v50 = vor.u32 %v6972_v7, %v11875_v12  ;;  %v6984_v53 = vshll.u32 %v6851_v48, 16  ;;  %v6990_v59 = vshll.u32 %v6852_v33, 16  ;;  %v6994_v44 = vshrl.u32 %v6852_v33, 16 }
 0x2a9   : > { %v11877_v52 = vpop.f32.mrf.mxu0  ;;  %9454 = vmatmul.mubr.msk.bf16.gmra.mxu0 %vm1943_vm2, %v8551_v43  ;;  %v7005_v22 = vshrl.u32 %v6854_v17, 16  ;;  %v7008_v39 = vshll.u32 %v6854_v17, 16  ;;  %v7014_v23 = vshll.u32 %v6855_v47, 16  ;;  %v7018_v11 = vshrl.u32 %v6855_v47, 16 }
 0x2aa   : > { %9489 = vmatprep.mubr.msk.bf16.mxu0 %vm1943_vm2, %v8584_v30  ;;  %v6981_v30 = vshrl.u32 %v6851_v48, 16  ;;  %v8585_v60 = vcombine.low %v6897_v63, %v6907_v3  ;;  %v8586_v21 = vcombine.low %v6921_v10, %v6931_v2  ;;  %v6940_v20 = vrot.slane %v6939_v51, 4  ;;  %v6853_v63 = vld [vmem:[#allocation2 + $0xbc] sm:$0x1] }
 0x2ab   : > { %v11891_v43 = vpop.f32.mrf.mxu0  ;;  %v6954_v8 = vrot.slane %v6952_v54, 5  ;;  %v6950_v46 = vrot.slane %v6949_v62, 4  ;;  %v6964_v26 = vrot.slane %v6963_v34, 4  ;;  %v6978_v9 = vrot.slane %v6976_v35, 5  ;;  %v6856_v54 = vld [vmem:[#allocation2 + $0xc8] sm:$0x1]  ;;  %v11911_v62 = vpop.f32.mrf.mxu1 }
 0x2ac   : > { %13044 = vst [vmem:[#allocation37_spill] sm:$0xff] %v11891_v43  ;;  %v6983_v7 = vrot.slane %v6981_v30, 4  ;;  %v6986_v48 = vrot.slane %v6984_v53, 5  ;;  %v6992_v25 = vrot.slane %v6990_v59, 5  ;;  %v6996_v33 = vrot.slane %v6994_v44, 4 }
 0x2ad   : > { %v11897_v37 = vpop.f32.mrf.mxu0  ;;  %v7007_v3 = vrot.slane %v7005_v22, 4  ;;  %v7010_v10 = vrot.slane %v7008_v39, 5  ;;  %v7016_v2 = vrot.slane %v7014_v23, 5  ;;  %v7020_v51 = vrot.slane %v7018_v11, 4 }
 0x2ae   : > { %13045 = vst [vmem:[#allocation38_spill] sm:$0xff] %v11897_v37  ;;  %v6974_v37 = vrot.slane %v6973_v50, 4  ;;  %v2737_v47 = vadd.f32 %v11564_v40, %v11626_v31  ;;  %v6945_v34 = vsel %vm10419_vm5, %v6940_v20, %v11873_v16  ;;  %v6955_v35 = vsel %vm10419_vm5, %v6950_v46, %v6954_v8  ;;  %v11928_v16 = vpop.f32.mrf.mxu1 }
 0x2af   : > { %v11899_v43 = vpop.f32.mrf.mxu0  ;;  %v6969_v30 = vsel %vm10419_vm5, %v6964_v26, %v11875_v12  ;;  %v6997_v50 = vor.u32 %v6996_v33, %v6992_v25  ;;  %v7000_v53 = vshll.u32 %v6853_v63, 16  ;;  %v7011_v31 = vor.u32 %v7010_v10, %v7007_v3 }
 0x2b0   : > { %v6979_v40 = vsel %vm10419_vm5, %v6974_v37, %v6978_v9  ;;  %v7021_v44 = vor.u32 %v7020_v51, %v7016_v2  ;;  %v7024_v22 = vshll.u32 %v6856_v54, 16  ;;  %v3147_v20 = vadd.f32 %v11712_v4, %v2737_v47  ;;  %v9280_v63 = vpop.f32.mrf.mxu1 }
 0x2b1   : > { %v11903_v13 = vpop.f32.mrf.mxu0  ;;  %9490 = vmatmul.mubr.msk.bf16.vlgmr.msra.gmra.mxu0 %vm1943_vm2, %v8585_v60  ;;  %v2738_v8 = vadd.f32 %v11593_v57, %v11638_v15  ;;  %v8587_v12 = vcombine.low %v6945_v34, %v6955_v35  ;;  %v8588_v11 = vcombine.low %v6969_v30, %v6979_v40  ;;  %v6998_v46 = vrot.slane %v6997_v50, 4 }
 0x2b2   : > { %9493 = vmatprep.mubr.msk.bf16.mxu0 %vm1943_vm2, %v8586_v21  ;;  %v6987_v21 = vor.u32 %v6986_v48, %v6983_v7  ;;  %v7002_v26 = vrot.slane %v7000_v53, 5  ;;  %v3431_v9 = vadd.f32 %v11668_v29, %v11710_v19  ;;  %v7012_v4 = vrot.slane %v7011_v31, 4  ;;  %v4022_v54 = vpop.f32.mrf.mxu1 }
 0x2b3   : > { %v11907_v17 = vpop.f32.mrf.mxu0  ;;  %v7022_v7 = vrot.slane %v7021_v44, 4  ;;  %v7026_v57 = vrot.slane %v7024_v22, 5  ;;  %v3429_v33 = vadd.f32 %v11678_v58, %v3147_v20  ;;  %v3432_v51 = vadd.f32 %v11689_v24, %v11717_v55 }
 0x2b4   : > { %v6988_v60 = vrot.slane %v6987_v21, 4  ;;  %v3658_v48 = vadd.f32 %v11842_v28, %v3431_v9  ;;  %v7003_v29 = vsel %vm10419_vm5, %v6998_v46, %v7002_v26  ;;  %v13049_v46 = vld [vmem:[#allocation22_spill] sm:$0xff]  ;;  %v13050_v26 = vld [vmem:[#allocation20_spill] sm:$0xff] }
 0x2b5   : > { %v11921_v59 = vpop.f32.mrf.mxu0  ;;  %v3656_v10 = vadd.f32 %v11852_v38, %v3429_v33  ;;  %v7027_v58 = vsel %vm10419_vm5, %v7022_v7, %v7026_v57  ;;  %v3659_v28 = vadd.f32 %v11858_v5, %v3432_v51  ;;  %v11963_v38 = vld [vmem:[%s12974_s6] ss:$0 sm:$0xff]  ;;  %v3434_v9 = vadd.f32 %v13050_v26, %v13049_v46  ;;  %v13053_v51 = vld [vmem:[#allocation23_spill] sm:$0xff] }
 0x2b6   : > { %v6993_v3 = vsel %vm10419_vm5, %v6988_v60, %v6992_v25  ;;  %v4068_v34 = vadd.f32 %v11860_v42, %v3658_v48  ;;  %v13060_v26 = vld [vmem:[#allocation16_spill] sm:$0xff] }
 0x2b7   : > { %v9263_v39 = vpop.f32.mrf.mxu0  ;;  %v8589_v47 = vcombine.low %v6993_v3, %v7003_v29  ;;  %v4066_v5 = vadd.f32 %v11871_v41, %v3656_v10  ;;  %v4069_v53 = vadd.f32 %v11893_v18, %v3659_v28  ;;  %v11979_v41 = vld [vmem:[%s12975_s7] ss:$0 sm:$0xff]  ;;  %v13047_v18 = vld [vmem:[#allocation19_spill] sm:$0xff] }
 0x2b8   : > { %v11931_v23 = vadd.f32 %v9263_v39, %v11817_v0  ;;  %v3148_v0 = vadd.f32 %v11719_v36, %v2738_v8  ;;  %v7017_v36 = vsel %vm10419_vm5, %v7012_v4, %v7016_v2  ;;  %v9283_v2 = vpop.f32.mrf.mxu1  ;;  %v13046_v39 = vld [vmem:[#allocation21_spill] sm:$0xff]  ;;  %v13052_v10 = vld [vmem:[#allocation24_spill] sm:$0xff] }
 0x2b9   : > { %v11933_v37 = vpop.f32.mrf.mxu0  ;;  %9494 = vmatmul.mubr.msk.bf16.gmra.mxu0 %vm1943_vm2, %v8587_v12  ;;  %v8590_v35 = vcombine.low %v7017_v36, %v7027_v58  ;;  %v3436_v20 = vadd.f32 %v13047_v18, %v13046_v39  ;;  %v3439_v36 = vadd.f32 %v13053_v51, %v13052_v10  ;;  %v9746_v18 = vld [vmem:[#allocation6 + $0x50] sm:$0xff]   ;;  %v13064_v51 = vld [vmem:[#allocation32_spill] sm:$0xff] }
 0x2ba   : > { %9497 = vmatprep.mubr.msk.bf16.mxu0 %vm1943_vm2, %v8588_v11  ;;  %v3430_v25 = vadd.f32 %v11697_v32, %v3148_v0  ;;  %v3435_v32 = vadd.f32 %v11707_v56, %v11726_v6  ;;  %v4035_v8 = vpop.f32.mrf.mxu1  ;;  %v13048_v11 = vld [vmem:[#allocation37_spill] sm:$0xff]  ;;  %v13051_v0 = vld [vmem:[#allocation38_spill] sm:$0xff] }
 0x2bb   : > { %v11939_v15 = vpop.f32.mrf.mxu0  ;;  %v3663_v60 = vadd.f32 %v13048_v11, %v3436_v20  ;;  %v3661_v48 = vadd.f32 %v13051_v0, %v3434_v9  ;;  %v13061_v9 = vmov 0  }
 0x2bc   : > { %v3657_v24 = vadd.f32 %v11867_v61, %v3430_v25  ;;  %v3662_v40 = vadd.f32 %v11869_v49, %v3435_v32  ;;  %v3433_v61 = vadd.f32 %v11714_v1, %v11731_v45  ;;  %v9284_v29 = vpop.f32.mrf.mxu1 }
 0x2bd   : > { %v11948_v19 = vpop.f32.mrf.mxu0 }
 0x2be   : > { %v4067_v44 = vadd.f32 %v11901_v14, %v3657_v24  ;;  %v3660_v22 = vadd.f32 %v11877_v52, %v3433_v61  ;;  %v4072_v4 = vadd.f32 %v11911_v62, %v3662_v40  ;;  %v4071_v40 = vadd.f32 %v4022_v54, %v3661_v48  ;;  %v4038_v61 = vpop.f32.mrf.mxu1 }
 0x2c0   : > { %v9299_v30 = vpop.f32.mrf.mxu0  ;;  %v4070_v3 = vadd.f32 %v11928_v16, %v3660_v22 }
 0x2c1   : > { %9498 = vmatmul.mubr.msk.bf16.gmra.mxu0 %vm1943_vm2, %v8589_v47  ;;  %v4350_v55 = vadd.f32 %v9299_v30, %v4068_v34  ;;  %v13054_v47 = vld [vmem:[#allocation26_spill] sm:$0xff]  ;;  %v13055_v34 = vld [vmem:[#allocation25_spill] sm:$0xff] }
 0x2c2   : > { %9501 = vmatprep.mubr.msk.bf16.mxu0 %vm1943_vm2, %v8590_v35  ;;  %v4285_v42 = vpop.f32.mrf.mxu0  ;;  %v3437_v35 = vadd.f32 %v13055_v34, %v13054_v47 }
 0x2c3   : > { %v4373_v21 = vmul.f32 %v11963_v38, %v4350_v55  ;;  %v4348_v50 = vadd.f32 %v4285_v42, %v4066_v5  ;;  %v4073_v55 = vadd.f32 %v9280_v63, %v3663_v60  ;;  %v3666_v5 = vadd.f32 %v11899_v43, %v3439_v36  ;;  %v13065_v36 = vld [vmem:[#allocation31_spill] sm:$0xff] }
 0x2c4   : > { %v9300_v56 = vpop.f32.mrf.mxu0 }
 0x2c5   : > { %v4371_v6 = vmul.f32 %v11963_v38, %v4348_v50  ;;  %v4351_v31 = vadd.f32 %v9300_v56, %v4069_v53  ;;  %v4396_v1 = vadd.f32 %v11979_v41, %v4373_v21  ;;  %v3664_v56 = vadd.f32 %v11903_v13, %v3437_v35 }
 0x2c6   : > { %v4288_v49 = vpop.f32.mrf.mxu0  ;;  %v4076_v54 = vadd.f32 %v9283_v2, %v3666_v5  ;;  %v9747_v2 = vld [vmem:[#allocation6 + $0x48] sm:$0xff]  }
 0x2c7   : > { %v4374_v45 = vmul.f32 %v11963_v38, %v4351_v31  ;;  %v4349_v12 = vadd.f32 %v4288_v49, %v4067_v44  ;;  %v4394_v14 = vadd.f32 %v11979_v41, %v4371_v6  ;;  %v4412_v58 = vmax.f32 %v4396_v1, 0.0  ;;  %v13056_v6 = vld [vmem:[#allocation27_spill] sm:$0xff]  ;;  %v13057_v31 = vld [vmem:[#allocation28_spill] sm:$0xff]  ;;  %v13058_v1 = vld [vmem:[#allocation29_spill] sm:$0xff] }
 0x2c8   : > { %v3440_v44 = vadd.f32 %v13057_v31, %v13056_v6 }
 0x2c9   : > { %v4397_v52 = vadd.f32 %v11979_v41, %v4374_v45  ;;  %v4372_v7 = vmul.f32 %v11963_v38, %v4349_v12  ;;  %v4410_v32 = vmax.f32 %v4394_v14, 0.0  ;;  %v13059_v45 = vld [vmem:[#allocation30_spill] sm:$0xff] }
 0x2ca   : > { %v9303_v57 = vpop.f32.mrf.mxu0  ;;  %v3667_v49 = vadd.f32 %v11907_v17, %v3440_v44  ;;  %v3438_v12 = vadd.f32 %v13059_v45, %v13058_v1  ;;  %v12043_v1 = vld [vmem:[#allocation6 + $0x98] sm:$0xff]  }
 0x2cb   : > { %v4354_v33 = vadd.f32 %v9303_v57, %v4072_v4  ;;  %v4413_v28 = vmax.f32 %v4397_v52, 0.0  ;;  %v4395_v62 = vadd.f32 %v11979_v41, %v4372_v7  ;;  %v9287_v4 = vpop.f32.mrf.mxu1  ;;  %v4074_v52 = vadd.f32 %v4035_v8, %v3664_v56  ;;  %v13062_v7 = vld [vmem:[#allocation18_spill] sm:$0xff]  ;;  %v13063_v57 = vld [vmem:[#allocation17_spill] sm:$0xff] }
 0x2cc   : > { %v4301_v25 = vpop.f32.mrf.mxu0  ;;  %v3665_v17 = vadd.f32 %v11921_v59, %v3438_v12  ;;  %v2750_v0 = vadd.f32 %v13063_v57, %v13062_v7  ;;  %v13066_v59 = vld [vmem:[#allocation35_spill] sm:$0xff] }
 0x2cd   : > { %v4377_v30 = vmul.f32 %v11963_v38, %v4354_v33  ;;  %v4352_v24 = vadd.f32 %v4301_v25, %v4070_v3  ;;  %v4427_v16 = vpack.c.bf16 %v4413_v28, %v4412_v58  ;;  %v4411_v42 = vmax.f32 %v4395_v62, 0.0 }
 0x2ce   : > { %v9304_v21 = vpop.f32.mrf.mxu0  ;;  %v3441_v58 = vadd.f32 %v13065_v36, %v13064_v51  ;;  %v4077_v25 = vadd.f32 %v9284_v29, %v3667_v49  ;;  %v3160_v47 = vadd.f32 %v13066_v59, %v2750_v0 }
 0x2cf   : > { %v4375_v50 = vmul.f32 %v11963_v38, %v4352_v24  ;;  %v4355_v53 = vadd.f32 %v9304_v21, %v4073_v55  ;;  %v4426_v22 = vpack.c.bf16 %v4411_v42, %v4410_v32  ;;  %v4400_v63 = vadd.f32 %v11979_v41, %v4377_v30  ;;  %v4051_v24 = vpop.f32.mrf.mxu1  ;;  %v9748_v42 = vld [vmem:[#allocation6 + $0x40] sm:$0xff]  }
 0x2d0   : > { %v4304_v39 = vpop.f32.mrf.mxu0  ;;  %v4075_v32 = vadd.f32 %v4038_v61, %v3665_v17  ;;  %v3668_v21 = vadd.f32 %v11933_v37, %v3441_v58 }
 0x2d1   : > { %v4378_v43 = vmul.f32 %v11963_v38, %v4355_v53  ;;  %v4353_v20 = vadd.f32 %v4304_v39, %v4071_v40  ;;  %8420 = vmatmul.mubr.msk.bf16.vlgmr.msra.gmra.mxu1 %vm1943_vm2, %v4426_v22  ;;  %v4398_v13 = vadd.f32 %v11979_v41, %v4375_v50  ;;  %v4416_v48 = vmax.f32 %v4400_v63, 0.0  ;;  %v13067_v50 = vld [vmem:[#allocation34_spill] sm:$0xff]  ;;  %v13068_v53 = vld [vmem:[#allocation33_spill] sm:$0xff]  ;;  %v13069_v39 = vld [vmem:[#allocation36_spill] sm:$0xff]  ;;  %v9288_v37 = vpop.f32.mrf.mxu1 }
 0x2d2   : > { %9362 = vmatpush3.bf16.msra.mxu1 %v13060_v26  ;;  %4548 = vmatprep.mubr.bf16.mxu1 %v13061_v9  ;;  %v3444_v29 = vadd.f32 %v13068_v53, %v13067_v50  ;;  %v3442_v61 = vadd.f32 %v13069_v39, %v3160_v47  ;;  %v4078_v45 = vadd.f32 %v4051_v24, %v3668_v21  ;;  %v12085_v21 = vld [vmem:[#allocation2 + $0xd4] sm:$0x1] }
 0x2d3   : > { %v4401_v11 = vadd.f32 %v11979_v41, %v4378_v43  ;;  %v4376_v60 = vmul.f32 %v11963_v38, %v4353_v20  ;;  %v9307_v46 = vpop.f32.mrf.mxu0  ;;  %9363 = vmatprep.subr.bf16.mxu1 %v9746_v18  ;;  %v4414_v8 = vmax.f32 %v4398_v13, 0.0  ;;  %v4054_v26 = vpop.f32.mrf.mxu1 }
 0x2d4   : > { %v4358_v14 = vadd.f32 %v9307_v46, %v4076_v54  ;;  %v3671_v22 = vadd.f32 %v11939_v15, %v3444_v29  ;;  %v3669_v15 = vadd.f32 %v11948_v19, %v3442_v61 }
 0x2d5   : > { %v4417_v33 = vmax.f32 %v4401_v11, 0.0  ;;  %v4399_v3 = vadd.f32 %v11979_v41, %v4376_v60  ;;  %v4317_v10 = vpop.f32.mrf.mxu0 }
 0x2d6   : > { %v4381_v28 = vmul.f32 %v11963_v38, %v4358_v14  ;;  %v4356_v62 = vadd.f32 %v4317_v10, %v4074_v52  ;;  %9364 = vmatpush3.bf16.msra.mxu1 %v9746_v18  ;;  %v4080_v18 = vadd.f32 %v9287_v4, %v11931_v23  ;;  %v4081_v46 = vadd.f32 %v9288_v37, %v3671_v22 }
 0x2d7   : > { %v12027_v34 = vpack.c.bf16 %v4417_v33, %v4416_v48  ;;  %v4415_v35 = vmax.f32 %v4399_v3, 0.0  ;;  %v9308_v30 = vpop.f32.mrf.mxu0  ;;  %9365 = vmatprep.subr.bf16.mxu1 %v9747_v2  ;;  %v4079_v7 = vadd.f32 %v4054_v26, %v3669_v15  ;;  %v5424_v26 = vld [vmem:[#allocation2 + $0x78] sm:$0xe] }
 0x2d8   : > { %v4379_v55 = vmul.f32 %v11963_v38, %v4356_v62  ;;  %v4359_v5 = vadd.f32 %v9308_v30, %v4077_v25  ;;  %v4404_v6 = vadd.f32 %v11979_v41, %v4381_v28 }
 0x2d9   : > { %v4428_v40 = vpack.c.bf16 %v4415_v35, %v4414_v8  ;;  %v4320_v56 = vpop.f32.mrf.mxu0  ;;  %8421 = vmatmul.mubr.msk.bf16.gmra.mxu1 %vm1943_vm2, %v4427_v16 }
 0x2da   : > { %v4382_v31 = vmul.f32 %v11963_v38, %v4359_v5  ;;  %v4357_v44 = vadd.f32 %v4320_v56, %v4075_v32  ;;  %4558 = vmatprep.mubr.bf16.mxu1 %v13061_v9  ;;  %9366 = vmatpush3.bf16.msra.mxu1 %v9747_v2  ;;  %v4402_v63 = vadd.f32 %v11979_v41, %v4379_v55  ;;  %v4420_v12 = vmax.f32 %v4404_v6, 0.0  ;;  %v6857_v32 = vld [vmem:[#allocation2 + $0xcc] sm:$0xf]  ;;  %v9783_v56 = vld [vmem:[#allocation2 + $0x64] sm:$0xf] }
 0x2db   : > { %9367 = vmatprep.subr.bf16.mxu1 %v9748_v42  ;;  %v7029_v50 = vshrl.u32 %v6857_v32, 16  ;;  %v7032_v53 = vshll.u32 %v6857_v32, 16  ;;  %v5448_v6 = vrot.slane %v9783_v56, 5 }
 0x2dc   : > { %v4405_v43 = vadd.f32 %v11979_v41, %v4382_v31  ;;  %v4380_v20 = vmul.f32 %v11963_v38, %v4357_v44  ;;  %v9311_v49 = vpop.f32.mrf.mxu0  ;;  %v4418_v4 = vmax.f32 %v4402_v63, 0.0  ;;  %v7048_v31 = vshll.u32 %v12085_v21, 16  ;;  %v5422_v44 = vld [vmem:[#allocation2 + $0x60] sm:$0xe] }
 0x2dd   : > { %v4362_v16 = vadd.f32 %v9311_v49, %v4080_v18  ;;  %v7031_v22 = vrot.slane %v7029_v50, 4  ;;  %v7034_v39 = vrot.slane %v7032_v53, 5  ;;  %v8468_v15 = vrot.slane %v5422_v44, 9  ;;  %v5425_v50 = vld [vmem:[#allocation2 + $0x84] sm:$0xe] }
 0x2de   : > { %v4421_v23 = vmax.f32 %v4405_v43, 0.0  ;;  %v4403_v54 = vadd.f32 %v11979_v41, %v4380_v20  ;;  %v4333_v13 = vpop.f32.mrf.mxu0  ;;  %9368 = vmatpush3.bf16.msra.mxu1 %v9748_v42  ;;  %v12083_v42 = vld [vmem:[#allocation2 + $0xd0] sm:$0xf]  ;;  %v7050_v20 = vrot.slane %v7048_v31, 5  ;;  %v9789_v53 = vld [vmem:[#allocation2 + $0x88] sm:$0xf] }
 0x2df   : > { %v4385_v11 = vmul.f32 %v11963_v38, %v4362_v16  ;;  %v4360_v60 = vadd.f32 %v4333_v13, %v4078_v45  ;;  %9409 = vmatprep.subr.bf16.mxu1 %v12043_v1  ;;  %v7038_v29 = vshll.u32 %v12083_v42, 16  ;;  %v7035_v63 = vor.u32 %v7034_v39, %v7031_v22  ;;  %v9784_v45 = vld [vmem:[#allocation2 + $0x68] sm:$0x1]  ;;  %v9790_v31 = vld [vmem:[#allocation2 + $0x94] sm:$0xf] }
 0x2e0   : > { %v4431_v17 = vpack.c.bf16 %v4421_v23, %v4420_v12  ;;  %v4419_v14 = vmax.f32 %v4403_v54, 0.0  ;;  %v9312_v52 = vpop.f32.mrf.mxu0  ;;  %v5450_v16 = vrot.slane %v5448_v6, 4  ;;  %v5451_v12 = vrot.slane %v9784_v45, 5  ;;  %v9785_v23 = vld [vmem:[#allocation2 + $0x70] sm:$0xf] }
 0x2e1   : > { %v4383_v19 = vmul.f32 %v11963_v38, %v4360_v60  ;;  %v4363_v2 = vadd.f32 %v9312_v52, %v4081_v46  ;;  %8422 = vmatmul.mubr.msk.bf16.gmra.mxu1 %vm1943_vm2, %v4428_v40  ;;  %v4408_v48 = vadd.f32 %v11979_v41, %v4385_v11  ;;  %v7042_v40 = vshrl.u32 %v12083_v42, 16  ;;  %v5423_v46 = vld [vmem:[#allocation2 + $0x6c] sm:$0xe] }
 0x2e2   : > { %v4430_v57 = vpack.c.bf16 %v4419_v14, %v4418_v4  ;;  %v4336_v0 = vpop.f32.mrf.mxu0  ;;  %4568 = vmatprep.mubr.bf16.mxu1 %v13061_v9  ;;  %v7040_v61 = vrot.slane %v7038_v29, 5  ;;  %v5455_v54 = vrot.slane %v9785_v23, 5  ;;  %v7036_v13 = vrot.slane %v7035_v63, 4  ;;  %v9786_v4 = vld [vmem:[#allocation2 + $0x7c] sm:$0xf] }
 0x2e3   : > { %v4386_v33 = vmul.f32 %v11963_v38, %v4363_v2  ;;  %v4361_v3 = vadd.f32 %v4336_v0, %v4079_v7  ;;  %v4406_v10 = vadd.f32 %v11979_v41, %v4383_v19  ;;  %v4424_v58 = vmax.f32 %v4408_v48, 0.0  ;;  %v9787_v48 = vld [vmem:[#allocation2 + $0x74] sm:$0x1]  ;;  %v4651_v2 = vld [vmem:[%s12976_s8] sm:$0x3] }
 0x2e4   : > { %v7044_v18 = vrot.slane %v7042_v40, 4  ;;  %v7041_v14 = vsel %vm10419_vm5, %v7036_v13, %v7040_v61  ;;  %v5449_v7 = vsel %vm10434_vm8, %v8468_v15, %v5448_v6  ;;  %v5469_v29 = vrot.slane %v9789_v53, 5  ;;  %v5426_v6 = vld [vmem:[#allocation2 + $0x90] sm:$0xe] }
 0x2e5   : > { %v4409_v51 = vadd.f32 %v11979_v41, %v4386_v33  ;;  %v4384_v36 = vmul.f32 %v11963_v38, %v4361_v3  ;;  %v4422_v25 = vmax.f32 %v4406_v10, 0.0  ;;  %v5458_v33 = vrot.slane %v9787_v48, 5 }
 0x2e6   : > { %v7045_v43 = vor.u32 %v7044_v18, %v7040_v61  ;;  %v8469_v3 = vrot.slane %v5423_v46, 9  ;;  %v5457_v10 = vrot.slane %v5455_v54, 4  ;;  %v5476_v44 = vrot.slane %v9790_v31, 5  ;;  %v9791_v61 = vld [vmem:[#allocation2 + $0x8c] sm:$0x1] }
 0x2e7   : > { %v4425_v28 = vmax.f32 %v4409_v51, 0.0  ;;  %v4407_v62 = vadd.f32 %v11979_v41, %v4384_v36  ;;  %v8470_v51 = vrot.slane %v5424_v26, 9  ;;  %v5920_v36 = vld [vmem:[#allocation2 + $0x6c] sm:$0xf]  ;;  %v8472_v23 = vrot.slane %v5426_v6, 9 }
 0x2e8   : > { %v7046_v11 = vrot.slane %v7045_v43, 4  ;;  %v5945_v22 = vshrl.u32 %v5920_v36, 16  ;;  %v5948_v39 = vshll.u32 %v5920_v36, 16  ;;  %v5456_v18 = vsel %vm10434_vm8, %v8469_v3, %v5455_v54  ;;  %v9792_v54 = vld [vmem:[#allocation2 + $0x70] sm:$0xf]  ;;  %v9750_v3 = vld [vmem:[#allocation6 + $0x90] sm:$0xff]  }
 0x2e9   : > { %v12058_v59 = vpack.c.bf16 %v4425_v28, %v4424_v58  ;;  %v4423_v47 = vmax.f32 %v4407_v62, 0.0  ;;  %v12060_v8 = vpop.f32.mrf.mxu0  ;;  %8423 = vmatmul.mubr.msk.bf16.gmra.mxu1 %vm1943_vm2, %v12027_v34  ;;  %v9788_v28 = vld [vmem:[#allocation2 + $0x80] sm:$0x1]  ;;  %v5954_v13 = vshll.u32 %v9792_v54, 16  ;;  %v5478_v26 = vrot.slane %v5476_v44, 4 }
 0x2ea   : > { %4578 = vmatprep.mubr.bf16.mxu1 %v13061_v9  ;;  %v7051_v52 = vsel %vm10419_vm5, %v7046_v11, %v7050_v20  ;;  %v5465_v62 = vrot.slane %v9788_v28, 5  ;;  %v5459_v20 = vsel %vm10434_vm8, %v5457_v10, %v5458_v33  ;;  %v12147_v36 = vsel %vm10434_vm8, %v8472_v23, %v5476_v44  ;;  %v9796_v31 = vld [vmem:[#allocation2 + $0xa4] sm:$0x1] }
 0x2eb   : > { %v4432_v35 = vpack.c.bf16 %v4423_v47, %v4422_v25  ;;  %v12064_v30 = vpop.f32.mrf.mxu0  ;;  %v8591_v0 = vcombine.low %v7041_v14, %v7051_v52  ;;  %v7252_v25 = vld [vmem:[#allocation2 + $0xcc] sm:$0xe]  ;;  %v7328_v47 = vrot.slane %v12083_v42, 5  ;;  %v5947_v14 = vrot.slane %v5945_v22, 4 }
 0x2ec   : > { %v8611_v40 = vrot.slane %v7252_v25, 9  ;;  %v5950_v52 = vrot.slane %v5948_v39, 5  ;;  %v8477_v48 = vcombine.low %v5456_v18, %v5459_v20  ;;  %v5486_v44 = vrot.slane %v9796_v31, 5  ;;  %v9751_v39 = vld [vmem:[#allocation6 + $0x88] sm:$0xff]   ;;  %v12159_v18 = vld [vmem:[#allocation2 + $0xbc] sm:$0x1] }
 0x2ed   : > { %v12067_v24 = vpop.f32.mrf.mxu0  ;;  %9502 = vmatmul.mubr.msk.bf16.gmra.mxu0 %vm1943_vm2, %v8591_v0  ;;  %v7330_v42 = vrot.slane %v7328_v47, 4 }
 0x2ee   : > { %7700 = vmatprep.mubr.bf16.mxu0 %v13061_v9  ;;  %v12123_v43 = vsel %vm10434_vm8, %v8611_v40, %v7328_v47  ;;  %v5951_v25 = vor.u32 %v5950_v52, %v5947_v14  ;;  %v9794_v47 = vld [vmem:[#allocation2 + $0x74] sm:$0x1]  ;;  %v9795_v40 = vld [vmem:[#allocation2 + $0x7c] sm:$0xf]  ;;  %v5428_v14 = vld [vmem:[#allocation2 + $0xa8] sm:$0xe] }
 0x2ef   : > { %v12069_v38 = vpop.f32.mrf.mxu0  ;;  %v5978_v6 = vshll.u32 %v9795_v40, 16 }
 0x2f1   : > { %8424 = vmatmul.mubr.msk.bf16.gmra.mxu1 %vm1943_vm2, %v4430_v57  ;;  %v5452_v57 = vsel %vm10434_vm8, %v5450_v16, %v5451_v12  ;;  %v8471_v16 = vrot.slane %v5425_v50, 9  ;;  %v5471_v12 = vrot.slane %v5469_v29, 4 }
 0x2f2   : > { %4588 = vmatprep.mubr.bf16.mxu1 %v13061_v9  ;;  %v8476_v32 = vcombine.low %v5449_v7, %v5452_v57  ;;  %v5958_v7 = vshrl.u32 %v9792_v54, 16  ;;  %v5923_v57 = vld [vmem:[#allocation2 + $0x78] sm:$0xf]  ;;  %v12166_v54 = vrot.slane %v5951_v25, 4 }
 0x2f3   : > { %v5470_v10 = vsel %vm10434_vm8, %v8471_v16, %v5469_v29  ;;  %v5972_v29 = vshll.u32 %v5923_v57, 16 }
 0x2f4   : > { %v12073_v41 = vpop.f32.mrf.mxu0  ;;  %v5960_v53 = vrot.slane %v5958_v7, 4  ;;  %v12174_v7 = vrot.slane %v5978_v6, 5 }
 0x2f5   : > { %v5974_v52 = vrot.slane %v5972_v29, 5  ;;  %v9802_v29 = vld [vmem:[#allocation2 + $0xb0] sm:$0x1] }
 0x2f6   : > { %v12075_v55 = vpop.f32.mrf.mxu0 }
 0x2f8   : > { %v12077_v5 = vpop.f32.mrf.mxu0 }
 0x2f9   : > { %8425 = vmatmul.mubr.msk.bf16.gmra.mxu1 %vm1943_vm2, %v4431_v17  ;;  %v5462_v17 = vrot.slane %v9786_v4, 5  ;;  %v9793_v4 = vld [vmem:[#allocation2 + $0x98] sm:$0x1] }
 0x2fa   : > { %4598 = vmatprep.mubr.bf16.mxu1 %v13061_v9  ;;  %v12081_v34 = vpop.f32.mrf.mxu0 }
 0x2fb   : > { %v5464_v58 = vrot.slane %v5462_v17, 4  ;;  %v5463_v63 = vsel %vm10434_vm8, %v8470_v51, %v5462_v17  ;;  %v5479_v17 = vrot.slane %v9793_v4, 5  ;;  %v5926_v4 = vld [vmem:[#allocation2 + $0x84] sm:$0xf] }
 0x2fc   : > { %v5996_v25 = vshll.u32 %v5926_v4, 16 }
 0x2fd   : > { %v5466_v15 = vsel %vm10434_vm8, %v5464_v58, %v5465_v62  ;;  %v12149_v58 = vrot.slane %v5954_v13, 5  ;;  %v5480_v62 = vsel %vm10434_vm8, %v5478_v26, %v5479_v17 }
 0x2fe   : > { %v8478_v33 = vcombine.low %v5463_v63, %v5466_v15  ;;  %v8480_v20 = vcombine.low %v12147_v36, %v5480_v62  ;;  %v5427_v15 = vld [vmem:[#allocation2 + $0x9c] sm:$0xe]  ;;  %v9800_v36 = vld [vmem:[#allocation2 + $0x80] sm:$0x1] }
 0x2ff   : > { %v12090_v37 = vpop.f32.mrf.mxu0 }
 0x301   : > { %v12092_v49 = vpop.f32.mrf.mxu0  ;;  %8426 = vmatmul.mubr.msk.bf16.gmra.mxu1 %vm1943_vm2, %v4432_v35  ;;  %v7331_v35 = vrot.slane %v12085_v21, 5  ;;  %v5472_v21 = vrot.slane %v9791_v61, 5 }
 0x302   : > { %4608 = vmatprep.mubr.bf16.mxu1 %v13061_v9 }
 0x303   : > { %v12096_v60 = vpop.f32.mrf.mxu0  ;;  %v12133_v45 = vsel %vm10434_vm8, %v7330_v42, %v7331_v35  ;;  %v5473_v51 = vsel %vm10434_vm8, %v5471_v12, %v5472_v21  ;;  %v5964_v35 = vshll.u32 %v9794_v47, 16  ;;  %v9797_v42 = vld [vmem:[#allocation2 + $0xa0] sm:$0xf]  ;;  %v5982_v21 = vshrl.u32 %v9795_v40, 16  ;;  %v9799_v12 = vld [vmem:[#allocation2 + $0xac] sm:$0xf] }
 0x304   : > { %v8619_v11 = vcombine.low %v12123_v43, %v12133_v45  ;;  %v5483_v61 = vrot.slane %v9797_v42, 5  ;;  %v8479_v63 = vcombine.low %v5470_v10, %v5473_v51  ;;  %v5490_v23 = vrot.slane %v9799_v12, 5  ;;  %v9752_v10 = vld [vmem:[#allocation6 + $0x80] sm:$0xff]  }
 0x305   : > { %v12102_v19 = vpop.f32.mrf.mxu0  ;;  %v12168_v13 = vrot.slane %v5964_v35, 5  ;;  %v5984_v51 = vrot.slane %v5982_v21, 4  ;;  %v5493_v40 = vrot.slane %v9802_v29, 5 }
 0x309   : > { %v12112_v56 = vpop.f32.mrf.mxu0  ;;  %8427 = vmatmul.mubr.msk.bf16.gmra.mxu1 %vm1943_vm2, %v12058_v59 }
 0x30a   : > { %9369 = vmatprep.mubr.msk.bf16.mxu1 %vm1943_vm2, %v8476_v32  ;;  %v5969_v32 = vshrl.u32 %v5923_v57, 16 }
 0x30b   : > { %v12125_v59 = vpop.f32.mrf.mxu0 }
 0x30c   : > { %v5971_v26 = vrot.slane %v5969_v32, 4  ;;  %v8474_v32 = vrot.slane %v5428_v14, 9 }
 0x30d   : > { %v12137_v46 = vpop.f32.mrf.mxu0 }
 0x30e   : > { %v5975_v42 = vor.u32 %v5974_v52, %v5971_v26 }
 0x30f   : > { %v12139_v0 = vpop.f32.mrf.mxu0 }
 0x311   : > { %v9347_v28 = vpop.f32.mrf.mxu0  ;;  %9370 = vmatmul.mubr.msk.bf16.vlgmr.msra.gmra.mxu1 %vm1943_vm2, %v8477_v48  ;;  %v8473_v48 = vrot.slane %v5427_v15, 9 }
 0x312   : > { %v12155_v50 = vadd.f32 %v9347_v28, %v12060_v8  ;;  %9410 = vmatpush3.bf16.msra.mxu1 %v12043_v1  ;;  %9373 = vmatprep.mubr.msk.bf16.mxu1 %vm1943_vm2, %v8478_v33  ;;  %v5500_v8 = vrot.slane %v12159_v18, 5  ;;  %v5485_v33 = vrot.slane %v5483_v61, 4  ;;  %v5988_v28 = vshll.u32 %v9800_v36, 16 }
 0x313   : > { %v5359_v22 = vpop.f32.mrf.mxu0  ;;  %9411 = vmatprep.subr.bf16.mxu1 %v9750_v3  ;;  %v5976_v36 = vrot.slane %v5975_v42, 4 }
 0x314   : > { %v12163_v1 = vadd.f32 %v5359_v22, %v12064_v30  ;;  %v5961_v30 = vor.u32 %v5960_v53, %v12149_v58  ;;  %v5492_v53 = vrot.slane %v5490_v23, 4  ;;  %v5487_v15 = vsel %vm10434_vm8, %v5485_v33, %v5486_v44 }
 0x315   : > { %v9348_v16 = vpop.f32.mrf.mxu0 }
 0x316   : > { %v12171_v17 = vadd.f32 %v9348_v16, %v12067_v24  ;;  %9412 = vmatpush3.bf16.msra.mxu1 %v9750_v3  ;;  %v5993_v24 = vshrl.u32 %v5926_v4, 16  ;;  %v9801_v3 = vld [vmem:[#allocation2 + $0x88] sm:$0xf]  ;;  %v12188_v22 = vrot.slane %v5961_v30, 4  ;;  %v5929_v16 = vld [vmem:[#allocation2 + $0x90] sm:$0xf]  ;;  %v5494_v44 = vsel %vm10434_vm8, %v5492_v53, %v5493_v40 }
 0x317   : > { %v5362_v57 = vpop.f32.mrf.mxu0  ;;  %9413 = vmatprep.subr.bf16.mxu1 %v9751_v39  ;;  %v6002_v47 = vshll.u32 %v9801_v3, 16  ;;  %v6006_v6 = vshrl.u32 %v9801_v3, 16  ;;  %v9803_v4 = vld [vmem:[#allocation2 + $0xb8] sm:$0xf]  ;;  %v5998_v30 = vrot.slane %v5996_v25, 5  ;;  %v6020_v25 = vshll.u32 %v5929_v16, 16 }
 0x318   : > { %v12177_v62 = vadd.f32 %v5362_v57, %v12069_v38  ;;  %v5957_v38 = vsel %vm10419_vm5, %v12166_v54, %v12149_v58  ;;  %v5497_v26 = vrot.slane %v9803_v4, 5  ;;  %v5995_v14 = vrot.slane %v5993_v24, 4  ;;  %v5429_v57 = vld [vmem:[#allocation2 + $0xb4] sm:$0xe] }
 0x319   : > { %v9351_v35 = vpop.f32.mrf.mxu0  ;;  %9374 = vmatmul.mubr.msk.bf16.gmra.mxu1 %vm1943_vm2, %v8479_v63  ;;  %v5484_v63 = vsel %vm10434_vm8, %v8473_v48, %v5483_v61  ;;  %v5491_v61 = vsel %vm10434_vm8, %v8474_v32, %v5490_v23  ;;  %v12206_v48 = vrot.slane %v6002_v47, 5  ;;  %v6008_v33 = vrot.slane %v6006_v6, 4  ;;  %v9804_v3 = vld [vmem:[#allocation2 + $0x94] sm:$0xf]  ;;  %v5932_v32 = vld [vmem:[#allocation2 + $0x9c] sm:$0xf] }
 0x31a   : > { %v12181_v31 = vadd.f32 %v9351_v35, %v12073_v41  ;;  %9377 = vmatprep.mubr.msk.bf16.mxu1 %vm1943_vm2, %v8480_v20  ;;  %9414 = vmatpush3.bf16.msra.mxu1 %v9751_v39  ;;  %v12194_v41 = vld [vmem:[#allocation6 + $0xd8] sm:$0xff]   ;;  %v5985_v39 = vor.u32 %v5984_v51, %v12174_v7  ;;  %v12197_v20 = vrot.slane %v5988_v28, 5  ;;  %v6017_v28 = vshrl.u32 %v5929_v16, 16 }
 0x31b   : > { %v5375_v21 = vpop.f32.mrf.mxu0  ;;  %9415 = vmatprep.subr.bf16.mxu1 %v9752_v10  ;;  %v5967_v23 = vsel %vm10419_vm5, %v12188_v22, %v12168_v13  ;;  %v6026_v47 = vshll.u32 %v9804_v3, 16  ;;  %v6030_v35 = vshrl.u32 %v9804_v3, 16  ;;  %v8482_v53 = vcombine.low %v5491_v61, %v5494_v44  ;;  %v9805_v22 = vld [vmem:[#allocation2 + $0x8c] sm:$0x1]  ;;  %v9806_v44 = vld [vmem:[#allocation2 + $0xa0] sm:$0xf] }
 0x31c   : > { %v12200_v12 = vadd.f32 %v5375_v21, %v12075_v55  ;;  %v8481_v55 = vcombine.low %v5484_v63, %v5487_v15  ;;  %v5499_v29 = vrot.slane %v5497_v26, 4  ;;  %v5986_v6 = vrot.slane %v5985_v39, 4 }
 0x31d   : > { %v9352_v52 = vpop.f32.mrf.mxu0  ;;  %v5999_v42 = vor.u32 %v5998_v30, %v5995_v14  ;;  %v6009_v13 = vor.u32 %v6008_v33, %v12206_v48  ;;  %v6012_v21 = vshll.u32 %v9805_v22, 16  ;;  %v6019_v15 = vrot.slane %v6017_v28, 4 }
 0x31e   : > { %v12209_v51 = vadd.f32 %v9352_v52, %v12077_v5  ;;  %9416 = vmatpush3.bf16.msra.mxu1 %v9752_v10  ;;  %v8475_v10 = vrot.slane %v5429_v57, 9  ;;  %v6044_v16 = vshll.u32 %v5932_v32, 16  ;;  %v6022_v52 = vrot.slane %v6020_v25, 5 }
 0x31f   : > { %v5378_v24 = vpop.f32.mrf.mxu0  ;;  %9457 = vmatprep.subr.bf16.mxu1 %v12194_v41  ;;  %v12225_v61 = vrot.slane %v6026_v47, 5  ;;  %v6050_v57 = vshll.u32 %v9806_v44, 16  ;;  %v6054_v39 = vshrl.u32 %v9806_v44, 16  ;;  %v6032_v33 = vrot.slane %v6030_v35, 4 }
 0x320   : > { %v12217_v5 = vadd.f32 %v5378_v24, %v12081_v34  ;;  %v6041_v34 = vshrl.u32 %v5932_v32, 16  ;;  %v5498_v30 = vsel %vm10434_vm8, %v8475_v10, %v5497_v26  ;;  %v5981_v28 = vsel %vm10419_vm5, %v5976_v36, %v12174_v7 }
 0x321   : > { %v9355_v40 = vpop.f32.mrf.mxu0  ;;  %9378 = vmatmul.mubr.msk.bf16.gmra.mxu1 %vm1943_vm2, %v8481_v55  ;;  %v6000_v24 = vrot.slane %v5999_v42, 4  ;;  %v6010_v25 = vrot.slane %v6009_v13, 4  ;;  %v6014_v3 = vrot.slane %v6012_v21, 5  ;;  %v5991_v26 = vsel %vm10419_vm5, %v5986_v6, %v12197_v20  ;;  %v5938_v21 = vld [vmem:[#allocation2 + $0xb4] sm:$0xf] }
 0x322   : > { %v12222_v63 = vadd.f32 %v9355_v40, %v12090_v37  ;;  %9381 = vmatprep.mubr.msk.bf16.mxu1 %vm1943_vm2, %v8482_v53  ;;  %v5501_v37 = vsel %vm10434_vm8, %v5499_v29, %v5500_v8  ;;  %v6043_v18 = vrot.slane %v6041_v34, 4  ;;  %v6046_v47 = vrot.slane %v6044_v16, 5  ;;  %v5935_v53 = vld [vmem:[#allocation2 + $0xa8] sm:$0xf]  ;;  %v9807_v29 = vld [vmem:[#allocation2 + $0x98] sm:$0x1] }
 0x323   : > { %v5391_v4 = vpop.f32.mrf.mxu0  ;;  %v8483_v8 = vcombine.low %v5498_v30, %v5501_v37  ;;  %v8516_v7 = vcombine.low %v5957_v38, %v5967_v23  ;;  %v12250_v36 = vrot.slane %v6050_v57, 5  ;;  %v6056_v35 = vrot.slane %v6054_v39, 4  ;;  %v9808_v23 = vld [vmem:[#allocation2 + $0xa4] sm:$0x1] }
 0x324   : > { %v12228_v14 = vadd.f32 %v5391_v4, %v12092_v49  ;;  %v6023_v10 = vor.u32 %v6022_v52, %v6019_v15  ;;  %v6033_v20 = vor.u32 %v6032_v33, %v12225_v61  ;;  %v6036_v40 = vshll.u32 %v9807_v29, 16  ;;  %v9809_v4 = vld [vmem:[#allocation2 + $0xac] sm:$0xf] }
 0x325   : > { %v9356_v55 = vpop.f32.mrf.mxu0  ;;  %v8517_v42 = vcombine.low %v5981_v28, %v5991_v26  ;;  %v6005_v58 = vsel %vm10419_vm5, %v6000_v24, %v12206_v48  ;;  %v6015_v54 = vsel %vm10419_vm5, %v6010_v25, %v6014_v3  ;;  %v6060_v13 = vshll.u32 %v9808_v23, 16 }
 0x326   : > { %v12240_v49 = vadd.f32 %v9356_v55, %v12096_v60  ;;  %v6065_v22 = vshrl.u32 %v5935_v53, 16  ;;  %v6057_v34 = vor.u32 %v6056_v35, %v12250_v36  ;;  %v6068_v16 = vshll.u32 %v5935_v53, 16  ;;  %v9810_v55 = vld [vmem:[#allocation2 + $0xb8] sm:$0xf] }
 0x327   : > { %v5394_v32 = vpop.f32.mrf.mxu0  ;;  %v6074_v52 = vshll.u32 %v9809_v4, 16  ;;  %v6078_v48 = vshrl.u32 %v9809_v4, 16  ;;  %v6024_v57 = vrot.slane %v6023_v10, 4  ;;  %v6038_v39 = vrot.slane %v6036_v40, 5 }
 0x328   : > { %v12253_v60 = vadd.f32 %v5394_v32, %v12102_v19  ;;  %v6047_v19 = vor.u32 %v6046_v47, %v6043_v18  ;;  %v6089_v37 = vshrl.u32 %v5938_v21, 16  ;;  %v6092_v33 = vshll.u32 %v5938_v21, 16  ;;  %v9754_v32 = vld [vmem:[#allocation6 + $0xd0] sm:$0xff]  }
 0x329   : > { %v9359_v6 = vpop.f32.mrf.mxu0  ;;  %9382 = vmatmul.mubr.msk.bf16.gmra.mxu1 %vm1943_vm2, %v8483_v8  ;;  %v6098_v28 = vshll.u32 %v9810_v55, 16  ;;  %v6102_v24 = vshrl.u32 %v9810_v55, 16  ;;  %v6062_v26 = vrot.slane %v6060_v13, 5  ;;  %v6067_v18 = vrot.slane %v6065_v22, 4  ;;  %v9811_v13 = vld [vmem:[#allocation2 + $0xb0] sm:$0x1] }
 0x32a   : > { %v12263_v38 = vadd.f32 %v9359_v6, %v12112_v56  ;;  %9417 = vmatprep.mubr.msk.bf16.mxu1 %vm1943_vm2, %v8516_v7  ;;  %v6034_v56 = vrot.slane %v6033_v20, 4  ;;  %v6048_v3 = vrot.slane %v6047_v19, 4  ;;  %v6058_v8 = vrot.slane %v6057_v34, 4  ;;  %v5941_v6 = vld [vmem:[#allocation2 + $0xc0] sm:$0xf] }
 0x32b   : > { %v5407_v15 = vpop.f32.mrf.mxu0  ;;  %v6076_v7 = vrot.slane %v6074_v52, 5  ;;  %v6080_v35 = vrot.slane %v6078_v48, 4  ;;  %v8518_v10 = vcombine.low %v6005_v58, %v6015_v54  ;;  %v6091_v20 = vrot.slane %v6089_v37, 4  ;;  %v9755_v54 = vld [vmem:[#allocation6 + $0xc8] sm:$0xff]   ;;  %v9813_v48 = vld [vmem:[#allocation2 + $0xbc] sm:$0x1] }
 0x32c   : > { %v12268_v44 = vadd.f32 %v5407_v15, %v12125_v59  ;;  %v6070_v59 = vrot.slane %v6068_v16, 5  ;;  %v6094_v29 = vrot.slane %v6092_v33, 5  ;;  %v6100_v40 = vrot.slane %v6098_v28, 5  ;;  %v9812_v34 = vld [vmem:[#allocation2 + $0xc4] sm:$0xf]  ;;  %v9756_v33 = vld [vmem:[#allocation6 + $0xc0] sm:$0xff]  }
 0x32d   : > { %v9360_v30 = vpop.f32.mrf.mxu0  ;;  %v6029_v19 = vsel %vm10419_vm5, %v6024_v57, %v12225_v61  ;;  %v6063_v58 = vsel %vm10419_vm5, %v6058_v8, %v6062_v26  ;;  %v6084_v22 = vshll.u32 %v9811_v13, 16  ;;  %v6113_v21 = vshrl.u32 %v5941_v6, 16  ;;  %v9758_v8 = vld [vmem:[#allocation6 + $0x118] sm:$0xff]   ;;  %v9759_v13 = vld [vmem:[#allocation2 + $0x84] sm:$0xff]  }
 0x32e   : > { %v12271_v25 = vadd.f32 %v9360_v30, %v12137_v46  ;;  %v6104_v46 = vrot.slane %v6102_v24, 4  ;;  %v6071_v23 = vor.u32 %v6070_v59, %v6067_v18  ;;  %v6116_v15 = vshll.u32 %v5941_v6, 16 }
 0x32f   : > { %v5410_v47 = vpop.f32.mrf.mxu0  ;;  %v6122_v61 = vshll.u32 %v9812_v34, 16  ;;  %v6126_v16 = vshrl.u32 %v9812_v34, 16  ;;  %v6095_v4 = vor.u32 %v6094_v29, %v6091_v20  ;;  %v6108_v57 = vshll.u32 %v9813_v48, 16  ;;  %v9814_v20 = vld [vmem:[#allocation2 + $0xc8] sm:$0x1]  ;;  %v9762_v34 = vld [vmem:[#allocation2 + $0x9c] sm:$0xff]  }
 0x330   : > { %v12274_v53 = vadd.f32 %v5410_v47, %v12139_v0  ;;  %v6039_v0 = vsel %vm10419_vm5, %v6034_v56, %v6038_v39  ;;  %v6105_v52 = vor.u32 %v6104_v46, %v6100_v40  ;;  %v6072_v39 = vrot.slane %v6071_v23, 4  ;;  %v9765_v48 = vld [vmem:[#allocation2 + $0xb4] sm:$0xff]  }
 0x331   : > { %9418 = vmatmul.mubr.msk.bf16.vlgmr.msra.gmra.mxu1 %vm1943_vm2, %v8517_v42  ;;  %v6053_v42 = vsel %vm10419_vm5, %v6048_v3, %v12250_v36  ;;  %v8519_v56 = vcombine.low %v6029_v19, %v6039_v0  ;;  %v6086_v37 = vrot.slane %v6084_v22, 5  ;;  %v6115_v55 = vrot.slane %v6113_v21, 4  ;;  %v9761_v22 = vld [vmem:[#allocation6 + $0x110] sm:$0xff]   ;;  %v9760_v21 = vld [vmem:[#allocation2 + $0x90] sm:$0xff]  }
 0x332   : > { %9458 = vmatpush3.bf16.msra.mxu1 %v12194_v41  ;;  %9421 = vmatprep.mubr.msk.bf16.mxu1 %vm1943_vm2, %v8518_v10  ;;  %v6081_v41 = vor.u32 %v6080_v35, %v6076_v7  ;;  %v8520_v36 = vcombine.low %v6053_v42, %v6063_v58  ;;  %v6118_v28 = vrot.slane %v6116_v15, 5  ;;  %v6124_v24 = vrot.slane %v6122_v61, 5  ;;  %v9764_v15 = vld [vmem:[#allocation6 + $0x108] sm:$0xff]   ;;  %v9763_v61 = vld [vmem:[#allocation2 + $0xa8] sm:$0xff]  }
 0x333   : > { %9459 = vmatprep.subr.bf16.mxu1 %v9754_v32  ;;  %v6128_v3 = vrot.slane %v6126_v16, 4  ;;  %v6096_v26 = vrot.slane %v6095_v4, 4  ;;  %v6106_v18 = vrot.slane %v6105_v52, 4  ;;  %v6110_v47 = vrot.slane %v6108_v57, 5  ;;  %v9815_v16 = vld [vmem:[#allocation2 + $0x7c] sm:$0xf] }
 0x334   : > { %v6082_v30 = vrot.slane %v6081_v41, 4  ;;  %v6119_v35 = vor.u32 %v6118_v28, %v6115_v55  ;;  %v6132_v29 = vshll.u32 %v9814_v20, 16  ;;  %v9757_v41 = vld [vmem:[#allocation2 + $0x78] sm:$0xff]   ;;  %v7279_v4 = vrot.slane %v9815_v16, 5  ;;  %v9766_v57 = vld [vmem:[#allocation2 + $0xc0] sm:$0xff]   ;;  %v9768_v55 = vld [vmem:[#allocation2 + $0xcc] sm:$0xff]  }
 0x335   : > { %v6129_v10 = vor.u32 %v6128_v3, %v6124_v24  ;;  %v6101_v46 = vsel %vm10419_vm5, %v6096_v26, %v6100_v40  ;;  %v6111_v6 = vsel %vm10419_vm5, %v6106_v18, %v6110_v47  ;;  %v7245_v52 = vld [vmem:[#allocation2 + $0x78] sm:$0xe]  ;;  %v7246_v3 = vld [vmem:[#allocation2 + $0x84] sm:$0xe]  ;;  %v9818_v26 = vld [vmem:[#allocation2 + $0x94] sm:$0xf] }
 0x336   : > { %9460 = vmatpush3.bf16.msra.mxu1 %v9754_v32  ;;  %v6077_v32 = vsel %vm10419_vm5, %v6072_v39, %v6076_v7  ;;  %v6087_v59 = vsel %vm10419_vm5, %v6082_v30, %v6086_v37  ;;  %v8522_v0 = vcombine.low %v6101_v46, %v6111_v6  ;;  %v6120_v7 = vrot.slane %v6119_v35, 4  ;;  %v9816_v39 = vld [vmem:[#allocation2 + $0x80] sm:$0x1]  ;;  %v9817_v37 = vld [vmem:[#allocation2 + $0x88] sm:$0xf] }
 0x337   : > { %9461 = vmatprep.subr.bf16.mxu1 %v9755_v54  ;;  %v8521_v19 = vcombine.low %v6077_v32, %v6087_v59  ;;  %v6130_v42 = vrot.slane %v6129_v10, 4  ;;  %v6134_v58 = vrot.slane %v6132_v29, 5  ;;  %v7282_v30 = vrot.slane %v9816_v39, 5  ;;  %v7247_v47 = vld [vmem:[#allocation2 + $0x90] sm:$0xe] }
 0x338   : > { %v7293_v18 = vrot.slane %v9818_v26, 5  ;;  %v9819_v35 = vld [vmem:[#allocation2 + $0x8c] sm:$0x1]  ;;  %v8606_v20 = vrot.slane %v7247_v47, 9  ;;  %v9820_v46 = vld [vmem:[#allocation2 + $0x98] sm:$0x1] }
 0x339   : > { %9422 = vmatmul.mubr.msk.bf16.gmra.mxu1 %vm1943_vm2, %v8519_v56  ;;  %v6135_v40 = vsel %vm10419_vm5, %v6130_v42, %v6134_v58  ;;  %v8604_v56 = vrot.slane %v7245_v52, 9  ;;  %v7289_v10 = vrot.slane %v9819_v35, 5  ;;  %v7296_v6 = vrot.slane %v9820_v46, 5  ;;  %v9824_v52 = vld [vmem:[#allocation2 + $0xb0] sm:$0x1] }
 0x33a   : > { %9425 = vmatprep.mubr.msk.bf16.mxu1 %vm1943_vm2, %v8520_v36  ;;  %9462 = vmatpush3.bf16.msra.mxu1 %v9755_v54  ;;  %v6125_v54 = vsel %vm10419_vm5, %v6120_v7, %v6124_v24  ;;  %v7281_v36 = vrot.slane %v7279_v4, 4  ;;  %v7295_v29 = vrot.slane %v7293_v18, 4  ;;  %v9821_v7 = vld [vmem:[#allocation2 + $0xa0] sm:$0xf]  ;;  %v7294_v58 = vsel %vm10434_vm8, %v8606_v20, %v7293_v18 }
 0x33b   : > { %9463 = vmatprep.subr.bf16.mxu1 %v9756_v33  ;;  %v8523_v23 = vcombine.low %v6125_v54, %v6135_v40  ;;  %v7280_v28 = vsel %vm10434_vm8, %v8604_v56, %v7279_v4  ;;  %v7300_v42 = vrot.slane %v9821_v7, 5  ;;  %v7248_v40 = vld [vmem:[#allocation2 + $0x9c] sm:$0xe] }
 0x33c   : > { %v7283_v24 = vsel %vm10434_vm8, %v7281_v36, %v7282_v30  ;;  %v7297_v54 = vsel %vm10434_vm8, %v7295_v29, %v7296_v6  ;;  %v9825_v36 = vld [vmem:[#allocation2 + $0xb8] sm:$0xf] }
 0x33d   : > { %v8612_v32 = vcombine.low %v7280_v28, %v7283_v24  ;;  %v7314_v39 = vrot.slane %v9825_v36, 5  ;;  %v7251_v24 = vld [vmem:[#allocation2 + $0xc0] sm:$0xe]  ;;  %v4621_v36 = vld [vmem:[%s10140_s24 + $0x10] sm:$0xff] }
 0x33e   : > { %9464 = vmatpush3.bf16.msra.mxu1 %v9756_v33  ;;  %v7286_v33 = vrot.slane %v9817_v37, 5 }
 0x33f   : > { %9505 = vmatprep.subr.bf16.mxu1 %v9758_v8  ;;  %v7316_v47 = vrot.slane %v7314_v39, 4 }
 0x340   : > { %v7288_v59 = vrot.slane %v7286_v33, 4 }
 0x341   : > { %9426 = vmatmul.mubr.msk.bf16.gmra.mxu1 %vm1943_vm2, %v8521_v19 }
 0x342   : > { %9429 = vmatprep.mubr.msk.bf16.mxu1 %vm1943_vm2, %v8522_v0  ;;  %v7290_v0 = vsel %vm10434_vm8, %v7288_v59, %v7289_v10  ;;  %v8610_v59 = vrot.slane %v7251_v24, 9  ;;  %v9828_v10 = vld [vmem:[#allocation2 + $0xc8] sm:$0x1]  ;;  %v4622_v24 = vld [vmem:[%s10140_s24 + $0x18] sm:$0xff] }
 0x343   : > { %v7324_v20 = vrot.slane %v9828_v10, 5 }
 0x349   : > { %9430 = vmatmul.mubr.msk.bf16.gmra.mxu1 %vm1943_vm2, %v8523_v23  ;;  %v9822_v23 = vld [vmem:[#allocation2 + $0xac] sm:$0xf] }
 0x34a   : > { %9465 = vmatprep.mubr.msk.bf16.mxu1 %vm1943_vm2, %v9757_v41  ;;  %v7307_v41 = vrot.slane %v9822_v23, 5  ;;  %v4695_v23 = vld [vmem:[%s12977_s9] sm:$0x3] }
 0x34c   : > { %v7309_v4 = vrot.slane %v7307_v41, 4 }
 0x351   : > { %9466 = vmatmul.mubr.msk.bf16.vlgmr.msra.gmra.mxu1 %vm1943_vm2, %v9759_v13  ;;  %v7249_v13 = vld [vmem:[#allocation2 + $0xa8] sm:$0xe] }
 0x352   : > { %9506 = vmatpush3.bf16.msra.mxu1 %v9758_v8  ;;  %9469 = vmatprep.mubr.msk.bf16.mxu1 %vm1943_vm2, %v9760_v21  ;;  %v8605_v8 = vrot.slane %v7246_v3, 9  ;;  %v8614_v21 = vcombine.low %v7294_v58, %v7297_v54  ;;  %v8608_v16 = vrot.slane %v7249_v13, 9 }
 0x353   : > { %9507 = vmatprep.subr.bf16.mxu1 %v9761_v22 }
 0x354   : > { %v7287_v19 = vsel %vm10434_vm8, %v8605_v8, %v7286_v33  ;;  %v7308_v30 = vsel %vm10434_vm8, %v8608_v16, %v7307_v41  ;;  %v7250_v33 = vld [vmem:[#allocation2 + $0xb4] sm:$0xe] }
 0x355   : > { %v8609_v18 = vrot.slane %v7250_v33, 9 }
 0x356   : > { %9508 = vmatpush3.bf16.msra.mxu1 %v9761_v22  ;;  %v8613_v22 = vcombine.low %v7287_v19, %v7290_v0 }
 0x357   : > { %9509 = vmatprep.subr.bf16.mxu1 %v9764_v15  ;;  %v7315_v29 = vsel %vm10434_vm8, %v8609_v18, %v7314_v39 }
 0x359   : > { %9470 = vmatmul.mubr.msk.bf16.gmra.mxu1 %vm1943_vm2, %v9762_v34  ;;  %v7302_v34 = vrot.slane %v7300_v42, 4 }
 0x35a   : > { %9473 = vmatprep.mubr.msk.bf16.mxu1 %vm1943_vm2, %v9763_v61  ;;  %9510 = vmatpush3.bf16.msra.mxu1 %v9764_v15  ;;  %v8607_v15 = vrot.slane %v7248_v40, 9 }
 0x35b   : > { %9511 = vmatprep.subr.bf16.mxu1 %v9767_v27 }
 0x35e   : > { %9512 = vmatpush3.bf16.msra.mxu1 %v9767_v27  ;;  %v9823_v27 = vld [vmem:[#allocation2 + $0xa4] sm:$0x1] }
 0x35f   : > { %v7303_v61 = vrot.slane %v9823_v27, 5 }
 0x361   : > { %9474 = vmatmul.mubr.msk.bf16.gmra.mxu1 %vm1943_vm2, %v9765_v48  ;;  %v7310_v48 = vrot.slane %v9824_v52, 5  ;;  %v7304_v56 = vsel %vm10434_vm8, %v7302_v34, %v7303_v61 }
 0x362   : > { %9477 = vmatprep.mubr.msk.bf16.mxu1 %vm1943_vm2, %v9766_v57  ;;  %v7301_v57 = vsel %vm10434_vm8, %v8607_v15, %v7300_v42  ;;  %v4653_v42 = vlaneseq  ;;  %v4619_v15 = vld [vmem:[%s10140_s24] sm:$0xff] }
 0x363   : > { %v7311_v37 = vsel %vm10434_vm8, %v7309_v4, %v7310_v48  ;;  %v8615_v3 = vcombine.low %v7301_v57, %v7304_v56  ;;  %v4620_v4 = vld [vmem:[%s10140_s24 + $0x8] sm:$0xff] }
 0x364   : > { %v8616_v26 = vcombine.low %v7308_v30, %v7311_v37  ;;  %v4654_v58 = vshrl.u32 %v4653_v42, 7 }
 0x366   : > { %v12353_v54 = vsub.s32 0, %v4654_v58  ;;  %v12358_v40 = vsub.s32 1, %v4654_v58 }
 0x368   : > { %13071 = vst [vmem:[#allocation21_spill] sm:$0xff] %v12353_v54  ;;  %13072 = vst [vmem:[#allocation19_spill] sm:$0xff] %v12358_v40  ;;  %v12364_v41 = vrot.slane %v4651_v2, %v12353_v54  ;;  %v12367_v43 = vrot.slane %v4695_v23, %v12353_v54  ;;  %v12370_v45 = vrot.slane %v4651_v2, %v12358_v40  ;;  %v4625_v2 = vld [vmem:[%s10140_s24 + $0x30] sm:$0xff] }
 0x369   : > { %9478 = vmatmul.mubr.msk.bf16.gmra.mxu1 %vm1943_vm2, %v9768_v55  ;;  %v9826_v55 = vld [vmem:[#allocation2 + $0xc4] sm:$0xf] }
 0x36a   : > { %9513 = vmatprep.mubr.msk.bf16.mxu1 %vm1943_vm2, %v8612_v32  ;;  %v7321_v28 = vrot.slane %v9826_v55, 5  ;;  %v9827_v32 = vld [vmem:[#allocation2 + $0xbc] sm:$0x1] }
 0x36b   : > { %v7317_v8 = vrot.slane %v9827_v32, 5 }
 0x36c   : > { %v7323_v35 = vrot.slane %v7321_v28, 4  ;;  %v7322_v6 = vsel %vm10434_vm8, %v8610_v59, %v7321_v28 }
 0x36d   : > { %v7318_v46 = vsel %vm10434_vm8, %v7316_v47, %v7317_v8  ;;  %v4623_v8 = vld [vmem:[%s10140_s24 + $0x20] sm:$0xff] }
 0x36e   : > { %v7325_v19 = vsel %vm10434_vm8, %v7323_v35, %v7324_v20  ;;  %v8617_v0 = vcombine.low %v7315_v29, %v7318_v46 }
 0x36f   : > { %v8618_v7 = vcombine.low %v7322_v6, %v7325_v19  ;;  %v4624_v6 = vld [vmem:[%s10140_s24 + $0x28] sm:$0xff] }
 0x371   : > { %9514 = vmatmul.mubr.msk.bf16.vlgmr.msra.gmra.mxu1 %vm1943_vm2, %v8613_v22 }
 0x372   : > { %9517 = vmatprep.mubr.msk.bf16.mxu1 %vm1943_vm2, %v8614_v21  ;;  %v12376_v21 = vrot.slane %v4695_v23, %v12358_v40 }
 0x379   : > { %9518 = vmatmul.mubr.msk.bf16.gmra.mxu1 %vm1943_vm2, %v8615_v3 }
 0x37a   : > { %9521 = vmatprep.mubr.msk.bf16.mxu1 %vm1943_vm2, %v8616_v26 }
 0x381   : > { %9522 = vmatmul.mubr.msk.bf16.gmra.mxu1 %vm1943_vm2, %v8617_v0 }
 0x382   : > { %9525 = vmatprep.mubr.msk.bf16.mxu1 %vm1943_vm2, %v8618_v7 }
 0x389   : > { %9526 = vmatmul.mubr.msk.bf16.gmra.mxu1 %vm1943_vm2, %v8619_v11  ;;  %v12372_v11 = vpop.f32.mrf.mxu0 }
 0x38b   : > { %v12381_v16 = vpop.f32.mrf.mxu0 }
 0x38d   : > { %v12389_v28 = vpop.f32.mrf.mxu0 }
 0x38f   : > { %v12403_v46 = vpop.f32.mrf.mxu0 }
 0x391   : > { %v4540_v13 = vpop.f32.mrf.mxu1 }
 0x392   : > { %v4663_v22 = vmul.f32 %v12364_v41, %v4540_v13 }
 0x393   : > { %v4542_v34 = vpop.f32.mrf.mxu1 }
 0x394   : > { %v4707_v27 = vadd.f32 %v12367_v43, %v4663_v22  ;;  %v4664_v61 = vmul.f32 %v12370_v45, %v4542_v34 }
 0x395   : > { %v4544_v52 = vpop.f32.mrf.mxu1 }
 0x396   : > { %v4739_v48 = vadd.f32 %v4707_v27, %v4619_v15  ;;  %v4708_v57 = vadd.f32 %v12376_v21, %v4664_v61  ;;  %v4665_v56 = vmul.f32 %v12364_v41, %v4544_v52  ;;  %v12413_v27 = vpop.f32.mrf.mxu0  ;;  %v4626_v61 = vld [vmem:[%s10140_s24 + $0x38] sm:$0xff] }
 0x397   : > { %v4546_v39 = vpop.f32.mrf.mxu1 }
 0x398   : > { %v4771_v30 = vmax.f32 %v4739_v48, 0.0  ;;  %v4740_v37 = vadd.f32 %v4708_v57, %v4620_v4  ;;  %v4709_v33 = vadd.f32 %v12367_v43, %v4665_v56  ;;  %v4666_v55 = vmul.f32 %v12370_v45, %v4546_v39  ;;  %v9771_v39 = vld [vmem:[%s12971_s3 + $0x34] ss:$8 sps:$4 sm:$0xff]  }
 0x399   : > { %v4550_v3 = vpop.f32.mrf.mxu1  ;;  %7676 = vmatprep.subr.bf16.mxu0 %v9771_v39  ;;  %v4632_v39 = vld [vmem:[%s10140_s24 + $0x68] sm:$0xff] }
 0x39a   : > { %4803 = vst [vmem:[%s12394_s29] sm:$0xff] %v4771_v30  ;;  %v4772_v26 = vmax.f32 %v4740_v37, 0.0  ;;  %v4741_v18 = vadd.f32 %v4709_v33, %v4621_v36  ;;  %v4710_v47 = vadd.f32 %v12376_v21, %v4666_v55  ;;  %v4667_v32 = vmul.f32 %v12364_v41, %v4550_v3  ;;  %v9769_v36 = vld [vmem:[%s12971_s3 + $0x30] ss:$8 sps:$4 sm:$0xff]  }
 0x39b   : > { %v4552_v59 = vpop.f32.mrf.mxu1  ;;  %v4627_v30 = vld [vmem:[%s10140_s24 + $0x40] sm:$0xff]  ;;  %7677 = vmatpush1.bf16.msra.mxu0 %v9769_v36 }
 0x39c   : > { %4804 = vst [vmem:[%s12394_s29 + $0x8] sm:$0xff] %v4772_v26  ;;  %v4773_v35 = vmax.f32 %v4741_v18, 0.0  ;;  %v4742_v10 = vadd.f32 %v4710_v47, %v4622_v24  ;;  %v4711_v20 = vadd.f32 %v12367_v43, %v4667_v32  ;;  %v4668_v29 = vmul.f32 %v12370_v45, %v4552_v59  ;;  %v12429_v26 = vpop.f32.mrf.mxu0  ;;  %v4628_v18 = vld [vmem:[%s10140_s24 + $0x48] sm:$0xff] }
 0x39d   : > { %v4554_v19 = vpop.f32.mrf.mxu1 }
 0x39e   : > { %4805 = vst [vmem:[%s12394_s29 + $0x10] sm:$0xff] %v4773_v35  ;;  %v4774_v0 = vmax.f32 %v4742_v10, 0.0  ;;  %v4743_v7 = vadd.f32 %v4711_v20, %v4623_v8  ;;  %v4712_v42 = vadd.f32 %v12376_v21, %v4668_v29  ;;  %v4669_v58 = vmul.f32 %v12364_v41, %v4554_v19  ;;  %v4629_v10 = vld [vmem:[%s10140_s24 + $0x50] sm:$0xff] }
 0x39f   : > { %v4556_v23 = vpop.f32.mrf.mxu1 }
 0x3a0   : > { %4806 = vst [vmem:[%s12394_s29 + $0x18] sm:$0xff] %v4774_v0  ;;  %v4775_v13 = vmax.f32 %v4743_v7, 0.0  ;;  %v4744_v22 = vadd.f32 %v4712_v42, %v4624_v6  ;;  %v4713_v15 = vadd.f32 %v12367_v43, %v4669_v58  ;;  %v4670_v34 = vmul.f32 %v12370_v45, %v4556_v23  ;;  %v12439_v7 = vpop.f32.mrf.mxu0  ;;  %v4630_v42 = vld [vmem:[%s10140_s24 + $0x58] sm:$0xff] }
 0x3a1   : > { %v4560_v4 = vpop.f32.mrf.mxu1 }
 0x3a2   : > { %4807 = vst [vmem:[%s12394_s29 + $0x20] sm:$0xff] %v4775_v13  ;;  %v4776_v52 = vmax.f32 %v4744_v22, 0.0  ;;  %v4745_v48 = vadd.f32 %v4713_v15, %v4625_v2  ;;  %v4714_v57 = vadd.f32 %v12376_v21, %v4670_v34  ;;  %v4671_v56 = vmul.f32 %v12364_v41, %v4560_v4  ;;  %v9772_v15 = vld [vmem:[%s12971_s3 + $0x20] ss:$8 sps:$4 sm:$0xff]   ;;  %v9774_v34 = vld [vmem:[%s12971_s3 + $0x24] ss:$8 sps:$4 sm:$0xff]   ;;  %v12455_v36 = vpop.f32.mrf.mxu0 }
 0x3a3   : > { %v4562_v37 = vpop.f32.mrf.mxu1  ;;  %7678 = vmatprep.subr.bf16.mxu0 %v9774_v34  ;;  %v4636_v34 = vld [vmem:[%s10140_s24 + $0x88] sm:$0xff] }
 0x3a4   : > { %4808 = vst [vmem:[%s12394_s29 + $0x28] sm:$0xff] %v4776_v52  ;;  %v4777_v33 = vmax.f32 %v4745_v48, 0.0  ;;  %v4746_v55 = vadd.f32 %v4714_v57, %v4626_v61  ;;  %v4715_v24 = vadd.f32 %v12367_v43, %v4671_v56  ;;  %v4672_v3 = vmul.f32 %v12370_v45, %v4562_v37  ;;  %v4631_v61 = vld [vmem:[%s10140_s24 + $0x60] sm:$0xff]  ;;  %7679 = vmatpush1.bf16.msra.mxu0 %v9772_v15 }
 0x3a5   : > { %v4564_v47 = vpop.f32.mrf.mxu1 }
 0x3a6   : > { %4809 = vst [vmem:[%s12394_s29 + $0x30] sm:$0xff] %v4777_v33  ;;  %v4778_v32 = vmax.f32 %v4746_v55, 0.0  ;;  %v4747_v8 = vadd.f32 %v4715_v24, %v4627_v30  ;;  %v4716_v59 = vadd.f32 %v12376_v21, %v4672_v3  ;;  %v4673_v35 = vmul.f32 %v12364_v41, %v4564_v47  ;;  %v4633_v3 = vld [vmem:[%s10140_s24 + $0x70] sm:$0xff] }
 0x3a7   : > { %v4566_v20 = vpop.f32.mrf.mxu1 }
 0x3a8   : > { %4810 = vst [vmem:[%s12394_s29 + $0x38] sm:$0xff] %v4778_v32  ;;  %v4779_v29 = vmax.f32 %v4747_v8, 0.0  ;;  %v4748_v6 = vadd.f32 %v4716_v59, %v4628_v18  ;;  %v4717_v19 = vadd.f32 %v12367_v43, %v4673_v35  ;;  %v4674_v0 = vmul.f32 %v12370_v45, %v4566_v20  ;;  %v12465_v35 = vpop.f32.mrf.mxu0 }
 0x3a9   : > { %v4570_v58 = vpop.f32.mrf.mxu1 }
 0x3aa   : > { %4811 = vst [vmem:[%s12394_s29 + $0x40] sm:$0xff] %v4779_v29  ;;  %v4780_v2 = vmax.f32 %v4748_v6, 0.0  ;;  %v4749_v23 = vadd.f32 %v4717_v19, %v4629_v10  ;;  %v4718_v13 = vadd.f32 %v12376_v21, %v4674_v0  ;;  %v4675_v22 = vmul.f32 %v12364_v41, %v4570_v58  ;;  %v4634_v10 = vld [vmem:[%s10140_s24 + $0x78] sm:$0xff]  ;;  %v12475_v15 = vpop.f32.mrf.mxu0 }
 0x3ab   : > { %v4572_v4 = vpop.f32.mrf.mxu1 }
 0x3ac   : > { %4812 = vst [vmem:[%s12394_s29 + $0x48] sm:$0xff] %v4780_v2  ;;  %v4781_v52 = vmax.f32 %v4749_v23, 0.0  ;;  %v4750_v48 = vadd.f32 %v4718_v13, %v4630_v42  ;;  %v4719_v57 = vadd.f32 %v12367_v43, %v4675_v22  ;;  %v4676_v56 = vmul.f32 %v12370_v45, %v4572_v4  ;;  %v4635_v42 = vld [vmem:[%s10140_s24 + $0x80] sm:$0xff] }
 0x3ad   : > { %v4574_v30 = vpop.f32.mrf.mxu1 }
 0x3ae   : > { %4813 = vst [vmem:[%s12394_s29 + $0x50] sm:$0xff] %v4781_v52  ;;  %v4782_v37 = vmax.f32 %v4750_v48, 0.0  ;;  %v4751_v33 = vadd.f32 %v4719_v57, %v4631_v61  ;;  %v4720_v55 = vadd.f32 %v12376_v21, %v4676_v56  ;;  %v4677_v24 = vmul.f32 %v12364_v41, %v4574_v30  ;;  %v4637_v56 = vld [vmem:[%s10140_s24 + $0x90] sm:$0xff] }
 0x3af   : > { %v4576_v18 = vpop.f32.mrf.mxu1 }
 0x3b0   : > { %4814 = vst [vmem:[%s12394_s29 + $0x58] sm:$0xff] %v4782_v37  ;;  %v4783_v47 = vmax.f32 %v4751_v33, 0.0  ;;  %v4752_v32 = vadd.f32 %v4720_v55, %v4632_v39  ;;  %v4721_v8 = vadd.f32 %v12367_v43, %v4677_v24  ;;  %v4678_v59 = vmul.f32 %v12370_v45, %v4576_v18  ;;  %v9775_v24 = vld [vmem:[%s12971_s3 + $0x10] ss:$8 sps:$4 sm:$0xff]   ;;  %v12491_v18 = vpop.f32.mrf.mxu0 }
 0x3b1   : > { %v4580_v20 = vpop.f32.mrf.mxu1 }
 0x3b2   : > { %4815 = vst [vmem:[%s12394_s29 + $0x60] sm:$0xff] %v4783_v47  ;;  %v4784_v29 = vmax.f32 %v4752_v32, 0.0  ;;  %v4753_v6 = vadd.f32 %v4721_v8, %v4633_v3  ;;  %v4722_v19 = vadd.f32 %v12376_v21, %v4678_v59  ;;  %v4679_v0 = vmul.f32 %v12364_v41, %v4580_v20  ;;  %v9777_v3 = vld [vmem:[%s12971_s3 + $0x14] ss:$8 sps:$4 sm:$0xff]  }
 0x3b3   : > { %v4582_v58 = vpop.f32.mrf.mxu1  ;;  %v4638_v47 = vld [vmem:[%s10140_s24 + $0x98] sm:$0xff]  ;;  %7680 = vmatprep.subr.bf16.mxu0 %v9777_v3 }
 0x3b4   : > { %4816 = vst [vmem:[%s12394_s29 + $0x68] sm:$0xff] %v4784_v29  ;;  %v4785_v2 = vmax.f32 %v4753_v6, 0.0  ;;  %v4754_v23 = vadd.f32 %v4722_v19, %v4634_v10  ;;  %v4723_v13 = vadd.f32 %v12367_v43, %v4679_v0  ;;  %v4680_v22 = vmul.f32 %v12370_v45, %v4582_v58  ;;  %v4639_v29 = vld [vmem:[%s10140_s24 + $0xa0] sm:$0xff]  ;;  %7681 = vmatpush1.bf16.msra.mxu0 %v9775_v24  ;;  %v4642_v24 = vld [vmem:[%s10140_s24 + $0xb8] sm:$0xff] }
 0x3b5   : > { %v4584_v61 = vpop.f32.mrf.mxu1 }
 0x3b6   : > { %4817 = vst [vmem:[%s12394_s29 + $0x70] sm:$0xff] %v4785_v2  ;;  %v4786_v4 = vmax.f32 %v4754_v23, 0.0  ;;  %v4755_v52 = vadd.f32 %v4723_v13, %v4635_v42  ;;  %v4724_v48 = vadd.f32 %v12376_v21, %v4680_v22  ;;  %v4681_v57 = vmul.f32 %v12364_v41, %v4584_v61  ;;  %v12501_v2 = vpop.f32.mrf.mxu0  ;;  %v4640_v23 = vld [vmem:[%s10140_s24 + $0xa8] sm:$0xff] }
 0x3b7   : > { %v4586_v39 = vpop.f32.mrf.mxu1 }
 0x3b8   : > { %4818 = vst [vmem:[%s12394_s29 + $0x78] sm:$0xff] %v4786_v4  ;;  %v4787_v30 = vmax.f32 %v4755_v52, 0.0  ;;  %v4756_v37 = vadd.f32 %v4724_v48, %v4636_v34  ;;  %v4725_v33 = vadd.f32 %v12367_v43, %v4681_v57  ;;  %v4682_v55 = vmul.f32 %v12370_v45, %v4586_v39  ;;  %v4641_v52 = vld [vmem:[%s10140_s24 + $0xb0] sm:$0xff] }
 0x3b9   : > { %v4590_v32 = vpop.f32.mrf.mxu1 }
 0x3ba   : > { %4819 = vst [vmem:[%s12394_s29 + $0x80] sm:$0xff] %v4787_v30  ;;  %v4788_v8 = vmax.f32 %v4756_v37, 0.0  ;;  %v4757_v59 = vadd.f32 %v4725_v33, %v4637_v56  ;;  %v4726_v10 = vadd.f32 %v12376_v21, %v4682_v55  ;;  %v4683_v20 = vmul.f32 %v12364_v41, %v4590_v32  ;;  %v9778_v37 = vld [vmem:[%s12971_s3] ss:$8 sps:$4 sm:$0xff]   ;;  %v9780_v33 = vld [vmem:[%s12971_s3 + $0x4] ss:$8 sps:$4 sm:$0xff]   ;;  %v12517_v55 = vpop.f32.mrf.mxu0 }
 0x3bb   : > { %v4592_v6 = vpop.f32.mrf.mxu1  ;;  %7682 = vmatprep.subr.bf16.mxu0 %v9780_v33 }
 0x3bc   : > { %4820 = vst [vmem:[%s12394_s29 + $0x88] sm:$0xff] %v4788_v8  ;;  %v4789_v19 = vmax.f32 %v4757_v59, 0.0  ;;  %v4758_v0 = vadd.f32 %v4726_v10, %v4638_v47  ;;  %v4727_v42 = vadd.f32 %v12367_v43, %v4683_v20  ;;  %v4684_v58 = vmul.f32 %v12370_v45, %v4592_v6  ;;  %v4643_v10 = vld [vmem:[%s10140_s24 + $0xc0] sm:$0xff]  ;;  %7683 = vmatpush1.bf16.msra.mxu0 %v9778_v37  ;;  %v4646_v37 = vld [vmem:[%s10140_s24 + $0xd8] sm:$0xff] }
 0x3bd   : > { %v4594_v13 = vpop.f32.mrf.mxu1 }
 0x3be   : > { %4821 = vst [vmem:[%s12394_s29 + $0x90] sm:$0xff] %v4789_v19  ;;  %v4790_v22 = vmax.f32 %v4758_v0, 0.0  ;;  %v4759_v34 = vadd.f32 %v4727_v42, %v4639_v29  ;;  %v4728_v61 = vadd.f32 %v12376_v21, %v4684_v58  ;;  %v4685_v4 = vmul.f32 %v12364_v41, %v4594_v13  ;;  %v12527_v42 = vpop.f32.mrf.mxu0  ;;  %v4644_v58 = vld [vmem:[%s10140_s24 + $0xc8] sm:$0xff] }
 0x3bf   : > { %v4596_v48 = vpop.f32.mrf.mxu1 }
 0x3c0   : > { %4822 = vst [vmem:[%s12394_s29 + $0x98] sm:$0xff] %v4790_v22  ;;  %v4791_v57 = vmax.f32 %v4759_v34, 0.0  ;;  %v4760_v56 = vadd.f32 %v4728_v61, %v4640_v23  ;;  %v4729_v39 = vadd.f32 %v12367_v43, %v4685_v4  ;;  %v4686_v30 = vmul.f32 %v12370_v45, %v4596_v48  ;;  %v4645_v4 = vld [vmem:[%s10140_s24 + $0xd0] sm:$0xff] }
 0x3c1   : > { %v4600_v3 = vpop.f32.mrf.mxu1 }
 0x3c2   : > { %4823 = vst [vmem:[%s12394_s29 + $0xa0] sm:$0xff] %v4791_v57  ;;  %v4792_v47 = vmax.f32 %v4760_v56, 0.0  ;;  %v4761_v32 = vadd.f32 %v4729_v39, %v4641_v52  ;;  %v4730_v8 = vadd.f32 %v12376_v21, %v4686_v30  ;;  %v4687_v59 = vmul.f32 %v12364_v41, %v4600_v3  ;;  %v12537_v30 = vpop.f32.mrf.mxu0 }
 0x3c3   : > { %v4602_v20 = vpop.f32.mrf.mxu1 }
 0x3c4   : > { %4824 = vst [vmem:[%s12394_s29 + $0xa8] sm:$0xff] %v4792_v47  ;;  %v4793_v29 = vmax.f32 %v4761_v32, 0.0  ;;  %v4762_v6 = vadd.f32 %v4730_v8, %v4642_v24  ;;  %v4731_v19 = vadd.f32 %v12367_v43, %v4687_v59  ;;  %v4688_v0 = vmul.f32 %v12370_v45, %v4602_v20  ;;  %v4647_v8 = vld [vmem:[%s10140_s24 + $0xe0] sm:$0xff] }
 0x3c5   : > { %v4604_v23 = vpop.f32.mrf.mxu1 }
 0x3c6   : > { %4825 = vst [vmem:[%s12394_s29 + $0xb0] sm:$0xff] %v4793_v29  ;;  %v4794_v13 = vmax.f32 %v4762_v6, 0.0  ;;  %v4763_v22 = vadd.f32 %v4731_v19, %v4643_v10  ;;  %v4732_v34 = vadd.f32 %v12376_v21, %v4688_v0  ;;  %v4689_v61 = vmul.f32 %v12364_v41, %v4604_v23  ;;  %v12547_v19 = vpop.f32.mrf.mxu0  ;;  %v4648_v0 = vld [vmem:[%s10140_s24 + $0xe8] sm:$0xff] }
 0x3c7   : > { %v4606_v52 = vpop.f32.mrf.mxu1 }
 0x3c8   : > { %4826 = vst [vmem:[%s12394_s29 + $0xb8] sm:$0xff] %v4794_v13  ;;  %v4795_v48 = vmax.f32 %v4763_v22, 0.0  ;;  %v4764_v57 = vadd.f32 %v4732_v34, %v4644_v58  ;;  %v4733_v56 = vadd.f32 %v12367_v43, %v4689_v61  ;;  %v4690_v39 = vmul.f32 %v12370_v45, %v4606_v52  ;;  %v4649_v61 = vld [vmem:[%s10140_s24 + $0xf0] sm:$0xff] }
 0x3c9   : > { %v4610_v33 = vpop.f32.mrf.mxu1 }
 0x3ca   : > { %4827 = vst [vmem:[%s12394_s29 + $0xc0] sm:$0xff] %v4795_v48  ;;  %v4796_v24 = vmax.f32 %v4764_v57, 0.0  ;;  %v4765_v3 = vadd.f32 %v4733_v56, %v4645_v4  ;;  %v4734_v47 = vadd.f32 %v12376_v21, %v4690_v39  ;;  %v4691_v32 = vmul.f32 %v12364_v41, %v4610_v33  ;;  %v12557_v39 = vpop.f32.mrf.mxu0 }
 0x3cb   : > { %v4612_v59 = vpop.f32.mrf.mxu1 }
 0x3cc   : > { %4828 = vst [vmem:[%s12394_s29 + $0xc8] sm:$0xff] %v4796_v24  ;;  %v4797_v10 = vmax.f32 %v4765_v3, 0.0  ;;  %v4766_v20 = vadd.f32 %v4734_v47, %v4646_v37  ;;  %v4735_v29 = vadd.f32 %v12367_v43, %v4691_v32  ;;  %v4692_v6 = vmul.f32 %v12370_v45, %v4612_v59  ;;  %v4650_v37 = vld [vmem:[%s10140_s24 + $0xf8] sm:$0xff] }
 0x3cd   : > { %v4614_v58 = vpop.f32.mrf.mxu1 }
 0x3ce   : > { %4829 = vst [vmem:[%s12394_s29 + $0xd0] sm:$0xff] %v4797_v10  ;;  %v4798_v23 = vmax.f32 %v4766_v20, 0.0  ;;  %v4767_v13 = vadd.f32 %v4735_v29, %v4647_v8  ;;  %v4736_v22 = vadd.f32 %v12376_v21, %v4692_v6  ;;  %v4693_v34 = vmul.f32 %v12364_v41, %v4614_v58 }
 0x3cf   : > { %v4616_v4 = vpop.f32.mrf.mxu1 }
 0x3d0   : > { %4830 = vst [vmem:[%s12394_s29 + $0xd8] sm:$0xff] %v4798_v23  ;;  %v4799_v52 = vmax.f32 %v4767_v13, 0.0  ;;  %v4768_v48 = vadd.f32 %v4736_v22, %v4648_v0  ;;  %v4737_v57 = vadd.f32 %v12367_v43, %v4693_v34  ;;  %v4694_v56 = vmul.f32 %v12370_v45, %v4616_v4  ;;  %v12567_v45 = vpop.f32.mrf.mxu0 }
 0x3d1   : > { %v9371_v33 = vpop.f32.mrf.mxu1 }
 0x3d2   : > { %4831 = vst [vmem:[%s12394_s29 + $0xe0] sm:$0xff] %v4799_v52  ;;  %v4800_v24 = vmax.f32 %v4768_v48, 0.0  ;;  %v4769_v3 = vadd.f32 %v4737_v57, %v4649_v61  ;;  %v4738_v41 = vadd.f32 %v12376_v21, %v4694_v56  ;;  %v5681_v47 = vadd.f32 %v9371_v33, %v12155_v50  ;;  %v12575_v50 = vpop.f32.mrf.mxu0 }
 0x3d3   : > { %v5616_v32 = vpop.f32.mrf.mxu1 }
 0x3d4   : > { %4832 = vst [vmem:[%s12394_s29 + $0xe8] sm:$0xff] %v4800_v24  ;;  %v4801_v8 = vmax.f32 %v4769_v3, 0.0  ;;  %v4770_v59 = vadd.f32 %v4738_v41, %v4650_v37  ;;  %v12565_v43 = vadd.f32 %v5616_v32, %v12163_v1  ;;  %v12579_v13 = vpop.f32.mrf.mxu0 }
 0x3d5   : > { %v9372_v10 = vpop.f32.mrf.mxu1 }
 0x3d6   : > { %4833 = vst [vmem:[%s12394_s29 + $0xf0] sm:$0xff] %v4801_v8  ;;  %v4802_v20 = vmax.f32 %v4770_v59, 0.0  ;;  %v5682_v29 = vadd.f32 %v9372_v10, %v12171_v17  ;;  %v12583_v4 = vpop.f32.mrf.mxu0 }
 0x3d7   : > { %v5619_v6 = vpop.f32.mrf.mxu1 }
 0x3d8   : > { %4834 = vst [vmem:[%s12394_s29 + $0xf8] sm:$0xff] %v4802_v20  ;;  %v12573_v21 = vadd.f32 %v5619_v6, %v12177_v62  ;;  %v12588_v56 = vpop.f32.mrf.mxu0 }
 0x3d9   : > { %v9375_v0 = vpop.f32.mrf.mxu1 }
 0x3da   : > { %v5685_v58 = vadd.f32 %v9375_v0, %v12181_v31  ;;  %v12592_v24 = vpop.f32.mrf.mxu0 }
 0x3db   : > { %v5632_v23 = vpop.f32.mrf.mxu1 }
 0x3dc   : > { %v5683_v1 = vadd.f32 %v5632_v23, %v12200_v12 }
 0x3dd   : > { %v9376_v22 = vpop.f32.mrf.mxu1 }
 0x3de   : > { %v5686_v34 = vadd.f32 %v9376_v22, %v12209_v51 }
 0x3df   : > { %v5635_v61 = vpop.f32.mrf.mxu1 }
 0x3e0   : > { %v5684_v17 = vadd.f32 %v5635_v61, %v12217_v5  ;;  %v5908_v61 = vadd.f32 %v12429_v26, %v5683_v1 }
 0x3e1   : > { %v9379_v62 = vpop.f32.mrf.mxu1 }
 0x3e2   : > { %v5689_v52 = vadd.f32 %v9379_v62, %v12222_v63  ;;  %v5909_v48 = vadd.f32 %v12455_v36, %v5684_v17  ;;  %v12596_v36 = vpop.f32.mrf.mxu0 }
 0x3e3   : > { %v5648_v57 = vpop.f32.mrf.mxu1 }
 0x3e4   : > { %v5687_v31 = vadd.f32 %v5648_v57, %v12228_v14  ;;  %v12601_v10 = vpop.f32.mrf.mxu0 }
 0x3e5   : > { %v9380_v12 = vpop.f32.mrf.mxu1 }
 0x3e6   : > { %v5690_v37 = vadd.f32 %v9380_v12, %v12240_v49  ;;  %v5906_v49 = vadd.f32 %v12372_v11, %v5681_v47  ;;  %v5912_v26 = vadd.f32 %v12475_v15, %v5687_v31 }
 0x3e7   : > { %v5651_v33 = vpop.f32.mrf.mxu1 }
 0x3e8   : > { %v5688_v51 = vadd.f32 %v5651_v33, %v12253_v60 }
 0x3e9   : > { %v9383_v5 = vpop.f32.mrf.mxu1 }
 0x3ea   : > { %v5693_v3 = vadd.f32 %v9383_v5, %v12263_v38  ;;  %v5907_v38 = vadd.f32 %v12389_v28, %v5682_v29  ;;  %v5911_v28 = vadd.f32 %v12439_v7, %v5686_v34  ;;  %v5915_v7 = vadd.f32 %v12491_v18, %v5690_v37 }
 0x3eb   : > { %v5664_v41 = vpop.f32.mrf.mxu1 }
 0x3ec   : > { %v5691_v63 = vadd.f32 %v5664_v41, %v12268_v44  ;;  %v12608_v44 = vpop.f32.mrf.mxu0 }
 0x3ed   : > { %v9384_v32 = vpop.f32.mrf.mxu1 }
 0x3ee   : > { %v5694_v14 = vadd.f32 %v9384_v32, %v12271_v25  ;;  %v12615_v22 = vpop.f32.mrf.mxu0 }
 0x3ef   : > { %v5667_v8 = vpop.f32.mrf.mxu1 }
 0x3f0   : > { %v5692_v59 = vadd.f32 %v5667_v8, %v12274_v53  ;;  %v5910_v53 = vadd.f32 %v12413_v27, %v5685_v58  ;;  %v12623_v29 = vpop.f32.mrf.mxu0  ;;  %v5914_v27 = vadd.f32 %v12465_v35, %v5689_v52  ;;  %v5918_v52 = vadd.f32 %v12517_v55, %v5693_v3 }
 0x3f1   : > { %v9419_v60 = vpop.f32.mrf.mxu1  ;;  %v5919_v37 = vadd.f32 %v12537_v30, %v5694_v14 }
 0x3f2   : > { %v12603_v20 = vadd.f32 %v9419_v60, %v5906_v49  ;;  %v9455_v58 = vpop.f32.mrf.mxu0 }
 0x3f3   : > { %v12605_v6 = vpop.f32.mrf.mxu1 }
 0x3f4   : > { %v12636_v34 = vpop.f32.mrf.mxu0 }
 0x3f5   : > { %v9420_v0 = vpop.f32.mrf.mxu1 }
 0x3f6   : > { %v12610_v23 = vadd.f32 %v9420_v0, %v5907_v38  ;;  %v12644_v0 = vpop.f32.mrf.mxu0 }
 0x3f7   : > { %v12612_v25 = vpop.f32.mrf.mxu1 }
 0x3f9   : > { %v9423_v11 = vpop.f32.mrf.mxu1 }
 0x3fa   : > { %v12617_v47 = vadd.f32 %v9423_v11, %v5910_v53  ;;  %v5916_v53 = vadd.f32 %v12527_v42, %v5691_v63 }
 0x3fb   : > { %v6266_v17 = vpop.f32.mrf.mxu1 }
 0x3fc   : > { %v12620_v62 = vadd.f32 %v6266_v17, %v5908_v61  ;;  %v12650_v61 = vpop.f32.mrf.mxu0 }
 0x3fd   : > { %v9424_v57 = vpop.f32.mrf.mxu1  ;;  %13073 = vst [vmem:[#allocation37_spill] sm:$0xff] %v12650_v61 }
 0x3fe   : > { %v12625_v12 = vadd.f32 %v9424_v57, %v5911_v28  ;;  %v9491_v3 = vpop.f32.mrf.mxu0 }
 0x3ff   : > { %v6269_v33 = vpop.f32.mrf.mxu1 }
 0x400   : > { %v12627_v5 = vadd.f32 %v6269_v33, %v5909_v48  ;;  %v5913_v48 = vadd.f32 %v12501_v2, %v5688_v51  ;;  %v5917_v51 = vadd.f32 %v12547_v19, %v5692_v59 }
 0x401   : > { %v9427_v41 = vpop.f32.mrf.mxu1 }
 0x402   : > { %v12630_v32 = vadd.f32 %v9427_v41, %v5914_v27  ;;  %v7166_v27 = vpop.f32.mrf.mxu0 }
 0x403   : > { %v6282_v1 = vpop.f32.mrf.mxu1 }
 0x404   : > { %v12633_v8 = vadd.f32 %v6282_v1, %v5912_v26  ;;  %v9492_v41 = vpop.f32.mrf.mxu0 }
 0x405   : > { %v9428_v49 = vpop.f32.mrf.mxu1 }
 0x406   : > { %v12638_v60 = vadd.f32 %v9428_v49, %v5915_v7  ;;  %v7169_v30 = vpop.f32.mrf.mxu0 }
 0x407   : > { %v6285_v38 = vpop.f32.mrf.mxu1 }
 0x408   : > { %v12641_v35 = vadd.f32 %v6285_v38, %v5913_v48  ;;  %v9495_v49 = vpop.f32.mrf.mxu0 }
 0x409   : > { %v9431_v15 = vpop.f32.mrf.mxu1 }
 0x40a   : > { %v6327_v31 = vadd.f32 %v9431_v15, %v5918_v52  ;;  %v7182_v19 = vpop.f32.mrf.mxu0  ;;  %v5904_v52 = vadd.f32 %v12381_v16, %v12565_v43 }
 0x40b   : > { %v6298_v11 = vpop.f32.mrf.mxu1 }
 0x40c   : > { %v12647_v18 = vadd.f32 %v6298_v11, %v5916_v53  ;;  %v6313_v53 = vadd.f32 %v12605_v6, %v5904_v52  ;;  %v6608_v11 = vadd.f32 %v9455_v58, %v6327_v31  ;;  %v6597_v52 = vadd.f32 %v12575_v50, %v12610_v23 }
 0x40d   : > { %v9432_v17 = vpop.f32.mrf.mxu1  ;;  %v6598_v50 = vadd.f32 %v12588_v56, %v12620_v62  ;;  %v6601_v56 = vadd.f32 %v12592_v24, %v12625_v12  ;;  %v6599_v62 = vadd.f32 %v12596_v36, %v12627_v5 }
 0x40e   : > { %v12652_v2 = vadd.f32 %v9432_v17, %v5919_v37  ;;  %v12666_v37 = vpop.f32.mrf.mxu0  ;;  %v6594_v61 = vadd.f32 %v12567_v45, %v6313_v53 }
 0x40f   : > { %v6301_v28 = vpop.f32.mrf.mxu1 }
 0x410   : > { %v12655_v55 = vadd.f32 %v6301_v28, %v5917_v51  ;;  %v5905_v51 = vadd.f32 %v12403_v46, %v12573_v21  ;;  %v6596_v28 = vadd.f32 %v12557_v39, %v12603_v20  ;;  %v7185_v6 = vpop.f32.mrf.mxu0 }
 0x411   : > { %v9467_v57 = vpop.f32.mrf.mxu1 }
 0x412   : > { %v6314_v16 = vadd.f32 %v12612_v25, %v5905_v51  ;;  %v6822_v43 = vadd.f32 %v9467_v57, %v6596_v28  ;;  %v12688_v25 = vld [vmem:[%s12974_s6] ss:$0 sm:$0xff] }
 0x413   : > { %v6757_v33 = vpop.f32.mrf.mxu1 }
 0x414   : > { %v6820_v31 = vadd.f32 %v6757_v33, %v6594_v61  ;;  %v6595_v39 = vadd.f32 %v12579_v13, %v6314_v16  ;;  %v7231_v20 = vadd.f32 %v9491_v3, %v6822_v43  ;;  %v6600_v61 = vadd.f32 %v12583_v4, %v12617_v47 }
 0x415   : > { %v9468_v42 = vpop.f32.mrf.mxu1 }
 0x416   : > { %v6823_v21 = vadd.f32 %v9468_v42, %v6597_v52  ;;  %v7229_v33 = vadd.f32 %v7166_v27, %v6820_v31 }
 0x417   : > { %v6760_v63 = vpop.f32.mrf.mxu1 }
 0x418   : > { %v6821_v45 = vadd.f32 %v6760_v63, %v6595_v39  ;;  %v7232_v53 = vadd.f32 %v9492_v41, %v6823_v21  ;;  %v12698_v63 = vld [vmem:[%s12975_s7] ss:$0 sm:$0xff] }
 0x419   : > { %v9471_v26 = vpop.f32.mrf.mxu1 }
 0x41a   : > { %v6826_v42 = vadd.f32 %v9471_v26, %v6600_v61  ;;  %v7230_v27 = vadd.f32 %v7169_v30, %v6821_v45  ;;  %v6602_v61 = vadd.f32 %v12608_v44, %v12633_v8 }
 0x41b   : > { %v6773_v1 = vpop.f32.mrf.mxu1 }
 0x41c   : > { %v6824_v28 = vadd.f32 %v6773_v1, %v6598_v50  ;;  %v7235_v31 = vadd.f32 %v9495_v49, %v6826_v42 }
 0x41d   : > { %v9472_v14 = vpop.f32.mrf.mxu1 }
 0x41e   : > { %v6827_v21 = vadd.f32 %v9472_v14, %v6601_v56  ;;  %v6605_v14 = vadd.f32 %v12615_v22, %v12638_v60 }
 0x41f   : > { %v6776_v7 = vpop.f32.mrf.mxu1 }
 0x420   : > { %v6825_v39 = vadd.f32 %v6776_v7, %v6599_v62 }
 0x421   : > { %v9475_v48 = vpop.f32.mrf.mxu1 }
 0x422   : > { %v7234_v42 = vadd.f32 %v7185_v6, %v6825_v39 }
 0x423   : > { %v12657_v38 = vpop.f32.mrf.mxu1 }
 0x425   : > { %v12659_v59 = vpop.f32.mrf.mxu1 }
 0x427   : > { %v12663_v15 = vpop.f32.mrf.mxu1 }
 0x429   : > { %v9479_v17 = vpop.f32.mrf.mxu1 }
 0x42a   : > { %v12672_v40 = vadd.f32 %v9479_v17, %v6608_v11  ;;  %v9499_v11 = vpop.f32.mrf.mxu0 }
 0x42b   : > { %v12674_v54 = vpop.f32.mrf.mxu1 }
 0x42c   : > { %v7198_v51 = vpop.f32.mrf.mxu0 }
 0x42d   : > { %v12678_v58 = vpop.f32.mrf.mxu1 }
 0x42e   : > { %v9500_v52 = vpop.f32.mrf.mxu0 }
 0x42f   : > { %v12682_v46 = vpop.f32.mrf.mxu1 }
 0x431   : > { %v9515_v17 = vpop.f32.mrf.mxu1 }
 0x432   : > { %v7512_v57 = vadd.f32 %v9515_v17, %v7231_v20  ;;  %v6604_v20 = vadd.f32 %v12601_v10, %v12630_v32  ;;  %v7233_v17 = vadd.f32 %v7182_v19, %v6824_v28  ;;  %v7201_v19 = vpop.f32.mrf.mxu0  ;;  %v6831_v28 = vadd.f32 %v12659_v59, %v6605_v14 }
 0x433   : > { %v7447_v23 = vpop.f32.mrf.mxu1 }
 0x434   : > { %v7535_v13 = vmul.f32 %v12688_v25, %v7512_v57  ;;  %v7510_v3 = vadd.f32 %v7447_v23, %v7229_v33  ;;  %v6830_v45 = vadd.f32 %v9475_v48, %v6604_v20  ;;  %v6828_v33 = vadd.f32 %v12657_v38, %v6602_v61  ;;  %v9503_v60 = vpop.f32.mrf.mxu0 }
 0x435   : > { %v9516_v16 = vpop.f32.mrf.mxu1  ;;  %v7236_v23 = vadd.f32 %v12666_v37, %v6827_v21  ;;  %v6603_v38 = vadd.f32 %v12623_v29, %v12641_v35  ;;  %v7240_v39 = vadd.f32 %v9500_v52, %v6831_v28 }
 0x436   : > { %v7533_v4 = vmul.f32 %v12688_v25, %v7510_v3  ;;  %v7513_v47 = vadd.f32 %v9516_v16, %v7232_v53  ;;  %v7558_v41 = vadd.f32 %v12698_v63, %v7535_v13 }
 0x437   : > { %v7450_v26 = vpop.f32.mrf.mxu1  ;;  %v6829_v59 = vadd.f32 %v12663_v15, %v6603_v38  ;;  %v13074_v15 = vld [vmem:[#allocation37_spill] sm:$0xff] }
 0x438   : > { %v7536_v1 = vmul.f32 %v12688_v25, %v7513_v47  ;;  %v7511_v43 = vadd.f32 %v7450_v26, %v7230_v27  ;;  %v7556_v24 = vadd.f32 %v12698_v63, %v7533_v4  ;;  %v7574_v49 = vmax.f32 %v7558_v41, 0.0 }
 0x439   : > { %v9519_v30 = vpop.f32.mrf.mxu1  ;;  %v7239_v47 = vadd.f32 %v9499_v11, %v6830_v45  ;;  %v7237_v41 = vadd.f32 %v7198_v51, %v6828_v33  ;;  %v6606_v11 = vadd.f32 %v12636_v34, %v12647_v18  ;;  %v6609_v51 = vadd.f32 %v12644_v0, %v12652_v2 }
 0x43a   : > { %v7559_v12 = vadd.f32 %v12698_v63, %v7536_v1  ;;  %v7534_v36 = vmul.f32 %v12688_v25, %v7511_v43  ;;  %v7516_v5 = vadd.f32 %v9519_v30, %v7235_v31  ;;  %v7572_v13 = vmax.f32 %v7556_v24, 0.0  ;;  %v7214_v1 = vpop.f32.mrf.mxu0 }
 0x43b   : > { %v7463_v7 = vpop.f32.mrf.mxu1  ;;  %v6607_v20 = vadd.f32 %v13074_v15, %v12655_v55  ;;  %v7238_v14 = vadd.f32 %v7201_v19, %v6829_v59  ;;  %v7243_v0 = vadd.f32 %v9503_v60, %v12672_v40 }
 0x43c   : > { %v7575_v57 = vmax.f32 %v7559_v12, 0.0  ;;  %v7557_v10 = vadd.f32 %v12698_v63, %v7534_v36  ;;  %v7514_v32 = vadd.f32 %v7463_v7, %v7233_v17  ;;  %v7539_v50 = vmul.f32 %v12688_v25, %v7516_v5  ;;  %v9504_v45 = vpop.f32.mrf.mxu0 }
 0x43d   : > { %v9520_v48 = vpop.f32.mrf.mxu1  ;;  %v6832_v17 = vadd.f32 %v12674_v54, %v6606_v11  ;;  %v6835_v5 = vadd.f32 %v12678_v58, %v6609_v51  ;;  %v13076_v51 = vld [vmem:[#allocation19_spill] sm:$0xff] }
 0x43e   : > { %v7589_v44 = vpack.c.bf16 %v7575_v57, %v7574_v49  ;;  %v7573_v8 = vmax.f32 %v7557_v10, 0.0  ;;  %v7537_v22 = vmul.f32 %v12688_v25, %v7514_v32  ;;  %v7517_v3 = vadd.f32 %v9520_v48, %v7236_v23  ;;  %v7217_v19 = vpop.f32.mrf.mxu0 }
 0x43f   : > { %v7466_v53 = vpop.f32.mrf.mxu1  ;;  %v7562_v37 = vadd.f32 %v12698_v63, %v7539_v50  ;;  %v7241_v10 = vadd.f32 %v7214_v1, %v6832_v17  ;;  %v6833_v32 = vadd.f32 %v12682_v46, %v6607_v20  ;;  %v7244_v50 = vadd.f32 %v9504_v45, %v6835_v5 }
 0x440   : > { %v7588_v16 = vpack.c.bf16 %v7573_v8, %v7572_v13  ;;  %v7515_v4 = vadd.f32 %v7466_v53, %v7234_v42  ;;  %v7540_v6 = vmul.f32 %v12688_v25, %v7517_v3  ;;  %v7560_v56 = vadd.f32 %v12698_v63, %v7537_v22 }
 0x441   : > { %v9523_v27 = vpop.f32.mrf.mxu1  ;;  %v7578_v30 = vmax.f32 %v7562_v37, 0.0  ;;  %v7242_v3 = vadd.f32 %v7217_v19, %v6833_v32 }
 0x442   : > { %v7538_v62 = vmul.f32 %v12688_v25, %v7515_v4  ;;  %v7520_v26 = vadd.f32 %v9523_v27, %v7239_v47  ;;  %8642 = vmatmul.mubr.msk.bf16.vlgmr.msra.gmra.mxu0 %vm1943_vm2, %v7588_v16  ;;  %v7563_v29 = vadd.f32 %v12698_v63, %v7540_v6  ;;  %v7576_v24 = vmax.f32 %v7560_v56, 0.0 }
 0x443   : > { %v7479_v35 = vpop.f32.mrf.mxu1  ;;  %7710 = vmatprep.mubr.bf16.mxu0 %v13061_v9 }
 0x444   : > { %v7561_v43 = vadd.f32 %v12698_v63, %v7538_v62  ;;  %v7543_v31 = vmul.f32 %v12688_v25, %v7520_v26  ;;  %v7518_v21 = vadd.f32 %v7479_v35, %v7237_v41  ;;  %v7579_v34 = vmax.f32 %v7563_v29, 0.0 }
 0x445   : > { %v9524_v18 = vpop.f32.mrf.mxu1 }
 0x446   : > { %v7577_v12 = vmax.f32 %v7561_v43, 0.0  ;;  %v7521_v36 = vadd.f32 %v9524_v18, %v7240_v39  ;;  %v7591_v61 = vpack.c.bf16 %v7579_v34, %v7578_v30  ;;  %v7541_v52 = vmul.f32 %v12688_v25, %v7518_v21  ;;  %v8650_v34 = vld [vmem:[%s10140_s24 + $0x100] sm:$0xff] }
 0x447   : > { %v7482_v7 = vpop.f32.mrf.mxu1  ;;  %v7566_v55 = vadd.f32 %v12698_v63, %v7543_v31  ;;  %v13075_v31 = vld [vmem:[#allocation21_spill] sm:$0xff] }
 0x448   : > { %v7590_v2 = vpack.c.bf16 %v7577_v12, %v7576_v24  ;;  %v7544_v49 = vmul.f32 %v12688_v25, %v7521_v36  ;;  %v7519_v57 = vadd.f32 %v7482_v7, %v7238_v14  ;;  %v7564_v23 = vadd.f32 %v12698_v63, %v7541_v52  ;;  %v8651_v12 = vld [vmem:[%s10140_s24 + $0x108] sm:$0xff]  ;;  %v8652_v52 = vld [vmem:[%s10140_s24 + $0x110] sm:$0xff] }
 0x449   : > { %v9527_v54 = vpop.f32.mrf.mxu1  ;;  %v7582_v42 = vmax.f32 %v7566_v55, 0.0 }
 0x44a   : > { %v7567_v58 = vadd.f32 %v12698_v63, %v7544_v49  ;;  %v7524_v33 = vadd.f32 %v9527_v54, %v7243_v0  ;;  %8643 = vmatmul.mubr.msk.bf16.gmra.mxu0 %vm1943_vm2, %v7589_v44  ;;  %v7542_v40 = vmul.f32 %v12688_v25, %v7519_v57  ;;  %v7580_v16 = vmax.f32 %v7564_v23, 0.0  ;;  %v8653_v49 = vld [vmem:[%s10140_s24 + $0x118] sm:$0xff] }
 0x44b   : > { %v7495_v48 = vpop.f32.mrf.mxu1  ;;  %7720 = vmatprep.mubr.bf16.mxu0 %v13061_v9 }
 0x44c   : > { %v7583_v13 = vmax.f32 %v7567_v58, 0.0  ;;  %v7547_v8 = vmul.f32 %v12688_v25, %v7524_v33  ;;  %v7522_v22 = vadd.f32 %v7495_v48, %v7241_v10  ;;  %v7565_v46 = vadd.f32 %v12698_v63, %v7542_v40  ;;  %v8654_v33 = vld [vmem:[%s10140_s24 + $0x120] sm:$0xff] }
 0x44d   : > { %v9528_v60 = vpop.f32.mrf.mxu1 }
 0x44e   : > { %v7593_v53 = vpack.c.bf16 %v7583_v13, %v7582_v42  ;;  %v7545_v44 = vmul.f32 %v12688_v25, %v7522_v22  ;;  %v7525_v28 = vadd.f32 %v9528_v60, %v7244_v50  ;;  %v7581_v4 = vmax.f32 %v7565_v46, 0.0  ;;  %v8655_v42 = vld [vmem:[%s10140_s24 + $0x128] sm:$0xff] }
 0x44f   : > { %v7498_v47 = vpop.f32.mrf.mxu1  ;;  %v7570_v38 = vadd.f32 %v12698_v63, %v7547_v8 }
 0x450   : > { %v7548_v37 = vmul.f32 %v12688_v25, %v7525_v28  ;;  %v7523_v6 = vadd.f32 %v7498_v47, %v7242_v3  ;;  %v7592_v27 = vpack.c.bf16 %v7581_v4, %v7580_v16  ;;  %v7568_v56 = vadd.f32 %v12698_v63, %v7545_v44  ;;  %v8656_v3 = vld [vmem:[%s10140_s24 + $0x130] sm:$0xff]  ;;  %v8657_v47 = vld [vmem:[%s10140_s24 + $0x138] sm:$0xff] }
 0x451   : > { %v7586_v41 = vmax.f32 %v7570_v38, 0.0 }
 0x452   : > { %v7571_v62 = vadd.f32 %v12698_v63, %v7548_v37  ;;  %v7546_v26 = vmul.f32 %v12688_v25, %v7523_v6  ;;  %8644 = vmatmul.mubr.msk.bf16.gmra.mxu0 %vm1943_vm2, %v7590_v2  ;;  %v7584_v1 = vmax.f32 %v7568_v56, 0.0  ;;  %v7813_v25 = vld [vmem:[%s12976_s8] sm:$0x3] }
 0x453   : > { %7730 = vmatprep.mubr.bf16.mxu0 %v13061_v9  ;;  %v12779_v21 = vrot.slane %v7813_v25, %v13075_v31  ;;  %v12785_v15 = vrot.slane %v7813_v25, %v13076_v51 }
 0x454   : > { %v7587_v59 = vmax.f32 %v7571_v62, 0.0  ;;  %v7569_v11 = vadd.f32 %v12698_v63, %v7546_v26  ;;  %v7857_v63 = vld [vmem:[%s12977_s9] sm:$0x3]  ;;  %v8658_v62 = vld [vmem:[%s10140_s24 + $0x140] sm:$0xff] }
 0x455   : > { %v12782_v39 = vrot.slane %v7857_v63, %v13075_v31  ;;  %v12789_v30 = vrot.slane %v7857_v63, %v13076_v51  ;;  %v8660_v51 = vld [vmem:[%s10140_s24 + $0x150] sm:$0xff] }
 0x456   : > { %v7595_v29 = vpack.c.bf16 %v7587_v59, %v7586_v41  ;;  %v7585_v35 = vmax.f32 %v7569_v11, 0.0 }
 0x458   : > { %v7594_v43 = vpack.c.bf16 %v7585_v35, %v7584_v1 }
 0x45a   : > { %8645 = vmatmul.mubr.msk.bf16.gmra.mxu0 %vm1943_vm2, %v7591_v61 }
 0x45b   : > { %7740 = vmatprep.mubr.bf16.mxu0 %v13061_v9 }
 0x462   : > { %8646 = vmatmul.mubr.msk.bf16.gmra.mxu0 %vm1943_vm2, %v7592_v27 }
 0x463   : > { %7750 = vmatprep.mubr.bf16.mxu0 %v13061_v9 }
 0x46a   : > { %8647 = vmatmul.mubr.msk.bf16.gmra.mxu0 %vm1943_vm2, %v7593_v53 }
 0x46b   : > { %7760 = vmatprep.mubr.bf16.mxu0 %v13061_v9 }
 0x472   : > { %8648 = vmatmul.mubr.msk.bf16.gmra.mxu0 %vm1943_vm2, %v7594_v43 }
 0x473   : > { %7770 = vmatprep.mubr.bf16.mxu0 %v13061_v9 }
 0x47a   : > { %8649 = vmatmul.mubr.msk.bf16.gmra.mxu0 %vm1943_vm2, %v7595_v29  ;;  %v8659_v29 = vld [vmem:[%s10140_s24 + $0x148] sm:$0xff] }
 0x502   : > { %v7702_v9 = vpop.f32.mrf.mxu0 }
 0x503   : > { %v7825_v20 = vmul.f32 %v12779_v21, %v7702_v9 }
 0x504   : > { %v7704_v18 = vpop.f32.mrf.mxu0 }
 0x505   : > { %v7869_v17 = vadd.f32 %v12782_v39, %v7825_v20  ;;  %v7826_v24 = vmul.f32 %v12785_v15, %v7704_v18 }
 0x506   : > { %v7706_v36 = vpop.f32.mrf.mxu0 }
 0x507   : > { %v7901_v5 = vadd.f32 %v8650_v34, %v7869_v17  ;;  %v7870_v45 = vadd.f32 %v12789_v30, %v7826_v24  ;;  %v7827_v61 = vmul.f32 %v12779_v21, %v7706_v36  ;;  %v8661_v24 = vld [vmem:[%s10140_s24 + $0x158] sm:$0xff] }
 0x508   : > { %v7708_v14 = vpop.f32.mrf.mxu0 }
 0x509   : > { %v7933_v7 = vmax.f32 %v7901_v5, 0.0  ;;  %v7902_v0 = vadd.f32 %v8651_v12, %v7870_v45  ;;  %v7871_v2 = vadd.f32 %v12782_v39, %v7827_v61  ;;  %v7828_v55 = vmul.f32 %v12785_v15, %v7708_v14 }
 0x50a   : > { %v7712_v57 = vpop.f32.mrf.mxu0 }
 0x50b   : > { %8682 = vst [vmem:[%s12394_s29 + $0x100] sm:$0xff] %v7933_v7  ;;  %v7934_v54 = vmax.f32 %v7902_v0, 0.0  ;;  %v7903_v10 = vadd.f32 %v8652_v52, %v7871_v2  ;;  %v7872_v32 = vadd.f32 %v12789_v30, %v7828_v55  ;;  %v7829_v58 = vmul.f32 %v12779_v21, %v7712_v57  ;;  %v8662_v52 = vld [vmem:[%s10140_s24 + $0x160] sm:$0xff] }
 0x50c   : > { %v7714_v50 = vpop.f32.mrf.mxu0 }
 0x50d   : > { %8683 = vst [vmem:[%s12394_s29 + $0x108] sm:$0xff] %v7934_v54  ;;  %v7935_v19 = vmax.f32 %v7903_v10, 0.0  ;;  %v7904_v23 = vadd.f32 %v8653_v49, %v7872_v32  ;;  %v7873_v40 = vadd.f32 %v12782_v39, %v7829_v58  ;;  %v7830_v48 = vmul.f32 %v12785_v15, %v7714_v50  ;;  %v8663_v49 = vld [vmem:[%s10140_s24 + $0x168] sm:$0xff] }
 0x50e   : > { %v7716_v13 = vpop.f32.mrf.mxu0 }
 0x50f   : > { %8684 = vst [vmem:[%s12394_s29 + $0x110] sm:$0xff] %v7935_v19  ;;  %v7936_v8 = vmax.f32 %v7904_v23, 0.0  ;;  %v7905_v22 = vadd.f32 %v8654_v33, %v7873_v40  ;;  %v7874_v46 = vadd.f32 %v12789_v30, %v7830_v48  ;;  %v7831_v60 = vmul.f32 %v12779_v21, %v7716_v13  ;;  %v8664_v33 = vld [vmem:[%s10140_s24 + $0x170] sm:$0xff] }
 0x510   : > { %v7718_v53 = vpop.f32.mrf.mxu0 }
 0x511   : > { %8685 = vst [vmem:[%s12394_s29 + $0x118] sm:$0xff] %v7936_v8  ;;  %v7937_v44 = vmax.f32 %v7905_v22, 0.0  ;;  %v7906_v28 = vadd.f32 %v8655_v42, %v7874_v46  ;;  %v7875_v16 = vadd.f32 %v12782_v39, %v7831_v60  ;;  %v7832_v4 = vmul.f32 %v12785_v15, %v7718_v53  ;;  %v8665_v42 = vld [vmem:[%s10140_s24 + $0x178] sm:$0xff] }
 0x512   : > { %v7722_v38 = vpop.f32.mrf.mxu0 }
 0x513   : > { %8686 = vst [vmem:[%s12394_s29 + $0x120] sm:$0xff] %v7937_v44  ;;  %v7938_v37 = vmax.f32 %v7906_v28, 0.0  ;;  %v7907_v6 = vadd.f32 %v8656_v3, %v7875_v16  ;;  %v7876_v27 = vadd.f32 %v12789_v30, %v7832_v4  ;;  %v7833_v56 = vmul.f32 %v12779_v21, %v7722_v38  ;;  %v8666_v3 = vld [vmem:[%s10140_s24 + $0x180] sm:$0xff] }
 0x514   : > { %v7724_v26 = vpop.f32.mrf.mxu0 }
 0x515   : > { %8687 = vst [vmem:[%s12394_s29 + $0x128] sm:$0xff] %v7938_v37  ;;  %v7939_v41 = vmax.f32 %v7907_v6, 0.0  ;;  %v7908_v59 = vadd.f32 %v8657_v47, %v7876_v27  ;;  %v7877_v11 = vadd.f32 %v12782_v39, %v7833_v56  ;;  %v7834_v1 = vmul.f32 %v12785_v15, %v7724_v26  ;;  %v8667_v47 = vld [vmem:[%s10140_s24 + $0x188] sm:$0xff] }
 0x516   : > { %v7726_v35 = vpop.f32.mrf.mxu0 }
 0x517   : > { %8688 = vst [vmem:[%s12394_s29 + $0x130] sm:$0xff] %v7939_v41  ;;  %v7940_v43 = vmax.f32 %v7908_v59, 0.0  ;;  %v7909_v25 = vadd.f32 %v8658_v62, %v7877_v11  ;;  %v7878_v63 = vadd.f32 %v12789_v30, %v7834_v1  ;;  %v7835_v31 = vmul.f32 %v12779_v21, %v7726_v35  ;;  %v8668_v62 = vld [vmem:[%s10140_s24 + $0x190] sm:$0xff] }
 0x518   : > { %v7728_v9 = vpop.f32.mrf.mxu0 }
 0x519   : > { %8689 = vst [vmem:[%s12394_s29 + $0x138] sm:$0xff] %v7940_v43  ;;  %v7941_v20 = vmax.f32 %v7909_v25, 0.0  ;;  %v7910_v34 = vadd.f32 %v8659_v29, %v7878_v63  ;;  %v7879_v18 = vadd.f32 %v12782_v39, %v7835_v31  ;;  %v7836_v17 = vmul.f32 %v12785_v15, %v7728_v9  ;;  %v8669_v29 = vld [vmem:[%s10140_s24 + $0x198] sm:$0xff] }
 0x51a   : > { %v7732_v12 = vpop.f32.mrf.mxu0 }
 0x51b   : > { %8690 = vst [vmem:[%s12394_s29 + $0x140] sm:$0xff] %v7941_v20  ;;  %v7942_v36 = vmax.f32 %v7910_v34, 0.0  ;;  %v7911_v5 = vadd.f32 %v8660_v51, %v7879_v18  ;;  %v7880_v45 = vadd.f32 %v12789_v30, %v7836_v17  ;;  %v7837_v61 = vmul.f32 %v12779_v21, %v7732_v12  ;;  %v8670_v51 = vld [vmem:[%s10140_s24 + $0x1a0] sm:$0xff] }
 0x51c   : > { %v7734_v14 = vpop.f32.mrf.mxu0 }
 0x51d   : > { %8691 = vst [vmem:[%s12394_s29 + $0x148] sm:$0xff] %v7942_v36  ;;  %v7943_v7 = vmax.f32 %v7911_v5, 0.0  ;;  %v7912_v0 = vadd.f32 %v8661_v24, %v7880_v45  ;;  %v7881_v2 = vadd.f32 %v12782_v39, %v7837_v61  ;;  %v7838_v55 = vmul.f32 %v12785_v15, %v7734_v14  ;;  %v8671_v24 = vld [vmem:[%s10140_s24 + $0x1a8] sm:$0xff] }
 0x51e   : > { %v7736_v57 = vpop.f32.mrf.mxu0 }
 0x51f   : > { %8692 = vst [vmem:[%s12394_s29 + $0x150] sm:$0xff] %v7943_v7  ;;  %v7944_v54 = vmax.f32 %v7912_v0, 0.0  ;;  %v7913_v10 = vadd.f32 %v8662_v52, %v7881_v2  ;;  %v7882_v32 = vadd.f32 %v12789_v30, %v7838_v55  ;;  %v7839_v58 = vmul.f32 %v12779_v21, %v7736_v57  ;;  %v8672_v52 = vld [vmem:[%s10140_s24 + $0x1b0] sm:$0xff] }
 0x520   : > { %v7738_v50 = vpop.f32.mrf.mxu0 }
 0x521   : > { %8693 = vst [vmem:[%s12394_s29 + $0x158] sm:$0xff] %v7944_v54  ;;  %v7945_v19 = vmax.f32 %v7913_v10, 0.0  ;;  %v7914_v23 = vadd.f32 %v8663_v49, %v7882_v32  ;;  %v7883_v40 = vadd.f32 %v12782_v39, %v7839_v58  ;;  %v7840_v48 = vmul.f32 %v12785_v15, %v7738_v50  ;;  %v8673_v49 = vld [vmem:[%s10140_s24 + $0x1b8] sm:$0xff] }
 0x522   : > { %v7742_v13 = vpop.f32.mrf.mxu0 }
 0x523   : > { %8694 = vst [vmem:[%s12394_s29 + $0x160] sm:$0xff] %v7945_v19  ;;  %v7946_v8 = vmax.f32 %v7914_v23, 0.0  ;;  %v7915_v22 = vadd.f32 %v8664_v33, %v7883_v40  ;;  %v7884_v46 = vadd.f32 %v12789_v30, %v7840_v48  ;;  %v7841_v60 = vmul.f32 %v12779_v21, %v7742_v13  ;;  %v8674_v33 = vld [vmem:[%s10140_s24 + $0x1c0] sm:$0xff] }
 0x524   : > { %v7744_v53 = vpop.f32.mrf.mxu0 }
 0x525   : > { %8695 = vst [vmem:[%s12394_s29 + $0x168] sm:$0xff] %v7946_v8  ;;  %v7947_v44 = vmax.f32 %v7915_v22, 0.0  ;;  %v7916_v28 = vadd.f32 %v8665_v42, %v7884_v46  ;;  %v7885_v16 = vadd.f32 %v12782_v39, %v7841_v60  ;;  %v7842_v4 = vmul.f32 %v12785_v15, %v7744_v53  ;;  %v8675_v42 = vld [vmem:[%s10140_s24 + $0x1c8] sm:$0xff] }
 0x526   : > { %v7746_v38 = vpop.f32.mrf.mxu0 }
 0x527   : > { %8696 = vst [vmem:[%s12394_s29 + $0x170] sm:$0xff] %v7947_v44  ;;  %v7948_v37 = vmax.f32 %v7916_v28, 0.0  ;;  %v7917_v6 = vadd.f32 %v8666_v3, %v7885_v16  ;;  %v7886_v27 = vadd.f32 %v12789_v30, %v7842_v4  ;;  %v7843_v56 = vmul.f32 %v12779_v21, %v7746_v38  ;;  %v8676_v3 = vld [vmem:[%s10140_s24 + $0x1d0] sm:$0xff] }
 0x528   : > { %v7748_v26 = vpop.f32.mrf.mxu0 }
 0x529   : > { %8697 = vst [vmem:[%s12394_s29 + $0x178] sm:$0xff] %v7948_v37  ;;  %v7949_v41 = vmax.f32 %v7917_v6, 0.0  ;;  %v7918_v59 = vadd.f32 %v8667_v47, %v7886_v27  ;;  %v7887_v11 = vadd.f32 %v12782_v39, %v7843_v56  ;;  %v7844_v1 = vmul.f32 %v12785_v15, %v7748_v26  ;;  %v8677_v47 = vld [vmem:[%s10140_s24 + $0x1d8] sm:$0xff] }
 0x52a   : > { %v7752_v35 = vpop.f32.mrf.mxu0 }
 0x52b   : > { %8698 = vst [vmem:[%s12394_s29 + $0x180] sm:$0xff] %v7949_v41  ;;  %v7950_v43 = vmax.f32 %v7918_v59, 0.0  ;;  %v7919_v25 = vadd.f32 %v8668_v62, %v7887_v11  ;;  %v7888_v63 = vadd.f32 %v12789_v30, %v7844_v1  ;;  %v7845_v31 = vmul.f32 %v12779_v21, %v7752_v35  ;;  %v8678_v62 = vld [vmem:[%s10140_s24 + $0x1e0] sm:$0xff] }
 0x52c   : > { %v7754_v9 = vpop.f32.mrf.mxu0 }
 0x52d   : > { %8699 = vst [vmem:[%s12394_s29 + $0x188] sm:$0xff] %v7950_v43  ;;  %v7951_v20 = vmax.f32 %v7919_v25, 0.0  ;;  %v7920_v34 = vadd.f32 %v8669_v29, %v7888_v63  ;;  %v7889_v18 = vadd.f32 %v12782_v39, %v7845_v31  ;;  %v7846_v17 = vmul.f32 %v12785_v15, %v7754_v9  ;;  %v8679_v29 = vld [vmem:[%s10140_s24 + $0x1e8] sm:$0xff] }
 0x52e   : > { %v7756_v12 = vpop.f32.mrf.mxu0 }
 0x52f   : > { %8700 = vst [vmem:[%s12394_s29 + $0x190] sm:$0xff] %v7951_v20  ;;  %v7952_v36 = vmax.f32 %v7920_v34, 0.0  ;;  %v7921_v5 = vadd.f32 %v8670_v51, %v7889_v18  ;;  %v7890_v45 = vadd.f32 %v12789_v30, %v7846_v17  ;;  %v7847_v61 = vmul.f32 %v12779_v21, %v7756_v12  ;;  %v8680_v51 = vld [vmem:[%s10140_s24 + $0x1f0] sm:$0xff] }
 0x530   : > { %v7758_v14 = vpop.f32.mrf.mxu0 }
 0x531   : > { %8701 = vst [vmem:[%s12394_s29 + $0x198] sm:$0xff] %v7952_v36  ;;  %v7953_v7 = vmax.f32 %v7921_v5, 0.0  ;;  %v7922_v0 = vadd.f32 %v8671_v24, %v7890_v45  ;;  %v7891_v2 = vadd.f32 %v12782_v39, %v7847_v61  ;;  %v7848_v55 = vmul.f32 %v12785_v15, %v7758_v14  ;;  %v8681_v24 = vld [vmem:[%s10140_s24 + $0x1f8] sm:$0xff]  ;;  %s7999_s24 = scalar_lea.sflag [#allocation5], %s10134_s20 }
 0x532   : > { %v7762_v57 = vpop.f32.mrf.mxu0 }
 0x533   : > { %8702 = vst [vmem:[%s12394_s29 + $0x1a0] sm:$0xff] %v7953_v7  ;;  %v7954_v54 = vmax.f32 %v7922_v0, 0.0  ;;  %v7923_v10 = vadd.f32 %v8672_v52, %v7891_v2  ;;  %v7892_v32 = vadd.f32 %v12789_v30, %v7848_v55  ;;  %v7849_v58 = vmul.f32 %v12779_v21, %v7762_v57 }
 0x534   : > { %v7764_v50 = vpop.f32.mrf.mxu0 }
 0x535   : > { %8703 = vst [vmem:[%s12394_s29 + $0x1a8] sm:$0xff] %v7954_v54  ;;  %v7955_v19 = vmax.f32 %v7923_v10, 0.0  ;;  %v7924_v23 = vadd.f32 %v8673_v49, %v7892_v32  ;;  %v7893_v40 = vadd.f32 %v12782_v39, %v7849_v58  ;;  %v7850_v48 = vmul.f32 %v12785_v15, %v7764_v50 }
 0x536   : > { %v7766_v13 = vpop.f32.mrf.mxu0 }
 0x537   : > { %8704 = vst [vmem:[%s12394_s29 + $0x1b0] sm:$0xff] %v7955_v19  ;;  %v7956_v8 = vmax.f32 %v7924_v23, 0.0  ;;  %v7925_v22 = vadd.f32 %v8674_v33, %v7893_v40  ;;  %v7894_v46 = vadd.f32 %v12789_v30, %v7850_v48  ;;  %v7851_v60 = vmul.f32 %v12779_v21, %v7766_v13 }
 0x538   : > { %v7768_v53 = vpop.f32.mrf.mxu0 }
 0x539   : > { %8705 = vst [vmem:[%s12394_s29 + $0x1b8] sm:$0xff] %v7956_v8  ;;  %v7957_v44 = vmax.f32 %v7925_v22, 0.0  ;;  %v7926_v28 = vadd.f32 %v8675_v42, %v7894_v46  ;;  %v7895_v16 = vadd.f32 %v12782_v39, %v7851_v60  ;;  %v7852_v4 = vmul.f32 %v12785_v15, %v7768_v53 }
 0x53a   : > { %v7772_v38 = vpop.f32.mrf.mxu0 }
 0x53b   : > { %8706 = vst [vmem:[%s12394_s29 + $0x1c0] sm:$0xff] %v7957_v44  ;;  %v7958_v37 = vmax.f32 %v7926_v28, 0.0  ;;  %v7927_v6 = vadd.f32 %v8676_v3, %v7895_v16  ;;  %v7896_v27 = vadd.f32 %v12789_v30, %v7852_v4  ;;  %v7853_v56 = vmul.f32 %v12779_v21, %v7772_v38 }
 0x53c   : > { %v7774_v26 = vpop.f32.mrf.mxu0 }
 0x53d   : > { %8707 = vst [vmem:[%s12394_s29 + $0x1c8] sm:$0xff] %v7958_v37  ;;  %v7959_v41 = vmax.f32 %v7927_v6, 0.0  ;;  %v7928_v59 = vadd.f32 %v8677_v47, %v7896_v27  ;;  %v7897_v11 = vadd.f32 %v12782_v39, %v7853_v56  ;;  %v7854_v1 = vmul.f32 %v12785_v15, %v7774_v26 }
 0x53e   : > { %v7776_v35 = vpop.f32.mrf.mxu0 }
 0x53f   : > { %8708 = vst [vmem:[%s12394_s29 + $0x1d0] sm:$0xff] %v7959_v41  ;;  %v7960_v43 = vmax.f32 %v7928_v59, 0.0  ;;  %v7929_v25 = vadd.f32 %v8678_v62, %v7897_v11  ;;  %v7898_v63 = vadd.f32 %v12789_v30, %v7854_v1  ;;  %v7855_v31 = vmul.f32 %v12779_v21, %v7776_v35 }
 0x540   : > { %v7778_v9 = vpop.f32.mrf.mxu0 }
 0x541   : > { %8709 = vst [vmem:[%s12394_s29 + $0x1d8] sm:$0xff] %v7960_v43  ;;  %v7961_v20 = vmax.f32 %v7929_v25, 0.0  ;;  %v7930_v34 = vadd.f32 %v8679_v29, %v7898_v63  ;;  %v7899_v18 = vadd.f32 %v12782_v39, %v7855_v31  ;;  %v7856_v17 = vmul.f32 %v12785_v15, %v7778_v9 }
 0x543   : > { %8710 = vst [vmem:[%s12394_s29 + $0x1e0] sm:$0xff] %v7961_v20  ;;  %v7962_v12 = vmax.f32 %v7930_v34, 0.0  ;;  %v7931_v36 = vadd.f32 %v8680_v51, %v7899_v18  ;;  %v7900_v5 = vadd.f32 %v12789_v30, %v7856_v17 }
 0x545   : > { %8711 = vst [vmem:[%s12394_s29 + $0x1e8] sm:$0xff] %v7962_v12  ;;  %v7963_v21 = vmax.f32 %v7931_v36, 0.0  ;;  %v7932_v45 = vadd.f32 %v8681_v24, %v7900_v5 }
 0x547   : > { %8712 = vst [vmem:[%s12394_s29 + $0x1f0] sm:$0xff] %v7963_v21  ;;  %v7964_v39 = vmax.f32 %v7932_v45, 0.0 }
 0x549   : > { %8713 = vst [vmem:[%s12394_s29 + $0x1f8] sm:$0xff] %v7964_v39 }
 0x54a   : > { %9896 = shalt.err (!%p9893_p0)
}
 0x54b   : > { %s9897_s29 = scalar_lea.hbm %s12921_s13, 8192  ;;  %s9901_s26 = scalar_lea.hbm %s12978_s10, 16384 }
 0x54c   : > { %p9898_p5 = scmp.ne.s32.totalorder %s12921_s13, %s9897_s29  ;;  %p9902_p4 = scmp.lt.s32.totalorder %s12921_s13, %s12978_s10 }
 0x54d   : > { %p9903_p6 = scmp.lt.s32.totalorder %s9901_s26, %s9897_s29 }
 0x54e   : > { %p9899_p9 = pnand %p9898_p5, %p13077_p11 }
 0x54f   : > { %p9904_p8 = por %p9903_p6, %p9902_p4 }
 0x550   : > { %p9900_p1 = pneg %p9899_p9 }
 0x552   : > { %p9905_p3 = pnand %p9904_p8, %p9900_p1 }
 0x554   : > { %9908 = shalt.err (!%p9905_p3)
}
 0x555   : > { %s9961_s19 = smov 256   ;;  %s9962_s23 = smov 16  }
 0x556   : > { %9551 = dma.vmem_to_hbm [thread:$0]  (%p13077_p11), %s12923_s28, 8192, %s12921_s13, %s7999_s24, %s9961_s19, %s9961_s19, %s9962_s23  }
 0x557 PF: > { %s13078_s30 = sld [smem:[#allocation12_spill]]  ;;  %p13081_p12 = scmp.ge.s32.totalorder %s9951_s16, 2 }
 0x558   : > { %s13079_s17 = sld [smem:[#allocation13_spill]] }
 0x55d   : > { %s8027_s25 = sand.u32 1, %s13078_s30  }
 0x55e   : > { %p13080_p7 = scmp.ne.s32.totalorder %s13079_s17, 0  ;;  %s8028_s12 = scalar_lea.sflag [#allocation5], %s8027_s25 }
 0x560   : > { %p9562_p10 = pnand %p13081_p12, %p13080_p7 }
 0x562   : > { %p9563_p2 = pneg %p9562_p10 }
 0x564   : > { %9934 = dma.done.wait (%p9563_p2), %s8028_s12, 8192  }
 0x565   : > { %9936 = vsyncadd (%p9563_p2), %s8028_s12, 4294959104  ;;  %s13082_s16 = sld [smem:[#allocation14_spill]]  ;;  %s13083_s13 = smov %s9943_s14 }
 0x566   : > { %s13084_s14 = smov %s9947_s15  ;;  %s13085_s15 = smov %s10089_s18 }
 0x56b   : > { %p24_p13 = scmp.ge.s32.totalorder %s13082_s16, 4  }
 0x56d   :  { %26 = sbr.rel (!%p24_p13) target bundleno = 8 (0x8), region = 124 }
 0x572   :  { %8033 = vsyncpa [#allocation4], 1 }
 0x573   :  { %8035 = vsyncpa [#allocation4 + $0x1], 1 }
 0x574   :  { %8036 = vsyncpa [#allocation7], 1 }
 0x575   :  { %8037 = vsyncpa [#allocation5], 1 }
 0x576   :  { %8039 = vsyncpa [#allocation5 + $0x1], 1 }

</bundles_post_ra>
